<compile_context>
chip_gen: v5e
topology: v5e:2x2
jax: 0.10.0
libtpu: 0.0.40
codegen_flags: <defaults>
</compile_context>

<pallas_src>
import functools

import jax
import jax.numpy as jnp
from jax import lax
from jax.experimental import pallas as pl
from jax.experimental.pallas import tpu as pltpu

_LANES = 128
_SUBLANES = 8
# Conservative bytes of simultaneously-live VMEM intermediates per element of the
# (tm, W, tj) comparison slab (two broadcast f32 operands + two masks).
_LIVE_BYTES_PER_ELEM = 16
_INTERMEDIATE_BUDGET = 24 * 1024 * 1024   # keeps tiles comfortable on v5e/v6e/v7x
_MAX_BLOCK_ROWS = 512


def _cdiv(a, b):
    return -(-a // b)


def _round_up(x, m):
    return _cdiv(x, m) * m


def _next_pow2(x):
    return 1 << (max(int(x), 1) - 1).bit_length()


def _choose_tj(w):
    """Largest j-chunk (multiple of 128, divisor of W, <= 512) whose 8-row slab fits."""
    best = _LANES
    c = _LANES
    while c <= min(w, 512):
        if w % c == 0 and 8 * w * c * _LIVE_BYTES_PER_ELEM <= _INTERMEDIATE_BUDGET:
            best = c
        c += _LANES
    return best


def _rank_scaled_gaussian_kernel(d_ref, o_ref, *, lambd, blk_shift, packed, tj):
    tm, w = d_ref.shape
    nj = w // tj

    d = d_ref[...]                                    # (tm, W) f32
    di = d[:, :, None]                                # (tm, W, 1)

    # Batch-independent 2-D index masks, hoisted above the j-chunk loop.
    ii = lax.broadcasted_iota(jnp.int32, (w, tj), 0)     # global i index
    jj0 = lax.broadcasted_iota(jnp.int32, (w, tj), 1)    # local j index within a chunk
    blk_i = (ii >> blk_shift) if packed else None        # lane-group (original row) id

    def chunk_counts(dj, jj):
        # dj: (tm, 1, tj) values of this j-chunk; jj: (W, tj) global j indices.
        precedes = jnp.logical_or(dj < di,
                                  jnp.logical_and(dj == di, jj < ii))
        if packed:
            # Only compare within the same packed original row (block-diagonal mask).
            precedes = jnp.logical_and(precedes, blk_i == (jj >> blk_shift))
        # Accumulate the predicate as int32; cast to f32 only on the final ranks.
        return jnp.sum(precedes.astype(jnp.int32), axis=-1)   # (tm, W) int32

    if nj == 1:
        ranks = chunk_counts(d[:, None, :], jj0)
    else:
        def body(c, acc):
            j_start = pl.multiple_of(c * tj, tj)
            dj = d_ref[:, pl.ds(j_start, tj)][:, None, :]
            return acc + chunk_counts(dj, jj0 + c * tj)
        ranks = lax.fori_loop(0, nj, body, jnp.zeros((tm, w), jnp.int32))

    r = ranks.astype(jnp.float32)
    o_ref[...] = jnp.exp(-jnp.exp(r * (-1.0 / lambd)) * d)


def rank_scaled_gaussian_pallas(distances, lambd, *, block_rows=None):
    """exp(-exp(-ranks/lambd) * distances), ranks = double-argsort along axis 1."""
    assert distances.ndim == 2, "expected (batch, num_prototypes)"
    B, N = distances.shape
    orig_dtype = distances.dtype
    d = distances.astype(jnp.float32)

    # ---- lane packing / padding: make the last dim a dense multiple of 128 ----
    if N >= _LANES:
        Np = _round_up(N, _LANES)      # pad prototype axis to a multiple of 128
        G = 1                          # one original row per packed row
    else:
        Np = _next_pow2(N)             # pad to a power of two <= 128 ...
        G = _LANES // Np               # ... and pack G rows into one 128-lane group
    W = Np * G                         # packed row width (multiple of 128)
    packed = G > 1
    blk_shift = (Np.bit_length() - 1) if packed else 0

    # ---- tile sizing: many rows per grid step, bounded live intermediates ----
    tj = _choose_tj(W)
    Bp = _cdiv(B, G)                   # packed rows holding real data
    if block_rows is None:
        tm = _INTERMEDIATE_BUDGET // (W * tj * _LIVE_BYTES_PER_ELEM)
        tm = max(_SUBLANES, min(_MAX_BLOCK_ROWS, (tm // _SUBLANES) * _SUBLANES))
    else:
        tm = max(_SUBLANES, _round_up(int(block_rows), _SUBLANES))
    tm = min(tm, _round_up(Bp, _SUBLANES))
    grid_len = _cdiv(Bp, tm)
    tm = _round_up(_cdiv(Bp, grid_len), _SUBLANES)   # trim tile -> less batch padding
    Bp_pad = grid_len * tm
    B_pad = Bp_pad * G

    # ---- wrapper-side padding (sliced back off below) ----
    if Np != N:
        # +inf sentinels never "precede" a finite value, so real ranks are unchanged.
        d = jnp.pad(d, ((0, 0), (0, Np - N)), constant_values=jnp.inf)
    if B_pad != B:
        d = jnp.pad(d, ((0, B_pad - B), (0, 0)), constant_values=0.0)
    d_packed = d.reshape(Bp_pad, W)

    kernel = functools.partial(
        _rank_scaled_gaussian_kernel,
        lambd=float(lambd), blk_shift=blk_shift, packed=packed, tj=tj)

    scratch_est = tm * W * tj * _LIVE_BYTES_PER_ELEM
    io_bytes = 2 * 2 * tm * W * 4            # double-buffered input + output tiles
    vmem_limit = int(min(56 * 1024 * 1024,   # stay under v7x's 64 MiB physical VMEM
                         max(32 * 1024 * 1024, scratch_est + io_bytes + (8 << 20))))

    out = pl.pallas_call(
        kernel,
        out_shape=jax.ShapeDtypeStruct((Bp_pad, W), jnp.float32),
        grid_spec=pltpu.PrefetchScalarGridSpec(
            num_scalar_prefetch=0,
            grid=(grid_len,),
            in_specs=[pl.BlockSpec((tm, W), lambda i: (i, 0))],
            out_specs=pl.BlockSpec((tm, W), lambda i: (i, 0)),
        ),
        compiler_params=pltpu.CompilerParams(
            dimension_semantics=("parallel",),
            vmem_limit_bytes=vmem_limit,
        ),
    )(d_packed)

    out = out.reshape(B_pad, Np)[:B, :N]
    return out.astype(orig_dtype)


def rank_scaled_gaussian_ref(distances, lambd):
    order = jnp.argsort(distances, axis=1)
    ranks = jnp.argsort(order, axis=1).astype(distances.dtype)
    return jnp.exp(-jnp.exp(-ranks / lambd) * distances)


if __name__ == "__main__":
    lambd = 2.0                        # constructor arg of RankScaledGaussianPrior
    key = jax.random.PRNGKey(0)

    # (batch, num_prototypes) cases covering the three code paths:
    #  (16, 16)  -> tiny N, 8 rows packed per 128-lane group (block-diagonal mask)
    #  (32, 160) -> N padded with +inf to 256 lanes, multi-step grid
    #  (16, 640) -> wide row, j-chunked lax.fori_loop accumulation
    for idx, (B, N) in enumerate([(16, 16), (32, 160), (16, 640)]):
        k = jax.random.fold_in(key, idx)
        # distances are typically nonnegative (squared euclidean to prototypes)
        distances = jax.random.uniform(k, (B, N), dtype=jnp.float32) * 4.0

        out = jax.block_until_ready(rank_scaled_gaussian_pallas(distances, lambd))
        ref = rank_scaled_gaussian_ref(distances, lambd)
        if not jnp.allclose(out, ref, atol=1e-5, rtol=1e-5):
            raise AssertionError(f"Pallas kernel does not match reference at {(B, N)}")

    print("KERNEL_OK")
</pallas_src>

<mosaic_0001>
module attributes {stable_mosaic.version = 11 : i64} {
  func.func @_rank_scaled_gaussian_kernel(%arg0: i32, %arg1: memref<8x128xf32, #tpu.memory_space<vmem>>, %arg2: memref<8x128xf32, #tpu.memory_space<vmem>>) attributes {dimension_semantics = [#tpu.dimension_semantics<parallel>], iteration_bounds = array<i64: 1>, scalar_prefetch = 0 : i64, scratch_operands = 0 : i64, tpu.core_type = #tpu.core_type<tc>, window_params = [{transform_indices = @transform_0, window_bounds = array<i64: 8, 128>}, {transform_indices = @transform_1, window_bounds = array<i64: 8, 128>}]} {
    %c0 = arith.constant 0 : index
    %c0_0 = arith.constant 0 : index
    %0 = vector.load %arg1[%c0, %c0_0] : memref<8x128xf32, #tpu.memory_space<vmem>>, vector<8x128xf32>
    %1 = vector.shape_cast %0 : vector<8x128xf32> to vector<8x128x1xf32>
    %2 = tpu.iota {dimensions = array<i32: 0>} : vector<128x128xi32>
    %3 = tpu.iota {dimensions = array<i32: 1>} : vector<128x128xi32>
    %c4_i32 = arith.constant 4 : i32
    %4 = vector.broadcast %c4_i32 : i32 to vector<128x128xi32>
    %5 = arith.shrsi %2, %4 : vector<128x128xi32>
    %6 = vector.shape_cast %0 : vector<8x128xf32> to vector<8x1x128xf32>
    %7 = vector.broadcast %6 : vector<8x1x128xf32> to vector<8x128x128xf32>
    %8 = vector.broadcast %1 : vector<8x128x1xf32> to vector<8x128x128xf32>
    %9 = arith.cmpf olt, %7, %8 : vector<8x128x128xf32>
    %10 = vector.broadcast %6 : vector<8x1x128xf32> to vector<8x128x128xf32>
    %11 = vector.broadcast %1 : vector<8x128x1xf32> to vector<8x128x128xf32>
    %12 = arith.cmpf oeq, %10, %11 : vector<8x128x128xf32>
    %13 = arith.cmpi slt, %3, %2 : vector<128x128xi32>
    %14 = vector.shape_cast %13 : vector<128x128xi1> to vector<1x128x128xi1>
    %15 = vector.broadcast %14 : vector<1x128x128xi1> to vector<8x128x128xi1>
    %16 = arith.andi %12, %15 : vector<8x128x128xi1>
    %17 = arith.ori %9, %16 : vector<8x128x128xi1>
    %c4_i32_1 = arith.constant 4 : i32
    %18 = vector.broadcast %c4_i32_1 : i32 to vector<128x128xi32>
    %19 = arith.shrsi %3, %18 : vector<128x128xi32>
    %20 = arith.cmpi eq, %5, %19 : vector<128x128xi32>
    %21 = vector.shape_cast %20 : vector<128x128xi1> to vector<1x128x128xi1>
    %22 = vector.broadcast %21 : vector<1x128x128xi1> to vector<8x128x128xi1>
    %23 = arith.andi %17, %22 : vector<8x128x128xi1>
    %24 = arith.extui %23 : vector<8x128x128xi1> to vector<8x128x128xi32>
    %cst = arith.constant dense<0> : vector<8x128xi32>
    %25 = vector.multi_reduction <add>, %24, %cst [2] : vector<8x128x128xi32> to vector<8x128xi32>
    %26 = arith.sitofp %25 : vector<8x128xi32> to vector<8x128xf32>
    %cst_2 = arith.constant -5.000000e-01 : f32
    %27 = vector.broadcast %cst_2 : f32 to vector<8x128xf32>
    %28 = arith.mulf %26, %27 : vector<8x128xf32>
    %29 = math.exp %28 : vector<8x128xf32>
    %cst_3 = arith.constant 0.000000e+00 : f32
    %30 = vector.broadcast %cst_3 : f32 to vector<8x128xf32>
    %31 = arith.subf %30, %29 : vector<8x128xf32>
    %32 = arith.mulf %31, %0 : vector<8x128xf32>
    %33 = math.exp %32 : vector<8x128xf32>
    %c0_4 = arith.constant 0 : index
    %c0_5 = arith.constant 0 : index
    %34 = vector.load %arg2[%c0_4, %c0_5] : memref<8x128xf32, #tpu.memory_space<vmem>>, vector<8x128xf32>
    tpu.vector_store %arg2[%c0_4, %c0_5], %33 {strides = array<i32>} : memref<8x128xf32, #tpu.memory_space<vmem>>, vector<8x128xf32>,
    return
  }
  func.func @transform_0(%arg0: i32) -> (i32, i32) {
    %c0_i32 = arith.constant 0 : i32
    %c0_i32_0 = arith.constant 0 : i32
    return %arg0, %c0_i32 : i32, i32
  }
  func.func @transform_1(%arg0: i32) -> (i32, i32) {
    %c0_i32 = arith.constant 0 : i32
    %c0_i32_0 = arith.constant 0 : i32
    return %arg0, %c0_i32 : i32, i32
  }
}

</mosaic_0001>

<bundles_post_ra>
// kernel: tpu_custom_call.1
= control target key start
LH: loop header
LB: loop body
LE: loop exit
PB: predicated region body
PF: predicated region fallthrough
CT: control target
= control target key end

     0   :  { %6 = vsyncpa [#allocation3], 0  ;;  %s10884_s0 = inlined_call_operand.hbm [shape: f32[8,128], index: 0, kind: input, shape index: {}]   ;;  %s10885_s1 = inlined_call_operand.hbm [shape: f32[8,128], index: 1, kind: output, shape index: {}]  }
   0x1   :  { %7 = vsyncpa [#allocation4], 0  ;;  %s13_s8 = sshll.u32 %s10884_s0, 4  ;;  %s6817_s9 = smov [#allocation2]   ;;  %s14_s8 = int_to_ptr.hbm [resolvable:$true] %s13_s8 }
   0x2   :  { %s15_s10 = sshll.u32 %s6817_s9, 4  ;;  %s16_s10 = int_to_ptr.vmem [resolvable:$true] %s15_s10 }
   0x3   :  { %18 = dma.hbm_to_vmem [thread:$0]  %s14_s8, 128, %s16_s10, [#allocation3]  }
   0x4   :  { %6813 = dma.done.wait [#allocation3], 128  }
   0x5   :  { %6814 = vsyncadd [#allocation3], 4294967168  ;;  %v25_v0 = vlaneseq  ;;  %v6845_v4 = vld [vmem:[#allocation2] sm:$0xff]  ;;  %v11203_v32 = vmov 0  ;;  %v11205_v36 = vmov 0  ;;  %v11209_v38 = vmov 0 }
   0x6   :  { %v6848_v5 = vperm.slane %v6845_v4, 0  ;;  %v6854_v6 = vperm.slane %v6845_v4, 3  ;;  %v6908_v16 = vperm.slane %v6845_v4, 4  ;;  %v6926_v19 = vperm.slane %v6845_v4, 1  ;;  %s6819_s0 = smov [#allocation5]   ;;  %s6000_s14 = sshll.u32 %s10885_s1, 4  ;;  %s6001_s14 = int_to_ptr.hbm [resolvable:$true] %s6000_s14 }
   0x7   :  { %v6834_v1 = vshrl.u32 %v25_v0, 7  ;;  %v6932_v20 = vperm.slane %v6845_v4, 5  ;;  %v6968_v23 = vperm.slane %v6845_v4, 6  ;;  %v6977_v24 = vperm.slane %v6845_v4, 2  ;;  %s5998_s11 = sshll.u32 %s6819_s0, 4  ;;  %s5999_s11 = int_to_ptr.vmem [resolvable:$true] %s5998_s11 }
   0x8   :  { %11183 = vst [vmem:[#allocation11_spill] sm:$0xff] %v6848_v5  ;;  %v7004_v25 = vperm.slane %v6845_v4, 7  ;;  %v7046_v31 = vand.u32 127, %v25_v0  ;;  %v10911_v40 = vmov 0   ;;  %v11213_v45 = vmov 0 }
   0x9   :  { %11180 = vst [vmem:[#allocation8_spill] sm:$0xff] %v6834_v1  ;;  %6013 = vset.pattern.permute.xlu0 %v6834_v1  ;;  %v6838_v2 = vadd.s32 32, %v6834_v1  ;;  %v6841_v3 = vadd.s32 16, %v6834_v1  ;;  %v6857_v7 = vadd.s32 40, %v6834_v1  ;;  %v6860_v8 = vadd.s32 24, %v6834_v1 }
   0xa   :  { %11184 = vst [vmem:[#allocation12_spill] sm:$0xff] %v6854_v6  ;;  %v6869_v9 = vadd.s32 56, %v6834_v1  ;;  %v6872_v10 = vadd.s32 48, %v6834_v1  ;;  %v6878_v11 = vadd.s32 80, %v6834_v1  ;;  %v6884_v12 = vadd.s32 72, %v6834_v1 }
   0xb   :  { %11181 = vst [vmem:[#allocation9_spill] sm:$0xff] %v6838_v2  ;;  %6016 = vset.pattern.permute.xlu2 %v6838_v2  ;;  %6014 = vset.pattern.permute.xlu1 %v6841_v3  ;;  %v6890_v13 = vadd.s32 120, %v6834_v1  ;;  %v6896_v14 = vadd.s32 96, %v6834_v1  ;;  %v6899_v15 = vadd.s32 88, %v6834_v1  ;;  %v6911_v17 = vadd.s32 112, %v6834_v1 }
   0xc   :  { %11182 = vst [vmem:[#allocation10_spill] sm:$0xff] %v6841_v3  ;;  %v6920_v18 = vadd.s32 8, %v6834_v1  ;;  %v6938_v21 = vadd.s32 64, %v6834_v1  ;;  %v6950_v22 = vadd.s32 104, %v6834_v1  ;;  %vm7051_vm1 = vcmp.lt.s32.totalorder %v7046_v31, %v6834_v1 }
   0xd   :  { %11185 = vst [vmem:[#allocation13_spill] sm:$0xff] %v6857_v7  ;;  %v11204_v32 = vsel %vm7051_vm1, 4294967295, %v11203_v32  ;;  %v819_v33 = vshra.s32 %v6834_v1, 4  ;;  %v7060_v34 = vshra.s32 %v7046_v31, 4  ;;  %vm7075_vm7 = vcmp.lt.s32.totalorder %v7046_v31, %v6841_v3 }
   0xe   :  { %11186 = vst [vmem:[#allocation14_spill] sm:$0xff] %v6869_v9  ;;  %v11210_v38 = vsel %vm7075_vm7, 4294967295, %v11209_v38  ;;  %v821_v39 = vshra.s32 %v6841_v3, 4  ;;  %vm7099_vm13 = vcmp.lt.s32.totalorder %v7046_v31, %v6860_v8  ;;  %v11215_v46 = vmov 0 }
   0xf   :  { %11187 = vst [vmem:[#allocation15_spill] sm:$0xff] %v6872_v10  ;;  %vm7065_vm5 = vcmp.eq.s32.totalorder %v819_v33, %v7060_v34  ;;  %v11216_v46 = vsel %vm7099_vm13, 4294967295, %v11215_v46  ;;  %v822_v49 = vshra.s32 %v6860_v8, 4  ;;  %v11220_v52 = vmov 0 }
  0x10   :  { %11188 = vst [vmem:[#allocation16_spill] sm:$0xff] %v6878_v11  ;;  %v11206_v36 = vsel %vm7065_vm5, 4294967295, %v11205_v36  ;;  %vm7093_vm12 = vcmp.eq.s32.totalorder %v821_v39, %v7060_v34  ;;  %v11223_v54 = vmov 0  ;;  %v824_v55 = vshra.s32 %v6857_v7, 4 }
  0x11   :  { %29 = vperm.xlu0 %6013, %v6848_v5   ;;  %11189 = vst [vmem:[#allocation17_spill] sm:$0xff] %v6890_v13  ;;  %v11214_v45 = vsel %vm7093_vm12, 4294967295, %v11213_v45  ;;  %v11227_v60 = vmov 0  ;;  %v11229_v61 = vmov 0  ;;  %v825_v63 = vshra.s32 %v6872_v10, 4 }
  0x12   :  { %11190 = vst [vmem:[#allocation18_spill] sm:$0xff] %v6896_v14 }
  0x13   :  { %53 = vperm.xlu2 %6016, %v6848_v5   ;;  %41 = vperm.xlu1 %6014, %v6848_v5   ;;  %11191 = vst [vmem:[#allocation19_spill] sm:$0xff] %v6899_v15 }
  0x14   :  { %11192 = vst [vmem:[#allocation20_spill] sm:$0xff] %v6908_v16 }
  0x15   :  { %11193 = vst [vmem:[#allocation21_spill] sm:$0xff] %v6911_v17 }
  0x16   :  { %11194 = vst [vmem:[#allocation22_spill] sm:$0xff] %v6920_v18 }
  0x17   :  { %11195 = vst [vmem:[#allocation23_spill] sm:$0xff] %v6926_v19 }
  0x18   :  { %11196 = vst [vmem:[#allocation24_spill] sm:$0xff] %v6932_v20 }
  0x19   :  { %320 = vperm.xlu0 %6013, %v6854_v6   ;;  %11197 = vst [vmem:[#allocation25_spill] sm:$0xff] %v6950_v22 }
  0x1a   :  { %11198 = vst [vmem:[#allocation26_spill] sm:$0xff] %v6968_v23 }
  0x1b   :  { %6017 = vset.pattern.permute.xlu2 %v6857_v7  ;;  %6015 = vset.pattern.permute.xlu1 %v6860_v8  ;;  %11199 = vst [vmem:[#allocation27_spill] sm:$0xff] %v6977_v24 }
  0x1c   :  { %11200 = vst [vmem:[#allocation28_spill] sm:$0xff] %v7004_v25 }
  0x1d   :  { %11202 = vst [vmem:[#allocation30_spill] sm:$0xff] %v7046_v31 }
  0x1e   :  { %11207 = vst [vmem:[#allocation31_spill] sm:$0xff] %v11206_v36 }
  0x1f   :  { %11217 = vst [vmem:[#allocation35_spill] sm:$0xff] %v11216_v46 }
  0x21   :  { %6056 = vset.pattern.permute.xlu0 %v6857_v7 }
  0x23   :  { %59 = vperm.xlu2 %6017, %v6848_v5   ;;  %47 = vperm.xlu1 %6015, %v6848_v5  }
  0x29   :  { %350 = vperm.xlu0 %6056, %v6854_v6  }
  0x2b   :  { %6019 = vset.pattern.permute.xlu2 %v6869_v9  ;;  %6018 = vset.pattern.permute.xlu1 %v6872_v10 }
  0x31   :  { %6061 = vset.pattern.permute.xlu0 %v6878_v11 }
  0x33   :  { %71 = vperm.xlu2 %6019, %v6848_v5   ;;  %65 = vperm.xlu1 %6018, %v6848_v5  }
  0x39   :  { %380 = vperm.xlu0 %6061, %v6854_v6  }
  0x3b   :  { %6021 = vset.pattern.permute.xlu2 %v6878_v11  ;;  %6020 = vset.pattern.permute.xlu1 %v6884_v12 }
  0x41   :  { %6066 = vset.pattern.permute.xlu0 %v6890_v13 }
  0x43   :  { %89 = vperm.xlu2 %6021, %v6848_v5   ;;  %83 = vperm.xlu1 %6020, %v6848_v5  }
  0x49   :  { %410 = vperm.xlu0 %6066, %v6854_v6  }
  0x4b   :  { %6023 = vset.pattern.permute.xlu2 %v6896_v14  ;;  %6022 = vset.pattern.permute.xlu1 %v6899_v15 }
  0x51   :  { %6075 = vset.pattern.permute.xlu0 %v6884_v12 }
  0x53   :  { %101 = vperm.xlu2 %6023, %v6848_v5   ;;  %95 = vperm.xlu1 %6022, %v6848_v5  }
  0x59   :  { %471 = vperm.xlu0 %6075, %v6908_v16  }
  0x5b   :  { %6025 = vset.pattern.permute.xlu2 %v6890_v13  ;;  %6024 = vset.pattern.permute.xlu1 %v6911_v17 }
  0x61   :  { %6080 = vset.pattern.permute.xlu0 %v6911_v17 }
  0x63   :  { %119 = vperm.xlu2 %6025, %v6848_v5   ;;  %113 = vperm.xlu1 %6024, %v6848_v5  }
  0x69   :  { %501 = vperm.xlu0 %6080, %v6908_v16  }
  0x6b   :  { %6027 = vset.pattern.permute.xlu2 %v6920_v18  ;;  %6026 = vset.pattern.permute.xlu1 %v6834_v1 }
  0x6d   :  { %v7089_v42 = vpop.permute.xlu2 %53 }
  0x6e   :  { %11212 = vst [vmem:[#allocation34_spill] sm:$0xff] %v7089_v42  ;;  %v11279_v42 = vmov 0 }
  0x71   :  { %6085 = vset.pattern.permute.xlu0 %v6860_v8 }
  0x73   :  { %132 = vperm.xlu2 %6027, %v6926_v19   ;;  %126 = vperm.xlu1 %6026, %v6926_v19  }
  0x79   :  { %532 = vperm.xlu0 %6085, %v6932_v20  }
  0x7b   :  { %6029 = vset.pattern.permute.xlu2 %v6838_v2  ;;  %6028 = vset.pattern.permute.xlu1 %v6860_v8 }
  0x7d   :  { %v60_v51 = vpop.permute.xlu2 %59 }
  0x81   :  { %6086 = vset.pattern.permute.xlu0 %v6938_v21 }
  0x83   :  { %150 = vperm.xlu2 %6029, %v6926_v19   ;;  %144 = vperm.xlu1 %6028, %v6926_v19   ;;  %v30_v26 = vpop.permute.xlu0 %29 }
  0x84   :  { %vm987_vm0 = vcmp.eq.f32.partialorder %v6848_v5, %v30_v26  ;;  %vm859_vm2 = vcmp.lt.f32.partialorder %v6848_v5, %v30_v26 }
  0x85   :  { %vm1163_vm3 = vmand %vm987_vm0, %vm7051_vm1  ;;  %v42_v35 = vpop.permute.xlu1 %41 }
  0x86   :  { %vm1291_vm4 = vmor %vm859_vm2, %vm1163_vm3  ;;  %vm989_vm8 = vcmp.eq.f32.partialorder %v6848_v5, %v42_v35  ;;  %vm861_vm9 = vcmp.lt.f32.partialorder %v6848_v5, %v42_v35  ;;  %v11234_v35 = vmov 0 }
  0x87   :  { %vm1468_vm6 = vmand %vm1291_vm4, %vm7065_vm5  ;;  %vm7118_vm4 = vcmp.eq.s32.totalorder %v822_v49, %v7060_v34 }
  0x88   :  { %v7082_v41 = vsel %vm1468_vm6, 1, %v10911_v40  ;;  %vm1165_vm10 = vmand %vm989_vm8, %vm7075_vm7  ;;  %v11221_v52 = vsel %vm7118_vm4, 4294967295, %v11220_v52  ;;  %vm7125_vm6 = vcmp.lt.s32.totalorder %v7046_v31, %v6857_v7  ;;  %vm992_vm8 = vcmp.eq.f32.partialorder %v6848_v5, %v60_v51 }
  0x89   :  { %77 = vperm.xlu0 %6086, %v6848_v5   ;;  %11211 = vst [vmem:[#allocation33_spill] sm:$0xff] %v7082_v41  ;;  %v1724_v44 = vand.u32 65535, %v7082_v41  ;;  %vm1293_vm11 = vmor %vm861_vm9, %vm1165_vm10  ;;  %v11224_v54 = vsel %vm7125_vm6, 4294967295, %v11223_v54  ;;  %vm864_vm10 = vcmp.lt.f32.partialorder %v6848_v5, %v60_v51 }
  0x8a   :  { %vm1470_vm15 = vmand %vm1293_vm11, %vm7093_vm12  ;;  %11222 = vst [vmem:[#allocation38_spill] sm:$0xff] %v11221_v52 }
  0x8b   :  { %6031 = vset.pattern.permute.xlu2 %v6872_v10  ;;  %6030 = vset.pattern.permute.xlu1 %v6857_v7  ;;  %v7027_v27 = vpop.permute.xlu0 %320  ;;  %v1726_v48 = vcvt.s32.f32 %v1724_v44  ;;  %v7115_v50 = vsel %vm1470_vm15, 1, %v10911_v40  ;;  %vm1168_vm11 = vmand %vm992_vm8, %vm7125_vm6  ;;  %vm7144_vm15 = vcmp.eq.s32.totalorder %v824_v55, %v7060_v34  ;;  %v11237_v44 = vmov 0 }
  0x8c   :  { %11219 = vst [vmem:[#allocation37_spill] sm:$0xff] %v7115_v50  ;;  %v1748_v53 = vand.u32 65535, %v7115_v50  ;;  %v11228_v60 = vsel %vm7144_vm15, 4294967295, %v11227_v60 }
  0x8e   :  { %v1750_v57 = vcvt.s32.f32 %v1748_v53  ;;  %v7197_v53 = vpop.permute.xlu2 %71 }
  0x8f   :  { %11240 = vst [vmem:[#allocation44_spill] sm:$0xff] %v7197_v53 }
  0x91   :  { %562 = vperm.xlu0 %6086, %v6932_v20  }
  0x93   :  { %162 = vperm.xlu2 %6031, %v6926_v19   ;;  %156 = vperm.xlu1 %6030, %v6926_v19  }
  0x95   :  { %v48_v43 = vpop.permute.xlu1 %47 }
  0x96   :  { %vm990_vm14 = vcmp.eq.f32.partialorder %v6848_v5, %v48_v43  ;;  %vm862_vm0 = vcmp.lt.f32.partialorder %v6848_v5, %v48_v43 }
  0x97   :  { %vm1166_vm2 = vmand %vm990_vm14, %vm7099_vm13 }
  0x98   :  { %vm1294_vm3 = vmor %vm862_vm0, %vm1166_vm2  ;;  %vm7150_vm0 = vcmp.lt.s32.totalorder %v7046_v31, %v6872_v10 }
  0x99   :  { %6091 = vset.pattern.permute.xlu0 %v6950_v22  ;;  %vm1471_vm9 = vmand %vm1294_vm3, %vm7118_vm4  ;;  %v11230_v61 = vsel %vm7150_vm0, 4294967295, %v11229_v61 }
  0x9a   :  { %v7141_v59 = vsel %vm1471_vm9, 1, %v10911_v40  ;;  %vm1296_vm14 = vmor %vm864_vm10, %vm1168_vm11  ;;  %vm7172_vm11 = vcmp.eq.s32.totalorder %v825_v63, %v7060_v34  ;;  %v828_v63 = vshra.s32 %v6884_v12, 4 }
  0x9b   :  { %6033 = vset.pattern.permute.xlu2 %v6884_v12  ;;  %6032 = vset.pattern.permute.xlu1 %v6938_v21  ;;  %v7032_v28 = vpop.permute.xlu0 %350  ;;  %11226 = vst [vmem:[#allocation40_spill] sm:$0xff] %v7141_v59  ;;  %v1761_v62 = vshrl.u32 %v7141_v59, 16  ;;  %vm1473_vm3 = vmand %vm1296_vm14, %vm7144_vm15  ;;  %v11235_v35 = vsel %vm7172_vm11, 4294967295, %v11234_v35  ;;  %v820_v59 = vshra.s32 %v6920_v18, 4 }
  0x9c   :  { %v7165_v26 = vsel %vm1473_vm3, 1, %v10911_v40  ;;  %11236 = vst [vmem:[#allocation42_spill] sm:$0xff] %v11235_v35 }
  0x9d   :  { %v1763_v0 = vcvt.s32.f32 %v1761_v62  ;;  %11231 = vst [vmem:[#allocation41_spill] sm:$0xff] %v7165_v26  ;;  %v1784_v43 = vand.u32 65535, %v7165_v26  ;;  %v11243_v62 = vmov 0 }
  0x9f   :  { %v1786_v49 = vcvt.s32.f32 %v1784_v43 }
  0xa1   :  { %107 = vperm.xlu0 %6091, %v6848_v5  }
  0xa3   :  { %180 = vperm.xlu2 %6033, %v6926_v19   ;;  %174 = vperm.xlu1 %6032, %v6926_v19  }
  0xa5   :  { %v66_v58 = vpop.permute.xlu1 %65 }
  0xa6   :  { %vm993_vm2 = vcmp.eq.f32.partialorder %v6848_v5, %v66_v58  ;;  %vm865_vm8 = vcmp.lt.f32.partialorder %v6848_v5, %v66_v58 }
  0xa7   :  { %vm1169_vm9 = vmand %vm993_vm2, %vm7150_vm0  ;;  %vm7180_vm2 = vcmp.lt.s32.totalorder %v7046_v31, %v6938_v21 }
  0xa8   :  { %vm7167_vm10 = vmor %vm865_vm8, %vm1169_vm9  ;;  %v11238_v44 = vsel %vm7180_vm2, 4294967295, %v11237_v44 }
  0xa9   :  { %592 = vperm.xlu0 %6091, %v6932_v20   ;;  %vm1474_vm3 = vmand %vm7167_vm10, %vm7172_vm11 }
  0xaa   :  { %v7195_v51 = vsel %vm1474_vm3, 1, %v10911_v40 }
  0xab   :  { %6035 = vset.pattern.permute.xlu2 %v6899_v15  ;;  %6034 = vset.pattern.permute.xlu1 %v6878_v11  ;;  %v7037_v29 = vpop.permute.xlu0 %380  ;;  %11239 = vst [vmem:[#allocation43_spill] sm:$0xff] %v7195_v51  ;;  %v1797_v58 = vshrl.u32 %v7195_v51, 16  ;;  %v11269_v51 = vmov 0 }
  0xac   :  { %11201 = vst [vmem:[#allocation29_spill] sm:$0xff] %v7037_v29 }
  0xad   :  { %v1799_v33 = vcvt.s32.f32 %v1797_v58 }
  0xb1   :  { %6096 = vset.pattern.permute.xlu0 %v6841_v3 }
  0xb3   :  { %192 = vperm.xlu2 %6035, %v6926_v19   ;;  %186 = vperm.xlu1 %6034, %v6926_v19  }
  0xb5   :  { %v84_v55 = vpop.permute.xlu1 %83 }
  0xb6   :  { %vm996_vm3 = vcmp.eq.f32.partialorder %v6848_v5, %v84_v55 }
  0xb9   :  { %138 = vperm.xlu0 %6096, %v6926_v19  }
  0xbb   :  { %6037 = vset.pattern.permute.xlu2 %v6911_v17  ;;  %6036 = vset.pattern.permute.xlu1 %v6950_v22  ;;  %v7043_v30 = vpop.permute.xlu0 %410 }
  0xc1   :  { %623 = vperm.xlu0 %6096, %v6968_v23  }
  0xc3   :  { %210 = vperm.xlu2 %6037, %v6926_v19   ;;  %204 = vperm.xlu1 %6036, %v6926_v19  }
  0xc5   :  { %v96_v43 = vpop.permute.xlu1 %95 }
  0xc9   :  { %6101 = vset.pattern.permute.xlu0 %v6869_v9 }
  0xcb   :  { %6039 = vset.pattern.permute.xlu2 %v6834_v1  ;;  %6038 = vset.pattern.permute.xlu1 %v6890_v13  ;;  %v7069_v37 = vpop.permute.xlu0 %471 }
  0xcc   :  { %11208 = vst [vmem:[#allocation32_spill] sm:$0xff] %v7069_v37  ;;  %v11255_v37 = vmov 0 }
  0xd1   :  { %168 = vperm.xlu0 %6101, %v6926_v19  }
  0xd3   :  { %223 = vperm.xlu2 %6039, %v6977_v24   ;;  %216 = vperm.xlu1 %6038, %v6926_v19  }
  0xd5   :  { %v114_v29 = vpop.permute.xlu1 %113 }
  0xd9   :  { %653 = vperm.xlu0 %6101, %v6968_v23  }
  0xdb   :  { %6041 = vset.pattern.permute.xlu2 %v6860_v8  ;;  %6040 = vset.pattern.permute.xlu1 %v6841_v3  ;;  %v7104_v47 = vpop.permute.xlu0 %501 }
  0xdc   :  { %11218 = vst [vmem:[#allocation36_spill] sm:$0xff] %v7104_v47 }
  0xe1   :  { %6106 = vset.pattern.permute.xlu0 %v6896_v14 }
  0xe3   :  { %241 = vperm.xlu2 %6041, %v6977_v24   ;;  %235 = vperm.xlu1 %6040, %v6977_v24  }
  0xe9   :  { %198 = vperm.xlu0 %6106, %v6926_v19  }
  0xeb   :  { %6043 = vset.pattern.permute.xlu2 %v6857_v7  ;;  %6042 = vset.pattern.permute.xlu1 %v6838_v2  ;;  %v7136_v56 = vpop.permute.xlu0 %532 }
  0xec   :  { %11225 = vst [vmem:[#allocation39_spill] sm:$0xff] %v7136_v56 }
  0xf1   :  { %683 = vperm.xlu0 %6106, %v6968_v23  }
  0xf3   :  { %253 = vperm.xlu2 %6043, %v6977_v24   ;;  %247 = vperm.xlu1 %6042, %v6977_v24  }
  0xf9   :  { %6111 = vset.pattern.permute.xlu0 %v6920_v18 }
  0xfb   :  { %6045 = vset.pattern.permute.xlu2 %v6938_v21  ;;  %6044 = vset.pattern.permute.xlu1 %v6869_v9  ;;  %v78_v39 = vpop.permute.xlu0 %77 }
  0xfc   :  { %vm995_vm14 = vcmp.eq.f32.partialorder %v6848_v5, %v78_v39  ;;  %vm867_vm8 = vcmp.lt.f32.partialorder %v6848_v5, %v78_v39  ;;  %v7223_v39 = vpop.permute.xlu2 %89 }
  0xfd   :  { %vm1171_vm9 = vmand %vm995_vm14, %vm7180_vm2  ;;  %11246 = vst [vmem:[#allocation46_spill] sm:$0xff] %v7223_v39 }
  0xfe   :  { %vm1299_vm0 = vmor %vm867_vm8, %vm1171_vm9  ;;  %vm7209_vm8 = vcmp.lt.s32.totalorder %v7046_v31, %v6884_v12  ;;  %vm868_vm9 = vcmp.lt.f32.partialorder %v6848_v5, %v84_v55  ;;  %v11249_v55 = vmov 0 }
  0xff   :  { %v11244_v62 = vsel %vm7209_vm8, 4294967295, %v11243_v62  ;;  %vm1172_vm11 = vmand %vm996_vm3, %vm7209_vm8  ;;  %vm7233_vm3 = vcmp.lt.s32.totalorder %v7046_v31, %v6899_v15  ;;  %vm998_vm8 = vcmp.eq.f32.partialorder %v6848_v5, %v96_v43 }
 0x100   :  { %v11250_v55 = vsel %vm7233_vm3, 4294967295, %v11249_v55 }
 0x101   :  { %35 = vperm.xlu0 %6111, %v6848_v5  }
 0x103   :  { %271 = vperm.xlu2 %6045, %v6977_v24   ;;  %265 = vperm.xlu1 %6044, %v6977_v24   ;;  %v7254_v19 = vpop.permute.xlu0 %562 }
 0x104   :  { %11254 = vst [vmem:[#allocation48_spill] sm:$0xff] %v7254_v19 }
 0x109   :  { %229 = vperm.xlu0 %6111, %v6977_v24  }
 0x10b   :  { %6047 = vset.pattern.permute.xlu2 %v6878_v11  ;;  %6046 = vset.pattern.permute.xlu1 %v6884_v12 }
 0x111   :  { %714 = vperm.xlu0 %6111, %v7004_v25  }
 0x113   :  { %283 = vperm.xlu2 %6047, %v6977_v24   ;;  %277 = vperm.xlu1 %6046, %v6977_v24  }
 0x119   :  { %6116 = vset.pattern.permute.xlu0 %v6872_v10 }
 0x11b   :  { %6049 = vset.pattern.permute.xlu2 %v6950_v22  ;;  %6048 = vset.pattern.permute.xlu1 %v6896_v14 }
 0x121   :  { %259 = vperm.xlu0 %6116, %v6977_v24  }
 0x123   :  { %301 = vperm.xlu2 %6049, %v6977_v24   ;;  %295 = vperm.xlu1 %6048, %v6977_v24  }
 0x129   :  { %744 = vperm.xlu0 %6116, %v7004_v25  }
 0x12b   :  { %6051 = vset.pattern.permute.xlu2 %v6890_v13  ;;  %6050 = vset.pattern.permute.xlu1 %v6911_v17 }
 0x131   :  { %6121 = vset.pattern.permute.xlu0 %v6899_v15 }
 0x133   :  { %313 = vperm.xlu2 %6051, %v6977_v24   ;;  %307 = vperm.xlu1 %6050, %v6977_v24  }
 0x139   :  { %289 = vperm.xlu0 %6121, %v6977_v24   ;;  %v102_v24 = vpop.permute.xlu2 %101 }
 0x13b   :  { %6053 = vset.pattern.permute.xlu2 %v6841_v3  ;;  %6052 = vset.pattern.permute.xlu1 %v6920_v18 }
 0x141   :  { %774 = vperm.xlu0 %6121, %v7004_v25   ;;  %v832_v25 = vshra.s32 %v6950_v22, 4 }
 0x143   :  { %332 = vperm.xlu2 %6053, %v6854_v6   ;;  %326 = vperm.xlu1 %6052, %v6854_v6  }
 0x149   :  { %6126 = vset.pattern.permute.xlu0 %v6838_v2 }
 0x14b   :  { %6055 = vset.pattern.permute.xlu2 %v6838_v2  ;;  %6054 = vset.pattern.permute.xlu1 %v6860_v8 }
 0x151   :  { %441 = vperm.xlu0 %6126, %v6908_v16  }
 0x153   :  { %344 = vperm.xlu2 %6055, %v6854_v6   ;;  %338 = vperm.xlu1 %6054, %v6854_v6  }
 0x15b   :  { %6058 = vset.pattern.permute.xlu2 %v6869_v9  ;;  %6057 = vset.pattern.permute.xlu1 %v6872_v10 }
 0x163   :  { %362 = vperm.xlu2 %6058, %v6854_v6   ;;  %356 = vperm.xlu1 %6057, %v6854_v6  }
 0x16b   :  { %6060 = vset.pattern.permute.xlu2 %v6884_v12  ;;  %6059 = vset.pattern.permute.xlu1 %v6938_v21 }
 0x173   :  { %374 = vperm.xlu2 %6060, %v6854_v6   ;;  %368 = vperm.xlu1 %6059, %v6854_v6  }
 0x17b   :  { %6063 = vset.pattern.permute.xlu2 %v6896_v14  ;;  %6062 = vset.pattern.permute.xlu1 %v6899_v15 }
 0x17c   :  { %1728 = vadd.xlane.f32.xlu0 %v1726_v48  ;;  %v827_v48 = vshra.s32 %v6938_v21, 4 }
 0x17e   :  { %vm7200_vm10 = vcmp.eq.s32.totalorder %v827_v48, %v7060_v34 }
 0x17f   :  { %vm1476_vm14 = vmand %vm1299_vm0, %vm7200_vm10 }
 0x180   :  { %vm1300_vm0 = vmor %vm868_vm9, %vm1172_vm11  ;;  %vm870_vm11 = vcmp.lt.f32.partialorder %v6848_v5, %v96_v43 }
 0x181   :  { %vm1174_vm9 = vmand %vm998_vm8, %vm7233_vm3  ;;  %vm7259_vm8 = vcmp.lt.s32.totalorder %v7046_v31, %v6896_v14 }
 0x182   :  { %vm1302_vm13 = vmor %vm870_vm11, %vm1174_vm9  ;;  %v11256_v37 = vsel %vm7259_vm8, 4294967295, %v11255_v37  ;;  %vm871_vm11 = vcmp.lt.f32.partialorder %v6848_v5, %v102_v24 }
 0x183   :  { %392 = vperm.xlu2 %6063, %v6854_v6   ;;  %386 = vperm.xlu1 %6062, %v6854_v6  }
 0x184   :  { %1752 = vadd.xlane.f32.xlu0 %v1750_v57  ;;  %v11241_v57 = vmov 0 }
 0x185   :  { %v11242_v57 = vsel %vm7200_vm10, 4294967295, %v11241_v57 }
 0x18b   :  { %6065 = vset.pattern.permute.xlu2 %v6911_v17  ;;  %6064 = vset.pattern.permute.xlu1 %v6950_v22 }
 0x18c   :  { %1766 = vadd.xlane.f32.xlu0 %v1763_v0  ;;  %v7216_v0 = vsel %vm1476_vm14, 1, %v10911_v40  ;;  %vm7227_vm14 = vcmp.eq.s32.totalorder %v828_v63, %v7060_v34 }
 0x18d   :  { %11245 = vst [vmem:[#allocation45_spill] sm:$0xff] %v7216_v0  ;;  %v1820_v48 = vand.u32 65535, %v7216_v0  ;;  %vm1477_vm4 = vmand %vm1300_vm0, %vm7227_vm14 }
 0x18e   :  { %v7247_v63 = vsel %vm1477_vm4, 1, %v10911_v40  ;;  %vm999_vm4 = vcmp.eq.f32.partialorder %v6848_v5, %v102_v24 }
 0x18f   :  { %v1822_v58 = vcvt.s32.f32 %v1820_v48  ;;  %11251 = vst [vmem:[#allocation47_spill] sm:$0xff] %v7247_v63  ;;  %v11252_v48 = vmov 0  ;;  %v1833_v43 = vshrl.u32 %v7247_v63, 16  ;;  %vm1175_vm9 = vmand %vm999_vm4, %vm7259_vm8  ;;  %vm7283_vm4 = vcmp.lt.s32.totalorder %v7046_v31, %v6911_v17 }
 0x190   :  { %vm1001_vm8 = vcmp.eq.f32.partialorder %v6848_v5, %v114_v29  ;;  %v11263_v63 = vmov 0  }
 0x193   :  { %404 = vperm.xlu2 %6065, %v6854_v6   ;;  %398 = vperm.xlu1 %6064, %v6854_v6   ;;  %v11258_v6 = vmov 0 }
 0x194   :  { %1788 = vadd.xlane.f32.xlu0 %v1786_v49  ;;  %v11247_v49 = vmov 0 }
 0x195   :  { %v11248_v49 = vsel %vm7227_vm14, 4294967295, %v11247_v49  ;;  %vm1303_vm14 = vmor %vm871_vm11, %vm1175_vm9  ;;  %vm873_vm11 = vcmp.lt.f32.partialorder %v6848_v5, %v114_v29  ;;  %v11267_v29 = vmov 0 }
 0x196   :  { %vm1177_vm9 = vmand %vm1001_vm8, %vm7283_vm4  ;;  %vm7314_vm8 = vcmp.lt.s32.totalorder %v7046_v31, %v6890_v13 }
 0x197   :  { %vm7301_vm1 = vmor %vm873_vm11, %vm1177_vm9  ;;  %v11270_v51 = vsel %vm7314_vm8, 4294967295, %v11269_v51 }
 0x19b   :  { %6068 = vset.pattern.permute.xlu2 %v6920_v18  ;;  %6067 = vset.pattern.permute.xlu1 %v6834_v1 }
 0x19c   :  { %1802 = vadd.xlane.f32.xlu0 %v1799_v33  ;;  %v830_v33 = vshra.s32 %v6899_v15, 4 }
 0x19e   :  { %vm7250_vm5 = vcmp.eq.s32.totalorder %v830_v33, %v7060_v34  ;;  %v1835_v33 = vcvt.s32.f32 %v1833_v43  ;;  %v11260_v43 = vmov 0 }
 0x19f   :  { %v11253_v48 = vsel %vm7250_vm5, 4294967295, %v11252_v48  ;;  %vm1479_vm0 = vmand %vm1302_vm13, %vm7250_vm5  ;;  %v11261_v43 = vsel %vm7283_vm4, 4294967295, %v11260_v43  ;;  %vm7363_vm5 = vcmp.eq.s32.totalorder %v820_v59, %v7060_v34 }
 0x1a0   :  { %v7273_v19 = vsel %vm1479_vm0, 1, %v10911_v40  ;;  %v7288_v40 = vpop.permute.xlu0 %107  ;;  %v11280_v42 = vsel %vm7363_vm5, 4294967295, %v11279_v42 }
 0x1a1   :  { %11257 = vst [vmem:[#allocation49_spill] sm:$0xff] %v7273_v19  ;;  %v1856_v24 = vand.u32 65535, %v7273_v19  ;;  %v120_v19 = vpop.permute.xlu2 %119 }
 0x1a2   :  { %11262 = vst [vmem:[#allocation50_spill] sm:$0xff] %v7288_v40  ;;  %vm874_vm9 = vcmp.lt.f32.partialorder %v6848_v5, %v120_v19 }
 0x1a3   :  { %423 = vperm.xlu2 %6068, %v6908_v16   ;;  %417 = vperm.xlu1 %6067, %v6908_v16  }
 0x1a4   :  { %1824 = vadd.xlane.f32.xlu0 %v1822_v58  ;;  %v831_v58 = vshra.s32 %v6896_v14, 4 }
 0x1a6   :  { %vm7276_vm13 = vcmp.eq.s32.totalorder %v831_v58, %v7060_v34  ;;  %v833_v58 = vshra.s32 %v6911_v17, 4 }
 0x1a7   :  { %v11259_v6 = vsel %vm7276_vm13, 4294967295, %v11258_v6  ;;  %vm1480_vm0 = vmand %vm1303_vm14, %vm7276_vm13 }
 0x1a8   :  { %v7299_v0 = vsel %vm1480_vm0, 1, %v11263_v63  ;;  %vm7306_vm14 = vcmp.eq.s32.totalorder %v833_v58, %v7060_v34  ;;  %vm1002_vm0 = vcmp.eq.f32.partialorder %v6848_v5, %v120_v19  ;;  %v834_v58 = vshra.s32 %v6890_v13, 4 }
 0x1a9   :  { %11264 = vst [vmem:[#allocation51_spill] sm:$0xff] %v7299_v0  ;;  %v11268_v29 = vsel %vm7306_vm14, 4294967295, %v11267_v29  ;;  %v1869_v39 = vshrl.u32 %v7299_v0, 16  ;;  %vm1482_vm11 = vmand %vm7301_vm1, %vm7306_vm14  ;;  %v7329_v0 = vpop.permute.xlu0 %592  ;;  %v133_v53 = vpop.permute.xlu2 %132  ;;  %v11275_v19 = vmov 0 }
 0x1aa   :  { %vm1178_vm13 = vmand %vm1002_vm0, %vm7314_vm8  ;;  %11271 = vst [vmem:[#allocation52_spill] sm:$0xff] %v7329_v0  ;;  %v7334_v40 = vsel %vm1482_vm11, 1, %v11263_v63  ;;  %vm7337_vm14 = vcmp.eq.s32.totalorder %v834_v58, %v7060_v34  ;;  %vm7343_vm0 = vcmp.lt.s32.totalorder %v7046_v31, %v6920_v18  ;;  %v7355_v58 = vpop.permute.xlu1 %126 }
 0x1ab   :  { %6070 = vset.pattern.permute.xlu2 %v6860_v8  ;;  %6069 = vset.pattern.permute.xlu1 %v6841_v3  ;;  %v1871_v26 = vcvt.s32.f32 %v1869_v39  ;;  %11272 = vst [vmem:[#allocation53_spill] sm:$0xff] %v7334_v40  ;;  %vm1306_vm1 = vmor %vm874_vm9, %vm1178_vm13  ;;  %v11276_v19 = vsel %vm7343_vm0, 4294967295, %v11275_v19  ;;  %v1892_v39 = vand.u32 65535, %v7334_v40 }
 0x1ac   :  { %1838 = vadd.xlane.f32.xlu0 %v1835_v33  ;;  %v1858_v33 = vcvt.s32.f32 %v1856_v24  ;;  %v836_v24 = vrot.slane %v6845_v4, 1  ;;  %vm1483_vm13 = vmand %vm1306_vm1, %vm7337_vm14  ;;  %11277 = vst [vmem:[#allocation54_spill] sm:$0xff] %v7355_v58 }
 0x1ad   :  { %v7360_v50 = vsel %vm1483_vm13, 1, %v11263_v63 }
 0x1ae   :  { %11278 = vst [vmem:[#allocation55_spill] sm:$0xff] %v7360_v50 }
 0x1b1   :  { %v139_v40 = vpop.permute.xlu0 %138 }
 0x1b2   :  { %v7374_v58 = vpop.permute.xlu1 %144 }
 0x1b3   :  { %435 = vperm.xlu2 %6070, %v6908_v16   ;;  %429 = vperm.xlu1 %6069, %v6908_v16   ;;  %11281 = vst [vmem:[#allocation56_spill] sm:$0xff] %v7374_v58  ;;  %v823_v58 = vshra.s32 %v6838_v2, 4 }
 0x1b4   :  { %1860 = vadd.xlane.f32.xlu0 %v1858_v33  ;;  %v7324_v33 = vperm.slane %v836_v24, 0  ;;  %v11273_v24 = vmov 0 }
 0x1b5   :  { %v11274_v24 = vsel %vm7337_vm14, 4294967295, %v11273_v24 }
 0x1b6   :  { %vm1004_vm8 = vcmp.eq.f32.partialorder %v7324_v33, %v133_v53  ;;  %vm876_vm11 = vcmp.lt.f32.partialorder %v7324_v33, %v133_v53  ;;  %v1905_v53 = vshrl.u32 %v7360_v50, 16  ;;  %vm877_vm14 = vcmp.lt.f32.partialorder %v7324_v33, %v139_v40 }
 0x1b7   :  { %vm1180_vm9 = vmand %vm1004_vm8, %vm7343_vm0  ;;  %vm1005_vm8 = vcmp.eq.f32.partialorder %v7324_v33, %v139_v40  ;;  %v11283_v40 = vmov 0 }
 0x1b8   :  { %vm1308_vm4 = vmor %vm876_vm11, %vm1180_vm9 }
 0x1b9   :  { %vm1485_vm1 = vmand %vm1308_vm4, %vm7363_vm5 }
 0x1ba   :  { %vm1181_vm13 = vmand %vm1005_vm8, %vm7075_vm7  ;;  %v7379_v59 = vsel %vm1485_vm1, 1, %v11263_v63  ;;  %vm7387_vm8 = vcmp.lt.s32.totalorder %v7046_v31, %v6838_v2  ;;  %v157_v41 = vpop.permute.xlu1 %156 }
 0x1bb   :  { %6072 = vset.pattern.permute.xlu2 %v6872_v10  ;;  %6071 = vset.pattern.permute.xlu1 %v6857_v7  ;;  %vm1309_vm11 = vmor %vm877_vm14, %vm1181_vm13  ;;  %11282 = vst [vmem:[#allocation57_spill] sm:$0xff] %v7379_v59  ;;  %v1928_v50 = vand.u32 65535, %v7379_v59  ;;  %v11284_v40 = vsel %vm7387_vm8, 4294967295, %v11283_v40 }
 0x1bc   :  { %1874 = vadd.xlane.f32.xlu0 %v1871_v26  ;;  %v1894_v26 = vcvt.s32.f32 %v1892_v39  ;;  %v1907_v39 = vcvt.s32.f32 %v1905_v53  ;;  %vm1486_vm4 = vmand %vm1309_vm11, %vm7093_vm12  ;;  %vm1008_vm11 = vcmp.eq.f32.partialorder %v7324_v33, %v157_v41  ;;  %vm880_vm12 = vcmp.lt.f32.partialorder %v7324_v33, %v157_v41 }
 0x1bd   :  { %v7392_v53 = vsel %vm1486_vm4, 1, %v11263_v63  ;;  %v1930_v59 = vcvt.s32.f32 %v1928_v50  ;;  %vm7405_vm4 = vcmp.eq.s32.totalorder %v823_v58, %v7060_v34  ;;  %vm1184_vm7 = vmand %vm1008_vm11, %vm7125_vm6 }
 0x1be   :  { %11285 = vst [vmem:[#allocation58_spill] sm:$0xff] %v7392_v53  ;;  %v1941_v0 = vshrl.u32 %v7392_v53, 16 }
 0x1c2   :  { %v175_v58 = vpop.permute.xlu1 %174 }
 0x1c3   :  { %453 = vperm.xlu2 %6072, %v6908_v16   ;;  %447 = vperm.xlu1 %6071, %v6908_v16  }
 0x1c4   :  { %1896 = vadd.xlane.f32.xlu0 %v1894_v26  ;;  %v151_v26 = vpop.permute.xlu2 %150 }
 0x1c5   :  { %vm1007_vm9 = vcmp.eq.f32.partialorder %v7324_v33, %v151_v26  ;;  %vm879_vm14 = vcmp.lt.f32.partialorder %v7324_v33, %v151_v26  ;;  %v11287_v26 = vmov 0 }
 0x1c6   :  { %vm1183_vm1 = vmand %vm1007_vm9, %vm7387_vm8  ;;  %v11288_v26 = vsel %vm7405_vm4, 4294967295, %v11287_v26 }
 0x1c7   :  { %vm1311_vm13 = vmor %vm879_vm14, %vm1183_vm1 }
 0x1c8   :  { %vm1488_vm9 = vmand %vm1311_vm13, %vm7405_vm4  ;;  %vm7427_vm13 = vcmp.lt.s32.totalorder %v7046_v31, %v6869_v9 }
 0x1c9   :  { %v7417_v50 = vsel %vm1488_vm9, 1, %v11263_v63  ;;  %vm7419_vm14 = vmor %vm880_vm12, %vm1184_vm7 }
 0x1ca   :  { %11289 = vst [vmem:[#allocation60_spill] sm:$0xff] %v7417_v50  ;;  %v1964_v41 = vand.u32 65535, %v7417_v50  ;;  %vm1489_vm7 = vmand %vm7419_vm14, %vm7144_vm15 }
 0x1cb   :  { %6074 = vset.pattern.permute.xlu2 %v6938_v21  ;;  %6073 = vset.pattern.permute.xlu1 %v6869_v9  ;;  %v7444_v5 = vsel %vm1489_vm7, 1, %v11263_v63  ;;  %vm883_vm7 = vcmp.lt.f32.partialorder %v7324_v33, %v175_v58 }
 0x1cc   :  { %1910 = vadd.xlane.f32.xlu0 %v1907_v39  ;;  %v7397_v39 = vpop.permute.xlu0 %623  ;;  %v1966_v53 = vcvt.s32.f32 %v1964_v41  ;;  %v7439_v50 = vpop.permute.xlu2 %162  ;;  %11295 = vst [vmem:[#allocation62_spill] sm:$0xff] %v7444_v5  ;;  %v1977_v56 = vshrl.u32 %v7444_v5, 16 }
 0x1cd   :  { %11286 = vst [vmem:[#allocation59_spill] sm:$0xff] %v7397_v39  ;;  %v1943_v39 = vcvt.s32.f32 %v1941_v0  ;;  %v187_v5 = vpop.permute.xlu1 %186 }
 0x1ce   :  { %11294 = vst [vmem:[#allocation61_spill] sm:$0xff] %v7439_v50  ;;  %vm885_vm15 = vcmp.lt.f32.partialorder %v7324_v33, %v187_v5 }
 0x1d3   :  { %465 = vperm.xlu2 %6074, %v6908_v16   ;;  %459 = vperm.xlu1 %6073, %v6908_v16  }
 0x1d4   :  { %1932 = vadd.xlane.f32.xlu0 %v1930_v59  ;;  %v169_v0 = vpop.permute.xlu0 %168  ;;  %v11292_v59 = vmov 0 }
 0x1d5   :  { %vm1010_vm1 = vcmp.eq.f32.partialorder %v7324_v33, %v169_v0  ;;  %v11293_v59 = vsel %vm7427_vm13, 4294967295, %v11292_v59  ;;  %vm882_vm12 = vcmp.lt.f32.partialorder %v7324_v33, %v169_v0  ;;  %v11296_v0 = vmov 0 }
 0x1d6   :  { %vm1186_vm11 = vmand %vm1010_vm1, %vm7427_vm13 }
 0x1d7   :  { %vm1314_vm9 = vmor %vm882_vm12, %vm1186_vm11  ;;  %vm1011_vm12 = vcmp.eq.f32.partialorder %v7324_v33, %v175_v58 }
 0x1d8   :  { %vm1187_vm11 = vmand %vm1011_vm12, %vm7180_vm2  ;;  %vm7473_vm2 = vcmp.lt.s32.totalorder %v7046_v31, %v6878_v11 }
 0x1db   :  { %6077 = vset.pattern.permute.xlu2 %v6899_v15  ;;  %6076 = vset.pattern.permute.xlu1 %v6878_v11 }
 0x1dc   :  { %1946 = vadd.xlane.f32.xlu0 %v1943_v39  ;;  %v826_v39 = vshra.s32 %v6869_v9, 4  ;;  %v7465_v50 = vpop.permute.xlu0 %653 }
 0x1dd   :  { %11300 = vst [vmem:[#allocation65_spill] sm:$0xff] %v7465_v50 }
 0x1de   :  { %vm7447_vm14 = vcmp.eq.s32.totalorder %v826_v39, %v7060_v34  ;;  %v7461_v39 = vpop.permute.xlu2 %180 }
 0x1df   :  { %v11297_v0 = vsel %vm7447_vm14, 4294967295, %v11296_v0  ;;  %vm1491_vm1 = vmand %vm1314_vm9, %vm7447_vm14  ;;  %11299 = vst [vmem:[#allocation64_spill] sm:$0xff] %v7461_v39 }
 0x1e0   :  { %v7456_v41 = vsel %vm1491_vm1, 1, %v11263_v63  ;;  %vm1315_vm9 = vmor %vm883_vm7, %vm1187_vm11  ;;  %vm1013_vm1 = vcmp.eq.f32.partialorder %v7324_v33, %v187_v5  ;;  %v11305_v5 = vmov 0 }
 0x1e1   :  { %11298 = vst [vmem:[#allocation63_spill] sm:$0xff] %v7456_v41  ;;  %v2000_v47 = vand.u32 65535, %v7456_v41  ;;  %vm1492_vm12 = vmand %vm1315_vm9, %vm7200_vm10 }
 0x1e2   :  { %vm1189_vm6 = vmand %vm1013_vm1, %vm7473_vm2 }
 0x1e3   :  { %483 = vperm.xlu2 %6077, %v6908_v16   ;;  %477 = vperm.xlu1 %6076, %v6908_v16   ;;  %v2002_v58 = vcvt.s32.f32 %v2000_v47  ;;  %v7484_v47 = vsel %vm1492_vm12, 1, %v11263_v63  ;;  %vm1317_vm7 = vmor %vm885_vm15, %vm1189_vm6  ;;  %vm7508_vm15 = vcmp.lt.s32.totalorder %v7046_v31, %v6950_v22 }
 0x1e4   :  { %1968 = vadd.xlane.f32.xlu0 %v1966_v53  ;;  %v1979_v53 = vcvt.s32.f32 %v1977_v56  ;;  %v11301_v56 = vmov 0  ;;  %11303 = vst [vmem:[#allocation66_spill] sm:$0xff] %v7484_v47  ;;  %v7486_v41 = vpop.permute.xlu0 %198  ;;  %v2013_v39 = vshrl.u32 %v7484_v47, 16 }
 0x1e5   :  { %v11302_v56 = vsel %vm7473_vm2, 4294967295, %v11301_v56  ;;  %11304 = vst [vmem:[#allocation67_spill] sm:$0xff] %v7486_v41  ;;  %v205_v41 = vpop.permute.xlu1 %204 }
 0x1e6   :  { %v193_v50 = vpop.permute.xlu2 %192 }
 0x1e7   :  { %vm1014_vm9 = vcmp.eq.f32.partialorder %v7324_v33, %v193_v50  ;;  %vm886_vm12 = vcmp.lt.f32.partialorder %v7324_v33, %v193_v50  ;;  %v11308_v50 = vmov 0 }
 0x1e8   :  { %vm1190_vm10 = vmand %vm1014_vm9, %vm7233_vm3  ;;  %v11309_v50 = vsel %vm7508_vm15, 4294967295, %v11308_v50  ;;  %vm11311_vm9 = vnez %v11253_v48 }
 0x1e9   :  { %vm1318_vm6 = vmor %vm886_vm12, %vm1190_vm10 }
 0x1ea   :  { %vm1495_vm3 = vmand %vm1318_vm6, %vm11311_vm9  ;;  %vm7527_vm6 = vcmp.eq.s32.totalorder %v832_v25, %v7060_v34 }
 0x1eb   :  { %6079 = vset.pattern.permute.xlu2 %v6950_v22  ;;  %6078 = vset.pattern.permute.xlu1 %v6896_v14  ;;  %v7524_v31 = vsel %vm1495_vm3, 1, %v11263_v63 }
 0x1ec   :  { %1982 = vadd.xlane.f32.xlu0 %v1979_v53  ;;  %v829_v53 = vshra.s32 %v6878_v11, 4  ;;  %11312 = vst [vmem:[#allocation70_spill] sm:$0xff] %v7524_v31  ;;  %v2049_v22 = vshrl.u32 %v7524_v31, 16 }
 0x1ee   :  { %vm7490_vm11 = vcmp.eq.s32.totalorder %v829_v53, %v7060_v34  ;;  %v2051_v34 = vcvt.s32.f32 %v2049_v22 }
 0x1ef   :  { %v11306_v5 = vsel %vm7490_vm11, 4294967295, %v11305_v5  ;;  %vm1494_vm1 = vmand %vm1317_vm7, %vm7490_vm11  ;;  %vm1016_vm7 = vcmp.eq.f32.partialorder %v7324_v33, %v205_v41  ;;  %vm11318_vm11 = vnez %v11204_v32 }
 0x1f0   :  { %v7503_v53 = vsel %vm1494_vm1, 1, %v11263_v63  ;;  %vm888_vm1 = vcmp.lt.f32.partialorder %v7324_v33, %v205_v41  ;;  %vm1192_vm10 = vmand %vm1016_vm7, %vm7508_vm15  ;;  %v837_v41 = vrot.slane %v6845_v4, 2  ;;  %vm11317_vm15 = vnez %v11268_v29 }
 0x1f1   :  { %11307 = vst [vmem:[#allocation68_spill] sm:$0xff] %v7503_v53  ;;  %v2036_v47 = vand.u32 65535, %v7503_v53  ;;  %v211_v53 = vpop.permute.xlu2 %210  ;;  %vm1320_vm12 = vmor %vm888_vm1, %vm1192_vm10  ;;  %vm11315_vm1 = vnez %v11261_v43 }
 0x1f2   :  { %vm1017_vm7 = vcmp.eq.f32.partialorder %v7324_v33, %v211_v53  ;;  %vm1497_vm9 = vmand %vm1320_vm12, %vm7527_vm6  ;;  %vm889_vm3 = vcmp.lt.f32.partialorder %v7324_v33, %v211_v53 }
 0x1f3   :  { %495 = vperm.xlu2 %6079, %v6908_v16   ;;  %489 = vperm.xlu1 %6078, %v6908_v16   ;;  %vm1193_vm10 = vmand %vm1017_vm7, %vm11315_vm1  ;;  %v7546_v4 = vsel %vm1497_vm9, 1, %v11263_v63 }
 0x1f4   :  { %2004 = vadd.xlane.f32.xlu0 %v2002_v58  ;;  %v2015_v58 = vcvt.s32.f32 %v2013_v39  ;;  %v7513_v39 = vpop.permute.xlu0 %683  ;;  %11316 = vst [vmem:[#allocation71_spill] sm:$0xff] %v7546_v4  ;;  %vm1321_vm12 = vmor %vm889_vm3, %vm1193_vm10  ;;  %v2072_v53 = vand.u32 65535, %v7546_v4  ;;  %vm11321_vm10 = vnez %v11206_v36 }
 0x1f5   :  { %11310 = vst [vmem:[#allocation69_spill] sm:$0xff] %v7513_v39  ;;  %v11313_v39 = vmov 0  ;;  %vm1498_vm7 = vmand %vm1321_vm12, %vm11317_vm15 }
 0x1f6   :  { %v11314_v39 = vsel %vm7527_vm6, 4294967295, %v11313_v39  ;;  %v2074_v22 = vcvt.s32.f32 %v2072_v53 }
 0x1fb   :  { %6082 = vset.pattern.permute.xlu2 %v6834_v1  ;;  %6081 = vset.pattern.permute.xlu1 %v6890_v13 }
 0x1fc   :  { %2018 = vadd.xlane.f32.xlu0 %v2015_v58  ;;  %v2038_v58 = vcvt.s32.f32 %v2036_v47  ;;  %v7536_v47 = vperm.slane %v837_v41, 0  ;;  %v7541_v25 = vpop.permute.xlu0 %35  ;;  %v7555_v41 = vpop.permute.xlu1 %216 }
 0x1fd   :  { %11319 = vst [vmem:[#allocation72_spill] sm:$0xff] %v7555_v41 }
 0x203   :  { %514 = vperm.xlu2 %6082, %v6932_v20   ;;  %507 = vperm.xlu1 %6081, %v6908_v16  }
 0x204   :  { %2040 = vadd.xlane.f32.xlu0 %v2038_v58  ;;  %v224_v58 = vpop.permute.xlu2 %223  ;;  %v230_v16 = vpop.permute.xlu0 %229 }
 0x205   :  { %vm1019_vm6 = vcmp.eq.f32.partialorder %v7536_v47, %v224_v58  ;;  %vm891_vm1 = vcmp.lt.f32.partialorder %v7536_v47, %v224_v58  ;;  %vm1020_vm3 = vcmp.eq.f32.partialorder %v7536_v47, %v230_v16  ;;  %vm892_vm12 = vcmp.lt.f32.partialorder %v7536_v47, %v230_v16  ;;  %v7569_v4 = vpop.permute.xlu1 %235 }
 0x206   :  { %vm1195_vm2 = vmand %vm1019_vm6, %vm11318_vm11  ;;  %11322 = vst [vmem:[#allocation74_spill] sm:$0xff] %v7569_v4 }
 0x207   :  { %vm1323_vm9 = vmor %vm891_vm1, %vm1195_vm2 }
 0x208   :  { %vm1500_vm6 = vmand %vm1323_vm9, %vm11321_vm10  ;;  %vm11325_vm9 = vnez %v11216_v46 }
 0x209   :  { %vm1196_vm15 = vmand %vm1020_vm3, %vm7343_vm0 }
 0x20b   :  { %6084 = vset.pattern.permute.xlu2 %v6841_v3  ;;  %6083 = vset.pattern.permute.xlu1 %v6920_v18 }
 0x20c   :  { %2054 = vadd.xlane.f32.xlu0 %v2051_v34  ;;  %v7560_v34 = vsel %vm1498_vm7, 1, %v11263_v63  ;;  %vm1324_vm7 = vmor %vm892_vm12, %vm1196_vm15 }
 0x20d   :  { %11320 = vst [vmem:[#allocation73_spill] sm:$0xff] %v7560_v34  ;;  %v2085_v58 = vshrl.u32 %v7560_v34, 16  ;;  %v242_v34 = vpop.permute.xlu2 %241  ;;  %vm1501_vm2 = vmand %vm1324_vm7, %vm7363_vm5  ;;  %v248_v31 = vpop.permute.xlu1 %247  ;;  %vm11327_vm7 = vnez %v11221_v52 }
 0x20e   :  { %vm1022_vm1 = vcmp.eq.f32.partialorder %v7536_v47, %v242_v34  ;;  %v7581_v16 = vsel %vm1501_vm2, 1, %v11263_v63  ;;  %vm894_vm15 = vcmp.lt.f32.partialorder %v7536_v47, %v242_v34  ;;  %vm1023_vm12 = vcmp.eq.f32.partialorder %v7536_v47, %v248_v31 }
 0x20f   :  { %v2087_v53 = vcvt.s32.f32 %v2085_v58  ;;  %11324 = vst [vmem:[#allocation76_spill] sm:$0xff] %v7581_v16  ;;  %vm1198_vm3 = vmand %vm1022_vm1, %vm11325_vm9  ;;  %v7586_v58 = vpop.permute.xlu0 %714  ;;  %vm895_vm1 = vcmp.lt.f32.partialorder %v7536_v47, %v248_v31 }
 0x210   :  { %11326 = vst [vmem:[#allocation77_spill] sm:$0xff] %v7586_v58  ;;  %vm1199_vm5 = vmand %vm1023_vm12, %vm7387_vm8  ;;  %vm11329_vm12 = vnez %v11230_v61 }
 0x211   :  { %vm1327_vm0 = vmor %vm895_vm1, %vm1199_vm5  ;;  %vm11332_vm5 = vnez %v11235_v35 }
 0x213   :  { %526 = vperm.xlu2 %6084, %v6932_v20   ;;  %520 = vperm.xlu1 %6083, %v6932_v20  }
 0x214   :  { %2076 = vadd.xlane.f32.xlu0 %v2074_v22  ;;  %v7574_v22 = vsel %vm1500_vm6, 1, %v11263_v63  ;;  %vm1326_vm6 = vmor %vm894_vm15, %vm1198_vm3 }
 0x215   :  { %11323 = vst [vmem:[#allocation75_spill] sm:$0xff] %v7574_v22  ;;  %v2108_v41 = vand.u32 65535, %v7574_v22  ;;  %vm1503_vm2 = vmand %vm1326_vm6, %vm11327_vm7 }
 0x216   :  { %vm1504_vm3 = vmand %vm1327_vm0, %vm7405_vm4 }
 0x217   :  { %v2110_v4 = vcvt.s32.f32 %v2108_v41  ;;  %v260_v41 = vpop.permute.xlu0 %259 }
 0x218   :  { %vm1025_vm15 = vcmp.eq.f32.partialorder %v7536_v47, %v260_v41  ;;  %vm897_vm6 = vcmp.lt.f32.partialorder %v7536_v47, %v260_v41 }
 0x219   :  { %vm1201_vm8 = vmand %vm1025_vm15, %vm11329_vm12 }
 0x21a   :  { %vm1329_vm7 = vmor %vm897_vm6, %vm1201_vm8 }
 0x21b   :  { %6088 = vset.pattern.permute.xlu2 %v6857_v7  ;;  %6087 = vset.pattern.permute.xlu1 %v6838_v2  ;;  %vm1506_vm0 = vmand %vm1329_vm7, %vm11332_vm5 }
 0x21c   :  { %2090 = vadd.xlane.f32.xlu0 %v2087_v53  ;;  %v2121_v53 = vshrl.u32 %v7581_v16, 16 }
 0x21e   :  { %v2123_v34 = vcvt.s32.f32 %v2121_v53  ;;  %v7612_v53 = vsel %vm1504_vm3, 1, %v11263_v63 }
 0x21f   :  { %11330 = vst [vmem:[#allocation79_spill] sm:$0xff] %v7612_v53  ;;  %v2157_v41 = vshrl.u32 %v7612_v53, 16 }
 0x221   :  { %v2159_v22 = vcvt.s32.f32 %v2157_v41 }
 0x223   :  { %544 = vperm.xlu2 %6088, %v6932_v20   ;;  %538 = vperm.xlu1 %6087, %v6932_v20  }
 0x224   :  { %2112 = vadd.xlane.f32.xlu0 %v2110_v4  ;;  %v7600_v4 = vsel %vm1503_vm2, 1, %v11263_v63 }
 0x225   :  { %11328 = vst [vmem:[#allocation78_spill] sm:$0xff] %v7600_v4  ;;  %v2144_v16 = vand.u32 65535, %v7600_v4  ;;  %v266_v4 = vpop.permute.xlu1 %265 }
 0x226   :  { %vm1026_vm2 = vcmp.eq.f32.partialorder %v7536_v47, %v266_v4  ;;  %vm898_vm8 = vcmp.lt.f32.partialorder %v7536_v47, %v266_v4 }
 0x227   :  { %v2146_v31 = vcvt.s32.f32 %v2144_v16  ;;  %v7621_v16 = vsel %vm1506_vm0, 1, %v11263_v63  ;;  %vm1202_vm1 = vmand %vm1026_vm2, %vm7427_vm13  ;;  %vm11335_vm0 = vnez %v11244_v62 }
 0x228   :  { %11333 = vst [vmem:[#allocation81_spill] sm:$0xff] %v7621_v16  ;;  %v2180_v53 = vand.u32 65535, %v7621_v16  ;;  %vm1330_vm7 = vmor %vm898_vm8, %vm1202_vm1 }
 0x229   :  { %vm1507_vm3 = vmand %vm1330_vm7, %vm7447_vm14  ;;  %vm11337_vm7 = vnez %v11248_v49 }
 0x22a   :  { %v2182_v4 = vcvt.s32.f32 %v2180_v53 }
 0x22b   :  { %6090 = vset.pattern.permute.xlu2 %v6869_v9  ;;  %6089 = vset.pattern.permute.xlu1 %v6872_v10 }
 0x22c   :  { %2126 = vadd.xlane.f32.xlu0 %v2123_v34  ;;  %v7614_v34 = vpop.permute.xlu2 %253 }
 0x22d   :  { %11331 = vst [vmem:[#allocation80_spill] sm:$0xff] %v7614_v34  ;;  %v278_v34 = vpop.permute.xlu1 %277 }
 0x22e   :  { %vm1028_vm15 = vcmp.eq.f32.partialorder %v7536_v47, %v278_v34  ;;  %vm900_vm6 = vcmp.lt.f32.partialorder %v7536_v47, %v278_v34 }
 0x22f   :  { %vm1204_vm2 = vmand %vm1028_vm15, %vm11335_vm0  ;;  %vm11338_vm15 = vnez %v11302_v56 }
 0x230   :  { %vm1332_vm8 = vmor %vm900_vm6, %vm1204_vm2  ;;  %vm11340_vm2 = vnez %v11306_v5 }
 0x231   :  { %vm1509_vm14 = vmand %vm1332_vm8, %vm11337_vm7 }
 0x232   :  { %v7652_v34 = vsel %vm1509_vm14, 1, %v11263_v63  ;;  %vm11343_vm14 = vnez %v11259_v6 }
 0x233   :  { %556 = vperm.xlu2 %6090, %v6932_v20   ;;  %550 = vperm.xlu1 %6089, %v6932_v20   ;;  %11339 = vst [vmem:[#allocation84_spill] sm:$0xff] %v7652_v34 }
 0x234   :  { %2148 = vadd.xlane.f32.xlu0 %v2146_v31  ;;  %v7628_v31 = vpop.permute.xlu2 %271 }
 0x235   :  { %11334 = vst [vmem:[#allocation82_spill] sm:$0xff] %v7628_v31 }
 0x23b   :  { %6093 = vset.pattern.permute.xlu2 %v6878_v11  ;;  %6092 = vset.pattern.permute.xlu1 %v6884_v12 }
 0x23c   :  { %2162 = vadd.xlane.f32.xlu0 %v2159_v22  ;;  %v7640_v22 = vsel %vm1507_vm3, 1, %v11263_v63  ;;  %v284_v41 = vpop.permute.xlu2 %283 }
 0x23d   :  { %11336 = vst [vmem:[#allocation83_spill] sm:$0xff] %v7640_v22  ;;  %v2193_v16 = vshrl.u32 %v7640_v22, 16  ;;  %vm1029_vm1 = vcmp.eq.f32.partialorder %v7536_v47, %v284_v41  ;;  %vm901_vm13 = vcmp.lt.f32.partialorder %v7536_v47, %v284_v41  ;;  %v2216_v22 = vand.u32 65535, %v7652_v34 }
 0x23e   :  { %vm1205_vm4 = vmand %vm1029_vm1, %vm11338_vm15  ;;  %vm11341_vm15 = vnez %v11256_v37 }
 0x23f   :  { %v2195_v53 = vcvt.s32.f32 %v2193_v16  ;;  %vm1333_vm3 = vmor %vm901_vm13, %vm1205_vm4  ;;  %v2218_v16 = vcvt.s32.f32 %v2216_v22 }
 0x240   :  { %vm1510_vm8 = vmand %vm1333_vm3, %vm11340_vm2  ;;  %vm11344_vm2 = vnez %v11309_v50 }
 0x241   :  { %v7664_v41 = vsel %vm1510_vm8, 1, %v11263_v63 }
 0x242   :  { %11342 = vst [vmem:[#allocation85_spill] sm:$0xff] %v7664_v41  ;;  %v2229_v34 = vshrl.u32 %v7664_v41, 16  ;;  %v7678_v41 = vld [vmem:[#allocation2] sm:$0xff] }
 0x243   :  { %574 = vperm.xlu2 %6093, %v6932_v20   ;;  %568 = vperm.xlu1 %6092, %v6932_v20   ;;  %v838_v31 = vrot.slane %v7678_v41, 3 }
 0x244   :  { %2184 = vadd.xlane.f32.xlu0 %v2182_v4  ;;  %v296_v4 = vpop.permute.xlu1 %295  ;;  %v2231_v22 = vcvt.s32.f32 %v2229_v34 }
 0x245   :  { %vm1031_vm6 = vcmp.eq.f32.partialorder %v7536_v47, %v296_v4  ;;  %vm903_vm1 = vcmp.lt.f32.partialorder %v7536_v47, %v296_v4  ;;  %v7685_v34 = vperm.slane %v838_v31, 0 }
 0x246   :  { %vm1207_vm7 = vmand %vm1031_vm6, %vm11341_vm15 }
 0x247   :  { %vm1335_vm4 = vmor %vm903_vm1, %vm1207_vm7  ;;  %vm11346_vm1 = vnez %v11314_v39 }
 0x248   :  { %vm1512_vm3 = vmand %vm1335_vm4, %vm11343_vm14 }
 0x249   :  { %v7676_v4 = vsel %vm1512_vm3, 1, %v11263_v63  ;;  %vm11347_vm3 = vnez %v11270_v51 }
 0x24a   :  { %11345 = vst [vmem:[#allocation86_spill] sm:$0xff] %v7676_v4 }
 0x24b   :  { %6095 = vset.pattern.permute.xlu2 %v6896_v14  ;;  %6094 = vset.pattern.permute.xlu1 %v6899_v15 }
 0x24c   :  { %2198 = vadd.xlane.f32.xlu0 %v2195_v53  ;;  %v302_v53 = vpop.permute.xlu2 %301 }
 0x24d   :  { %vm1032_vm13 = vcmp.eq.f32.partialorder %v7536_v47, %v302_v53  ;;  %vm904_vm6 = vcmp.lt.f32.partialorder %v7536_v47, %v302_v53  ;;  %v2252_v53 = vand.u32 65535, %v7676_v4  ;;  %v7697_v4 = vpop.permute.xlu1 %307 }
 0x24e   :  { %vm1208_vm15 = vmand %vm1032_vm13, %vm11344_vm2  ;;  %11349 = vst [vmem:[#allocation88_spill] sm:$0xff] %v7697_v4 }
 0x24f   :  { %vm1336_vm7 = vmor %vm904_vm6, %vm1208_vm15  ;;  %vm1035_vm15 = vcmp.eq.f32.partialorder %v7685_v34, %v7027_v27 }
 0x250   :  { %vm1513_vm4 = vmand %vm1336_vm7, %vm11346_vm1  ;;  %vm11350_vm1 = vnez %v11274_v24 }
 0x251   :  { %v7693_v58 = vsel %vm1513_vm4, 1, %v11263_v63  ;;  %vm1211_vm7 = vmand %vm1035_vm15, %vm11318_vm11 }
 0x252   :  { %11348 = vst [vmem:[#allocation87_spill] sm:$0xff] %v7693_v58  ;;  %v2265_v31 = vshrl.u32 %v7693_v58, 16 }
 0x253   :  { %586 = vperm.xlu2 %6095, %v6932_v20   ;;  %580 = vperm.xlu1 %6094, %v6932_v20  }
 0x254   :  { %2220 = vadd.xlane.f32.xlu0 %v2218_v16  ;;  %v314_v16 = vpop.permute.xlu2 %313 }
 0x255   :  { %vm1034_vm8 = vcmp.eq.f32.partialorder %v7536_v47, %v314_v16  ;;  %vm906_vm13 = vcmp.lt.f32.partialorder %v7536_v47, %v314_v16  ;;  %v2267_v16 = vcvt.s32.f32 %v2265_v31 }
 0x256   :  { %vm1210_vm2 = vmand %vm1034_vm8, %vm11347_vm3  ;;  %vm907_vm8 = vcmp.lt.f32.partialorder %v7685_v34, %v7027_v27 }
 0x257   :  { %vm1338_vm6 = vmor %vm906_vm13, %vm1210_vm2 }
 0x258   :  { %vm1515_vm3 = vmand %vm1338_vm6, %vm11350_vm1  ;;  %vm11354_vm6 = vnez %v11210_v38 }
 0x259   :  { %vm1339_vm4 = vmor %vm907_vm8, %vm1211_vm7 }
 0x25a   :  { %vm1516_vm2 = vmand %vm1339_vm4, %vm11321_vm10  ;;  %vm11355_vm4 = vnez %v11214_v45 }
 0x25b   :  { %6098 = vset.pattern.permute.xlu2 %v6890_v13  ;;  %6097 = vset.pattern.permute.xlu1 %v6911_v17  ;;  %v7718_v31 = vsel %vm1516_vm2, 1, %v11263_v63 }
 0x25c   :  { %2234 = vadd.xlane.f32.xlu0 %v2231_v22  ;;  %v2254_v22 = vcvt.s32.f32 %v2252_v53  ;;  %v7709_v53 = vsel %vm1515_vm3, 1, %v11263_v63  ;;  %11353 = vst [vmem:[#allocation91_spill] sm:$0xff] %v7718_v31 }
 0x25d   :  { %11351 = vst [vmem:[#allocation89_spill] sm:$0xff] %v7709_v53  ;;  %v2288_v27 = vand.u32 65535, %v7709_v53 }
 0x25f   :  { %v2290_v58 = vcvt.s32.f32 %v2288_v27 }
 0x263   :  { %604 = vperm.xlu2 %6098, %v6932_v20   ;;  %598 = vperm.xlu1 %6097, %v6932_v20   ;;  %v7711_v20 = vpop.permute.xlu1 %326 }
 0x264   :  { %2256 = vadd.xlane.f32.xlu0 %v2254_v22  ;;  %v333_v22 = vpop.permute.xlu2 %332  ;;  %11352 = vst [vmem:[#allocation90_spill] sm:$0xff] %v7711_v20  ;;  %v2301_v20 = vshrl.u32 %v7718_v31, 16 }
 0x265   :  { %vm1037_vm13 = vcmp.eq.f32.partialorder %v7685_v34, %v333_v22  ;;  %vm909_vm15 = vcmp.lt.f32.partialorder %v7685_v34, %v333_v22 }
 0x266   :  { %vm1213_vm3 = vmand %vm1037_vm13, %vm11354_vm6  ;;  %v2303_v53 = vcvt.s32.f32 %v2301_v20 }
 0x267   :  { %vm1341_vm7 = vmor %vm909_vm15, %vm1213_vm3  ;;  %vm1040_vm15 = vcmp.eq.f32.partialorder %v7685_v34, %v7032_v28 }
 0x268   :  { %vm1518_vm2 = vmand %vm1341_vm7, %vm11355_vm4  ;;  %vm11357_vm7 = vnez %v11224_v54 }
 0x269   :  { %vm1216_vm11 = vmand %vm1040_vm15, %vm11357_vm7 }
 0x26b   :  { %6100 = vset.pattern.permute.xlu2 %v6920_v18  ;;  %6099 = vset.pattern.permute.xlu1 %v6834_v1 }
 0x26c   :  { %2270 = vadd.xlane.f32.xlu0 %v2267_v16  ;;  %v339_v16 = vpop.permute.xlu1 %338  ;;  %v7751_v27 = vpop.permute.xlu2 %344 }
 0x26d   :  { %vm1038_vm8 = vcmp.eq.f32.partialorder %v7685_v34, %v339_v16  ;;  %vm910_vm10 = vcmp.lt.f32.partialorder %v7685_v34, %v339_v16  ;;  %11360 = vst [vmem:[#allocation94_spill] sm:$0xff] %v7751_v27 }
 0x26e   :  { %vm1214_vm13 = vmand %vm1038_vm8, %vm11325_vm9  ;;  %vm912_vm8 = vcmp.lt.f32.partialorder %v7685_v34, %v7032_v28  ;;  %vm11358_vm9 = vnez %v11221_v52 }
 0x26f   :  { %vm1342_vm3 = vmor %vm910_vm10, %vm1214_vm13  ;;  %vm11361_vm10 = vnez %v11228_v60 }
 0x270   :  { %vm1519_vm4 = vmand %vm1342_vm3, %vm11358_vm9 }
 0x271   :  { %vm1344_vm6 = vmor %vm912_vm8, %vm1216_vm11 }
 0x273   :  { %617 = vperm.xlu2 %6100, %v6968_v23   ;;  %611 = vperm.xlu1 %6099, %v6968_v23  }
 0x274   :  { %2292 = vadd.xlane.f32.xlu0 %v2290_v58  ;;  %v7735_v58 = vsel %vm1518_vm2, 1, %v11263_v63  ;;  %v357_v16 = vpop.permute.xlu1 %356  ;;  %vm1521_vm2 = vmand %vm1344_vm6, %vm11361_vm10 }
 0x275   :  { %11356 = vst [vmem:[#allocation92_spill] sm:$0xff] %v7735_v58  ;;  %v2324_v22 = vand.u32 65535, %v7735_v58  ;;  %vm1041_vm13 = vcmp.eq.f32.partialorder %v7685_v34, %v357_v16  ;;  %vm913_vm11 = vcmp.lt.f32.partialorder %v7685_v34, %v357_v16 }
 0x277   :  { %v2326_v20 = vcvt.s32.f32 %v2324_v22  ;;  %v7758_v22 = vsel %vm1521_vm2, 1, %v11263_v63  ;;  %vm11364_vm2 = vnez %v11238_v44 }
 0x278   :  { %11362 = vst [vmem:[#allocation95_spill] sm:$0xff] %v7758_v22 }
 0x27b   :  { %6103 = vset.pattern.permute.xlu2 %v6838_v2  ;;  %6102 = vset.pattern.permute.xlu1 %v6860_v8 }
 0x27c   :  { %2306 = vadd.xlane.f32.xlu0 %v2303_v53  ;;  %v7749_v53 = vsel %vm1519_vm4, 1, %v11263_v63  ;;  %vm1217_vm4 = vmand %vm1041_vm13, %vm11329_vm12  ;;  %v369_v27 = vpop.permute.xlu1 %368 }
 0x27d   :  { %11359 = vst [vmem:[#allocation93_spill] sm:$0xff] %v7749_v53  ;;  %v2337_v28 = vshrl.u32 %v7749_v53, 16  ;;  %v2360_v53 = vand.u32 65535, %v7758_v22  ;;  %vm1345_vm6 = vmor %vm913_vm11, %vm1217_vm4  ;;  %vm1043_vm15 = vcmp.eq.f32.partialorder %v7685_v34, %v369_v27  ;;  %vm915_vm8 = vcmp.lt.f32.partialorder %v7685_v34, %v369_v27 }
 0x27e   :  { %vm1522_vm3 = vmand %vm1345_vm6, %vm11332_vm5  ;;  %vm11367_vm6 = vnez %v11242_v57 }
 0x27f   :  { %v2339_v58 = vcvt.s32.f32 %v2337_v28  ;;  %v2362_v16 = vcvt.s32.f32 %v2360_v53  ;;  %vm1219_vm13 = vmand %vm1043_vm15, %vm11364_vm2 }
 0x280   :  { %vm1347_vm11 = vmor %vm915_vm8, %vm1219_vm13  ;;  %vm11370_vm13 = vnez %v11248_v49 }
 0x281   :  { %vm1524_vm5 = vmand %vm1347_vm11, %vm11367_vm6 }
 0x282   :  { %v7791_v27 = vsel %vm1524_vm5, 1, %v11263_v63 }
 0x283   :  { %635 = vperm.xlu2 %6103, %v6968_v23   ;;  %629 = vperm.xlu1 %6102, %v6968_v23   ;;  %11368 = vst [vmem:[#allocation99_spill] sm:$0xff] %v7791_v27 }
 0x284   :  { %2328 = vadd.xlane.f32.xlu0 %v2326_v20  ;;  %v7765_v20 = vpop.permute.xlu2 %362 }
 0x285   :  { %11363 = vst [vmem:[#allocation96_spill] sm:$0xff] %v7765_v20 }
 0x28b   :  { %6105 = vset.pattern.permute.xlu2 %v6872_v10  ;;  %6104 = vset.pattern.permute.xlu1 %v6857_v7  ;;  %v7779_v10 = vpop.permute.xlu0 %744 }
 0x28c   :  { %2342 = vadd.xlane.f32.xlu0 %v2339_v58  ;;  %v7777_v58 = vsel %vm1522_vm3, 1, %v11263_v63  ;;  %v375_v28 = vpop.permute.xlu2 %374  ;;  %11366 = vst [vmem:[#allocation98_spill] sm:$0xff] %v7779_v10  ;;  %v2396_v10 = vand.u32 65535, %v7791_v27 }
 0x28d   :  { %11365 = vst [vmem:[#allocation97_spill] sm:$0xff] %v7777_v58  ;;  %v2373_v22 = vshrl.u32 %v7777_v58, 16  ;;  %vm1044_vm4 = vcmp.eq.f32.partialorder %v7685_v34, %v375_v28  ;;  %vm916_vm15 = vcmp.lt.f32.partialorder %v7685_v34, %v375_v28 }
 0x28e   :  { %vm1220_vm12 = vmand %vm1044_vm4, %vm11335_vm0  ;;  %vm11371_vm0 = vnez %v11250_v55 }
 0x28f   :  { %v2375_v53 = vcvt.s32.f32 %v2373_v22  ;;  %vm1348_vm3 = vmor %vm916_vm15, %vm1220_vm12  ;;  %v2398_v22 = vcvt.s32.f32 %v2396_v10  ;;  %vm11373_vm15 = vnez %v11253_v48 }
 0x290   :  { %vm1525_vm11 = vmand %vm1348_vm3, %vm11370_vm13  ;;  %vm11374_vm13 = vnez %v11256_v37 }
 0x291   :  { %v7805_v28 = vsel %vm1525_vm11, 1, %v11263_v63 }
 0x292   :  { %11372 = vst [vmem:[#allocation101_spill] sm:$0xff] %v7805_v28  ;;  %v2409_v27 = vshrl.u32 %v7805_v28, 16 }
 0x293   :  { %647 = vperm.xlu2 %6105, %v6968_v23   ;;  %641 = vperm.xlu1 %6104, %v6968_v23   ;;  %v7794_v58 = vpop.permute.xlu0 %289 }
 0x294   :  { %2364 = vadd.xlane.f32.xlu0 %v2362_v16  ;;  %v387_v16 = vpop.permute.xlu1 %386  ;;  %11369 = vst [vmem:[#allocation100_spill] sm:$0xff] %v7794_v58  ;;  %v2411_v10 = vcvt.s32.f32 %v2409_v27 }
 0x295   :  { %vm1046_vm8 = vcmp.eq.f32.partialorder %v7685_v34, %v387_v16  ;;  %vm918_vm4 = vcmp.lt.f32.partialorder %v7685_v34, %v387_v16 }
 0x296   :  { %vm1222_vm9 = vmand %vm1046_vm8, %vm11371_vm0 }
 0x297   :  { %vm1350_vm12 = vmor %vm918_vm4, %vm1222_vm9 }
 0x298   :  { %vm1527_vm3 = vmand %vm1350_vm12, %vm11373_vm15 }
 0x29b   :  { %6108 = vset.pattern.permute.xlu2 %v6884_v12  ;;  %6107 = vset.pattern.permute.xlu1 %v6938_v21  ;;  %v7811_v16 = vpop.permute.xlu0 %774 }
 0x29c   :  { %2378 = vadd.xlane.f32.xlu0 %v2375_v53  ;;  %v393_v53 = vpop.permute.xlu2 %392 }
 0x29d   :  { %vm1047_vm5 = vcmp.eq.f32.partialorder %v7685_v34, %v393_v53  ;;  %vm919_vm8 = vcmp.lt.f32.partialorder %v7685_v34, %v393_v53 }
 0x29e   :  { %vm1223_vm0 = vmand %vm1047_vm5, %vm11374_vm13  ;;  %vm11376_vm5 = vnez %v11261_v43 }
 0x29f   :  { %vm1351_vm9 = vmor %vm919_vm8, %vm1223_vm0  ;;  %vm11379_vm8 = vnez %v11268_v29 }
 0x2a0   :  { %vm1528_vm4 = vmand %vm1351_vm9, %vm11343_vm14 }
 0x2a3   :  { %665 = vperm.xlu2 %6108, %v6968_v23   ;;  %659 = vperm.xlu1 %6107, %v6968_v23   ;;  %v442_v53 = vpop.permute.xlu0 %441 }
 0x2a4   :  { %2400 = vadd.xlane.f32.xlu0 %v2398_v22  ;;  %v7819_v22 = vsel %vm1527_vm3, 1, %v11263_v63  ;;  %v405_v28 = vpop.permute.xlu2 %404  ;;  %vm1050_vm3 = vcmp.eq.f32.partialorder %v7685_v34, %v7043_v30 }
 0x2a5   :  { %11375 = vst [vmem:[#allocation102_spill] sm:$0xff] %v7819_v22  ;;  %v2432_v20 = vand.u32 65535, %v7819_v22  ;;  %vm1049_vm11 = vcmp.eq.f32.partialorder %v7685_v34, %v405_v28  ;;  %vm921_vm12 = vcmp.lt.f32.partialorder %v7685_v34, %v405_v28  ;;  %v839_v28 = vrot.slane %v7678_v41, 4 }
 0x2a6   :  { %vm1225_vm13 = vmand %vm1049_vm11, %vm11376_vm5  ;;  %vm922_vm11 = vcmp.lt.f32.partialorder %v7685_v34, %v7043_v30 }
 0x2a7   :  { %v2434_v27 = vcvt.s32.f32 %v2432_v20  ;;  %vm1353_vm0 = vmor %vm921_vm12, %vm1225_vm13 }
 0x2a8   :  { %vm1530_vm9 = vmand %vm1353_vm0, %vm11379_vm8 }
 0x2ab   :  { %6110 = vset.pattern.permute.xlu2 %v6899_v15  ;;  %6109 = vset.pattern.permute.xlu1 %v6878_v11  ;;  %v7833_v15 = vpop.permute.xlu1 %398  ;;  %v7854_v58 = vpop.xlane.xlu0 %1728 }
 0x2ac   :  { %2414 = vadd.xlane.f32.xlu0 %v2411_v10  ;;  %v7831_v10 = vsel %vm1528_vm4, 1, %v11263_v63  ;;  %11378 = vst [vmem:[#allocation104_spill] sm:$0xff] %v7833_v15  ;;  %vm11380_vm4 = vnez %v11270_v51  ;;  %v7845_v15 = vperm.slane %v839_v28, 0  ;;  %v424_v31 = vpop.permute.xlu2 %423 }
 0x2ad   :  { %11377 = vst [vmem:[#allocation103_spill] sm:$0xff] %v7831_v10  ;;  %v2445_v22 = vshrl.u32 %v7831_v10, 16  ;;  %vm1226_vm14 = vmand %vm1050_vm3, %vm11380_vm4  ;;  %v7850_v10 = vsel %vm1530_vm9, 1, %v11263_v63  ;;  %vm11384_vm4 = vnez %v11276_v19 }
 0x2ae   :  { %vm1354_vm13 = vmor %vm922_vm11, %vm1226_vm14  ;;  %11383 = vst [vmem:[#allocation105_spill] sm:$0xff] %v7854_v58  ;;  %v2468_v30 = vand.u32 65535, %v7850_v10  ;;  %vm1052_vm12 = vcmp.eq.f32.partialorder %v7845_v15, %v424_v31  ;;  %vm924_vm3 = vcmp.lt.f32.partialorder %v7845_v15, %v424_v31 }
 0x2af   :  { %v2447_v20 = vcvt.s32.f32 %v2445_v22  ;;  %vm1531_vm0 = vmand %vm1354_vm13, %vm11350_vm1  ;;  %vm11387_vm13 = vnez %v11280_v42 }
 0x2b0   :  { %vm1228_vm9 = vmand %vm1052_vm12, %vm11384_vm4  ;;  %v2470_v22 = vcvt.s32.f32 %v2468_v30  ;;  %v7866_v28 = vsel %vm1531_vm0, 1, %v11263_v63  ;;  %vm11388_vm4 = vnez %v11210_v38  ;;  %vm1055_vm0 = vcmp.eq.f32.partialorder %v7845_v15, %v442_v53 }
 0x2b1   :  { %11385 = vst [vmem:[#allocation106_spill] sm:$0xff] %v7866_v28  ;;  %vm1356_vm14 = vmor %vm924_vm3, %vm1228_vm9  ;;  %v2481_v58 = vshrl.u32 %v7866_v28, 16  ;;  %vm11390_vm9 = vnez %v11284_v40 }
 0x2b2   :  { %vm1533_vm12 = vmand %vm1356_vm14, %vm11387_vm13  ;;  %vm927_vm13 = vcmp.lt.f32.partialorder %v7845_v15, %v442_v53 }
 0x2b3   :  { %677 = vperm.xlu2 %6110, %v6968_v23   ;;  %671 = vperm.xlu1 %6109, %v6968_v23   ;;  %v7852_v4 = vpop.permute.xlu1 %417  ;;  %v2483_v31 = vcvt.s32.f32 %v2481_v58  ;;  %v7880_v30 = vsel %vm1533_vm12, 1, %v11263_v63  ;;  %vm1231_vm14 = vmand %vm1055_vm0, %vm11390_vm9 }
 0x2b4   :  { %2436 = vadd.xlane.f32.xlu0 %v2434_v27  ;;  %v11381_v27 = vld [vmem:[#allocation25_spill] sm:$0xff]  ;;  %11389 = vst [vmem:[#allocation108_spill] sm:$0xff] %v7880_v30  ;;  %vm1359_vm5 = vmor %vm927_vm13, %vm1231_vm14 }
 0x2b5   :  { %11382 = vst [vmem:[#allocation25_spill] sm:$0xff] %v7850_v10  ;;  %v7869_v10 = vpop.xlane.xlu0 %1752 }
 0x2b6   :  { %11386 = vst [vmem:[#allocation107_spill] sm:$0xff] %v7869_v10  ;;  %v11393_v10 = vld [vmem:[#allocation28_spill] sm:$0xff] }
 0x2bb   :  { %6113 = vset.pattern.permute.xlu2 %v6911_v17  ;;  %6112 = vset.pattern.permute.xlu1 %v11381_v27 }
 0x2bc   :  { %2450 = vadd.xlane.f32.xlu0 %v2447_v20  ;;  %v430_v20 = vpop.permute.xlu1 %429 }
 0x2bd   :  { %vm1053_vm11 = vcmp.eq.f32.partialorder %v7845_v15, %v430_v20  ;;  %vm925_vm1 = vcmp.lt.f32.partialorder %v7845_v15, %v430_v20  ;;  %v7889_v58 = vpop.xlane.xlu0 %1766 }
 0x2be   :  { %vm1229_vm8 = vmand %vm1053_vm11, %vm11388_vm4  ;;  %vm11391_vm11 = vnez %v11214_v45  ;;  %11392 = vst [vmem:[#allocation109_spill] sm:$0xff] %v7889_v58 }
 0x2bf   :  { %vm1357_vm3 = vmor %vm925_vm1, %vm1229_vm8  ;;  %vm11396_vm1 = vnez %v11288_v26 }
 0x2c0   :  { %vm1534_vm4 = vmand %vm1357_vm3, %vm11391_vm11 }
 0x2c1   :  { %vm1536_vm8 = vmand %vm1359_vm5, %vm11396_vm1 }
 0x2c3   :  { %695 = vperm.xlu2 %6113, %v6968_v23   ;;  %689 = vperm.xlu1 %6112, %v6968_v23  }
 0x2c4   :  { %2472 = vadd.xlane.f32.xlu0 %v2470_v22  ;;  %v2504_v22 = vand.u32 65535, %v7880_v30  ;;  %v448_v30 = vpop.permute.xlu1 %447 }
 0x2c5   :  { %vm1056_vm12 = vcmp.eq.f32.partialorder %v7845_v15, %v448_v30  ;;  %vm928_vm13 = vcmp.lt.f32.partialorder %v7845_v15, %v448_v30 }
 0x2c6   :  { %v2506_v20 = vcvt.s32.f32 %v2504_v22  ;;  %v7903_v22 = vsel %vm1536_vm8, 1, %v11263_v63  ;;  %vm11400_vm8 = vnez %v11293_v59 }
 0x2c7   :  { %11397 = vst [vmem:[#allocation112_spill] sm:$0xff] %v7903_v22 }
 0x2cb   :  { %6115 = vset.pattern.permute.xlu2 %v6834_v1  ;;  %6114 = vset.pattern.permute.xlu1 %v6890_v13  ;;  %v7896_v1 = vpop.permute.xlu2 %435 }
 0x2cc   :  { %2486 = vadd.xlane.f32.xlu0 %v2483_v31  ;;  %v7894_v31 = vsel %vm1534_vm4, 1, %v11263_v63  ;;  %11395 = vst [vmem:[#allocation111_spill] sm:$0xff] %v7896_v1  ;;  %vm1232_vm4 = vmand %vm1056_vm12, %vm11357_vm7  ;;  %v2540_v1 = vand.u32 65535, %v7903_v22 }
 0x2cd   :  { %11394 = vst [vmem:[#allocation110_spill] sm:$0xff] %v7894_v31  ;;  %v2517_v53 = vshrl.u32 %v7894_v31, 16  ;;  %v460_v31 = vpop.permute.xlu1 %459  ;;  %vm1360_vm5 = vmor %vm928_vm13, %vm1232_vm4 }
 0x2ce   :  { %vm1058_vm0 = vcmp.eq.f32.partialorder %v7845_v15, %v460_v31  ;;  %vm1537_vm3 = vmand %vm1360_vm5, %vm11361_vm10  ;;  %v2542_v30 = vcvt.s32.f32 %v2540_v1  ;;  %vm930_vm14 = vcmp.lt.f32.partialorder %v7845_v15, %v460_v31  ;;  %vm11403_vm5 = vnez %v11297_v0 }
 0x2cf   :  { %v2519_v58 = vcvt.s32.f32 %v2517_v53  ;;  %vm1234_vm12 = vmand %vm1058_vm0, %vm11400_vm8 }
 0x2d0   :  { %vm1362_vm13 = vmor %vm930_vm14, %vm1234_vm12 }
 0x2d1   :  { %vm1539_vm10 = vmand %vm1362_vm13, %vm11403_vm5 }
 0x2d2   :  { %v7938_v31 = vsel %vm1539_vm10, 1, %v11263_v63 }
 0x2d3   :  { %708 = vperm.xlu2 %6115, %v11393_v10   ;;  %701 = vperm.xlu1 %6114, %v6968_v23   ;;  %v7908_v23 = vpop.xlane.xlu0 %1788  ;;  %11404 = vst [vmem:[#allocation117_spill] sm:$0xff] %v7938_v31 }
 0x2d4   :  { %2508 = vadd.xlane.f32.xlu0 %v2506_v20  ;;  %11398 = vst [vmem:[#allocation113_spill] sm:$0xff] %v7908_v23  ;;  %v7912_v20 = vpop.permute.xlu2 %453 }
 0x2d5   :  { %11399 = vst [vmem:[#allocation114_spill] sm:$0xff] %v7912_v20  ;;  %v841_v20 = vrot.slane %v7678_v41, 6 }
 0x2db   :  { %6118 = vset.pattern.permute.xlu2 %v6860_v8  ;;  %6117 = vset.pattern.permute.xlu1 %v6841_v3  ;;  %v7926_v23 = vpop.xlane.xlu0 %1802 }
 0x2dc   :  { %2522 = vadd.xlane.f32.xlu0 %v2519_v58  ;;  %v7924_v58 = vsel %vm1537_vm3, 1, %v11263_v63  ;;  %v466_v53 = vpop.permute.xlu2 %465  ;;  %11402 = vst [vmem:[#allocation116_spill] sm:$0xff] %v7926_v23  ;;  %v2576_v23 = vand.u32 65535, %v7938_v31 }
 0x2dd   :  { %11401 = vst [vmem:[#allocation115_spill] sm:$0xff] %v7924_v58  ;;  %v2553_v22 = vshrl.u32 %v7924_v58, 16  ;;  %vm1059_vm4 = vcmp.eq.f32.partialorder %v7845_v15, %v466_v53  ;;  %vm931_vm0 = vcmp.lt.f32.partialorder %v7845_v15, %v466_v53 }
 0x2de   :  { %vm1235_vm7 = vmand %vm1059_vm4, %vm11364_vm2  ;;  %vm11406_vm4 = vnez %v11302_v56 }
 0x2df   :  { %v2555_v1 = vcvt.s32.f32 %v2553_v22  ;;  %vm1363_vm3 = vmor %vm931_vm0, %vm1235_vm7  ;;  %v2578_v22 = vcvt.s32.f32 %v2576_v23  ;;  %vm11408_vm0 = vnez %v11306_v5 }
 0x2e0   :  { %vm1540_vm12 = vmand %vm1363_vm3, %vm11367_vm6  ;;  %vm11410_vm6 = vnez %v11250_v55 }
 0x2e1   :  { %v7952_v53 = vsel %vm1540_vm12, 1, %v11263_v63 }
 0x2e2   :  { %11407 = vst [vmem:[#allocation119_spill] sm:$0xff] %v7952_v53 }
 0x2e3   :  { %726 = vperm.xlu2 %6118, %v11393_v10   ;;  %720 = vperm.xlu1 %6117, %v11393_v10   ;;  %v7941_v58 = vpop.xlane.xlu0 %1824 }
 0x2e4   :  { %2544 = vadd.xlane.f32.xlu0 %v2542_v30  ;;  %v478_v30 = vpop.permute.xlu1 %477  ;;  %11405 = vst [vmem:[#allocation118_spill] sm:$0xff] %v7941_v58  ;;  %v2589_v58 = vshrl.u32 %v7952_v53, 16  ;;  %v11416_v53 = vld [vmem:[#allocation36_spill] sm:$0xff] }
 0x2e5   :  { %vm1061_vm14 = vcmp.eq.f32.partialorder %v7845_v15, %v478_v30  ;;  %vm933_vm13 = vcmp.lt.f32.partialorder %v7845_v15, %v478_v30 }
 0x2e6   :  { %vm1237_vm2 = vmand %vm1061_vm14, %vm11406_vm4  ;;  %v2591_v23 = vcvt.s32.f32 %v2589_v58 }
 0x2e7   :  { %vm1365_vm7 = vmor %vm933_vm13, %vm1237_vm2 }
 0x2e8   :  { %vm1542_vm3 = vmand %vm1365_vm7, %vm11408_vm0 }
 0x2eb   :  { %6120 = vset.pattern.permute.xlu2 %v6857_v7  ;;  %6119 = vset.pattern.permute.xlu1 %v6838_v2  ;;  %v7958_v30 = vpop.xlane.xlu0 %1838 }
 0x2ec   :  { %2558 = vadd.xlane.f32.xlu0 %v2555_v1  ;;  %v484_v1 = vpop.permute.xlu2 %483  ;;  %11409 = vst [vmem:[#allocation120_spill] sm:$0xff] %v7958_v30  ;;  %v7982_v30 = vpop.permute.xlu1 %489 }
 0x2ed   :  { %vm1062_vm10 = vcmp.eq.f32.partialorder %v7845_v15, %v484_v1  ;;  %vm934_vm14 = vcmp.lt.f32.partialorder %v7845_v15, %v484_v1  ;;  %11415 = vst [vmem:[#allocation124_spill] sm:$0xff] %v7982_v30 }
 0x2ee   :  { %vm1238_vm11 = vmand %vm1062_vm10, %vm11410_vm6  ;;  %vm11412_vm10 = vnez %v11309_v50 }
 0x2ef   :  { %vm1366_vm2 = vmor %vm934_vm14, %vm1238_vm11  ;;  %vm11417_vm14 = vnez %v11314_v39 }
 0x2f0   :  { %vm1543_vm13 = vmand %vm1366_vm2, %vm11373_vm15 }
 0x2f3   :  { %738 = vperm.xlu2 %6120, %v11393_v10   ;;  %732 = vperm.xlu1 %6119, %v11393_v10   ;;  %v7975_v1 = vpop.xlane.xlu0 %1860 }
 0x2f4   :  { %2580 = vadd.xlane.f32.xlu0 %v2578_v22  ;;  %v7966_v22 = vsel %vm1542_vm3, 1, %v11263_v63  ;;  %v496_v2 = vpop.permute.xlu2 %495  ;;  %11413 = vst [vmem:[#allocation122_spill] sm:$0xff] %v7975_v1  ;;  %vm1065_vm3 = vcmp.eq.f32.partialorder %v7845_v15, %v11416_v53  ;;  %v8001_v30 = vpop.permute.xlu1 %507 }
 0x2f5   :  { %11411 = vst [vmem:[#allocation121_spill] sm:$0xff] %v7966_v22  ;;  %v2612_v7 = vand.u32 65535, %v7966_v22  ;;  %vm1064_vm12 = vcmp.eq.f32.partialorder %v7845_v15, %v496_v2  ;;  %vm936_vm7 = vcmp.lt.f32.partialorder %v7845_v15, %v496_v2  ;;  %v840_v2 = vrot.slane %v7678_v41, 5 }
 0x2f6   :  { %vm1240_vm6 = vmand %vm1064_vm12, %vm11412_vm10  ;;  %vm937_vm12 = vcmp.lt.f32.partialorder %v7845_v15, %v11416_v53  ;;  %11421 = vst [vmem:[#allocation126_spill] sm:$0xff] %v8001_v30 }
 0x2f7   :  { %v2614_v58 = vcvt.s32.f32 %v2612_v7  ;;  %vm1368_vm11 = vmor %vm936_vm7, %vm1240_vm6  ;;  %v7994_v1 = vperm.slane %v840_v2, 0 }
 0x2f8   :  { %vm1545_vm2 = vmand %vm1368_vm11, %vm11417_vm14  ;;  %vm11423_vm11 = vnez %v11268_v29  ;;  %vm11424_vm14 = vnez %v11204_v32 }
 0x2f9   :  { %11419 = vst [vmem:[#allocation36_spill] sm:$0xff] %v7994_v1 }
 0x2fb   :  { %6123 = vset.pattern.permute.xlu2 %v6938_v21  ;;  %6122 = vset.pattern.permute.xlu1 %v6869_v9  ;;  %v8003_v31 = vpop.xlane.xlu0 %1874 }
 0x2fc   :  { %2594 = vadd.xlane.f32.xlu0 %v2591_v23  ;;  %v7980_v23 = vsel %vm1543_vm13, 1, %v11263_v63  ;;  %vm11418_vm13 = vnez %v11261_v43  ;;  %11422 = vst [vmem:[#allocation127_spill] sm:$0xff] %v8003_v31 }
 0x2fd   :  { %11414 = vst [vmem:[#allocation123_spill] sm:$0xff] %v7980_v23  ;;  %v2625_v22 = vshrl.u32 %v7980_v23, 16  ;;  %vm1241_vm15 = vmand %vm1065_vm3, %vm11418_vm13  ;;  %v515_v23 = vpop.permute.xlu2 %514 }
 0x2fe   :  { %vm1369_vm6 = vmor %vm937_vm12, %vm1241_vm15  ;;  %vm1067_vm7 = vcmp.eq.f32.partialorder %v7994_v1, %v515_v23  ;;  %vm939_vm13 = vcmp.lt.f32.partialorder %v7994_v1, %v515_v23 }
 0x2ff   :  { %v2627_v7 = vcvt.s32.f32 %v2625_v22  ;;  %vm1546_vm3 = vmand %vm1369_vm6, %vm11423_vm11  ;;  %vm11427_vm6 = vnez %v11206_v36 }
 0x300   :  { %v8015_v2 = vsel %vm1546_vm3, 1, %v11263_v63 }
 0x301   :  { %11425 = vst [vmem:[#allocation128_spill] sm:$0xff] %v8015_v2  ;;  %v2661_v31 = vshrl.u32 %v8015_v2, 16 }
 0x303   :  { %756 = vperm.xlu2 %6123, %v11393_v10   ;;  %750 = vperm.xlu1 %6122, %v11393_v10   ;;  %v2663_v23 = vcvt.s32.f32 %v2661_v31 }
 0x304   :  { %2616 = vadd.xlane.f32.xlu0 %v2614_v58  ;;  %v7999_v58 = vsel %vm1545_vm2, 1, %v11263_v63  ;;  %vm1243_vm2 = vmand %vm1067_vm7, %vm11424_vm14  ;;  %vm11428_vm14 = vnez %v11276_v19 }
 0x305   :  { %11420 = vst [vmem:[#allocation125_spill] sm:$0xff] %v7999_v58  ;;  %v2648_v53 = vand.u32 65535, %v7999_v58  ;;  %vm1371_vm15 = vmor %vm939_vm13, %vm1243_vm2  ;;  %vm11431_vm2 = vnez %v11280_v42  ;;  %v11457_v58 = vld [vmem:[#allocation52_spill] sm:$0xff] }
 0x306   :  { %vm1548_vm7 = vmand %vm1371_vm15, %vm11427_vm6  ;;  %vm11433_vm6 = vnez %v11216_v46 }
 0x307   :  { %v2650_v22 = vcvt.s32.f32 %v2648_v53  ;;  %v8029_v53 = vsel %vm1548_vm7, 1, %v11263_v63  ;;  %vm11436_vm7 = vnez %v11221_v52 }
 0x308   :  { %11429 = vst [vmem:[#allocation130_spill] sm:$0xff] %v8029_v53 }
 0x30b   :  { %6125 = vset.pattern.permute.xlu2 %v6878_v11  ;;  %6124 = vset.pattern.permute.xlu1 %v6884_v12  ;;  %v8018_v11 = vpop.xlane.xlu0 %1896 }
 0x30c   :  { %2630 = vadd.xlane.f32.xlu0 %v2627_v7  ;;  %v521_v7 = vpop.permute.xlu1 %520  ;;  %11426 = vst [vmem:[#allocation129_spill] sm:$0xff] %v8018_v11  ;;  %v11430_v11 = vld [vmem:[#allocation39_spill] sm:$0xff] }
 0x30d   :  { %vm1068_vm12 = vcmp.eq.f32.partialorder %v7994_v1, %v521_v7  ;;  %vm940_vm11 = vcmp.lt.f32.partialorder %v7994_v1, %v521_v7  ;;  %vm1070_vm3 = vcmp.eq.f32.partialorder %v7994_v1, %v11430_v11 }
 0x30e   :  { %vm1244_vm10 = vmand %vm1068_vm12, %vm11428_vm14  ;;  %vm942_vm12 = vcmp.lt.f32.partialorder %v7994_v1, %v11430_v11 }
 0x30f   :  { %vm1372_vm13 = vmor %vm940_vm11, %vm1244_vm10 }
 0x310   :  { %vm1549_vm15 = vmand %vm1372_vm13, %vm11431_vm2 }
 0x311   :  { %vm1246_vm0 = vmand %vm1070_vm3, %vm11433_vm6 }
 0x312   :  { %vm1374_vm10 = vmor %vm942_vm12, %vm1246_vm0 }
 0x313   :  { %768 = vperm.xlu2 %6125, %v11393_v10   ;;  %762 = vperm.xlu1 %6124, %v11393_v10   ;;  %v8036_v7 = vpop.xlane.xlu0 %1910  ;;  %vm1551_vm13 = vmand %vm1374_vm10, %vm11436_vm7 }
 0x314   :  { %2652 = vadd.xlane.f32.xlu0 %v2650_v22  ;;  %v2684_v22 = vand.u32 65535, %v8029_v53  ;;  %11432 = vst [vmem:[#allocation39_spill] sm:$0xff] %v8036_v7  ;;  %v8047_v53 = vpop.permute.xlu2 %526  ;;  %v539_v2 = vpop.permute.xlu1 %538 }
 0x315   :  { %11435 = vst [vmem:[#allocation132_spill] sm:$0xff] %v8047_v53  ;;  %vm1071_vm11 = vcmp.eq.f32.partialorder %v7994_v1, %v539_v2  ;;  %vm943_vm3 = vcmp.lt.f32.partialorder %v7994_v1, %v539_v2 }
 0x316   :  { %v2686_v31 = vcvt.s32.f32 %v2684_v22  ;;  %vm1247_vm6 = vmand %vm1071_vm11, %vm11390_vm9  ;;  %vm11440_vm11 = vnez %v11230_v61 }
 0x317   :  { %vm1375_vm0 = vmor %vm943_vm3, %vm1247_vm6  ;;  %vm11443_vm3 = vnez %v11235_v35 }
 0x318   :  { %vm1552_vm12 = vmand %vm1375_vm0, %vm11396_vm1 }
 0x31b   :  { %6128 = vset.pattern.permute.xlu2 %v11381_v27  ;;  %6127 = vset.pattern.permute.xlu1 %v6896_v14  ;;  %v8056_v22 = vpop.xlane.xlu0 %1932  ;;  %v11469_v14 = vld [vmem:[#allocation37_spill] sm:$0xff] }
 0x31c   :  { %2666 = vadd.xlane.f32.xlu0 %v2663_v23  ;;  %v8045_v23 = vsel %vm1549_vm15, 1, %v11263_v63  ;;  %11437 = vst [vmem:[#allocation133_spill] sm:$0xff] %v8056_v22  ;;  %v551_v53 = vpop.permute.xlu1 %550 }
 0x31d   :  { %11434 = vst [vmem:[#allocation131_spill] sm:$0xff] %v8045_v23  ;;  %v2697_v7 = vshrl.u32 %v8045_v23, 16  ;;  %v8063_v23 = vpop.permute.xlu2 %544  ;;  %vm1073_vm15 = vcmp.eq.f32.partialorder %v7994_v1, %v551_v53  ;;  %vm945_vm10 = vcmp.lt.f32.partialorder %v7994_v1, %v551_v53 }
 0x31e   :  { %11439 = vst [vmem:[#allocation135_spill] sm:$0xff] %v8063_v23  ;;  %vm1249_vm7 = vmand %vm1073_vm15, %vm11440_vm11 }
 0x31f   :  { %v2699_v11 = vcvt.s32.f32 %v2697_v7  ;;  %vm1377_vm6 = vmor %vm945_vm10, %vm1249_vm7 }
 0x320   :  { %vm1554_vm0 = vmand %vm1377_vm6, %vm11443_vm3 }
 0x323   :  { %786 = vperm.xlu2 %6128, %v11393_v10   ;;  %780 = vperm.xlu1 %6127, %v11393_v10  }
 0x324   :  { %2688 = vadd.xlane.f32.xlu0 %v2686_v31  ;;  %v8061_v31 = vsel %vm1551_vm13, 1, %v11263_v63 }
 0x325   :  { %11438 = vst [vmem:[#allocation134_spill] sm:$0xff] %v8061_v31  ;;  %v2720_v2 = vand.u32 65535, %v8061_v31  ;;  %v557_v22 = vpop.permute.xlu2 %556 }
 0x326   :  { %vm1074_vm13 = vcmp.eq.f32.partialorder %v7994_v1, %v557_v22  ;;  %vm946_vm15 = vcmp.lt.f32.partialorder %v7994_v1, %v557_v22 }
 0x327   :  { %v2722_v7 = vcvt.s32.f32 %v2720_v2  ;;  %vm1250_vm11 = vmand %vm1074_vm13, %vm11400_vm8  ;;  %v8087_v2 = vsel %vm1554_vm0, 1, %v11263_v63  ;;  %vm11446_vm13 = vnez %v11244_v62 }
 0x328   :  { %11444 = vst [vmem:[#allocation138_spill] sm:$0xff] %v8087_v2  ;;  %vm1378_vm7 = vmor %vm946_vm15, %vm1250_vm11 }
 0x329   :  { %vm1555_vm10 = vmand %vm1378_vm7, %vm11403_vm5 }
 0x32b   :  { %6130 = vset.pattern.permute.xlu2 %v6890_v13  ;;  %6129 = vset.pattern.permute.xlu1 %v6911_v17  ;;  %v8077_v13 = vpop.xlane.xlu0 %1946 }
 0x32c   :  { %2702 = vadd.xlane.f32.xlu0 %v2699_v11  ;;  %v8075_v11 = vsel %vm1552_vm12, 1, %v11263_v63  ;;  %11442 = vst [vmem:[#allocation137_spill] sm:$0xff] %v8077_v13  ;;  %v2756_v13 = vand.u32 65535, %v8087_v2 }
 0x32d   :  { %11441 = vst [vmem:[#allocation136_spill] sm:$0xff] %v8075_v11  ;;  %v2733_v31 = vshrl.u32 %v8075_v11, 16  ;;  %v575_v2 = vpop.permute.xlu2 %574 }
 0x32e   :  { %v2758_v22 = vcvt.s32.f32 %v2756_v13  ;;  %vm1077_vm3 = vcmp.eq.f32.partialorder %v7994_v1, %v575_v2  ;;  %vm949_vm5 = vcmp.lt.f32.partialorder %v7994_v1, %v575_v2 }
 0x32f   :  { %v2735_v53 = vcvt.s32.f32 %v2733_v31  ;;  %v8101_v31 = vsel %vm1555_vm10, 1, %v11263_v63 }
 0x330   :  { %11447 = vst [vmem:[#allocation140_spill] sm:$0xff] %v8101_v31 }
 0x333   :  { %798 = vperm.xlu2 %6130, %v11393_v10   ;;  %792 = vperm.xlu1 %6129, %v11393_v10   ;;  %v8093_v10 = vpop.xlane.xlu0 %1968 }
 0x334   :  { %2724 = vadd.xlane.f32.xlu0 %v2722_v7  ;;  %v569_v7 = vpop.permute.xlu1 %568  ;;  %11445 = vst [vmem:[#allocation139_spill] sm:$0xff] %v8093_v10  ;;  %v2769_v10 = vshrl.u32 %v8101_v31, 16 }
 0x335   :  { %vm1076_vm12 = vcmp.eq.f32.partialorder %v7994_v1, %v569_v7  ;;  %vm948_vm6 = vcmp.lt.f32.partialorder %v7994_v1, %v569_v7  ;;  %v587_v31 = vpop.permute.xlu2 %586 }
 0x336   :  { %vm1252_vm0 = vmand %vm1076_vm12, %vm11446_vm13  ;;  %vm11449_vm13 = vnez %v11248_v49  ;;  %v2771_v7 = vcvt.s32.f32 %v2769_v10 }
 0x337   :  { %vm1380_vm15 = vmor %vm948_vm6, %vm1252_vm0 }
 0x338   :  { %vm1557_vm10 = vmand %vm1380_vm15, %vm11449_vm13  ;;  %vm1079_vm15 = vcmp.eq.f32.partialorder %v7994_v1, %v587_v31  ;;  %vm11452_vm13 = vnez %v11306_v5 }
 0x339   :  { %vm1253_vm6 = vmand %vm1077_vm3, %vm11406_vm4  ;;  %vm951_vm3 = vcmp.lt.f32.partialorder %v7994_v1, %v587_v31  ;;  %v11458_v31 = vld [vmem:[#allocation33_spill] sm:$0xff] }
 0x33a   :  { %v1725_v30 = vshrl.u32 %v11458_v31, 16 }
 0x33b   :  { %6131 = vset.pattern.permute.xlu1 %v6920_v18  ;;  %6132 = vset.pattern.permute.xlu2 %v6841_v3  ;;  %v8113_v13 = vpop.xlane.xlu0 %1982  ;;  %v11459_v18 = vld [vmem:[#allocation34_spill] sm:$0xff] }
 0x33c   :  { %2738 = vadd.xlane.f32.xlu0 %v2735_v53  ;;  %v11448_v53 = vld [vmem:[#allocation11_spill] sm:$0xff]  ;;  %v8136_v11 = vpop.permute.xlu1 %580  ;;  %v1727_v31 = vcvt.s32.f32 %v1725_v30 }
 0x33d   :  { %vm988_vm11 = vcmp.eq.f32.partialorder %v11448_v53, %v7541_v25  ;;  %vm860_vm12 = vcmp.lt.f32.partialorder %v11448_v53, %v7541_v25  ;;  %11450 = vst [vmem:[#allocation11_spill] sm:$0xff] %v8113_v13 }
 0x33e   :  { %vm1164_vm7 = vmand %vm988_vm11, %vm11428_vm14  ;;  %11456 = vst [vmem:[#allocation144_spill] sm:$0xff] %v8136_v11 }
 0x33f   :  { %vm1292_vm0 = vmor %vm860_vm12, %vm1164_vm7  ;;  %vm11453_vm7 = vnez %v11256_v37 }
 0x340   :  { %vm1381_vm11 = vmor %vm949_vm5, %vm1253_vm6 }
 0x341   :  { %vm1469_vm14 = vmand %vm1292_vm0, %vm11431_vm2  ;;  %vm952_vm0 = vcmp.lt.f32.partialorder %v7994_v1, %v11457_v58 }
 0x342   :  { %vm1558_vm8 = vmand %vm1381_vm11, %vm11452_vm13  ;;  %v1597_v2 = vsel %vm1469_vm14, 1, %v11263_v63  ;;  %vm1080_vm14 = vcmp.eq.f32.partialorder %v7994_v1, %v11457_v58  ;;  %vm11461_vm11 = vnez %v11309_v50 }
 0x343   :  { %vm1255_vm12 = vmand %vm1079_vm15, %vm11453_vm7  ;;  %v8134_v13 = vpop.xlane.xlu0 %2004  ;;  %v1737_v58 = vshrl.u32 %v1597_v2, 16 }
 0x344   :  { %2760 = vadd.xlane.f32.xlu0 %v2758_v22  ;;  %v8119_v22 = vsel %vm1557_vm10, 1, %v11263_v63  ;;  %11455 = vst [vmem:[#allocation143_spill] sm:$0xff] %v8134_v13  ;;  %vm1383_vm5 = vmor %vm951_vm3, %vm1255_vm12  ;;  %vm991_vm10 = vcmp.eq.f32.partialorder %v11448_v53, %v11459_v18  ;;  %vm863_vm3 = vcmp.lt.f32.partialorder %v11448_v53, %v11459_v18  ;;  %v8157_v11 = vpop.permute.xlu1 %598 }
 0x345   :  { %11451 = vst [vmem:[#allocation141_spill] sm:$0xff] %v8119_v22  ;;  %v2792_v25 = vand.u32 65535, %v8119_v22  ;;  %v1736_v22 = vand.u32 65535, %v1597_v2  ;;  %vm1256_vm15 = vmand %vm1080_vm14, %vm11461_vm11  ;;  %v1739_v2 = vcvt.s32.f32 %v1737_v58 }
 0x346   :  { %vm1167_vm12 = vmand %vm991_vm10, %vm11390_vm9  ;;  %11463 = vst [vmem:[#allocation33_spill] sm:$0xff] %v8157_v11  ;;  %v1749_v11 = vshrl.u32 %v11469_v14, 16  ;;  %v8184_v14 = vperm.slane %v841_v20, 0 }
 0x347   :  { %v2794_v10 = vcvt.s32.f32 %v2792_v25  ;;  %v1738_v25 = vcvt.s32.f32 %v1736_v22  ;;  %vm8163_vm14 = vmor %vm863_vm3, %vm1167_vm12  ;;  %vm11471_vm12 = vnez %v11270_v51 }
 0x348   :  { %11472 = vst [vmem:[#allocation37_spill] sm:$0xff] %v8184_v14 }
 0x34c   :  { %2774 = vadd.xlane.f32.xlu0 %v2771_v7  ;;  %v8132_v7 = vsel %vm1558_vm8, 1, %v11263_v63  ;;  %vm11460_vm8 = vnez %v11259_v6 }
 0x34d   :  { %11454 = vst [vmem:[#allocation142_spill] sm:$0xff] %v8132_v7  ;;  %v2805_v23 = vshrl.u32 %v8132_v7, 16  ;;  %vm1560_vm6 = vmand %vm1383_vm5, %vm11460_vm8  ;;  %v605_v7 = vpop.permute.xlu2 %604 }
 0x34e   :  { %v8155_v13 = vsel %vm1560_vm6, 1, %v11263_v63  ;;  %vm8159_vm5 = vmor %vm952_vm0, %vm1256_vm15  ;;  %vm1082_vm10 = vcmp.eq.f32.partialorder %v7994_v1, %v605_v7  ;;  %vm11470_vm6 = vnez %v11314_v39  ;;  %vm954_vm3 = vcmp.lt.f32.partialorder %v7994_v1, %v605_v7  ;;  %v11476_v7 = vld [vmem:[#allocation40_spill] sm:$0xff] }
 0x34f   :  { %11462 = vst [vmem:[#allocation52_spill] sm:$0xff] %v8155_v13  ;;  %v2828_v30 = vand.u32 65535, %v8155_v13  ;;  %vm1561_vm0 = vmand %vm8159_vm5, %vm11470_vm6  ;;  %v1760_v18 = vand.u32 65535, %v11476_v7 }
 0x350   :  { %vm1472_vm15 = vmand %vm8163_vm14, %vm11396_vm1 }
 0x351   :  { %vm1258_vm9 = vmand %vm1082_vm10, %vm11471_vm12  ;;  %v2830_v41 = vcvt.s32.f32 %v2828_v30  ;;  %v1600_v58 = vsel %vm1472_vm15, 1, %v11263_v63  ;;  %vm11482_vm12 = vnez %v11293_v59 }
 0x352   :  { %vm8190_vm5 = vmor %vm954_vm3, %vm1258_vm9  ;;  %vm11480_vm9 = vnez %v11274_v24  ;;  %vm11481_vm3 = vnez %v11204_v32 }
 0x354   :  { %2796 = vadd.xlane.f32.xlu0 %v2794_v10  ;;  %v2807_v10 = vcvt.s32.f32 %v2805_v23  ;;  %v8167_v23 = vpop.xlane.xlu0 %2018 }
 0x355   :  { %11468 = vst [vmem:[#allocation34_spill] sm:$0xff] %v8167_v23  ;;  %v8196_v20 = vpop.permute.xlu2 %617  ;;  %v11478_v23 = vld [vmem:[#allocation44_spill] sm:$0xff] }
 0x356   :  { %11477 = vst [vmem:[#allocation40_spill] sm:$0xff] %v8196_v20  ;;  %vm994_vm10 = vcmp.eq.f32.partialorder %v11448_v53, %v11478_v23  ;;  %vm866_vm2 = vcmp.lt.f32.partialorder %v11448_v53, %v11478_v23 }
 0x357   :  { %vm1170_vm8 = vmand %vm994_vm10, %vm11482_vm12  ;;  %vm11493_vm12 = vnez %v11210_v38 }
 0x35c   :  { %2810 = vadd.xlane.f32.xlu0 %v2807_v10  ;;  %1740 = vadd.xlane.f32.xlu2 %v1738_v25  ;;  %v1751_v25 = vcvt.s32.f32 %v1749_v11  ;;  %v8187_v10 = vsel %vm1561_vm0, 1, %v11263_v63  ;;  %v1772_v11 = vand.u32 65535, %v1600_v58  ;;  %vm1563_vm0 = vmand %vm8190_vm5, %vm11480_vm9 }
 0x35d   :  { %1730 = vadd.xlane.f32.xlu1 %v1727_v31  ;;  %11473 = vst [vmem:[#allocation145_spill] sm:$0xff] %v8187_v10  ;;  %v612_v31 = vpop.permute.xlu1 %611  ;;  %v2841_v30 = vshrl.u32 %v8187_v10, 16  ;;  %v8229_v10 = vpop.permute.xlu2 %635 }
 0x35e   :  { %vm1083_vm14 = vcmp.eq.f32.partialorder %v8184_v14, %v612_v31  ;;  %vm955_vm15 = vcmp.lt.f32.partialorder %v8184_v14, %v612_v31  ;;  %v1774_v7 = vcvt.s32.f32 %v1772_v11  ;;  %v11489_v11 = vld [vmem:[#allocation41_spill] sm:$0xff] }
 0x35f   :  { %vm1259_vm1 = vmand %vm1083_vm14, %vm11481_vm3  ;;  %v1785_v20 = vshrl.u32 %v11489_v11, 16 }
 0x360   :  { %vm8217_vm5 = vmor %vm955_vm15, %vm1259_vm1  ;;  %vm11491_vm1 = vnez %v11206_v36 }
 0x361   :  { %vm8221_vm14 = vmor %vm866_vm2, %vm1170_vm8  ;;  %vm11492_vm2 = vnez %v11297_v0  ;;  %v1787_v11 = vcvt.s32.f32 %v1785_v20 }
 0x362   :  { %vm1475_vm8 = vmand %vm8221_vm14, %vm11492_vm2 }
 0x364   :  { %2832 = vadd.xlane.f32.xlu0 %v2830_v41  ;;  %1742 = vadd.xlane.f32.xlu2 %v1739_v2  ;;  %v8201_v2 = vpop.xlane.xlu0 %2040  ;;  %v2843_v41 = vcvt.s32.f32 %v2841_v30  ;;  %v11488_v30 = vld [vmem:[#allocation59_spill] sm:$0xff] }
 0x365   :  { %1754 = vadd.xlane.f32.xlu1 %v1751_v25  ;;  %11479 = vst [vmem:[#allocation44_spill] sm:$0xff] %v8201_v2  ;;  %v1762_v25 = vcvt.s32.f32 %v1760_v18  ;;  %v8215_v2 = vsel %vm1563_vm0, 1, %v11263_v63  ;;  %v1773_v18 = vshrl.u32 %v1600_v58, 16  ;;  %vm1085_vm10 = vcmp.eq.f32.partialorder %v8184_v14, %v11488_v30  ;;  %vm1564_vm0 = vmand %vm8217_vm5, %vm11491_vm1 }
 0x366   :  { %11483 = vst [vmem:[#allocation146_spill] sm:$0xff] %v8215_v2  ;;  %v2864_v23 = vand.u32 65535, %v8215_v2  ;;  %vm957_vm15 = vcmp.lt.f32.partialorder %v8184_v14, %v11488_v30  ;;  %vm1261_vm9 = vmand %vm1085_vm10, %vm11493_vm12  ;;  %v8246_v22 = vsel %vm1564_vm0, 1, %v11263_v63  ;;  %v11498_v30 = vld [vmem:[#allocation43_spill] sm:$0xff]  ;;  %vm11500_vm0 = vnez %v11214_v45 }
 0x367   :  { %11490 = vst [vmem:[#allocation59_spill] sm:$0xff] %v8229_v10  ;;  %v1603_v10 = vsel %vm1475_vm8, 1, %v11263_v63  ;;  %vm8249_vm5 = vmor %vm957_vm15, %vm1261_vm9  ;;  %v1796_v2 = vand.u32 65535, %v11498_v30  ;;  %v2877_v13 = vshrl.u32 %v8246_v22, 16  ;;  %vm11501_vm15 = vnez %v11216_v46 }
 0x368   :  { %11495 = vst [vmem:[#allocation147_spill] sm:$0xff] %v8246_v22  ;;  %v1808_v20 = vand.u32 65535, %v1603_v10  ;;  %vm1566_vm9 = vmand %vm8249_vm5, %vm11500_vm0 }
 0x36a   :  { %v1810_v30 = vcvt.s32.f32 %v1808_v20  ;;  %v11508_v20 = vld [vmem:[#allocation45_spill] sm:$0xff] }
 0x36b   :  { %v1821_v22 = vshrl.u32 %v11508_v20, 16 }
 0x36c   :  { %2846 = vadd.xlane.f32.xlu0 %v2843_v41  ;;  %1764 = vadd.xlane.f32.xlu2 %v1762_v25  ;;  %v630_v41 = vpop.permute.xlu1 %629  ;;  %v8243_v58 = vpop.xlane.xlu0 %2054  ;;  %v2866_v25 = vcvt.s32.f32 %v2864_v23 }
 0x36d   :  { %1776 = vadd.xlane.f32.xlu1 %v1774_v7  ;;  %11494 = vst [vmem:[#allocation41_spill] sm:$0xff] %v8243_v58  ;;  %v1775_v7 = vcvt.s32.f32 %v1773_v18  ;;  %vm1086_vm14 = vcmp.eq.f32.partialorder %v8184_v14, %v630_v41  ;;  %v648_v23 = vpop.permute.xlu2 %647  ;;  %v11499_v18 = vld [vmem:[#allocation46_spill] sm:$0xff]  ;;  %vm958_vm8 = vcmp.lt.f32.partialorder %v8184_v14, %v630_v41  ;;  %v8270_v58 = vsel %vm1566_vm9, 1, %v11263_v63 }
 0x36e   :  { %vm997_vm10 = vcmp.eq.f32.partialorder %v11448_v53, %v11499_v18  ;;  %vm1262_vm2 = vmand %vm1086_vm14, %vm11501_vm15  ;;  %vm869_vm12 = vcmp.lt.f32.partialorder %v11448_v53, %v11499_v18  ;;  %11502 = vst [vmem:[#allocation43_spill] sm:$0xff] %v8270_v58  ;;  %v1809_v18 = vshrl.u32 %v1603_v10, 16  ;;  %vm11509_vm9 = vnez %v11221_v52 }
 0x36f   :  { %vm1173_vm7 = vmand %vm997_vm10, %vm11406_vm4 }
 0x370   :  { %vm8274_vm5 = vmor %vm958_vm8, %vm1262_vm2  ;;  %vm11510_vm8 = vnez %v11224_v54 }
 0x371   :  { %vm8278_vm14 = vmor %vm869_vm12, %vm1173_vm7 }
 0x372   :  { %vm1567_vm2 = vmand %vm8274_vm5, %vm11509_vm9 }
 0x373   :  { %vm1478_vm7 = vmand %vm8278_vm14, %vm11452_vm13  ;;  %v8299_v20 = vsel %vm1567_vm2, 1, %v11263_v63  ;;  %vm1089_vm14 = vcmp.eq.f32.partialorder %v8184_v14, %v648_v23 }
 0x374   :  { %2868 = vadd.xlane.f32.xlu0 %v2866_v25  ;;  %1778 = vadd.xlane.f32.xlu2 %v1775_v7  ;;  %v642_v25 = vpop.permute.xlu1 %641  ;;  %v2879_v7 = vcvt.s32.f32 %v2877_v13  ;;  %v8272_v31 = vpop.xlane.xlu0 %2076  ;;  %11511 = vst [vmem:[#allocation45_spill] sm:$0xff] %v8299_v20  ;;  %v1606_v41 = vsel %vm1478_vm7, 1, %v11263_v63  ;;  %v11514_v13 = vld [vmem:[#allocation47_spill] sm:$0xff]  ;;  %vm961_vm7 = vcmp.lt.f32.partialorder %v8184_v14, %v648_v23 }
 0x375   :  { %1790 = vadd.xlane.f32.xlu1 %v1787_v11  ;;  %v1798_v11 = vcvt.s32.f32 %v1796_v2  ;;  %11503 = vst [vmem:[#allocation46_spill] sm:$0xff] %v8272_v31  ;;  %v2900_v2 = vand.u32 65535, %v8270_v58  ;;  %vm1088_vm10 = vcmp.eq.f32.partialorder %v8184_v14, %v642_v25  ;;  %v8285_v1 = vpop.permute.xlu2 %665  ;;  %vm960_vm12 = vcmp.lt.f32.partialorder %v8184_v14, %v642_v25  ;;  %v11533_v23 = vld [vmem:[#allocation51_spill] sm:$0xff] }
 0x376   :  { %vm1264_vm4 = vmand %vm1088_vm10, %vm11510_vm8  ;;  %v1832_v25 = vand.u32 65535, %v11514_v13 }
 0x377   :  { %v2902_v10 = vcvt.s32.f32 %v2900_v2  ;;  %vm8302_vm5 = vmor %vm960_vm12, %vm1264_vm4  ;;  %v2913_v2 = vshrl.u32 %v8299_v20, 16  ;;  %vm11517_vm4 = vnez %v11228_v60  ;;  %vm11519_vm12 = vnez %v11230_v61 }
 0x378   :  { %vm1569_vm2 = vmand %vm8302_vm5, %vm11517_vm4  ;;  %v1834_v13 = vcvt.s32.f32 %v1832_v25 }
 0x379   :  { %vm1265_vm13 = vmand %vm1089_vm14, %vm11519_vm12  ;;  %v8329_v20 = vsel %vm1569_vm2, 1, %v11263_v63 }
 0x37a   :  { %11520 = vst [vmem:[#allocation148_spill] sm:$0xff] %v8329_v20  ;;  %vm8331_vm5 = vmor %vm961_vm7, %vm1265_vm13  ;;  %v2936_v25 = vand.u32 65535, %v8329_v20  ;;  %vm11527_vm13 = vnez %v11235_v35  ;;  %vm11529_vm7 = vnez %v11238_v44 }
 0x37b   :  { %vm1570_vm2 = vmand %vm8331_vm5, %vm11527_vm13 }
 0x37c   :  { %2882 = vadd.xlane.f32.xlu0 %v2879_v7  ;;  %1800 = vadd.xlane.f32.xlu2 %v1798_v11  ;;  %v660_v7 = vpop.permute.xlu1 %659  ;;  %v1811_v11 = vcvt.s32.f32 %v1809_v18  ;;  %v8307_v58 = vpop.xlane.xlu0 %2090  ;;  %v1844_v18 = vand.u32 65535, %v1606_v41 }
 0x37d   :  { %1812 = vadd.xlane.f32.xlu1 %v1810_v30  ;;  %v1823_v30 = vcvt.s32.f32 %v1821_v22  ;;  %11515 = vst [vmem:[#allocation47_spill] sm:$0xff] %v8307_v58  ;;  %v8311_v22 = vpop.permute.xlu2 %677 }
 0x37e   :  { %v1846_v58 = vcvt.s32.f32 %v1844_v18 }
 0x384   :  { %2904 = vadd.xlane.f32.xlu0 %v2902_v10  ;;  %1814 = vadd.xlane.f32.xlu2 %v1811_v11  ;;  %v11516_v10 = vld [vmem:[#allocation50_spill] sm:$0xff]  ;;  %v8319_v11 = vpop.permute.xlu1 %671 }
 0x385   :  { %1826 = vadd.xlane.f32.xlu1 %v1823_v30  ;;  %vm1000_vm10 = vcmp.eq.f32.partialorder %v11448_v53, %v11516_v10  ;;  %11518 = vst [vmem:[#allocation50_spill] sm:$0xff] %v8319_v11  ;;  %v2915_v30 = vcvt.s32.f32 %v2913_v2  ;;  %vm872_vm8 = vcmp.lt.f32.partialorder %v11448_v53, %v11516_v10  ;;  %v1845_v2 = vshrl.u32 %v1606_v41, 16  ;;  %v11525_v10 = vld [vmem:[#allocation49_spill] sm:$0xff]  ;;  %v8342_v18 = vpop.permute.xlu2 %695 }
 0x386   :  { %vm1176_vm0 = vmand %vm1000_vm10, %vm11461_vm11  ;;  %v1857_v11 = vshrl.u32 %v11525_v10, 16  ;;  %vm1091_vm10 = vcmp.eq.f32.partialorder %v8184_v14, %v660_v7  ;;  %v2938_v41 = vcvt.s32.f32 %v2936_v25 }
 0x387   :  { %vm8335_vm14 = vmor %vm872_vm8, %vm1176_vm0  ;;  %vm963_vm8 = vcmp.lt.f32.partialorder %v8184_v14, %v660_v7  ;;  %v1868_v7 = vand.u32 65535, %v11533_v23 }
 0x388   :  { %vm1481_vm0 = vmand %vm8335_vm14, %vm11470_vm6  ;;  %v1859_v10 = vcvt.s32.f32 %v1857_v11  ;;  %vm1092_vm14 = vcmp.eq.f32.partialorder %v8184_v14, %v8285_v1 }
 0x389   :  { %vm1267_vm11 = vmand %vm1091_vm10, %vm11529_vm7  ;;  %v1609_v31 = vsel %vm1481_vm0, 1, %v11263_v63  ;;  %vm964_vm0 = vcmp.lt.f32.partialorder %v8184_v14, %v8285_v1  ;;  %v1870_v23 = vcvt.s32.f32 %v1868_v7 }
 0x38a   :  { %vm8363_vm5 = vmor %vm963_vm8, %vm1267_vm11  ;;  %v1880_v25 = vand.u32 65535, %v1609_v31  ;;  %vm11538_vm8 = vnez %v11244_v62  ;;  %v1881_v7 = vshrl.u32 %v1609_v31, 16 }
 0x38b   :  { %vm1268_vm6 = vmand %vm1092_vm14, %vm11538_vm8 }
 0x38c   :  { %2918 = vadd.xlane.f32.xlu0 %v2915_v30  ;;  %1836 = vadd.xlane.f32.xlu2 %v1834_v13  ;;  %v8344_v30 = vpop.xlane.xlu0 %2112  ;;  %v1847_v13 = vcvt.s32.f32 %v1845_v2  ;;  %v11535_v2 = vld [vmem:[#allocation54_spill] sm:$0xff] }
 0x38d   :  { %1848 = vadd.xlane.f32.xlu1 %v1846_v58  ;;  %11526 = vst [vmem:[#allocation49_spill] sm:$0xff] %v8344_v30  ;;  %v8350_v58 = vpop.permute.xlu1 %689  ;;  %v8360_v30 = vsel %vm1570_vm2, 1, %v11263_v63  ;;  %v8371_v11 = vpop.permute.xlu2 %708  ;;  %vm1003_vm10 = vcmp.eq.f32.partialorder %v7324_v33, %v11535_v2  ;;  %vm11536_vm2 = vnez %v11242_v57  ;;  %vm875_vm7 = vcmp.lt.f32.partialorder %v7324_v33, %v11535_v2  ;;  %v11544_v2 = vld [vmem:[#allocation53_spill] sm:$0xff] }
 0x38e   :  { %11528 = vst [vmem:[#allocation149_spill] sm:$0xff] %v8350_v58  ;;  %v2949_v20 = vshrl.u32 %v8360_v30, 16  ;;  %vm1572_vm11 = vmand %vm8363_vm5, %vm11536_vm2  ;;  %v1882_v58 = vcvt.s32.f32 %v1880_v25 }
 0x38f   :  { %11530 = vst [vmem:[#allocation150_spill] sm:$0xff] %v8360_v30  ;;  %vm1179_vm4 = vmand %vm1003_vm10, %vm11481_vm3  ;;  %v1893_v30 = vshrl.u32 %v11544_v2, 16  ;;  %vm1094_vm10 = vcmp.eq.f32.partialorder %v8184_v14, %v8311_v22 }
 0x390   :  { %11534 = vst [vmem:[#allocation51_spill] sm:$0xff] %v8371_v11  ;;  %v8392_v11 = vsel %vm1572_vm11, 1, %v11263_v63  ;;  %vm8394_vm5 = vmor %vm964_vm0, %vm1268_vm6  ;;  %vm11546_vm6 = vnez %v11248_v49  ;;  %vm11547_vm0 = vnez %v11250_v55 }
 0x391   :  { %11539 = vst [vmem:[#allocation151_spill] sm:$0xff] %v8392_v11  ;;  %vm8398_vm14 = vmor %vm875_vm7, %vm1179_vm4  ;;  %vm966_vm7 = vcmp.lt.f32.partialorder %v8184_v14, %v8311_v22  ;;  %v11552_v22 = vld [vmem:[#allocation55_spill] sm:$0xff] }
 0x392   :  { %vm1573_vm11 = vmand %vm8394_vm5, %vm11546_vm6 }
 0x393   :  { %vm1484_vm4 = vmand %vm8398_vm14, %vm11491_vm1  ;;  %v8423_v2 = vsel %vm1573_vm11, 1, %v11263_v63  ;;  %vm11555_vm11 = vnez %v11253_v48 }
 0x394   :  { %2940 = vadd.xlane.f32.xlu0 %v2938_v41  ;;  %1850 = vadd.xlane.f32.xlu2 %v1847_v13  ;;  %v8381_v13 = vpop.xlane.xlu0 %2126  ;;  %vm1270_vm3 = vmand %vm1094_vm10, %vm11547_vm0  ;;  %11548 = vst [vmem:[#allocation152_spill] sm:$0xff] %v8423_v2 }
 0x395   :  { %1862 = vadd.xlane.f32.xlu1 %v1859_v10  ;;  %v8379_v41 = vpop.permute.xlu1 %701  ;;  %11537 = vst [vmem:[#allocation54_spill] sm:$0xff] %v8381_v13  ;;  %v2951_v10 = vcvt.s32.f32 %v2949_v20  ;;  %v2972_v20 = vand.u32 65535, %v8392_v11  ;;  %v8406_v25 = vpop.permute.xlu2 %726  ;;  %vm8428_vm5 = vmor %vm966_vm7, %vm1270_vm3  ;;  %v1904_v11 = vand.u32 65535, %v11552_v22  ;;  %vm11556_vm7 = vnez %v11256_v37 }
 0x396   :  { %11545 = vst [vmem:[#allocation53_spill] sm:$0xff] %v8406_v25  ;;  %v1612_v25 = vsel %vm1484_vm4, 1, %v11263_v63  ;;  %vm1575_vm3 = vmand %vm8428_vm5, %vm11555_vm11 }
 0x397   :  { %v2974_v31 = vcvt.s32.f32 %v2972_v20  ;;  %v2985_v20 = vshrl.u32 %v8423_v2, 16  ;;  %v1916_v28 = vand.u32 65535, %v1612_v25  ;;  %v8455_v1 = vsel %vm1575_vm3, 1, %v11263_v63 }
 0x398   :  { %11557 = vst [vmem:[#allocation55_spill] sm:$0xff] %v8455_v1  ;;  %vm969_vm3 = vcmp.lt.f32.partialorder %v8184_v14, %v8342_v18 }
 0x399   :  { %v1918_v22 = vcvt.s32.f32 %v1916_v28  ;;  %v11563_v28 = vld [vmem:[#allocation57_spill] sm:$0xff] }
 0x39a   :  { %v1929_v46 = vshrl.u32 %v11563_v28, 16 }
 0x39c   :  { %2954 = vadd.xlane.f32.xlu0 %v2951_v10  ;;  %1872 = vadd.xlane.f32.xlu2 %v1870_v23  ;;  %v1883_v23 = vcvt.s32.f32 %v1881_v7  ;;  %v8425_v13 = vpop.xlane.xlu0 %2148  ;;  %v11553_v7 = vld [vmem:[#allocation69_spill] sm:$0xff]  ;;  %v1931_v28 = vcvt.s32.f32 %v1929_v46 }
 0x39d   :  { %1884 = vadd.xlane.f32.xlu1 %v1882_v58  ;;  %v8412_v10 = vpop.permute.xlu1 %720  ;;  %v1895_v58 = vcvt.s32.f32 %v1893_v30  ;;  %11549 = vst [vmem:[#allocation153_spill] sm:$0xff] %v8425_v13  ;;  %vm1095_vm14 = vcmp.eq.f32.partialorder %v8184_v14, %v11553_v7  ;;  %v8436_v30 = vpop.permute.xlu2 %738  ;;  %v11554_v13 = vld [vmem:[#allocation56_spill] sm:$0xff]  ;;  %vm967_vm4 = vcmp.lt.f32.partialorder %v8184_v14, %v11553_v7  ;;  %v1917_v7 = vshrl.u32 %v1612_v25, 16 }
 0x39e   :  { %vm1006_vm10 = vcmp.eq.f32.partialorder %v7324_v33, %v11554_v13  ;;  %vm1271_vm1 = vmand %vm1095_vm14, %vm11556_vm7  ;;  %vm878_vm0 = vcmp.lt.f32.partialorder %v7324_v33, %v11554_v13  ;;  %v3008_v13 = vand.u32 65535, %v8455_v1 }
 0x39f   :  { %vm1182_vm2 = vmand %vm1006_vm10, %vm11501_vm15  ;;  %vm1097_vm10 = vcmp.eq.f32.partialorder %v8184_v14, %v8342_v18 }
 0x3a0   :  { %vm8457_vm5 = vmor %vm967_vm4, %vm1271_vm1  ;;  %vm11564_vm1 = vnez %v11259_v6  ;;  %vm11565_vm4 = vnez %v11261_v43  ;;  %v3010_v25 = vcvt.s32.f32 %v3008_v13 }
 0x3a1   :  { %vm8461_vm14 = vmor %vm878_vm0, %vm1182_vm2 }
 0x3a2   :  { %vm1576_vm2 = vmand %vm8457_vm5, %vm11564_vm1 }
 0x3a3   :  { %vm1487_vm0 = vmand %vm8461_vm14, %vm11509_vm9  ;;  %vm1098_vm14 = vcmp.eq.f32.partialorder %v8184_v14, %v8379_v41 }
 0x3a4   :  { %2976 = vadd.xlane.f32.xlu0 %v2974_v31  ;;  %1886 = vadd.xlane.f32.xlu2 %v1883_v23  ;;  %v2987_v23 = vcvt.s32.f32 %v2985_v20  ;;  %vm1273_vm15 = vmand %vm1097_vm10, %vm11565_vm4  ;;  %v1615_v2 = vsel %vm1487_vm0, 1, %v11263_v63  ;;  %v11569_v20 = vld [vmem:[#allocation58_spill] sm:$0xff]  ;;  %vm970_vm0 = vcmp.lt.f32.partialorder %v8184_v14, %v8379_v41 }
 0x3a5   :  { %1898 = vadd.xlane.f32.xlu1 %v1895_v58  ;;  %v8444_v31 = vpop.permute.xlu1 %732  ;;  %v1906_v58 = vcvt.s32.f32 %v1904_v11  ;;  %v8465_v11 = vpop.xlane.xlu0 %2162  ;;  %vm8491_vm5 = vmor %vm969_vm3, %vm1273_vm15  ;;  %v1940_v18 = vand.u32 65535, %v11569_v20  ;;  %v1952_v13 = vand.u32 65535, %v1615_v2  ;;  %vm11572_vm15 = vnez %v11268_v29 }
 0x3a6   :  { %11562 = vst [vmem:[#allocation69_spill] sm:$0xff] %v8465_v11  ;;  %v8488_v11 = vsel %vm1576_vm2, 1, %v11263_v63  ;;  %vm1578_vm2 = vmand %vm8491_vm5, %vm11572_vm15  ;;  %vm11574_vm3 = vnez %v11270_v51 }
 0x3a7   :  { %11566 = vst [vmem:[#allocation56_spill] sm:$0xff] %v8488_v11  ;;  %v3021_v52 = vshrl.u32 %v8488_v11, 16  ;;  %vm1274_vm9 = vmand %vm1098_vm14, %vm11574_vm3  ;;  %v1942_v36 = vcvt.s32.f32 %v1940_v18  ;;  %v1954_v1 = vcvt.s32.f32 %v1952_v13  ;;  %v11580_v13 = vld [vmem:[#allocation77_spill] sm:$0xff] }
 0x3a8   :  { %vm8524_vm5 = vmor %vm970_vm0, %vm1274_vm9  ;;  %vm11582_vm9 = vnez %v11274_v24  ;;  %vm11584_vm0 = vnez %v11276_v19 }
 0x3a9   :  { %v3023_v11 = vcvt.s32.f32 %v3021_v52 }
 0x3ac   :  { %2990 = vadd.xlane.f32.xlu0 %v2987_v23  ;;  %1908 = vadd.xlane.f32.xlu2 %v1906_v58  ;;  %v8471_v23 = vpop.permute.xlu2 %756 }
 0x3ad   :  { %1920 = vadd.xlane.f32.xlu1 %v1918_v22  ;;  %v8477_v58 = vpop.permute.xlu1 %750  ;;  %v1919_v22 = vcvt.s32.f32 %v1917_v7  ;;  %v11570_v7 = vld [vmem:[#allocation61_spill] sm:$0xff] }
 0x3ae   :  { %vm1009_vm10 = vcmp.eq.f32.partialorder %v7324_v33, %v11570_v7  ;;  %vm881_vm4 = vcmp.lt.f32.partialorder %v7324_v33, %v11570_v7  ;;  %v1953_v7 = vshrl.u32 %v1615_v2, 16 }
 0x3af   :  { %vm1185_vm11 = vmand %vm1009_vm10, %vm11519_vm12 }
 0x3b0   :  { %vm8528_vm14 = vmor %vm881_vm4, %vm1185_vm11 }
 0x3b1   :  { %vm1490_vm11 = vmand %vm8528_vm14, %vm11527_vm13 }
 0x3b4   :  { %3012 = vadd.xlane.f32.xlu0 %v3010_v25  ;;  %1922 = vadd.xlane.f32.xlu2 %v1919_v22  ;;  %v8499_v46 = vpop.permute.xlu2 %768  ;;  %v8503_v25 = vpop.xlane.xlu0 %2184 }
 0x3b5   :  { %1934 = vadd.xlane.f32.xlu1 %v1931_v28  ;;  %11571 = vst [vmem:[#allocation57_spill] sm:$0xff] %v8503_v25  ;;  %v8509_v22 = vpop.permute.xlu1 %762  ;;  %v6764_v28 = vld [vmem:[#allocation2] sm:$0xff]  ;;  %v8520_v25 = vsel %vm1578_vm2, 1, %v11263_v63  ;;  %vm1579_vm2 = vmand %vm8524_vm5, %vm11582_vm9 }
 0x3b6   :  { %11573 = vst [vmem:[#allocation58_spill] sm:$0xff] %v8509_v22  ;;  %v842_v20 = vrot.slane %v6764_v28, 7  ;;  %v3044_v18 = vand.u32 65535, %v8520_v25  ;;  %v11581_v22 = vld [vmem:[#allocation60_spill] sm:$0xff]  ;;  %v8555_v41 = vsel %vm1579_vm2, 1, %v11263_v63  ;;  %vm11591_vm2 = vnez %v11280_v42 }
 0x3b7   :  { %11575 = vst [vmem:[#allocation61_spill] sm:$0xff] %v8520_v25  ;;  %v3057_v35 = vshrl.u32 %v8555_v41, 16 }
 0x3b8   :  { %v8522_v28 = vperm.slane %v842_v20, 0 }
 0x3ba   :  { %vm1100_vm10 = vcmp.eq.f32.partialorder %v8522_v28, %v11580_v13  ;;  %vm972_vm4 = vcmp.lt.f32.partialorder %v8522_v28, %v11580_v13  ;;  %v11588_v13 = vld [vmem:[#allocation62_spill] sm:$0xff]  ;;  %vm1101_vm14 = vcmp.eq.f32.partialorder %v8522_v28, %v8412_v10 }
 0x3bb   :  { %vm1276_vm12 = vmand %vm1100_vm10, %vm11584_vm0  ;;  %v1976_v14 = vand.u32 65535, %v11588_v13 }
 0x3bc   :  { %3026 = vadd.xlane.f32.xlu0 %v3023_v11  ;;  %1944 = vadd.xlane.f32.xlu2 %v1942_v36  ;;  %v1965_v11 = vshrl.u32 %v11581_v22, 16  ;;  %v8536_v36 = vpop.permute.xlu2 %786  ;;  %v8552_v2 = vpop.xlane.xlu0 %2198  ;;  %v3046_v22 = vcvt.s32.f32 %v3044_v18  ;;  %vm8558_vm5 = vmor %vm972_vm4, %vm1276_vm12  ;;  %vm11592_vm4 = vnez %v11210_v38 }
 0x3bd   :  { %1956 = vadd.xlane.f32.xlu1 %v1954_v1  ;;  %v8542_v20 = vpop.permute.xlu1 %780  ;;  %11585 = vst [vmem:[#allocation60_spill] sm:$0xff] %v8552_v2  ;;  %v1955_v1 = vcvt.s32.f32 %v1953_v7  ;;  %vm1581_vm12 = vmand %vm8558_vm5, %vm11591_vm2 }
 0x3be   :  { %11583 = vst [vmem:[#allocation77_spill] sm:$0xff] %v8542_v20  ;;  %v1967_v25 = vcvt.s32.f32 %v1965_v11  ;;  %v1618_v20 = vsel %vm1490_vm11, 1, %v11263_v63  ;;  %v11590_v11 = vld [vmem:[#allocation64_spill] sm:$0xff]  ;;  %vm973_vm11 = vcmp.lt.f32.partialorder %v8522_v28, %v8412_v10  ;;  %vm1277_vm13 = vmand %vm1101_vm14, %vm11592_vm4  ;;  %v8585_v52 = vsel %vm1581_vm12, 1, %v11263_v63 }
 0x3bf   :  { %v1988_v7 = vand.u32 65535, %v1618_v20  ;;  %vm1012_vm10 = vcmp.eq.f32.partialorder %v7324_v33, %v11590_v11  ;;  %vm884_vm0 = vcmp.lt.f32.partialorder %v7324_v33, %v11590_v11  ;;  %vm8589_vm5 = vmor %vm973_vm11, %vm1277_vm13  ;;  %v1989_v11 = vshrl.u32 %v1618_v20, 16 }
 0x3c0   :  { %vm1188_vm15 = vmand %vm1012_vm10, %vm11538_vm8  ;;  %vm1103_vm10 = vcmp.eq.f32.partialorder %v8522_v28, %v8444_v31  ;;  %vm11600_vm13 = vnez %v11214_v45  ;;  %vm11602_vm11 = vnez %v11284_v40 }
 0x3c1   :  { %v1990_v13 = vcvt.s32.f32 %v1988_v7  ;;  %vm8593_vm14 = vmor %vm884_vm0, %vm1188_vm15  ;;  %v11598_v7 = vld [vmem:[#allocation63_spill] sm:$0xff]  ;;  %vm975_vm0 = vcmp.lt.f32.partialorder %v8522_v28, %v8444_v31 }
 0x3c2   :  { %vm1582_vm12 = vmand %vm8589_vm5, %vm11600_vm13 }
 0x3c3   :  { %vm1493_vm15 = vmand %vm8593_vm14, %vm11546_vm6  ;;  %vm1104_vm14 = vcmp.eq.f32.partialorder %v8522_v28, %v8436_v30 }
 0x3c4   :  { %3048 = vadd.xlane.f32.xlu0 %v3046_v22  ;;  %1958 = vadd.xlane.f32.xlu2 %v1955_v1  ;;  %v8566_v18 = vpop.permute.xlu2 %798  ;;  %v1978_v1 = vcvt.s32.f32 %v1976_v14  ;;  %v8587_v2 = vpop.xlane.xlu0 %2220  ;;  %v3080_v14 = vand.u32 65535, %v8585_v52  ;;  %vm1279_vm8 = vmand %vm1103_vm10, %vm11602_vm11  ;;  %v1621_v10 = vsel %vm1493_vm15, 1, %v11263_v63  ;;  %vm976_vm15 = vcmp.lt.f32.partialorder %v8522_v28, %v8436_v30  ;;  %v11624_v30 = vld [vmem:[#allocation70_spill] sm:$0xff] }
 0x3c5   :  { %1970 = vadd.xlane.f32.xlu1 %v1967_v25  ;;  %11589 = vst [vmem:[#allocation62_spill] sm:$0xff] %v8566_v18  ;;  %v8574_v22 = vpop.permute.xlu1 %792  ;;  %v3059_v25 = vcvt.s32.f32 %v3057_v35  ;;  %v2001_v18 = vshrl.u32 %v11598_v7, 16  ;;  %v8618_v7 = vsel %vm1582_vm12, 1, %v11263_v63  ;;  %vm8621_vm5 = vmor %vm975_vm0, %vm1279_vm8  ;;  %v11605_v35 = vld [vmem:[#allocation66_spill] sm:$0xff]  ;;  %vm11609_vm8 = vnez %v11288_v26 }
 0x3c6   :  { %11593 = vst [vmem:[#allocation64_spill] sm:$0xff] %v8587_v2  ;;  %v3082_v20 = vcvt.s32.f32 %v3080_v14  ;;  %v2012_v31 = vand.u32 65535, %v11605_v35  ;;  %v3093_v14 = vshrl.u32 %v8618_v7, 16  ;;  %vm1584_vm12 = vmand %vm8621_vm5, %vm11609_vm8  ;;  %vm11611_vm0 = vnez %v11224_v54 }
 0x3c7   :  { %vm1280_vm6 = vmand %vm1104_vm14, %vm11611_vm0 }
 0x3c8   :  { %v2014_v35 = vcvt.s32.f32 %v2012_v31  ;;  %vm8652_vm5 = vmor %vm976_vm15, %vm1280_vm6  ;;  %vm11619_vm6 = vnez %v11228_v60  ;;  %vm11621_vm15 = vnez %v11293_v59 }
 0x3cc   :  { %3062 = vadd.xlane.f32.xlu0 %v3059_v25  ;;  %1980 = vadd.xlane.f32.xlu2 %v1978_v1  ;;  %v1991_v1 = vcvt.s32.f32 %v1989_v11  ;;  %v2024_v11 = vand.u32 65535, %v1621_v10 }
 0x3cd   :  { %1992 = vadd.xlane.f32.xlu1 %v1990_v13  ;;  %v2003_v13 = vcvt.s32.f32 %v2001_v18 }
 0x3cf   :  { %v8601_v2 = vpop.xlane.xlu2 %1740 }
 0x3d0   :  { %11599 = vst [vmem:[#allocation63_spill] sm:$0xff] %v8601_v2  ;;  %v8607_v25 = vpop.xlane.xlu1 %1730  ;;  %v8650_v2 = vsel %vm1584_vm12, 1, %v11263_v63  ;;  %vm978_vm12 = vcmp.lt.f32.partialorder %v8522_v28, %v8477_v58 }
 0x3d1   :  { %11601 = vst [vmem:[#allocation154_spill] sm:$0xff] %v8607_v25  ;;  %v8626_v25 = vpop.xlane.xlu0 %2234  ;;  %v3116_v31 = vand.u32 65535, %v8650_v2 }
 0x3d2   :  { %11606 = vst [vmem:[#allocation66_spill] sm:$0xff] %v8626_v25 }
 0x3d4   :  { %3084 = vadd.xlane.f32.xlu0 %v3082_v20  ;;  %1994 = vadd.xlane.f32.xlu2 %v1991_v1  ;;  %v11608_v20 = vld [vmem:[#allocation67_spill] sm:$0xff] }
 0x3d5   :  { %2006 = vadd.xlane.f32.xlu1 %v2003_v13  ;;  %vm1015_vm10 = vcmp.eq.f32.partialorder %v7324_v33, %v11608_v20  ;;  %v3095_v13 = vcvt.s32.f32 %v3093_v14  ;;  %vm887_vm11 = vcmp.lt.f32.partialorder %v7324_v33, %v11608_v20  ;;  %v2025_v14 = vshrl.u32 %v1621_v10, 16  ;;  %v11616_v20 = vld [vmem:[#allocation68_spill] sm:$0xff] }
 0x3d6   :  { %vm1191_vm2 = vmand %vm1015_vm10, %vm11556_vm7  ;;  %v2037_v25 = vshrl.u32 %v11616_v20, 16  ;;  %vm1106_vm10 = vcmp.eq.f32.partialorder %v8522_v28, %v8477_v58  ;;  %v3118_v10 = vcvt.s32.f32 %v3116_v31  ;;  %v2048_v58 = vand.u32 65535, %v11624_v30 }
 0x3d7   :  { %v8631_v18 = vpop.xlane.xlu2 %1742  ;;  %vm8656_vm14 = vmor %vm887_vm11, %vm1191_vm2 }
 0x3d8   :  { %11607 = vst [vmem:[#allocation155_spill] sm:$0xff] %v8631_v18  ;;  %v8639_v1 = vpop.xlane.xlu1 %1754  ;;  %v2026_v18 = vcvt.s32.f32 %v2024_v11  ;;  %vm1585_vm2 = vmand %vm8652_vm5, %vm11619_vm6  ;;  %v2039_v20 = vcvt.s32.f32 %v2037_v25  ;;  %v2050_v30 = vcvt.s32.f32 %v2048_v58  ;;  %v11635_v58 = vld [vmem:[#allocation71_spill] sm:$0xff] }
 0x3d9   :  { %11610 = vst [vmem:[#allocation67_spill] sm:$0xff] %v8639_v1  ;;  %vm1496_vm11 = vmand %vm8656_vm14, %vm11564_vm1  ;;  %vm1107_vm14 = vcmp.eq.f32.partialorder %v8522_v28, %v8471_v23 }
 0x3da   :  { %vm1282_vm7 = vmand %vm1106_vm10, %vm11621_vm15  ;;  %v1624_v1 = vsel %vm1496_vm11, 1, %v11263_v63  ;;  %vm979_vm11 = vcmp.lt.f32.partialorder %v8522_v28, %v8471_v23 }
 0x3db   :  { %vm8686_vm5 = vmor %vm978_vm12, %vm1282_vm7  ;;  %v2060_v31 = vand.u32 65535, %v1624_v1  ;;  %vm11630_vm12 = vnez %v11238_v44 }
 0x3dc   :  { %3098 = vadd.xlane.f32.xlu0 %v3095_v13  ;;  %2016 = vadd.xlane.f32.xlu2 %v2014_v35  ;;  %v8666_v13 = vpop.xlane.xlu0 %2256  ;;  %v2027_v35 = vcvt.s32.f32 %v2025_v14  ;;  %v11626_v14 = vld [vmem:[#allocation72_spill] sm:$0xff]  ;;  %vm1283_vm1 = vmand %vm1107_vm14, %vm11630_vm12 }
 0x3dd   :  { %2028 = vadd.xlane.f32.xlu1 %v2026_v18  ;;  %11618 = vst [vmem:[#allocation156_spill] sm:$0xff] %v8666_v13  ;;  %v8683_v13 = vsel %vm1585_vm2, 1, %v11263_v63  ;;  %vm1018_vm10 = vcmp.eq.f32.partialorder %v7324_v33, %v11626_v14  ;;  %vm11627_vm2 = vnez %v11297_v0  ;;  %vm890_vm15 = vcmp.lt.f32.partialorder %v7324_v33, %v11626_v14 }
 0x3de   :  { %vm1587_vm7 = vmand %vm8686_vm5, %vm11627_vm2  ;;  %v2073_v14 = vshrl.u32 %v11635_v58, 16 }
 0x3df   :  { %v8664_v11 = vpop.xlane.xlu2 %1764  ;;  %vm1194_vm8 = vmand %vm1018_vm10, %vm11574_vm3  ;;  %vm1109_vm10 = vcmp.eq.f32.partialorder %v8522_v28, %v8499_v46 }
 0x3e0   :  { %11617 = vst [vmem:[#allocation68_spill] sm:$0xff] %v8664_v11  ;;  %v8672_v18 = vpop.xlane.xlu1 %1776  ;;  %v2062_v11 = vcvt.s32.f32 %v2060_v31  ;;  %vm8717_vm5 = vmor %vm979_vm11, %vm1283_vm1  ;;  %vm11637_vm1 = vnez %v11242_v57  ;;  %vm11639_vm11 = vnez %v11302_v56 }
 0x3e1   :  { %11620 = vst [vmem:[#allocation157_spill] sm:$0xff] %v8672_v18  ;;  %v3129_v18 = vshrl.u32 %v8683_v13, 16  ;;  %vm8721_vm14 = vmor %vm890_vm15, %vm1194_vm8  ;;  %vm981_vm15 = vcmp.lt.f32.partialorder %v8522_v28, %v8499_v46 }
 0x3e2   :  { %vm1499_vm8 = vmand %vm8721_vm14, %vm11582_vm9 }
 0x3e3   :  { %vm1285_vm3 = vmand %vm1109_vm10, %vm11639_vm11  ;;  %v1627_v23 = vsel %vm1499_vm8, 1, %v11263_v63  ;;  %vm11647_vm8 = vnez %v11306_v5 }
 0x3e4   :  { %3120 = vadd.xlane.f32.xlu0 %v3118_v10  ;;  %2030 = vadd.xlane.f32.xlu2 %v2027_v35  ;;  %v8704_v35 = vpop.xlane.xlu0 %2270  ;;  %vm8753_vm14 = vmor %vm981_vm15, %vm1285_vm3  ;;  %vm982_vm3 = vcmp.lt.f32.partialorder %v8522_v28, %v7811_v16 }
 0x3e5   :  { %2042 = vadd.xlane.f32.xlu1 %v2039_v20  ;;  %11629 = vst [vmem:[#allocation158_spill] sm:$0xff] %v8704_v35  ;;  %v3131_v20 = vcvt.s32.f32 %v3129_v18  ;;  %v2061_v18 = vshrl.u32 %v1624_v1, 16  ;;  %vm1590_vm15 = vmand %vm8753_vm14, %vm11647_vm8  ;;  %vm11654_vm8 = vnez %v11253_v48  ;;  %v11663_v35 = vld [vmem:[#allocation76_spill] sm:$0xff] }
 0x3e7   :  { %v8694_v25 = vpop.xlane.xlu2 %1778 }
 0x3e8   :  { %11625 = vst [vmem:[#allocation70_spill] sm:$0xff] %v8694_v25  ;;  %v8702_v10 = vpop.xlane.xlu1 %1790  ;;  %v8715_v25 = vsel %vm1587_vm7, 1, %v11263_v63  ;;  %vm1588_vm7 = vmand %vm8717_vm5, %vm11637_vm1  ;;  %vm1110_vm5 = vcmp.eq.f32.partialorder %v8522_v28, %v7811_v16 }
 0x3e9   :  { %11628 = vst [vmem:[#allocation72_spill] sm:$0xff] %v8702_v10  ;;  %v3152_v33 = vand.u32 65535, %v8715_v25  ;;  %v8746_v58 = vsel %vm1588_vm7, 1, %v11263_v63  ;;  %vm11645_vm7 = vnez %v11250_v55 }
 0x3ea   :  { %vm1286_vm9 = vmand %vm1110_vm5, %vm11645_vm7 }
 0x3eb   :  { %v3154_v1 = vcvt.s32.f32 %v3152_v33  ;;  %v11643_v33 = vld [vmem:[#allocation73_spill] sm:$0xff]  ;;  %vm8777_vm5 = vmor %vm982_vm3, %vm1286_vm9  ;;  %vm1112_vm9 = vcmp.eq.f32.partialorder %v8522_v28, %v8536_v36  ;;  %vm11660_vm3 = vnez %v11309_v50 }
 0x3ec   :  { %3134 = vadd.xlane.f32.xlu0 %v3131_v20  ;;  %2052 = vadd.xlane.f32.xlu2 %v2050_v30  ;;  %v2063_v30 = vcvt.s32.f32 %v2061_v18  ;;  %v8750_v10 = vpop.xlane.xlu0 %2292  ;;  %v2084_v18 = vand.u32 65535, %v11643_v33 }
 0x3ed   :  { %2064 = vadd.xlane.f32.xlu1 %v2062_v11  ;;  %v2075_v11 = vcvt.s32.f32 %v2073_v14  ;;  %11640 = vst [vmem:[#allocation160_spill] sm:$0xff] %v8750_v10  ;;  %v3165_v14 = vshrl.u32 %v8746_v58, 16 }
 0x3ee   :  { %v2086_v33 = vcvt.s32.f32 %v2084_v18 }
 0x3ef   :  { %v8729_v31 = vpop.xlane.xlu2 %1800 }
 0x3f0   :  { %11636 = vst [vmem:[#allocation71_spill] sm:$0xff] %v8729_v31  ;;  %v8735_v20 = vpop.xlane.xlu1 %1812 }
 0x3f1   :  { %11638 = vst [vmem:[#allocation159_spill] sm:$0xff] %v8735_v20  ;;  %v11644_v20 = vld [vmem:[#allocation74_spill] sm:$0xff] }
 0x3f2   :  { %vm1021_vm10 = vcmp.eq.f32.partialorder %v7536_v47, %v11644_v20  ;;  %vm893_vm11 = vcmp.lt.f32.partialorder %v7536_v47, %v11644_v20 }
 0x3f3   :  { %vm1197_vm2 = vmand %vm1021_vm10, %vm11592_vm4 }
 0x3f4   :  { %3156 = vadd.xlane.f32.xlu0 %v3154_v1  ;;  %2066 = vadd.xlane.f32.xlu2 %v2063_v30  ;;  %v2096_v1 = vand.u32 65535, %v1627_v23  ;;  %vm8784_vm14 = vmor %vm893_vm11, %vm1197_vm2  ;;  %v8792_v20 = vpop.xlane.xlu0 %2306  ;;  %vm984_vm11 = vcmp.lt.f32.partialorder %v8522_v28, %v8536_v36 }
 0x3f5   :  { %2078 = vadd.xlane.f32.xlu1 %v2075_v11  ;;  %v3167_v11 = vcvt.s32.f32 %v3165_v14  ;;  %vm1591_vm10 = vmand %vm8777_vm5, %vm11654_vm8  ;;  %11655 = vst [vmem:[#allocation162_spill] sm:$0xff] %v8792_v20  ;;  %v2097_v14 = vshrl.u32 %v1627_v23, 16 }
 0x3f6   :  { %v2098_v16 = vcvt.s32.f32 %v2096_v1  ;;  %v11656_v1 = vld [vmem:[#allocation75_spill] sm:$0xff]  ;;  %vm1502_vm2 = vmand %vm8784_vm14, %vm11600_vm13  ;;  %v8807_v31 = vsel %vm1591_vm10, 1, %v11263_v63  ;;  %vm1113_vm14 = vcmp.eq.f32.partialorder %v8522_v28, %v8574_v22 }
 0x3f7   :  { %v8763_v10 = vpop.xlane.xlu2 %1814  ;;  %11659 = vst [vmem:[#allocation164_spill] sm:$0xff] %v8807_v31  ;;  %v1630_v20 = vsel %vm1502_vm2, 1, %v11263_v63 }
 0x3f8   :  { %11646 = vst [vmem:[#allocation73_spill] sm:$0xff] %v8763_v10  ;;  %v8771_v30 = vpop.xlane.xlu1 %1826  ;;  %v8782_v10 = vsel %vm1590_vm15, 1, %v11263_v63  ;;  %vm1288_vm15 = vmand %vm1112_vm9, %vm11660_vm3  ;;  %vm11667_vm9 = vnez %v11314_v39 }
 0x3f9   :  { %11648 = vst [vmem:[#allocation74_spill] sm:$0xff] %v8771_v30  ;;  %v3188_v18 = vand.u32 65535, %v8782_v10  ;;  %v2109_v30 = vshrl.u32 %v11656_v1, 16  ;;  %vm8815_vm5 = vmor %vm984_vm11, %vm1288_vm15  ;;  %vm985_vm11 = vcmp.lt.f32.partialorder %v8522_v28, %v8574_v22  ;;  %vm11669_vm15 = vnez %v11261_v43 }
 0x3fa   :  { %11651 = vst [vmem:[#allocation161_spill] sm:$0xff] %v8782_v10  ;;  %vm1593_vm2 = vmand %vm8815_vm5, %vm11667_vm9  ;;  %v11680_v10 = vld [vmem:[#allocation82_spill] sm:$0xff] }
 0x3fb   :  { %v3190_v23 = vcvt.s32.f32 %v3188_v18  ;;  %v2111_v1 = vcvt.s32.f32 %v2109_v30  ;;  %v2132_v18 = vand.u32 65535, %v1630_v20  ;;  %v11665_v30 = vld [vmem:[#allocation80_spill] sm:$0xff]  ;;  %vm1289_vm13 = vmand %vm1113_vm14, %vm11669_vm15  ;;  %v8843_v46 = vsel %vm1593_vm2, 1, %v11263_v63 }
 0x3fc   :  { %3170 = vadd.xlane.f32.xlu0 %v3167_v11  ;;  %2088 = vadd.xlane.f32.xlu2 %v2086_v33  ;;  %vm1024_vm10 = vcmp.eq.f32.partialorder %v7536_v47, %v11665_v30  ;;  %vm896_vm4 = vcmp.lt.f32.partialorder %v7536_v47, %v11665_v30  ;;  %11670 = vst [vmem:[#allocation166_spill] sm:$0xff] %v8843_v46  ;;  %vm1417_vm5 = vmor %vm985_vm11, %vm1289_vm13  ;;  %v11674_v30 = vld [vmem:[#allocation78_spill] sm:$0xff]  ;;  %vm11675_vm14 = vnez %v11268_v29 }
 0x3fd   :  { %2100 = vadd.xlane.f32.xlu1 %v2098_v16  ;;  %v2099_v16 = vcvt.s32.f32 %v2097_v14  ;;  %v8826_v14 = vpop.xlane.xlu0 %2328  ;;  %vm1200_vm3 = vmand %vm1024_vm10, %vm11611_vm0  ;;  %vm1027_vm13 = vcmp.eq.f32.partialorder %v7536_v47, %v11680_v10 }
 0x3fe   :  { %11666 = vst [vmem:[#allocation80_spill] sm:$0xff] %v8826_v14  ;;  %vm8845_vm9 = vmor %vm896_vm4, %vm1200_vm3  ;;  %vm899_vm3 = vcmp.lt.f32.partialorder %v7536_v47, %v11680_v10 }
 0x3ff   :  { %v8798_v11 = vpop.xlane.xlu2 %1836  ;;  %vm1594_vm10 = vmand %vm1417_vm5, %vm11675_vm14 }
 0x400   :  { %11657 = vst [vmem:[#allocation75_spill] sm:$0xff] %v8798_v11  ;;  %v8800_v33 = vpop.xlane.xlu1 %1848  ;;  %v2120_v11 = vand.u32 65535, %v11663_v35  ;;  %vm1505_vm4 = vmand %vm8845_vm9, %vm11619_vm6 }
 0x401   :  { %11658 = vst [vmem:[#allocation163_spill] sm:$0xff] %v8800_v33  ;;  %v3201_v33 = vshrl.u32 %v8807_v31, 16  ;;  %vm1203_vm9 = vmand %vm1027_vm13, %vm11630_vm12 }
 0x402   :  { %v2122_v35 = vcvt.s32.f32 %v2120_v11  ;;  %v3224_v11 = vand.u32 65535, %v8843_v46  ;;  %vm1331_vm2 = vmor %vm899_vm3, %vm1203_vm9 }
 0x403   :  { %vm1508_vm11 = vmand %vm1331_vm2, %vm11637_vm1 }
 0x404   :  { %3192 = vadd.xlane.f32.xlu0 %v3190_v23  ;;  %2102 = vadd.xlane.f32.xlu2 %v2099_v16  ;;  %v3203_v16 = vcvt.s32.f32 %v3201_v33  ;;  %v2133_v33 = vshrl.u32 %v1630_v20, 16  ;;  %v8864_v20 = vsel %vm1594_vm10, 1, %v11263_v63 }
 0x405   :  { %2114 = vadd.xlane.f32.xlu1 %v2111_v1  ;;  %v2134_v1 = vcvt.s32.f32 %v2132_v18 }
 0x407   :  { %v8822_v36 = vpop.xlane.xlu2 %1850 }
 0x408   :  { %11664 = vst [vmem:[#allocation76_spill] sm:$0xff] %v8822_v36  ;;  %v8832_v23 = vpop.xlane.xlu1 %1862 }
 0x409   :  { %11668 = vst [vmem:[#allocation165_spill] sm:$0xff] %v8832_v23  ;;  %v2145_v23 = vshrl.u32 %v11674_v30, 16  ;;  %v1633_v30 = vsel %vm1505_vm4, 1, %v11263_v63 }
 0x40a   :  { %v2168_v22 = vand.u32 65535, %v1633_v30 }
 0x40b   :  { %v2147_v36 = vcvt.s32.f32 %v2145_v23 }
 0x40c   :  { %3206 = vadd.xlane.f32.xlu0 %v3203_v16  ;;  %2124 = vadd.xlane.f32.xlu2 %v2122_v35  ;;  %v8861_v16 = vpop.xlane.xlu0 %2342  ;;  %v3226_v35 = vcvt.s32.f32 %v3224_v11 }
 0x40d   :  { %2136 = vadd.xlane.f32.xlu1 %v2134_v1  ;;  %11677 = vst [vmem:[#allocation168_spill] sm:$0xff] %v8861_v16  ;;  %v2135_v1 = vcvt.s32.f32 %v2133_v33 }
 0x40f   :  { %v8850_v14 = vpop.xlane.xlu2 %1872 }
 0x410   :  { %11673 = vst [vmem:[#allocation167_spill] sm:$0xff] %v8850_v14  ;;  %v8855_v18 = vpop.xlane.xlu1 %1884  ;;  %v11678_v14 = vld [vmem:[#allocation79_spill] sm:$0xff] }
 0x411   :  { %11676 = vst [vmem:[#allocation78_spill] sm:$0xff] %v8855_v18  ;;  %v3237_v18 = vshrl.u32 %v8864_v20, 16  ;;  %v2156_v46 = vand.u32 65535, %v11678_v14  ;;  %v11683_v14 = vld [vmem:[#allocation81_spill] sm:$0xff] }
 0x413   :  { %v3239_v23 = vcvt.s32.f32 %v3237_v18  ;;  %v2158_v33 = vcvt.s32.f32 %v2156_v46 }
 0x414   :  { %3228 = vadd.xlane.f32.xlu0 %v3226_v35  ;;  %2138 = vadd.xlane.f32.xlu2 %v2135_v1  ;;  %v8879_v35 = vpop.xlane.xlu0 %2364  ;;  %v2181_v1 = vshrl.u32 %v11683_v14, 16 }
 0x415   :  { %2150 = vadd.xlane.f32.xlu1 %v2147_v36  ;;  %v2170_v36 = vcvt.s32.f32 %v2168_v22  ;;  %11682 = vst [vmem:[#allocation169_spill] sm:$0xff] %v8879_v35  ;;  %v1636_v22 = vsel %vm1508_vm11, 1, %v11263_v63 }
 0x416   :  { %v2183_v10 = vcvt.s32.f32 %v2181_v1 }
 0x417   :  { %v8869_v31 = vpop.xlane.xlu2 %1886 }
 0x418   :  { %11679 = vst [vmem:[#allocation79_spill] sm:$0xff] %v8869_v31  ;;  %v8873_v11 = vpop.xlane.xlu1 %1898  ;;  %v2169_v31 = vshrl.u32 %v1633_v30, 16  ;;  %v2204_v30 = vand.u32 65535, %v1636_v22 }
 0x419   :  { %11681 = vst [vmem:[#allocation82_spill] sm:$0xff] %v8873_v11 }
 0x41a   :  { %v2171_v46 = vcvt.s32.f32 %v2169_v31  ;;  %v2206_v1 = vcvt.s32.f32 %v2204_v30 }
 0x41c   :  { %3242 = vadd.xlane.f32.xlu0 %v3239_v23  ;;  %2160 = vadd.xlane.f32.xlu2 %v2158_v33  ;;  %v11686_v23 = vld [vmem:[#allocation100_spill] sm:$0xff]  ;;  %v11687_v33 = vld [vmem:[#allocation83_spill] sm:$0xff] }
 0x41d   :  { %2172 = vadd.xlane.f32.xlu1 %v2170_v36  ;;  %vm1030_vm5 = vcmp.eq.f32.partialorder %v7536_v47, %v11686_v23  ;;  %v2192_v36 = vand.u32 65535, %v11687_v33  ;;  %vm902_vm10 = vcmp.lt.f32.partialorder %v7536_v47, %v11686_v23  ;;  %v11691_v33 = vld [vmem:[#allocation84_spill] sm:$0xff] }
 0x41e   :  { %vm1206_vm4 = vmand %vm1030_vm5, %vm11645_vm7 }
 0x41f   :  { %v8882_v16 = vpop.xlane.xlu2 %1908  ;;  %v2194_v31 = vcvt.s32.f32 %v2192_v36  ;;  %vm1334_vm13 = vmor %vm902_vm10, %vm1206_vm4 }
 0x420   :  { %11684 = vst [vmem:[#allocation81_spill] sm:$0xff] %v8882_v16  ;;  %v8884_v18 = vpop.xlane.xlu1 %1920  ;;  %vm1511_vm3 = vmand %vm1334_vm13, %vm11654_vm8 }
 0x421   :  { %11685 = vst [vmem:[#allocation170_spill] sm:$0xff] %v8884_v18  ;;  %v2217_v18 = vshrl.u32 %v11691_v33, 16  ;;  %v1639_v36 = vsel %vm1511_vm3, 1, %v11263_v63  ;;  %vm11707_vm3 = vnez %v11276_v19 }
 0x423   :  { %v2219_v30 = vcvt.s32.f32 %v2217_v18 }
 0x424   :  { %2174 = vadd.xlane.f32.xlu2 %v2171_v46 }
 0x425   :  { %2186 = vadd.xlane.f32.xlu1 %v2183_v10  ;;  %v2205_v10 = vshrl.u32 %v1636_v22, 16  ;;  %v2240_v22 = vand.u32 65535, %v1639_v36 }
 0x427   :  { %v8892_v14 = vpop.xlane.xlu2 %1922  ;;  %v2207_v11 = vcvt.s32.f32 %v2205_v10  ;;  %v11700_v10 = vld [vmem:[#allocation86_spill] sm:$0xff] }
 0x428   :  { %11688 = vst [vmem:[#allocation100_spill] sm:$0xff] %v8892_v14  ;;  %v8894_v35 = vpop.xlane.xlu1 %1934  ;;  %v11693_v14 = vld [vmem:[#allocation12_spill] sm:$0xff] }
 0x429   :  { %11689 = vst [vmem:[#allocation83_spill] sm:$0xff] %v8894_v35  ;;  %v8905_v35 = vpop.xlane.xlu0 %2378 }
 0x42a   :  { %11692 = vst [vmem:[#allocation84_spill] sm:$0xff] %v8905_v35  ;;  %v2242_v35 = vcvt.s32.f32 %v2240_v22 }
 0x42c   :  { %2196 = vadd.xlane.f32.xlu2 %v2194_v31  ;;  %v11695_v31 = vld [vmem:[#allocation85_spill] sm:$0xff] }
 0x42d   :  { %2208 = vadd.xlane.f32.xlu1 %v2206_v1  ;;  %v2228_v1 = vand.u32 65535, %v11695_v31 }
 0x42f   :  { %v8902_v46 = vpop.xlane.xlu2 %1944 }
 0x430   :  { %11690 = vst [vmem:[#allocation171_spill] sm:$0xff] %v8902_v46  ;;  %4219 = vperm.xlu0 %6126, %v11693_v14   ;;  %v8908_v23 = vpop.xlane.xlu1 %1956  ;;  %v11697_v46 = vld [vmem:[#allocation88_spill] sm:$0xff] }
 0x431   :  { %11694 = vst [vmem:[#allocation172_spill] sm:$0xff] %v8908_v23  ;;  %vm1033_vm9 = vcmp.eq.f32.partialorder %v7536_v47, %v11697_v46  ;;  %v2230_v23 = vcvt.s32.f32 %v2228_v1  ;;  %vm905_vm2 = vcmp.lt.f32.partialorder %v7536_v47, %v11697_v46  ;;  %v8926_v31 = vpop.xlane.xlu0 %2400 }
 0x432   :  { %vm1209_vm11 = vmand %vm1033_vm9, %vm11669_vm15  ;;  %11701 = vst [vmem:[#allocation86_spill] sm:$0xff] %v8926_v31 }
 0x433   :  { %vm1337_vm5 = vmor %vm905_vm2, %vm1209_vm11  ;;  %vm11712_vm11 = vnez %v11280_v42 }
 0x434   :  { %2210 = vadd.xlane.f32.xlu2 %v2207_v11  ;;  %v2241_v11 = vshrl.u32 %v1639_v36, 16  ;;  %vm1514_vm10 = vmand %vm1337_vm5, %vm11675_vm14 }
 0x435   :  { %2222 = vadd.xlane.f32.xlu1 %v2219_v30  ;;  %v2253_v30 = vshrl.u32 %v11700_v10, 16 }
 0x436   :  { %v2243_v47 = vcvt.s32.f32 %v2241_v11 }
 0x437   :  { %v8912_v16 = vpop.xlane.xlu2 %1958  ;;  %v2255_v46 = vcvt.s32.f32 %v2253_v30 }
 0x438   :  { %11696 = vst [vmem:[#allocation85_spill] sm:$0xff] %v8912_v16  ;;  %6177 = vset.pattern.permute.xlu0 %v6884_v12  ;;  %v8917_v33 = vpop.xlane.xlu1 %1970  ;;  %v11715_v16 = vld [vmem:[#allocation94_spill] sm:$0xff] }
 0x439   :  { %11698 = vst [vmem:[#allocation88_spill] sm:$0xff] %v8917_v33  ;;  %v11705_v33 = vld [vmem:[#allocation90_spill] sm:$0xff] }
 0x43a   :  { %vm1036_vm4 = vcmp.eq.f32.partialorder %v7685_v34, %v11705_v33  ;;  %vm908_vm13 = vcmp.lt.f32.partialorder %v7685_v34, %v11705_v33 }
 0x43b   :  { %vm1212_vm9 = vmand %vm1036_vm4, %vm11707_vm3  ;;  %vm911_vm4 = vcmp.lt.f32.partialorder %v7685_v34, %v11715_v16 }
 0x43c   :  { %2232 = vadd.xlane.f32.xlu2 %v2230_v23  ;;  %v11703_v23 = vld [vmem:[#allocation87_spill] sm:$0xff]  ;;  %vm1340_vm2 = vmor %vm908_vm13, %vm1212_vm9  ;;  %vm11717_vm13 = vnez %v11284_v40 }
 0x43d   :  { %2244 = vadd.xlane.f32.xlu1 %v2242_v35  ;;  %v1642_v35 = vsel %vm1514_vm10, 1, %v11263_v63  ;;  %v2264_v36 = vand.u32 65535, %v11703_v23  ;;  %vm1517_vm5 = vmand %vm1340_vm2, %vm11712_vm11  ;;  %vm1039_vm10 = vcmp.eq.f32.partialorder %v7685_v34, %v11715_v16 }
 0x43e   :  { %v2276_v10 = vand.u32 65535, %v1642_v35  ;;  %v2277_v30 = vshrl.u32 %v1642_v35, 16  ;;  %v11713_v35 = vld [vmem:[#allocation91_spill] sm:$0xff]  ;;  %vm1215_vm9 = vmand %vm1039_vm10, %vm11717_vm13 }
 0x43f   :  { %v8923_v18 = vpop.xlane.xlu2 %1980  ;;  %vm1343_vm2 = vmor %vm911_vm4, %vm1215_vm9  ;;  %vm11728_vm9 = vnez %v11293_v59 }
 0x440   :  { %11699 = vst [vmem:[#allocation173_spill] sm:$0xff] %v8923_v18  ;;  %4249 = vperm.xlu0 %6177, %v11693_v14   ;;  %v8929_v22 = vpop.xlane.xlu1 %1992  ;;  %v2278_v11 = vcvt.s32.f32 %v2276_v10  ;;  %v2279_v33 = vcvt.s32.f32 %v2277_v30  ;;  %v2300_v10 = vand.u32 65535, %v11713_v35  ;;  %v11781_v18 = vld [vmem:[#allocation114_spill] sm:$0xff] }
 0x441   :  { %11702 = vst [vmem:[#allocation174_spill] sm:$0xff] %v8929_v22  ;;  %v2266_v22 = vcvt.s32.f32 %v2264_v36 }
 0x444   :  { %2246 = vadd.xlane.f32.xlu2 %v2243_v47 }
 0x445   :  { %2258 = vadd.xlane.f32.xlu1 %v2255_v46  ;;  %v11709_v46 = vld [vmem:[#allocation89_spill] sm:$0xff] }
 0x446   :  { %v2289_v23 = vshrl.u32 %v11709_v46, 16 }
 0x447   :  { %v8935_v1 = vpop.xlane.xlu2 %1994 }
 0x448   :  { %11704 = vst [vmem:[#allocation87_spill] sm:$0xff] %v8935_v1  ;;  %6182 = vset.pattern.permute.xlu0 %v6911_v17  ;;  %v8940_v31 = vpop.xlane.xlu1 %2006  ;;  %v8949_v1 = vpop.xlane.xlu0 %2414 }
 0x449   :  { %11706 = vst [vmem:[#allocation90_spill] sm:$0xff] %v8940_v31  ;;  %v2291_v31 = vcvt.s32.f32 %v2289_v23 }
 0x44a   :  { %11710 = vst [vmem:[#allocation89_spill] sm:$0xff] %v8949_v1  ;;  %v2302_v1 = vcvt.s32.f32 %v2300_v10 }
 0x44c   :  { %2268 = vadd.xlane.f32.xlu2 %v2266_v22  ;;  %v1645_v22 = vsel %vm1517_vm5, 1, %v11263_v63  ;;  %vm11723_vm5 = vnez %v11288_v26 }
 0x44d   :  { %2280 = vadd.xlane.f32.xlu1 %v2278_v11  ;;  %v2312_v46 = vand.u32 65535, %v1645_v22  ;;  %v2313_v30 = vshrl.u32 %v1645_v22, 16  ;;  %vm1520_vm11 = vmand %vm1343_vm2, %vm11723_vm5  ;;  %v11724_v22 = vld [vmem:[#allocation93_spill] sm:$0xff]  ;;  %vm11733_vm5 = vnez %v11297_v0 }
 0x44f   :  { %v8946_v47 = vpop.xlane.xlu2 %2016  ;;  %v2315_v16 = vcvt.s32.f32 %v2313_v30 }
 0x450   :  { %11708 = vst [vmem:[#allocation175_spill] sm:$0xff] %v8946_v47  ;;  %4279 = vperm.xlu0 %6182, %v11693_v14   ;;  %v8952_v36 = vpop.xlane.xlu1 %2028  ;;  %v11721_v14 = vld [vmem:[#allocation20_spill] sm:$0xff] }
 0x451   :  { %11711 = vst [vmem:[#allocation176_spill] sm:$0xff] %v8952_v36 }
 0x454   :  { %2282 = vadd.xlane.f32.xlu2 %v2279_v33  ;;  %v11719_v33 = vld [vmem:[#allocation92_spill] sm:$0xff] }
 0x455   :  { %2294 = vadd.xlane.f32.xlu1 %v2291_v31  ;;  %v2314_v31 = vcvt.s32.f32 %v2312_v46  ;;  %v2325_v35 = vshrl.u32 %v11719_v33, 16  ;;  %v2336_v46 = vand.u32 65535, %v11724_v22 }
 0x457   :  { %v8958_v11 = vpop.xlane.xlu2 %2030 }
 0x458   :  { %11714 = vst [vmem:[#allocation91_spill] sm:$0xff] %v8958_v11  ;;  %6187 = vset.pattern.permute.xlu0 %v6860_v8  ;;  %v8963_v36 = vpop.xlane.xlu1 %2042  ;;  %v8972_v11 = vpop.xlane.xlu0 %2436 }
 0x459   :  { %11716 = vst [vmem:[#allocation94_spill] sm:$0xff] %v8963_v36  ;;  %v2327_v36 = vcvt.s32.f32 %v2325_v35 }
 0x45a   :  { %11720 = vst [vmem:[#allocation92_spill] sm:$0xff] %v8972_v11 }
 0x45c   :  { %2304 = vadd.xlane.f32.xlu2 %v2302_v1  ;;  %v1648_v1 = vsel %vm1520_vm11, 1, %v11263_v63 }
 0x45d   :  { %2316 = vadd.xlane.f32.xlu1 %v2314_v31  ;;  %v2348_v33 = vand.u32 65535, %v1648_v1  ;;  %v2349_v30 = vshrl.u32 %v1648_v1, 16  ;;  %v11734_v1 = vld [vmem:[#allocation97_spill] sm:$0xff] }
 0x45f   :  { %v8969_v23 = vpop.xlane.xlu2 %2052 }
 0x460   :  { %11718 = vst [vmem:[#allocation177_spill] sm:$0xff] %v8969_v23  ;;  %4310 = vperm.xlu0 %6187, %v11721_v14   ;;  %v8975_v10 = vpop.xlane.xlu1 %2064  ;;  %v11726_v23 = vld [vmem:[#allocation96_spill] sm:$0xff] }
 0x461   :  { %11722 = vst [vmem:[#allocation178_spill] sm:$0xff] %v8975_v10  ;;  %vm1042_vm10 = vcmp.eq.f32.partialorder %v7685_v34, %v11726_v23  ;;  %v2338_v10 = vcvt.s32.f32 %v2336_v46  ;;  %vm914_vm4 = vcmp.lt.f32.partialorder %v7685_v34, %v11726_v23  ;;  %v2351_v23 = vcvt.s32.f32 %v2349_v30 }
 0x462   :  { %vm1218_vm11 = vmand %vm1042_vm10, %vm11728_vm9 }
 0x463   :  { %vm1346_vm2 = vmor %vm914_vm4, %vm1218_vm11  ;;  %vm11738_vm11 = vnez %v11302_v56 }
 0x464   :  { %2318 = vadd.xlane.f32.xlu2 %v2315_v16  ;;  %v11730_v16 = vld [vmem:[#allocation95_spill] sm:$0xff]  ;;  %vm1523_vm13 = vmand %vm1346_vm2, %vm11733_vm5  ;;  %vm11743_vm5 = vnez %v11306_v5 }
 0x465   :  { %2330 = vadd.xlane.f32.xlu1 %v2327_v36  ;;  %v2350_v36 = vcvt.s32.f32 %v2348_v33  ;;  %v2361_v22 = vshrl.u32 %v11730_v16, 16  ;;  %v2372_v33 = vand.u32 65535, %v11734_v1 }
 0x467   :  { %v8981_v31 = vpop.xlane.xlu2 %2066 }
 0x468   :  { %11725 = vst [vmem:[#allocation93_spill] sm:$0xff] %v8981_v31  ;;  %6192 = vset.pattern.permute.xlu0 %v6938_v21  ;;  %v8986_v11 = vpop.xlane.xlu1 %2078  ;;  %v8995_v31 = vpop.xlane.xlu0 %2450 }
 0x469   :  { %11727 = vst [vmem:[#allocation96_spill] sm:$0xff] %v8986_v11  ;;  %v2363_v11 = vcvt.s32.f32 %v2361_v22 }
 0x46a   :  { %11731 = vst [vmem:[#allocation95_spill] sm:$0xff] %v8995_v31  ;;  %v2374_v31 = vcvt.s32.f32 %v2372_v33 }
 0x46c   :  { %2340 = vadd.xlane.f32.xlu2 %v2338_v10  ;;  %v1651_v10 = vsel %vm1523_vm13, 1, %v11263_v63 }
 0x46d   :  { %2352 = vadd.xlane.f32.xlu1 %v2350_v36  ;;  %v2384_v16 = vand.u32 65535, %v1651_v10  ;;  %v2385_v30 = vshrl.u32 %v1651_v10, 16  ;;  %v11744_v10 = vld [vmem:[#allocation101_spill] sm:$0xff] }
 0x46f   :  { %v8992_v35 = vpop.xlane.xlu2 %2088 }
 0x470   :  { %11729 = vst [vmem:[#allocation179_spill] sm:$0xff] %v8992_v35  ;;  %4340 = vperm.xlu0 %6192, %v11721_v14   ;;  %v8998_v46 = vpop.xlane.xlu1 %2100  ;;  %v11736_v35 = vld [vmem:[#allocation29_spill] sm:$0xff] }
 0x471   :  { %11732 = vst [vmem:[#allocation180_spill] sm:$0xff] %v8998_v46  ;;  %vm1045_vm10 = vcmp.eq.f32.partialorder %v7685_v34, %v11736_v35  ;;  %vm917_vm4 = vcmp.lt.f32.partialorder %v7685_v34, %v11736_v35  ;;  %v2387_v35 = vcvt.s32.f32 %v2385_v30 }
 0x472   :  { %vm1221_vm13 = vmand %vm1045_vm10, %vm11738_vm11 }
 0x473   :  { %vm1349_vm2 = vmor %vm917_vm4, %vm1221_vm13  ;;  %vm11748_vm13 = vnez %v11309_v50 }
 0x474   :  { %2354 = vadd.xlane.f32.xlu2 %v2351_v23  ;;  %v11740_v23 = vld [vmem:[#allocation99_spill] sm:$0xff]  ;;  %vm1526_vm9 = vmand %vm1349_vm2, %vm11743_vm5  ;;  %vm11754_vm5 = vnez %v11314_v39 }
 0x475   :  { %2366 = vadd.xlane.f32.xlu1 %v2363_v11  ;;  %v2386_v11 = vcvt.s32.f32 %v2384_v16  ;;  %v2397_v1 = vshrl.u32 %v11740_v23, 16  ;;  %v2408_v16 = vand.u32 65535, %v11744_v10 }
 0x477   :  { %v9004_v36 = vpop.xlane.xlu2 %2102 }
 0x478   :  { %11735 = vst [vmem:[#allocation97_spill] sm:$0xff] %v9004_v36  ;;  %6197 = vset.pattern.permute.xlu0 %v11381_v27  ;;  %v9009_v46 = vpop.xlane.xlu1 %2114  ;;  %v9018_v36 = vpop.xlane.xlu0 %2472 }
 0x479   :  { %11737 = vst [vmem:[#allocation29_spill] sm:$0xff] %v9009_v46  ;;  %v2399_v46 = vcvt.s32.f32 %v2397_v1 }
 0x47a   :  { %11741 = vst [vmem:[#allocation99_spill] sm:$0xff] %v9018_v36 }
 0x47c   :  { %2376 = vadd.xlane.f32.xlu2 %v2374_v31  ;;  %v1654_v31 = vsel %vm1526_vm9, 1, %v11263_v63 }
 0x47d   :  { %2388 = vadd.xlane.f32.xlu1 %v2386_v11  ;;  %v2420_v23 = vand.u32 65535, %v1654_v31  ;;  %v2421_v30 = vshrl.u32 %v1654_v31, 16  ;;  %v11755_v31 = vld [vmem:[#allocation103_spill] sm:$0xff] }
 0x47f   :  { %v9015_v22 = vpop.xlane.xlu2 %2124 }
 0x480   :  { %11739 = vst [vmem:[#allocation181_spill] sm:$0xff] %v9015_v22  ;;  %4370 = vperm.xlu0 %6197, %v11721_v14   ;;  %v9021_v33 = vpop.xlane.xlu1 %2136  ;;  %v11746_v22 = vld [vmem:[#allocation104_spill] sm:$0xff] }
 0x481   :  { %11742 = vst [vmem:[#allocation182_spill] sm:$0xff] %v9021_v33  ;;  %vm1048_vm10 = vcmp.eq.f32.partialorder %v7685_v34, %v11746_v22  ;;  %v2410_v33 = vcvt.s32.f32 %v2408_v16  ;;  %vm920_vm4 = vcmp.lt.f32.partialorder %v7685_v34, %v11746_v22  ;;  %v11752_v14 = vld [vmem:[#allocation24_spill] sm:$0xff]  ;;  %v2423_v34 = vcvt.s32.f32 %v2421_v30 }
 0x482   :  { %vm1224_vm9 = vmand %vm1048_vm10, %vm11748_vm13  ;;  %vm1051_vm10 = vcmp.eq.f32.partialorder %v7845_v15, %v7852_v4 }
 0x483   :  { %vm1352_vm2 = vmor %vm920_vm4, %vm1224_vm9  ;;  %vm923_vm4 = vcmp.lt.f32.partialorder %v7845_v15, %v7852_v4  ;;  %vm11758_vm9 = vnez %v11204_v32 }
 0x484   :  { %2390 = vadd.xlane.f32.xlu2 %v2387_v35  ;;  %v11750_v35 = vld [vmem:[#allocation102_spill] sm:$0xff]  ;;  %vm1529_vm11 = vmand %vm1352_vm2, %vm11754_vm5 }
 0x485   :  { %2402 = vadd.xlane.f32.xlu1 %v2399_v46  ;;  %v2422_v46 = vcvt.s32.f32 %v2420_v23  ;;  %v2433_v10 = vshrl.u32 %v11750_v35, 16  ;;  %v2444_v23 = vand.u32 65535, %v11755_v31  ;;  %v11761_v31 = vld [vmem:[#allocation25_spill] sm:$0xff] }
 0x487   :  { %v9027_v11 = vpop.xlane.xlu2 %2138  ;;  %v2435_v22 = vcvt.s32.f32 %v2433_v10 }
 0x488   :  { %11745 = vst [vmem:[#allocation101_spill] sm:$0xff] %v9027_v11  ;;  %6202 = vset.pattern.permute.xlu0 %v6841_v3  ;;  %v9032_v36 = vpop.xlane.xlu1 %2150  ;;  %v9041_v11 = vpop.xlane.xlu0 %2486 }
 0x489   :  { %11747 = vst [vmem:[#allocation104_spill] sm:$0xff] %v9032_v36  ;;  %v2446_v36 = vcvt.s32.f32 %v2444_v23 }
 0x48a   :  { %11751 = vst [vmem:[#allocation102_spill] sm:$0xff] %v9041_v11 }
 0x48c   :  { %2412 = vadd.xlane.f32.xlu2 %v2410_v33  ;;  %v1657_v33 = vsel %vm1529_vm11, 1, %v11263_v63  ;;  %vm1227_vm11 = vmand %vm1051_vm10, %vm11758_vm9 }
 0x48d   :  { %2424 = vadd.xlane.f32.xlu1 %v2422_v46  ;;  %v2456_v35 = vand.u32 65535, %v1657_v33  ;;  %vm1355_vm2 = vmor %vm923_vm4, %vm1227_vm11 }
 0x48f   :  { %v9038_v1 = vpop.xlane.xlu2 %2160  ;;  %v2458_v30 = vcvt.s32.f32 %v2456_v35  ;;  %v11765_v35 = vld [vmem:[#allocation106_spill] sm:$0xff] }
 0x490   :  { %11749 = vst [vmem:[#allocation183_spill] sm:$0xff] %v9038_v1  ;;  %4401 = vperm.xlu0 %6202, %v11752_v14   ;;  %v9044_v16 = vpop.xlane.xlu1 %2172  ;;  %v9061_v10 = vpop.xlane.xlu0 %2508  ;;  %v11774_v1 = vld [vmem:[#allocation18_spill] sm:$0xff] }
 0x491   :  { %11753 = vst [vmem:[#allocation184_spill] sm:$0xff] %v9044_v16 }
 0x492   :  { %11759 = vst [vmem:[#allocation186_spill] sm:$0xff] %v9061_v10 }
 0x494   :  { %2426 = vadd.xlane.f32.xlu2 %v2423_v34  ;;  %v2457_v34 = vshrl.u32 %v1657_v33, 16 }
 0x495   :  { %2438 = vadd.xlane.f32.xlu1 %v2435_v22 }
 0x496   :  { %v2459_v4 = vcvt.s32.f32 %v2457_v34 }
 0x497   :  { %v9050_v46 = vpop.xlane.xlu2 %2174 }
 0x498   :  { %11756 = vst [vmem:[#allocation103_spill] sm:$0xff] %v9050_v46  ;;  %6203 = vset.pattern.permute.xlu0 %v6869_v9  ;;  %v9055_v16 = vpop.xlane.xlu1 %2186  ;;  %v2469_v46 = vshrl.u32 %v11761_v31, 16  ;;  %v9077_v31 = vpop.xlane.xlu0 %2522 }
 0x499   :  { %11757 = vst [vmem:[#allocation185_spill] sm:$0xff] %v9055_v16  ;;  %v11763_v16 = vld [vmem:[#allocation31_spill] sm:$0xff] }
 0x49a   :  { %vm11764_vm5 = vnez %v11763_v16  ;;  %v2471_v11 = vcvt.s32.f32 %v2469_v46  ;;  %11768 = vst [vmem:[#allocation106_spill] sm:$0xff] %v9077_v31  ;;  %v11770_v46 = vld [vmem:[#allocation35_spill] sm:$0xff] }
 0x49b   :  { %vm1532_vm13 = vmand %vm1355_vm2, %vm11764_vm5 }
 0x49c   :  { %2448 = vadd.xlane.f32.xlu2 %v2446_v36  ;;  %v1660_v36 = vsel %vm1532_vm13, 1, %v11263_v63  ;;  %vm11771_vm13 = vnez %v11770_v46 }
 0x49d   :  { %2460 = vadd.xlane.f32.xlu1 %v2458_v30  ;;  %v2480_v30 = vand.u32 65535, %v11765_v35  ;;  %v2492_v10 = vand.u32 65535, %v1660_v36 }
 0x49f   :  { %v9063_v22 = vpop.xlane.xlu2 %2196  ;;  %v2482_v34 = vcvt.s32.f32 %v2480_v30  ;;  %v11776_v30 = vld [vmem:[#allocation38_spill] sm:$0xff] }
 0x4a0   :  { %11760 = vst [vmem:[#allocation187_spill] sm:$0xff] %v9063_v22  ;;  %3946 = vperm.xlu0 %6203, %v11448_v53   ;;  %v9067_v23 = vpop.xlane.xlu1 %2208  ;;  %v11767_v22 = vld [vmem:[#allocation111_spill] sm:$0xff]  ;;  %vm11777_vm5 = vnez %v11776_v30 }
 0x4a1   :  { %11762 = vst [vmem:[#allocation25_spill] sm:$0xff] %v9067_v23  ;;  %vm1054_vm10 = vcmp.eq.f32.partialorder %v7845_v15, %v11767_v22  ;;  %vm926_vm4 = vcmp.lt.f32.partialorder %v7845_v15, %v11767_v22 }
 0x4a2   :  { %vm1230_vm11 = vmand %vm1054_vm10, %vm11771_vm13  ;;  %vm1057_vm10 = vcmp.eq.f32.partialorder %v7845_v15, %v11781_v18 }
 0x4a3   :  { %vm1358_vm2 = vmor %vm926_vm4, %vm1230_vm11  ;;  %vm929_vm4 = vcmp.lt.f32.partialorder %v7845_v15, %v11781_v18 }
 0x4a4   :  { %2462 = vadd.xlane.f32.xlu2 %v2459_v4  ;;  %v2493_v4 = vshrl.u32 %v1660_v36, 16  ;;  %vm1535_vm9 = vmand %vm1358_vm2, %vm11777_vm5  ;;  %v11779_v36 = vld [vmem:[#allocation110_spill] sm:$0xff] }
 0x4a5   :  { %2474 = vadd.xlane.f32.xlu1 %v2471_v11  ;;  %v2494_v11 = vcvt.s32.f32 %v2492_v10  ;;  %v1663_v10 = vsel %vm1535_vm9, 1, %v11263_v63  ;;  %vm11783_vm9 = vnez %v11230_v61 }
 0x4a6   :  { %v2495_v22 = vcvt.s32.f32 %v2493_v4  ;;  %vm1233_vm11 = vmand %vm1057_vm10, %vm11783_vm9 }
 0x4a7   :  { %v9073_v33 = vpop.xlane.xlu2 %2210  ;;  %vm1361_vm2 = vmor %vm929_vm4, %vm1233_vm11  ;;  %vm11795_vm11 = vnez %v11244_v62 }
 0x4a8   :  { %11766 = vst [vmem:[#allocation31_spill] sm:$0xff] %v9073_v33  ;;  %4431 = vperm.xlu0 %6203, %v11752_v14   ;;  %v9080_v23 = vpop.xlane.xlu1 %2222  ;;  %v11773_v33 = vld [vmem:[#allocation108_spill] sm:$0xff] }
 0x4a9   :  { %11769 = vst [vmem:[#allocation111_spill] sm:$0xff] %v9080_v23  ;;  %v2505_v31 = vshrl.u32 %v11773_v33, 16  ;;  %v2528_v33 = vand.u32 65535, %v1663_v10 }
 0x4ab   :  { %v2507_v23 = vcvt.s32.f32 %v2505_v31  ;;  %v11784_v31 = vld [vmem:[#allocation112_spill] sm:$0xff] }
 0x4ac   :  { %2484 = vadd.xlane.f32.xlu2 %v2482_v34  ;;  %v9095_v34 = vpop.xlane.xlu0 %2544 }
 0x4ad   :  { %2496 = vadd.xlane.f32.xlu1 %v2494_v11  ;;  %11778 = vst [vmem:[#allocation38_spill] sm:$0xff] %v9095_v34  ;;  %v2516_v11 = vand.u32 65535, %v11779_v36  ;;  %v2529_v36 = vshrl.u32 %v1663_v10, 16 }
 0x4af   :  { %v9086_v35 = vpop.xlane.xlu2 %2232  ;;  %v2518_v4 = vcvt.s32.f32 %v2516_v11 }
 0x4b0   :  { %11772 = vst [vmem:[#allocation35_spill] sm:$0xff] %v9086_v35  ;;  %6208 = vset.pattern.permute.xlu0 %v11774_v1  ;;  %v9090_v47 = vpop.xlane.xlu1 %2244  ;;  %v2531_v1 = vcvt.s32.f32 %v2529_v36 }
 0x4b1   :  { %11775 = vst [vmem:[#allocation108_spill] sm:$0xff] %v9090_v47 }
 0x4b4   :  { %2498 = vadd.xlane.f32.xlu2 %v2495_v22  ;;  %v2541_v22 = vshrl.u32 %v11784_v31, 16 }
 0x4b5   :  { %2510 = vadd.xlane.f32.xlu1 %v2507_v23  ;;  %v2530_v23 = vcvt.s32.f32 %v2528_v33 }
 0x4b6   :  { %v2543_v18 = vcvt.s32.f32 %v2541_v22 }
 0x4b7   :  { %v9098_v35 = vpop.xlane.xlu2 %2246 }
 0x4b8   :  { %11780 = vst [vmem:[#allocation110_spill] sm:$0xff] %v9098_v35  ;;  %3976 = vperm.xlu0 %6208, %v11448_v53   ;;  %v9103_v47 = vpop.xlane.xlu1 %2258  ;;  %v9112_v35 = vpop.xlane.xlu0 %2558 }
 0x4b9   :  { %11782 = vst [vmem:[#allocation114_spill] sm:$0xff] %v9103_v47  ;;  %v11788_v47 = vld [vmem:[#allocation42_spill] sm:$0xff] }
 0x4ba   :  { %11786 = vst [vmem:[#allocation188_spill] sm:$0xff] %v9112_v35  ;;  %vm11789_vm5 = vnez %v11788_v47 }
 0x4bb   :  { %vm1538_vm13 = vmand %vm1361_vm2, %vm11789_vm5  ;;  %vm11801_vm5 = vnez %v11248_v49 }
 0x4bc   :  { %2520 = vadd.xlane.f32.xlu2 %v2518_v4  ;;  %v1666_v33 = vsel %vm1538_vm13, 1, %v11263_v63  ;;  %v11790_v4 = vld [vmem:[#allocation115_spill] sm:$0xff] }
 0x4bd   :  { %2532 = vadd.xlane.f32.xlu1 %v2530_v23  ;;  %v2552_v23 = vand.u32 65535, %v11790_v4  ;;  %v2564_v31 = vand.u32 65535, %v1666_v33  ;;  %v2565_v36 = vshrl.u32 %v1666_v33, 16  ;;  %v11798_v4 = vld [vmem:[#allocation117_spill] sm:$0xff] }
 0x4bf   :  { %v9110_v34 = vpop.xlane.xlu2 %2268  ;;  %v2554_v35 = vcvt.s32.f32 %v2552_v23 }
 0x4c0   :  { %11785 = vst [vmem:[#allocation112_spill] sm:$0xff] %v9110_v34  ;;  %4461 = vperm.xlu0 %6208, %v11752_v14   ;;  %v9115_v11 = vpop.xlane.xlu1 %2280  ;;  %v11792_v34 = vld [vmem:[#allocation32_spill] sm:$0xff]  ;;  %v11793_v14 = vld [vmem:[#allocation22_spill] sm:$0xff]  ;;  %v9132_v22 = vpop.xlane.xlu0 %2580 }
 0x4c1   :  { %11787 = vst [vmem:[#allocation189_spill] sm:$0xff] %v9115_v11  ;;  %vm1060_vm10 = vcmp.eq.f32.partialorder %v7845_v15, %v11792_v34  ;;  %vm932_vm4 = vcmp.lt.f32.partialorder %v7845_v15, %v11792_v34  ;;  %v2567_v34 = vcvt.s32.f32 %v2565_v36 }
 0x4c2   :  { %vm1236_vm13 = vmand %vm1060_vm10, %vm11795_vm11  ;;  %11796 = vst [vmem:[#allocation32_spill] sm:$0xff] %v9132_v22 }
 0x4c3   :  { %vm1364_vm2 = vmor %vm932_vm4, %vm1236_vm13 }
 0x4c4   :  { %2534 = vadd.xlane.f32.xlu2 %v2531_v1  ;;  %v2566_v1 = vcvt.s32.f32 %v2564_v31  ;;  %vm1541_vm9 = vmand %vm1364_vm2, %vm11801_vm5  ;;  %v11802_v31 = vld [vmem:[#allocation119_spill] sm:$0xff]  ;;  %vm11813_vm5 = vnez %v11259_v6 }
 0x4c5   :  { %2546 = vadd.xlane.f32.xlu1 %v2543_v18 }
 0x4c7   :  { %v9121_v10 = vpop.xlane.xlu2 %2282 }
 0x4c8   :  { %11791 = vst [vmem:[#allocation42_spill] sm:$0xff] %v9121_v10  ;;  %6213 = vset.pattern.permute.xlu0 %v11793_v14  ;;  %v9126_v11 = vpop.xlane.xlu1 %2294  ;;  %v2577_v10 = vshrl.u32 %v11798_v4, 16  ;;  %v11799_v14 = vld [vmem:[#allocation23_spill] sm:$0xff]  ;;  %v9148_v4 = vpop.xlane.xlu0 %2594 }
 0x4c9   :  { %11794 = vst [vmem:[#allocation115_spill] sm:$0xff] %v9126_v11 }
 0x4ca   :  { %v2579_v11 = vcvt.s32.f32 %v2577_v10  ;;  %11805 = vst [vmem:[#allocation119_spill] sm:$0xff] %v9148_v4  ;;  %v11811_v4 = vld [vmem:[#allocation15_spill] sm:$0xff] }
 0x4cc   :  { %2556 = vadd.xlane.f32.xlu2 %v2554_v35  ;;  %v1669_v35 = vsel %vm1541_vm9, 1, %v11263_v63  ;;  %vm11808_vm9 = vnez %v11256_v37 }
 0x4cd   :  { %2568 = vadd.xlane.f32.xlu1 %v2566_v1  ;;  %v2588_v1 = vand.u32 65535, %v11802_v31  ;;  %v2600_v22 = vand.u32 65535, %v1669_v35  ;;  %v2601_v10 = vshrl.u32 %v1669_v35, 16  ;;  %v11810_v31 = vld [vmem:[#allocation121_spill] sm:$0xff]  ;;  %v11815_v35 = vld [vmem:[#allocation123_spill] sm:$0xff] }
 0x4cf   :  { %v9134_v18 = vpop.xlane.xlu2 %2304  ;;  %v2590_v36 = vcvt.s32.f32 %v2588_v1 }
 0x4d0   :  { %11797 = vst [vmem:[#allocation190_spill] sm:$0xff] %v9134_v18  ;;  %4007 = vperm.xlu0 %6213, %v11799_v14   ;;  %v9138_v23 = vpop.xlane.xlu1 %2316  ;;  %v11804_v18 = vld [vmem:[#allocation124_spill] sm:$0xff] }
 0x4d1   :  { %11800 = vst [vmem:[#allocation117_spill] sm:$0xff] %v9138_v23  ;;  %vm1063_vm10 = vcmp.eq.f32.partialorder %v7845_v15, %v11804_v18  ;;  %v11806_v23 = vld [vmem:[#allocation26_spill] sm:$0xff]  ;;  %vm935_vm4 = vcmp.lt.f32.partialorder %v7845_v15, %v11804_v18  ;;  %v2603_v18 = vcvt.s32.f32 %v2601_v10 }
 0x4d2   :  { %vm1239_vm13 = vmand %vm1063_vm10, %vm11808_vm9 }
 0x4d3   :  { %vm1367_vm2 = vmor %vm935_vm4, %vm1239_vm13 }
 0x4d4   :  { %2570 = vadd.xlane.f32.xlu2 %v2567_v34  ;;  %vm1544_vm11 = vmand %vm1367_vm2, %vm11813_vm5  ;;  %vm11824_vm5 = vnez %v11274_v24 }
 0x4d5   :  { %2582 = vadd.xlane.f32.xlu1 %v2579_v11  ;;  %v2602_v11 = vcvt.s32.f32 %v2600_v22  ;;  %v1672_v22 = vsel %vm1544_vm11, 1, %v11263_v63  ;;  %vm11819_vm11 = vnez %v11270_v51 }
 0x4d7   :  { %v9144_v33 = vpop.xlane.xlu2 %2318 }
 0x4d8   :  { %11803 = vst [vmem:[#allocation23_spill] sm:$0xff] %v9144_v33  ;;  %4492 = vperm.xlu0 %6213, %v11806_v23   ;;  %v9151_v9 = vpop.xlane.xlu1 %2330  ;;  %v2613_v33 = vshrl.u32 %v11810_v31, 16  ;;  %v2636_v31 = vand.u32 65535, %v1672_v22 }
 0x4d9   :  { %11807 = vst [vmem:[#allocation124_spill] sm:$0xff] %v9151_v9 }
 0x4da   :  { %v2615_v1 = vcvt.s32.f32 %v2613_v33  ;;  %v2638_v33 = vcvt.s32.f32 %v2636_v31 }
 0x4dc   :  { %2592 = vadd.xlane.f32.xlu2 %v2590_v36  ;;  %v9166_v36 = vpop.xlane.xlu0 %2616 }
 0x4dd   :  { %2604 = vadd.xlane.f32.xlu1 %v2602_v11  ;;  %11814 = vst [vmem:[#allocation15_spill] sm:$0xff] %v9166_v36  ;;  %v2624_v11 = vand.u32 65535, %v11815_v35  ;;  %v11821_v35 = vld [vmem:[#allocation125_spill] sm:$0xff] }
 0x4de   :  { %v2649_v36 = vshrl.u32 %v11821_v35, 16 }
 0x4df   :  { %v9157_v34 = vpop.xlane.xlu2 %2340  ;;  %v2626_v10 = vcvt.s32.f32 %v2624_v11 }
 0x4e0   :  { %11809 = vst [vmem:[#allocation191_spill] sm:$0xff] %v9157_v34  ;;  %6218 = vset.pattern.permute.xlu0 %v11811_v4  ;;  %v9161_v3 = vpop.xlane.xlu1 %2352  ;;  %v11817_v34 = vld [vmem:[#allocation126_spill] sm:$0xff] }
 0x4e1   :  { %11812 = vst [vmem:[#allocation121_spill] sm:$0xff] %v9161_v3  ;;  %vm1066_vm10 = vcmp.eq.f32.partialorder %v7845_v15, %v11817_v34  ;;  %vm938_vm4 = vcmp.lt.f32.partialorder %v7845_v15, %v11817_v34  ;;  %v2651_v34 = vcvt.s32.f32 %v2649_v36 }
 0x4e2   :  { %vm1242_vm13 = vmand %vm1066_vm10, %vm11819_vm11 }
 0x4e3   :  { %vm1370_vm2 = vmor %vm938_vm4, %vm1242_vm13  ;;  %vm11831_vm13 = vnez %v11210_v38 }
 0x4e4   :  { %2606 = vadd.xlane.f32.xlu2 %v2603_v18  ;;  %v2637_v18 = vshrl.u32 %v1672_v22, 16  ;;  %vm1547_vm9 = vmand %vm1370_vm2, %vm11824_vm5  ;;  %v11825_v22 = vld [vmem:[#allocation128_spill] sm:$0xff]  ;;  %vm11835_vm5 = vnez %v11214_v45 }
 0x4e5   :  { %2618 = vadd.xlane.f32.xlu1 %v2615_v1  ;;  %v1675_v31 = vsel %vm1547_vm9, 1, %v11263_v63 }
 0x4e6   :  { %v2639_v15 = vcvt.s32.f32 %v2637_v18  ;;  %v2672_v35 = vand.u32 65535, %v1675_v31 }
 0x4e7   :  { %v9169_v9 = vpop.xlane.xlu2 %2354 }
 0x4e8   :  { %11816 = vst [vmem:[#allocation123_spill] sm:$0xff] %v9169_v9  ;;  %4037 = vperm.xlu0 %6218, %v11799_v14   ;;  %v9174_v3 = vpop.xlane.xlu1 %2366  ;;  %v9183_v9 = vpop.xlane.xlu0 %2630  ;;  %v2674_v36 = vcvt.s32.f32 %v2672_v35  ;;  %v11836_v35 = vld [vmem:[#allocation131_spill] sm:$0xff] }
 0x4e9   :  { %11818 = vst [vmem:[#allocation126_spill] sm:$0xff] %v9174_v3  ;;  %v11827_v3 = vld [vmem:[#allocation132_spill] sm:$0xff] }
 0x4ea   :  { %11822 = vst [vmem:[#allocation125_spill] sm:$0xff] %v9183_v9  ;;  %v11828_v9 = vld [vmem:[#allocation36_spill] sm:$0xff] }
 0x4eb   :  { %vm1069_vm10 = vcmp.eq.f32.partialorder %v11828_v9, %v11827_v3  ;;  %vm941_vm4 = vcmp.lt.f32.partialorder %v11828_v9, %v11827_v3 }
 0x4ec   :  { %2628 = vadd.xlane.f32.xlu2 %v2626_v10  ;;  %v2660_v10 = vand.u32 65535, %v11825_v22  ;;  %vm1245_vm9 = vmand %vm1069_vm10, %vm11831_vm13  ;;  %v11833_v22 = vld [vmem:[#allocation130_spill] sm:$0xff] }
 0x4ed   :  { %2640 = vadd.xlane.f32.xlu1 %v2638_v33  ;;  %vm1373_vm2 = vmor %vm941_vm4, %vm1245_vm9 }
 0x4ee   :  { %v2662_v17 = vcvt.s32.f32 %v2660_v10  ;;  %vm1550_vm11 = vmand %vm1373_vm2, %vm11835_vm5 }
 0x4ef   :  { %v9180_v1 = vpop.xlane.xlu2 %2376 }
 0x4f0   :  { %11820 = vst [vmem:[#allocation192_spill] sm:$0xff] %v9180_v1  ;;  %4522 = vperm.xlu0 %6218, %v11806_v23   ;;  %v9186_v11 = vpop.xlane.xlu1 %2388  ;;  %v11829_v1 = vld [vmem:[#allocation19_spill] sm:$0xff]  ;;  %v9203_v18 = vpop.xlane.xlu0 %2652 }
 0x4f1   :  { %11823 = vst [vmem:[#allocation193_spill] sm:$0xff] %v9186_v11 }
 0x4f2   :  { %11832 = vst [vmem:[#allocation36_spill] sm:$0xff] %v9203_v18 }
 0x4f4   :  { %2642 = vadd.xlane.f32.xlu2 %v2639_v15  ;;  %v2673_v15 = vshrl.u32 %v1675_v31, 16 }
 0x4f5   :  { %2654 = vadd.xlane.f32.xlu1 %v2651_v34 }
 0x4f6   :  { %v2675_v3 = vcvt.s32.f32 %v2673_v15 }
 0x4f7   :  { %v9192_v33 = vpop.xlane.xlu2 %2390 }
 0x4f8   :  { %11826 = vst [vmem:[#allocation128_spill] sm:$0xff] %v9192_v33  ;;  %6223 = vset.pattern.permute.xlu0 %v11829_v1  ;;  %v9197_v11 = vpop.xlane.xlu1 %2402  ;;  %v2685_v33 = vshrl.u32 %v11833_v22, 16  ;;  %v9219_v22 = vpop.xlane.xlu0 %2666 }
 0x4f9   :  { %11830 = vst [vmem:[#allocation132_spill] sm:$0xff] %v9197_v11  ;;  %v11838_v11 = vld [vmem:[#allocation135_spill] sm:$0xff] }
 0x4fa   :  { %v2687_v38 = vcvt.s32.f32 %v2685_v33  ;;  %vm1072_vm10 = vcmp.eq.f32.partialorder %v11828_v9, %v11838_v11  ;;  %11839 = vst [vmem:[#allocation131_spill] sm:$0xff] %v9219_v22  ;;  %vm944_vm5 = vcmp.lt.f32.partialorder %v11828_v9, %v11838_v11 }
 0x4fc   :  { %2664 = vadd.xlane.f32.xlu2 %v2662_v17  ;;  %v1678_v17 = vsel %vm1550_vm11, 1, %v11263_v63  ;;  %vm1248_vm11 = vmand %vm1072_vm10, %vm11611_vm0 }
 0x4fd   :  { %2676 = vadd.xlane.f32.xlu1 %v2674_v36  ;;  %v2696_v36 = vand.u32 65535, %v11836_v35  ;;  %v2708_v18 = vand.u32 65535, %v1678_v17  ;;  %vm1376_vm4 = vmor %vm944_vm5, %vm1248_vm11  ;;  %v11841_v35 = vld [vmem:[#allocation134_spill] sm:$0xff] }
 0x4fe   :  { %vm1553_vm13 = vmand %vm1376_vm4, %vm11619_vm6 }
 0x4ff   :  { %v9205_v34 = vpop.xlane.xlu2 %2412  ;;  %v2698_v15 = vcvt.s32.f32 %v2696_v36  ;;  %v2710_v33 = vcvt.s32.f32 %v2708_v18  ;;  %v1681_v18 = vsel %vm1553_vm13, 1, %v11263_v63 }
 0x500   :  { %4067 = vperm.xlu0 %6223, %v11799_v14   ;;  %v9209_v10 = vpop.xlane.xlu1 %2424  ;;  %v9236_v54 = vpop.xlane.xlu0 %2688 }
 0x501   :  { %11834 = vst [vmem:[#allocation19_spill] sm:$0xff] %v9209_v10  ;;  %v2721_v10 = vshrl.u32 %v11841_v35, 16  ;;  %v2744_v35 = vand.u32 65535, %v1681_v18 }
 0x503   :  { %v2723_v36 = vcvt.s32.f32 %v2721_v10  ;;  %v2746_v10 = vcvt.s32.f32 %v2744_v35 }
 0x504   :  { %2678 = vadd.xlane.f32.xlu2 %v2675_v3  ;;  %v2709_v3 = vshrl.u32 %v1678_v17, 16  ;;  %v11845_v17 = vld [vmem:[#allocation136_spill] sm:$0xff] }
 0x505   :  { %2690 = vadd.xlane.f32.xlu1 %v2687_v38 }
 0x506   :  { %v2711_v11 = vcvt.s32.f32 %v2709_v3 }
 0x507   :  { %v9215_v31 = vpop.xlane.xlu2 %2426 }
 0x508   :  { %11837 = vst [vmem:[#allocation130_spill] sm:$0xff] %v9215_v31  ;;  %4552 = vperm.xlu0 %6223, %v11806_v23   ;;  %v9222_v45 = vpop.xlane.xlu1 %2438  ;;  %v11842_v31 = vld [vmem:[#allocation8_spill] sm:$0xff] }
 0x509   :  { %11840 = vst [vmem:[#allocation135_spill] sm:$0xff] %v9222_v45  ;;  %v11847_v45 = vld [vmem:[#allocation48_spill] sm:$0xff] }
 0x50a   :  { %11844 = vst [vmem:[#allocation8_spill] sm:$0xff] %v9236_v54  ;;  %vm1075_vm0 = vcmp.eq.f32.partialorder %v11828_v9, %v11847_v45  ;;  %vm947_vm6 = vcmp.lt.f32.partialorder %v11828_v9, %v11847_v45  ;;  %v11850_v54 = vld [vmem:[#allocation138_spill] sm:$0xff] }
 0x50b   :  { %vm1251_vm9 = vmand %vm1075_vm0, %vm11630_vm12 }
 0x50c   :  { %2700 = vadd.xlane.f32.xlu2 %v2698_v15  ;;  %v2732_v15 = vand.u32 65535, %v11845_v17  ;;  %vm1379_vm2 = vmor %vm947_vm6, %vm1251_vm9 }
 0x50d   :  { %2712 = vadd.xlane.f32.xlu1 %v2710_v33  ;;  %vm1556_vm10 = vmand %vm1379_vm2, %vm11637_vm1 }
 0x50e   :  { %v2734_v3 = vcvt.s32.f32 %v2732_v15  ;;  %v1684_v35 = vsel %vm1556_vm10, 1, %v11263_v63  ;;  %vm11879_vm10 = vnez %v11280_v42 }
 0x50f   :  { %v9228_v38 = vpop.xlane.xlu2 %2448 }
 0x510   :  { %6228 = vset.pattern.permute.xlu0 %v11842_v31  ;;  %v9232_v23 = vpop.xlane.xlu1 %2460 }
 0x511   :  { %11843 = vst [vmem:[#allocation134_spill] sm:$0xff] %v9232_v23  ;;  %v2757_v23 = vshrl.u32 %v11850_v54, 16 }
 0x513   :  { %v2759_v45 = vcvt.s32.f32 %v2757_v23 }
 0x514   :  { %2714 = vadd.xlane.f32.xlu2 %v2711_v11  ;;  %v9251_v11 = vpop.xlane.xlu0 %2702 }
 0x515   :  { %2726 = vadd.xlane.f32.xlu1 %v2723_v36  ;;  %11849 = vst [vmem:[#allocation194_spill] sm:$0xff] %v9251_v11  ;;  %v2745_v36 = vshrl.u32 %v1681_v18, 16  ;;  %v11855_v11 = vld [vmem:[#allocation144_spill] sm:$0xff] }
 0x516   :  { %vm1078_vm12 = vcmp.eq.f32.partialorder %v11828_v9, %v11855_v11  ;;  %vm950_vm1 = vcmp.lt.f32.partialorder %v11828_v9, %v11855_v11 }
 0x517   :  { %v9240_v33 = vpop.xlane.xlu2 %2462  ;;  %v2747_v44 = vcvt.s32.f32 %v2745_v36  ;;  %vm1254_vm5 = vmand %vm1078_vm12, %vm11645_vm7 }
 0x518   :  { %11846 = vst [vmem:[#allocation136_spill] sm:$0xff] %v9240_v33  ;;  %3904 = vperm.xlu0 %6228, %v11448_v53   ;;  %v9245_v60 = vpop.xlane.xlu1 %2474  ;;  %v11851_v33 = vld [vmem:[#allocation27_spill] sm:$0xff]  ;;  %vm1382_vm11 = vmor %vm950_vm1, %vm1254_vm5  ;;  %vm11885_vm5 = vnez %v11284_v40 }
 0x519   :  { %11848 = vst [vmem:[#allocation48_spill] sm:$0xff] %v9245_v60  ;;  %v2780_v60 = vand.u32 65535, %v1684_v35  ;;  %vm1559_vm4 = vmand %vm1382_vm11, %vm11654_vm8 }
 0x51b   :  { %v2782_v23 = vcvt.s32.f32 %v2780_v60  ;;  %v1687_v60 = vsel %vm1559_vm4, 1, %v11263_v63 }
 0x51c   :  { %2736 = vadd.xlane.f32.xlu2 %v2734_v3  ;;  %v11853_v3 = vld [vmem:[#allocation140_spill] sm:$0xff]  ;;  %v9267_v54 = vpop.xlane.xlu0 %2724 }
 0x51d   :  { %2748 = vadd.xlane.f32.xlu1 %v2746_v10  ;;  %v2768_v10 = vand.u32 65535, %v11853_v3  ;;  %11856 = vst [vmem:[#allocation140_spill] sm:$0xff] %v9267_v54  ;;  %v11859_v3 = vld [vmem:[#allocation141_spill] sm:$0xff] }
 0x51e   :  { %v2793_v54 = vshrl.u32 %v11859_v3, 16  ;;  %v2816_v3 = vand.u32 65535, %v1687_v60 }
 0x51f   :  { %v9253_v17 = vpop.xlane.xlu2 %2484  ;;  %v2770_v36 = vcvt.s32.f32 %v2768_v10 }
 0x520   :  { %4098 = vperm.xlu0 %6228, %v11851_v33   ;;  %v9257_v15 = vpop.xlane.xlu1 %2496  ;;  %v2795_v10 = vcvt.s32.f32 %v2793_v54  ;;  %v2818_v54 = vcvt.s32.f32 %v2816_v3 }
 0x521   :  { %11852 = vst [vmem:[#allocation138_spill] sm:$0xff] %v9257_v15  ;;  %v11857_v15 = vld [vmem:[#allocation28_spill] sm:$0xff] }
 0x524   :  { %2750 = vadd.xlane.f32.xlu2 %v2747_v44  ;;  %v2781_v44 = vshrl.u32 %v1684_v35, 16  ;;  %v9284_v11 = vpop.xlane.xlu0 %2738  ;;  %v11862_v35 = vld [vmem:[#allocation142_spill] sm:$0xff] }
 0x525   :  { %2762 = vadd.xlane.f32.xlu1 %v2759_v45 }
 0x526   :  { %v2783_v55 = vcvt.s32.f32 %v2781_v44 }
 0x527   :  { %v9263_v18 = vpop.xlane.xlu2 %2498 }
 0x528   :  { %11854 = vst [vmem:[#allocation27_spill] sm:$0xff] %v9263_v18  ;;  %4583 = vperm.xlu0 %6228, %v11857_v15   ;;  %v9270_v57 = vpop.xlane.xlu1 %2510  ;;  %v11860_v18 = vld [vmem:[#allocation13_spill] sm:$0xff] }
 0x529   :  { %11858 = vst [vmem:[#allocation144_spill] sm:$0xff] %v9270_v57  ;;  %v11864_v57 = vld [vmem:[#allocation33_spill] sm:$0xff] }
 0x52a   :  { %vm1081_vm7 = vcmp.eq.f32.partialorder %v11828_v9, %v11864_v57  ;;  %vm953_vm8 = vcmp.lt.f32.partialorder %v11828_v9, %v11864_v57 }
 0x52b   :  { %vm1257_vm13 = vmand %vm1081_vm7, %vm11669_vm15  ;;  %vm11889_vm7 = vnez %v11288_v26 }
 0x52c   :  { %2772 = vadd.xlane.f32.xlu2 %v2770_v36  ;;  %v2804_v36 = vand.u32 65535, %v11862_v35  ;;  %v9299_v44 = vpop.xlane.xlu0 %2760  ;;  %vm1385_vm0 = vmor %vm953_vm8, %vm1257_vm13  ;;  %v11867_v35 = vld [vmem:[#allocation52_spill] sm:$0xff] }
 0x52d   :  { %2784 = vadd.xlane.f32.xlu1 %v2782_v23  ;;  %11866 = vst [vmem:[#allocation142_spill] sm:$0xff] %v9299_v44  ;;  %vm1562_vm6 = vmand %vm1385_vm0, %vm11675_vm14  ;;  %v11872_v44 = vld [vmem:[#allocation40_spill] sm:$0xff] }
 0x52e   :  { %v1690_v57 = vsel %vm1562_vm6, 1, %v11263_v63  ;;  %vm11895_vm6 = vnez %v11293_v59 }
 0x52f   :  { %v9276_v45 = vpop.xlane.xlu2 %2520 }
 0x530   :  { %6233 = vset.pattern.permute.xlu0 %v11860_v18  ;;  %v9280_v22 = vpop.xlane.xlu1 %2532 }
 0x531   :  { %11861 = vst [vmem:[#allocation28_spill] sm:$0xff] %v9280_v22  ;;  %v2806_v22 = vcvt.s32.f32 %v2804_v36 }
 0x534   :  { %2786 = vadd.xlane.f32.xlu2 %v2783_v55  ;;  %v2817_v55 = vshrl.u32 %v1687_v60, 16  ;;  %v11870_v60 = vld [vmem:[#allocation145_spill] sm:$0xff] }
 0x535   :  { %2798 = vadd.xlane.f32.xlu1 %v2795_v10  ;;  %v2840_v3 = vand.u32 65535, %v11870_v60  ;;  %v11876_v60 = vld [vmem:[#allocation146_spill] sm:$0xff] }
 0x536   :  { %v2819_v9 = vcvt.s32.f32 %v2817_v55 }
 0x537   :  { %v9288_v23 = vpop.xlane.xlu2 %2534  ;;  %v2842_v55 = vcvt.s32.f32 %v2840_v3 }
 0x538   :  { %11863 = vst [vmem:[#allocation141_spill] sm:$0xff] %v9288_v23  ;;  %4128 = vperm.xlu0 %6233, %v11851_v33   ;;  %v9293_v48 = vpop.xlane.xlu1 %2546  ;;  %v2829_v23 = vshrl.u32 %v11867_v35, 16  ;;  %v2852_v35 = vand.u32 65535, %v1690_v57 }
 0x539   :  { %11865 = vst [vmem:[#allocation13_spill] sm:$0xff] %v9293_v48  ;;  %v11873_v48 = vld [vmem:[#allocation37_spill] sm:$0xff] }
 0x53a   :  { %v2831_v43 = vcvt.s32.f32 %v2829_v23  ;;  %vm1084_vm15 = vcmp.eq.f32.partialorder %v11873_v48, %v11872_v44  ;;  %vm956_vm14 = vcmp.lt.f32.partialorder %v11873_v48, %v11872_v44  ;;  %v2854_v23 = vcvt.s32.f32 %v2852_v35 }
 0x53b   :  { %vm1260_vm9 = vmand %vm1084_vm15, %vm11707_vm3 }
 0x53c   :  { %2808 = vadd.xlane.f32.xlu2 %v2806_v22  ;;  %v9310_v22 = vpop.xlane.xlu0 %2774  ;;  %vm1388_vm2 = vmor %vm956_vm14, %vm1260_vm9  ;;  %vm11898_vm9 = vnez %v11297_v0 }
 0x53d   :  { %2820 = vadd.xlane.f32.xlu1 %v2818_v54  ;;  %11869 = vst [vmem:[#allocation52_spill] sm:$0xff] %v9310_v22  ;;  %vm1565_vm12 = vmand %vm1388_vm2, %vm11879_vm10 }
 0x53e   :  { %v1693_v35 = vsel %vm1565_vm12, 1, %v11263_v63 }
 0x53f   :  { %v9301_v10 = vpop.xlane.xlu2 %2556 }
 0x540   :  { %4613 = vperm.xlu0 %6233, %v11857_v15   ;;  %v9305_v36 = vpop.xlane.xlu1 %2568 }
 0x541   :  { %11868 = vst [vmem:[#allocation33_spill] sm:$0xff] %v9305_v36  ;;  %v11874_v36 = vld [vmem:[#allocation16_spill] sm:$0xff] }
 0x544   :  { %2822 = vadd.xlane.f32.xlu2 %v2819_v9  ;;  %v2853_v9 = vshrl.u32 %v1690_v57, 16  ;;  %v9327_v22 = vpop.xlane.xlu0 %2796  ;;  %v11880_v57 = vld [vmem:[#allocation147_spill] sm:$0xff] }
 0x545   :  { %2834 = vadd.xlane.f32.xlu1 %v2831_v43  ;;  %11877 = vst [vmem:[#allocation37_spill] sm:$0xff] %v9327_v22 }
 0x546   :  { %v2855_v19 = vcvt.s32.f32 %v2853_v9 }
 0x547   :  { %v9313_v54 = vpop.xlane.xlu2 %2570 }
 0x548   :  { %11871 = vst [vmem:[#allocation145_spill] sm:$0xff] %v9313_v54  ;;  %6238 = vset.pattern.permute.xlu0 %v11874_v36  ;;  %v9318_v29 = vpop.xlane.xlu1 %2582  ;;  %v2865_v54 = vshrl.u32 %v11876_v60, 16  ;;  %v2888_v60 = vand.u32 65535, %v1693_v35 }
 0x549   :  { %11875 = vst [vmem:[#allocation40_spill] sm:$0xff] %v9318_v29  ;;  %v11882_v29 = vld [vmem:[#allocation59_spill] sm:$0xff] }
 0x54a   :  { %v2867_v44 = vcvt.s32.f32 %v2865_v54  ;;  %vm1087_vm3 = vcmp.eq.f32.partialorder %v11873_v48, %v11882_v29  ;;  %vm959_vm1 = vcmp.lt.f32.partialorder %v11873_v48, %v11882_v29  ;;  %v2890_v54 = vcvt.s32.f32 %v2888_v60 }
 0x54b   :  { %vm1263_vm11 = vmand %vm1087_vm3, %vm11885_vm5  ;;  %vm11904_vm3 = vnez %v11302_v56 }
 0x54c   :  { %2844 = vadd.xlane.f32.xlu2 %v2842_v55  ;;  %v2876_v55 = vand.u32 65535, %v11880_v57  ;;  %v9343_v42 = vpop.xlane.xlu0 %2810  ;;  %vm1391_vm4 = vmor %vm959_vm1, %vm1263_vm11  ;;  %v11886_v57 = vld [vmem:[#allocation43_spill] sm:$0xff]  ;;  %vm11906_vm11 = vnez %v11306_v5 }
 0x54d   :  { %2856 = vadd.xlane.f32.xlu1 %v2854_v23  ;;  %11884 = vst [vmem:[#allocation59_spill] sm:$0xff] %v9343_v42  ;;  %vm1568_vm8 = vmand %vm1391_vm4, %vm11889_vm7  ;;  %v11893_v42 = vld [vmem:[#allocation65_spill] sm:$0xff] }
 0x54e   :  { %v2878_v9 = vcvt.s32.f32 %v2876_v55  ;;  %v1696_v60 = vsel %vm1568_vm8, 1, %v11263_v63  ;;  %vm1090_vm13 = vcmp.eq.f32.partialorder %v11873_v48, %v11893_v42  ;;  %vm962_vm0 = vcmp.lt.f32.partialorder %v11873_v48, %v11893_v42 }
 0x54f   :  { %v9324_v43 = vpop.xlane.xlu2 %2592  ;;  %vm1266_vm15 = vmand %vm1090_vm13, %vm11895_vm6  ;;  %vm11911_vm13 = vnez %v11309_v50 }
 0x550   :  { %4158 = vperm.xlu0 %6238, %v11851_v33   ;;  %v9330_v3 = vpop.xlane.xlu1 %2604  ;;  %vm1394_vm14 = vmor %vm962_vm0, %vm1266_vm15  ;;  %vm11915_vm15 = vnez %v11314_v39 }
 0x551   :  { %11878 = vst [vmem:[#allocation16_spill] sm:$0xff] %v9330_v3  ;;  %v2901_v3 = vshrl.u32 %v11886_v57, 16  ;;  %v2924_v57 = vand.u32 65535, %v1696_v60  ;;  %vm1571_vm2 = vmand %vm1394_vm14, %vm11898_vm9 }
 0x553   :  { %v2903_v55 = vcvt.s32.f32 %v2901_v3  ;;  %v2926_v3 = vcvt.s32.f32 %v2924_v57  ;;  %v11899_v57 = vld [vmem:[#allocation150_spill] sm:$0xff] }
 0x554   :  { %2858 = vadd.xlane.f32.xlu2 %v2855_v19  ;;  %v2889_v19 = vshrl.u32 %v1693_v35, 16  ;;  %v9357_v40 = vpop.xlane.xlu0 %2832  ;;  %v11891_v35 = vld [vmem:[#allocation45_spill] sm:$0xff] }
 0x555   :  { %2870 = vadd.xlane.f32.xlu1 %v2867_v44 }
 0x556   :  { %v2891_v29 = vcvt.s32.f32 %v2889_v19 }
 0x557   :  { %v9336_v23 = vpop.xlane.xlu2 %2606 }
 0x558   :  { %11881 = vst [vmem:[#allocation146_spill] sm:$0xff] %v9336_v23  ;;  %4643 = vperm.xlu0 %6238, %v11857_v15   ;;  %v9341_v22 = vpop.xlane.xlu1 %2618  ;;  %v11887_v23 = vld [vmem:[#allocation17_spill] sm:$0xff] }
 0x559   :  { %11883 = vst [vmem:[#allocation147_spill] sm:$0xff] %v9341_v22 }
 0x55a   :  { %11890 = vst [vmem:[#allocation17_spill] sm:$0xff] %v9357_v40  ;;  %v11896_v40 = vld [vmem:[#allocation148_spill] sm:$0xff] }
 0x55c   :  { %2880 = vadd.xlane.f32.xlu2 %v2878_v9  ;;  %v2912_v9 = vand.u32 65535, %v11891_v35 }
 0x55d   :  { %2892 = vadd.xlane.f32.xlu1 %v2890_v54 }
 0x55e   :  { %v2914_v19 = vcvt.s32.f32 %v2912_v9  ;;  %v1699_v9 = vsel %vm1571_vm2, 1, %v11263_v63 }
 0x55f   :  { %v9349_v44 = vpop.xlane.xlu2 %2628 }
 0x560   :  { %6243 = vset.pattern.permute.xlu0 %v11887_v23  ;;  %v9353_v22 = vpop.xlane.xlu1 %2640 }
 0x561   :  { %11888 = vst [vmem:[#allocation43_spill] sm:$0xff] %v9353_v22  ;;  %v2937_v22 = vshrl.u32 %v11896_v40, 16 }
 0x563   :  { %v2939_v42 = vcvt.s32.f32 %v2937_v22 }
 0x564   :  { %2894 = vadd.xlane.f32.xlu2 %v2891_v29  ;;  %v9372_v29 = vpop.xlane.xlu0 %2846 }
 0x565   :  { %2906 = vadd.xlane.f32.xlu1 %v2903_v55  ;;  %v2925_v55 = vshrl.u32 %v1696_v60, 16 }
 0x567   :  { %v9361_v54 = vpop.xlane.xlu2 %2642  ;;  %v2927_v59 = vcvt.s32.f32 %v2925_v55 }
 0x568   :  { %11892 = vst [vmem:[#allocation45_spill] sm:$0xff] %v9361_v54  ;;  %4188 = vperm.xlu0 %6243, %v11851_v33   ;;  %v9366_v26 = vpop.xlane.xlu1 %2654 }
 0x569   :  { %11894 = vst [vmem:[#allocation65_spill] sm:$0xff] %v9366_v26  ;;  %v11901_v26 = vld [vmem:[#allocation50_spill] sm:$0xff] }
 0x56a   :  { %vm1093_vm10 = vcmp.eq.f32.partialorder %v11873_v48, %v11901_v26  ;;  %vm965_vm12 = vcmp.lt.f32.partialorder %v11873_v48, %v11901_v26 }
 0x56b   :  { %vm1269_vm1 = vmand %vm1093_vm10, %vm11904_vm3  ;;  %vm11920_vm10 = vnez %v11204_v32 }
 0x56c   :  { %2916 = vadd.xlane.f32.xlu2 %v2914_v19  ;;  %v2948_v19 = vand.u32 65535, %v11899_v57  ;;  %v9388_v40 = vpop.xlane.xlu0 %2868  ;;  %vm1397_vm5 = vmor %vm965_vm12, %vm1269_vm1  ;;  %v11905_v57 = vld [vmem:[#allocation151_spill] sm:$0xff]  ;;  %vm11923_vm1 = vnez %v11763_v16 }
 0x56d   :  { %2928 = vadd.xlane.f32.xlu1 %v2926_v3  ;;  %v2960_v3 = vand.u32 65535, %v1699_v9  ;;  %11902 = vst [vmem:[#allocation50_spill] sm:$0xff] %v9388_v40  ;;  %v2973_v40 = vshrl.u32 %v11905_v57, 16  ;;  %vm1574_vm4 = vmand %vm1397_vm5, %vm11906_vm11 }
 0x56e   :  { %v2950_v55 = vcvt.s32.f32 %v2948_v19  ;;  %v1702_v56 = vsel %vm1574_vm4, 1, %v11263_v63 }
 0x56f   :  { %v9374_v35 = vpop.xlane.xlu2 %2664  ;;  %v2962_v22 = vcvt.s32.f32 %v2960_v3  ;;  %v11908_v3 = vld [vmem:[#allocation152_spill] sm:$0xff]  ;;  %v2997_v57 = vshrl.u32 %v1702_v56, 16 }
 0x570   :  { %v9377_v54 = vpop.xlane.xlu1 %2676  ;;  %4673 = vperm.xlu0 %6243, %v11857_v15  }
 0x571   :  { %11897 = vst [vmem:[#allocation148_spill] sm:$0xff] %v9377_v54  ;;  %v2975_v54 = vcvt.s32.f32 %v2973_v40 }
 0x574   :  { %2930 = vadd.xlane.f32.xlu2 %v2927_v59  ;;  %v2961_v59 = vshrl.u32 %v1699_v9, 16 }
 0x575   :  { %2942 = vadd.xlane.f32.xlu1 %v2939_v42 }
 0x576   :  { %v2963_v19 = vcvt.s32.f32 %v2961_v59 }
 0x577   :  { %v9384_v60 = vpop.xlane.xlu2 %2678 }
 0x578   :  { %11900 = vst [vmem:[#allocation150_spill] sm:$0xff] %v9384_v60  ;;  %6250 = vset.pattern.permute.xlu0 %v11263_v63  ;;  %v9391_v0 = vpop.xlane.xlu1 %2690  ;;  %v11910_v60 = vld [vmem:[#allocation149_spill] sm:$0xff] }
 0x579   :  { %11903 = vst [vmem:[#allocation195_spill] sm:$0xff] %v9391_v0  ;;  %v9402_v0 = vpop.xlane.xlu0 %2882  ;;  %vm1096_vm7 = vcmp.eq.f32.partialorder %v11873_v48, %v11910_v60  ;;  %vm968_vm8 = vcmp.lt.f32.partialorder %v11873_v48, %v11910_v60  ;;  %v2999_v48 = vcvt.s32.f32 %v2997_v57 }
 0x57a   :  { %vm1272_vm0 = vmand %vm1096_vm7, %vm11911_vm13  ;;  %vm11927_vm7 = vnez %v11770_v46 }
 0x57b   :  { %vm1400_vm6 = vmor %vm968_vm8, %vm1272_vm0  ;;  %vm11929_vm0 = vnez %v11776_v30 }
 0x57c   :  { %2952 = vadd.xlane.f32.xlu2 %v2950_v55  ;;  %v2984_v55 = vand.u32 65535, %v11908_v3  ;;  %v11914_v3 = vld [vmem:[#allocation55_spill] sm:$0xff]  ;;  %vm1577_vm14 = vmand %vm1400_vm6, %vm11915_vm15 }
 0x57d   :  { %2964 = vadd.xlane.f32.xlu1 %v2962_v22  ;;  %v2996_v22 = vand.u32 65535, %v1702_v56  ;;  %v1705_v50 = vsel %vm1577_vm14, 1, %v11263_v63 }
 0x57e   :  { %v2986_v5 = vcvt.s32.f32 %v2984_v55  ;;  %v3032_v56 = vand.u32 65535, %v1705_v50  ;;  %v3033_v57 = vshrl.u32 %v1705_v50, 16 }
 0x57f   :  { %v9397_v42 = vpop.xlane.xlu2 %2700  ;;  %v2998_v40 = vcvt.s32.f32 %v2996_v22  ;;  %v11916_v22 = vld [vmem:[#allocation56_spill] sm:$0xff] }
 0x580   :  { %v9404_v26 = vpop.xlane.xlu1 %2712 }
 0x581   :  { %11907 = vst [vmem:[#allocation151_spill] sm:$0xff] %v9404_v26  ;;  %v9416_v59 = vpop.xlane.xlu0 %2904  ;;  %v3009_v26 = vshrl.u32 %v11914_v3, 16 }
 0x582   :  { %11912 = vst [vmem:[#allocation149_spill] sm:$0xff] %v9416_v59  ;;  %v11918_v59 = vld [vmem:[#allocation51_spill] sm:$0xff] }
 0x583   :  { %v3011_v60 = vcvt.s32.f32 %v3009_v26  ;;  %vm1099_vm9 = vcmp.eq.f32.partialorder %v8522_v28, %v11918_v59  ;;  %vm971_vm2 = vcmp.lt.f32.partialorder %v8522_v28, %v11918_v59  ;;  %v3034_v26 = vcvt.s32.f32 %v3032_v56 }
 0x584   :  { %2966 = vadd.xlane.f32.xlu2 %v2963_v19  ;;  %vm1275_vm12 = vmand %vm1099_vm9, %vm11920_vm10  ;;  %v3035_v59 = vcvt.s32.f32 %v3033_v57  ;;  %v3056_v56 = vand.u32 65535, %v8555_v41  ;;  %vm11934_vm9 = vnez %v11230_v61 }
 0x585   :  { %2978 = vadd.xlane.f32.xlu1 %v2975_v54  ;;  %vm1403_vm3 = vmor %vm971_vm2, %vm1275_vm12  ;;  %vm11936_vm12 = vnez %v11788_v47 }
 0x586   :  { %vm1580_vm5 = vmand %vm1403_vm3, %vm11923_vm1  ;;  %v3058_v16 = vcvt.s32.f32 %v3056_v56 }
 0x587   :  { %v9408_v9 = vpop.xlane.xlu2 %2714  ;;  %v1708_v32 = vsel %vm1580_vm5, 1, %v11263_v63 }
 0x588   :  { %11909 = vst [vmem:[#allocation152_spill] sm:$0xff] %v9408_v9  ;;  %v9418_v54 = vpop.xlane.xlu1 %2726  ;;  %v3069_v41 = vshrl.u32 %v1708_v32, 16 }
 0x589   :  { %11913 = vst [vmem:[#allocation196_spill] sm:$0xff] %v9418_v54  ;;  %v9426_v55 = vpop.xlane.xlu0 %2918  ;;  %v12003_v54 = vld [vmem:[#allocation157_spill] sm:$0xff] }
 0x58a   :  { %v3071_v56 = vcvt.s32.f32 %v3069_v41  ;;  %v1780_v9 = vcvt.f32.s32 %v12003_v54 }
 0x58c   :  { %2988 = vadd.xlane.f32.xlu2 %v2986_v5  ;;  %v3020_v5 = vand.u32 65535, %v11916_v22 }
 0x58d   :  { %3000 = vadd.xlane.f32.xlu1 %v2998_v40 }
 0x58e   :  { %v3022_v39 = vcvt.s32.f32 %v3020_v5 }
 0x58f   :  { %v9420_v19 = vpop.xlane.xlu2 %2736 }
 0x590   :  { %v9433_v3 = vpop.xlane.xlu1 %2748 }
 0x591   :  { %11919 = vst [vmem:[#allocation56_spill] sm:$0xff] %v9433_v3 }
 0x594   :  { %3002 = vadd.xlane.f32.xlu2 %v2999_v48 }
 0x595   :  { %3014 = vadd.xlane.f32.xlu1 %v3011_v60  ;;  %v11921_v60 = vld [vmem:[#allocation61_spill] sm:$0xff] }
 0x596   :  { %v3045_v22 = vshrl.u32 %v11921_v60, 16 }
 0x597   :  { %v9429_v40 = vpop.xlane.xlu2 %2750 }
 0x598   :  { %11917 = vst [vmem:[#allocation55_spill] sm:$0xff] %v9429_v40  ;;  %v9442_v40 = vpop.xlane.xlu0 %2940  ;;  %v9446_v5 = vpop.xlane.xlu1 %2762  ;;  %v3047_v3 = vcvt.s32.f32 %v3045_v22 }
 0x599   :  { %11922 = vst [vmem:[#allocation51_spill] sm:$0xff] %v9442_v40 }
 0x59a   :  { %11924 = vst [vmem:[#allocation61_spill] sm:$0xff] %v9446_v5 }
 0x59c   :  { %3024 = vadd.xlane.f32.xlu2 %v3022_v39  ;;  %v3068_v39 = vand.u32 65535, %v1708_v32 }
 0x59d   :  { %3036 = vadd.xlane.f32.xlu1 %v3034_v26  ;;  %v11926_v26 = vld [vmem:[#allocation53_spill] sm:$0xff] }
 0x59e   :  { %vm1102_vm11 = vcmp.eq.f32.partialorder %v8522_v28, %v11926_v26  ;;  %vm974_vm4 = vcmp.lt.f32.partialorder %v8522_v28, %v11926_v26  ;;  %v3070_v57 = vcvt.s32.f32 %v3068_v39 }
 0x59f   :  { %v9439_v48 = vpop.xlane.xlu2 %2772  ;;  %vm1278_vm8 = vmand %vm1102_vm11, %vm11927_vm7  ;;  %vm11941_vm11 = vnez %v11244_v62 }
 0x5a0   :  { %v9454_v60 = vpop.xlane.xlu0 %2954  ;;  %v9460_v22 = vpop.xlane.xlu1 %2784  ;;  %vm1406_vm13 = vmor %vm974_vm4, %vm1278_vm8  ;;  %vm11942_vm8 = vnez %v11248_v49 }
 0x5a1   :  { %11928 = vst [vmem:[#allocation53_spill] sm:$0xff] %v9460_v22  ;;  %vm1583_vm6 = vmand %vm1406_vm13, %vm11929_vm0  ;;  %v11933_v22 = vld [vmem:[#allocation98_spill] sm:$0xff] }
 0x5a2   :  { %v1711_v46 = vsel %vm1583_vm6, 1, %v11263_v63  ;;  %vm1105_vm15 = vcmp.eq.f32.partialorder %v8522_v28, %v11933_v22  ;;  %vm977_vm14 = vcmp.lt.f32.partialorder %v8522_v28, %v11933_v22 }
 0x5a3   :  { %vm1281_vm2 = vmand %vm1105_vm15, %vm11934_vm9  ;;  %vm11947_vm15 = vnez %v11256_v37 }
 0x5a4   :  { %3038 = vadd.xlane.f32.xlu2 %v3035_v59  ;;  %v3081_v59 = vshrl.u32 %v8585_v52, 16  ;;  %vm1409_vm10 = vmor %vm977_vm14, %vm1281_vm2  ;;  %vm11951_vm2 = vnez %v11259_v6 }
 0x5a5   :  { %3050 = vadd.xlane.f32.xlu1 %v3047_v3  ;;  %vm1586_vm3 = vmand %vm1409_vm10, %vm11936_vm12 }
 0x5a6   :  { %v3083_v40 = vcvt.s32.f32 %v3081_v59  ;;  %v3117_v59 = vshrl.u32 %v8650_v2, 16  ;;  %v1714_v61 = vsel %vm1586_vm3, 1, %v11263_v63 }
 0x5a7   :  { %v9450_v50 = vpop.xlane.xlu2 %2786 }
 0x5a8   :  { %11925 = vst [vmem:[#allocation197_spill] sm:$0xff] %v9450_v50  ;;  %v9467_v26 = vpop.xlane.xlu0 %2976  ;;  %v9470_v39 = vpop.xlane.xlu1 %2798 }
 0x5a9   :  { %11930 = vst [vmem:[#allocation198_spill] sm:$0xff] %v9467_v26 }
 0x5aa   :  { %11931 = vst [vmem:[#allocation199_spill] sm:$0xff] %v9470_v39  ;;  %v12000_v39 = vld [vmem:[#allocation70_spill] sm:$0xff] }
 0x5ac   :  { %3060 = vadd.xlane.f32.xlu2 %v3058_v16  ;;  %v3092_v16 = vand.u32 65535, %v8618_v7  ;;  %v3105_v7 = vshrl.u32 %v1711_v46, 16 }
 0x5ad   :  { %3072 = vadd.xlane.f32.xlu1 %v3070_v57  ;;  %v3104_v57 = vand.u32 65535, %v1711_v46  ;;  %v3140_v46 = vand.u32 65535, %v1714_v61 }
 0x5ae   :  { %v3094_v52 = vcvt.s32.f32 %v3092_v16  ;;  %v3107_v22 = vcvt.s32.f32 %v3105_v7  ;;  %v3119_v16 = vcvt.s32.f32 %v3117_v59 }
 0x5af   :  { %v9462_v3 = vpop.xlane.xlu2 %2808  ;;  %v3106_v30 = vcvt.s32.f32 %v3104_v57  ;;  %v3128_v57 = vand.u32 65535, %v8683_v13  ;;  %v3142_v7 = vcvt.s32.f32 %v3140_v46  ;;  %v3141_v13 = vshrl.u32 %v1714_v61, 16 }
 0x5b0   :  { %v3164_v46 = vand.u32 65535, %v8746_v58 }
 0x5b1   :  { %v3130_v47 = vcvt.s32.f32 %v3128_v57  ;;  %v3143_v57 = vcvt.s32.f32 %v3141_v13 }
 0x5b2   :  { %v3166_v49 = vcvt.s32.f32 %v3164_v46 }
 0x5b4   :  { %3074 = vadd.xlane.f32.xlu2 %v3071_v56  ;;  %v9486_v56 = vpop.xlane.xlu1 %2820 }
 0x5b5   :  { %3086 = vadd.xlane.f32.xlu1 %v3083_v40  ;;  %v9481_v40 = vpop.xlane.xlu0 %2990  ;;  %11935 = vst [vmem:[#allocation98_spill] sm:$0xff] %v9486_v56 }
 0x5b7   :  { %v9473_v32 = vpop.xlane.xlu2 %2822 }
 0x5b8   :  { %11932 = vst [vmem:[#allocation200_spill] sm:$0xff] %v9473_v32  ;;  %v11999_v32 = vld [vmem:[#allocation21_spill] sm:$0xff] }
 0x5bc   :  { %3096 = vadd.xlane.f32.xlu2 %v3094_v52  ;;  %v9498_v26 = vpop.xlane.xlu1 %2834 }
 0x5bd   :  { %3108 = vadd.xlane.f32.xlu1 %v3106_v30  ;;  %v11938_v30 = vld [vmem:[#allocation58_spill] sm:$0xff]  ;;  %v9496_v2 = vpop.xlane.xlu0 %3012  ;;  %11940 = vst [vmem:[#allocation202_spill] sm:$0xff] %v9498_v26 }
 0x5be   :  { %vm1108_vm1 = vcmp.eq.f32.partialorder %v8522_v28, %v11938_v30  ;;  %11939 = vst [vmem:[#allocation58_spill] sm:$0xff] %v9496_v2  ;;  %vm980_vm5 = vcmp.lt.f32.partialorder %v8522_v28, %v11938_v30 }
 0x5bf   :  { %v9483_v41 = vpop.xlane.xlu2 %2844  ;;  %vm1284_vm4 = vmand %vm1108_vm1, %vm11941_vm11  ;;  %vm11957_vm1 = vnez %v11270_v51 }
 0x5c0   :  { %vm1412_vm7 = vmor %vm980_vm5, %vm1284_vm4  ;;  %vm11960_vm4 = vnez %v11274_v24 }
 0x5c1   :  { %vm1589_vm13 = vmand %vm1412_vm7, %vm11942_vm8  ;;  %vm5702_vm8 = vcmask 130112  }
 0x5c2   :  { %v1717_v62 = vsel %vm1589_vm13, 1, %v11263_v63  ;;  %vm5706_vm13 = vcmask 195712  }
 0x5c4   :  { %3110 = vadd.xlane.f32.xlu2 %v3107_v22  ;;  %v3153_v22 = vshrl.u32 %v8715_v25, 16  ;;  %v9511_v30 = vpop.xlane.xlu1 %2856 }
 0x5c5   :  { %3122 = vadd.xlane.f32.xlu1 %v3119_v16  ;;  %v9509_v16 = vpop.xlane.xlu0 %3026  ;;  %11944 = vst [vmem:[#allocation204_spill] sm:$0xff] %v9511_v30 }
 0x5c6   :  { %11943 = vst [vmem:[#allocation203_spill] sm:$0xff] %v9509_v16  ;;  %v3155_v2 = vcvt.s32.f32 %v3153_v22 }
 0x5c7   :  { %v9492_v52 = vpop.xlane.xlu2 %2858 }
 0x5c8   :  { %11937 = vst [vmem:[#allocation201_spill] sm:$0xff] %v9492_v52 }
 0x5cc   :  { %3132 = vadd.xlane.f32.xlu2 %v3130_v47  ;;  %v3176_v47 = vand.u32 65535, %v1717_v62  ;;  %v9525_v58 = vpop.xlane.xlu1 %2870 }
 0x5cd   :  { %3144 = vadd.xlane.f32.xlu1 %v3142_v7  ;;  %v11946_v7 = vld [vmem:[#allocation77_spill] sm:$0xff]  ;;  %v9523_v13 = vpop.xlane.xlu0 %3048  ;;  %11949 = vst [vmem:[#allocation206_spill] sm:$0xff] %v9525_v58  ;;  %v11955_v58 = vld [vmem:[#allocation62_spill] sm:$0xff] }
 0x5ce   :  { %vm1111_vm0 = vcmp.eq.f32.partialorder %v8522_v28, %v11946_v7  ;;  %vm983_vm6 = vcmp.lt.f32.partialorder %v8522_v28, %v11946_v7  ;;  %v3178_v25 = vcvt.s32.f32 %v3176_v47  ;;  %11948 = vst [vmem:[#allocation77_spill] sm:$0xff] %v9523_v13  ;;  %vm1114_vm12 = vcmp.eq.f32.partialorder %v8522_v28, %v11955_v58 }
 0x5cf   :  { %v9504_v59 = vpop.xlane.xlu2 %2880  ;;  %vm1287_vm14 = vmand %vm1111_vm0, %vm11947_vm15  ;;  %vm986_vm3 = vcmp.lt.f32.partialorder %v8522_v28, %v11955_v58  ;;  %vm5710_vm0 = vcmask 261312   ;;  %vm5718_vm15 = vcmask 392512  }
 0x5d0   :  { %vm1415_vm9 = vmor %vm983_vm6, %vm1287_vm14  ;;  %vm5714_vm6 = vcmask 326912   ;;  %vm5722_vm14 = vcmask 458112  }
 0x5d1   :  { %vm1592_vm10 = vmand %vm1415_vm9, %vm11951_vm2  ;;  %vm5726_vm9 = vcmask 523712   ;;  %vm5730_vm2 = vcmask 589312  }
 0x5d2   :  { %v1720_v37 = vsel %vm1592_vm10, 1, %v11263_v63  ;;  %vm1290_vm5 = vmand %vm1114_vm12, %vm11957_vm1  ;;  %vm5734_vm10 = vcmask 654912   ;;  %vm5738_vm12 = vcmask 720512   ;;  %vm5746_vm1 = vcmask 851712  }
 0x5d3   :  { %vm1418_vm11 = vmor %vm986_vm3, %vm1290_vm5  ;;  %vm5742_vm3 = vcmask 786112   ;;  %vm5750_vm5 = vcmask 917312  }
 0x5d4   :  { %3146 = vadd.xlane.f32.xlu2 %v3143_v57  ;;  %v11950_v57 = vld [vmem:[#allocation161_spill] sm:$0xff]  ;;  %vm1595_vm7 = vmand %vm1418_vm11, %vm11960_vm4  ;;  %vm5754_vm11 = vcmask 982912   ;;  %vm5758_vm4 = vcmask 1048512  }
 0x5d5   :  { %3158 = vadd.xlane.f32.xlu1 %v3155_v2  ;;  %v3177_v2 = vshrl.u32 %v1717_v62, 16  ;;  %v3189_v30 = vshrl.u32 %v11950_v57, 16  ;;  %v9533_v47 = vpop.xlane.xlu0 %3062  ;;  %v3212_v62 = vand.u32 65535, %v1720_v37  ;;  %v9540_v57 = vpop.xlane.xlu1 %2892  ;;  %v1723_v51 = vsel %vm1595_vm7, 1, %v11263_v63 }
 0x5d6   :  { %11952 = vst [vmem:[#allocation161_spill] sm:$0xff] %v9533_v47  ;;  %v3249_v24 = vshrl.u32 %v1723_v51, 16  ;;  %vm5977_vm7 = vcmask 1041409  }
 0x5d7   :  { %v9515_v61 = vpop.xlane.xlu2 %2894  ;;  %v3179_v46 = vcvt.s32.f32 %v3177_v2  ;;  %v3191_v7 = vcvt.s32.f32 %v3189_v30  ;;  %11956 = vst [vmem:[#allocation62_spill] sm:$0xff] %v9540_v57  ;;  %v3214_v30 = vcvt.s32.f32 %v3212_v62  ;;  %v3213_v2 = vshrl.u32 %v1720_v37, 16 }
 0x5d8   :  { %11945 = vst [vmem:[#allocation205_spill] sm:$0xff] %v9515_v61  ;;  %v3236_v62 = vand.u32 65535, %v8864_v20 }
 0x5d9   :  { %v3215_v28 = vcvt.s32.f32 %v3213_v2 }
 0x5dc   :  { %3168 = vadd.xlane.f32.xlu2 %v3166_v49  ;;  %v11953_v49 = vld [vmem:[#allocation164_spill] sm:$0xff] }
 0x5dd   :  { %3180 = vadd.xlane.f32.xlu1 %v3178_v25  ;;  %v3200_v25 = vand.u32 65535, %v11953_v49 }
 0x5df   :  { %v9527_v22 = vpop.xlane.xlu2 %2916  ;;  %v3202_v6 = vcvt.s32.f32 %v3200_v25  ;;  %v9553_v25 = vpop.xlane.xlu1 %2906 }
 0x5e0   :  { %11961 = vst [vmem:[#allocation207_spill] sm:$0xff] %v9553_v25 }
 0x5e4   :  { %3182 = vadd.xlane.f32.xlu2 %v3179_v46 }
 0x5e5   :  { %3194 = vadd.xlane.f32.xlu1 %v3191_v7  ;;  %v11958_v7 = vld [vmem:[#allocation166_spill] sm:$0xff] }
 0x5e6   :  { %v3225_v49 = vshrl.u32 %v11958_v7, 16  ;;  %v3238_v7 = vcvt.s32.f32 %v3236_v62 }
 0x5e7   :  { %v9536_v13 = vpop.xlane.xlu2 %2930  ;;  %v9561_v57 = vpop.xlane.xlu1 %2928 }
 0x5e8   :  { %11954 = vst [vmem:[#allocation164_spill] sm:$0xff] %v9536_v13  ;;  %v9549_v13 = vpop.xlane.xlu0 %3084  ;;  %v3227_v58 = vcvt.s32.f32 %v3225_v49  ;;  %v3251_v49 = vcvt.s32.f32 %v3249_v24 }
 0x5e9   :  { %11959 = vst [vmem:[#allocation166_spill] sm:$0xff] %v9549_v13 }
 0x5ea   :  { %11964 = vst [vmem:[#allocation210_spill] sm:$0xff] %v9561_v57 }
 0x5ec   :  { %3204 = vadd.xlane.f32.xlu2 %v3202_v6  ;;  %v3248_v6 = vand.u32 65535, %v1723_v51 }
 0x5ed   :  { %3216 = vadd.xlane.f32.xlu1 %v3214_v30 }
 0x5ee   :  { %v3250_v13 = vcvt.s32.f32 %v3248_v6 }
 0x5ef   :  { %v9546_v46 = vpop.xlane.xlu2 %2952 }
 0x5f0   :  { %v9559_v30 = vpop.xlane.xlu0 %3098 }
 0x5f1   :  { %11963 = vst [vmem:[#allocation209_spill] sm:$0xff] %v9559_v30  ;;  %v12039_v30 = vld [vmem:[#allocation22_spill] sm:$0xff] }
 0x5f4   :  { %3218 = vadd.xlane.f32.xlu2 %v3215_v28 }
 0x5f5   :  { %3230 = vadd.xlane.f32.xlu1 %v3227_v58  ;;  %v9567_v58 = vpop.xlane.xlu1 %2942 }
 0x5f6   :  { %11967 = vst [vmem:[#allocation213_spill] sm:$0xff] %v9567_v58 }
 0x5f7   :  { %v9557_v37 = vpop.xlane.xlu2 %2966 }
 0x5f8   :  { %11962 = vst [vmem:[#allocation208_spill] sm:$0xff] %v9557_v37  ;;  %v9565_v28 = vpop.xlane.xlu0 %3120 }
 0x5f9   :  { %11966 = vst [vmem:[#allocation212_spill] sm:$0xff] %v9565_v28  ;;  %v11978_v28 = vld [vmem:[#allocation9_spill] sm:$0xff] }
 0x5fc   :  { %3240 = vadd.xlane.f32.xlu2 %v3238_v7 }
 0x5fd   :  { %3252 = vadd.xlane.f32.xlu1 %v3250_v13  ;;  %v9575_v62 = vpop.xlane.xlu1 %2964 }
 0x5fe   :  { %11971 = vst [vmem:[#allocation217_spill] sm:$0xff] %v9575_v62 }
 0x5ff   :  { %v9563_v2 = vpop.xlane.xlu2 %2988 }
 0x600   :  { %11965 = vst [vmem:[#allocation211_spill] sm:$0xff] %v9563_v2  ;;  %v9571_v37 = vpop.xlane.xlu0 %3134 }
 0x601   :  { %11969 = vst [vmem:[#allocation215_spill] sm:$0xff] %v9571_v37 }
 0x604   :  { %3254 = vadd.xlane.f32.xlu2 %v3251_v49 }
 0x605   :  { %v9582_v6 = vpop.xlane.xlu1 %2978 }
 0x606   :  { %11974 = vst [vmem:[#allocation220_spill] sm:$0xff] %v9582_v6 }
 0x607   :  { %v9569_v20 = vpop.xlane.xlu2 %3002 }
 0x608   :  { %11968 = vst [vmem:[#allocation214_spill] sm:$0xff] %v9569_v20  ;;  %v9580_v51 = vpop.xlane.xlu0 %3156 }
 0x609   :  { %11973 = vst [vmem:[#allocation219_spill] sm:$0xff] %v9580_v51 }
 0x60d   :  { %v9590_v49 = vpop.xlane.xlu1 %3000 }
 0x60e   :  { %11977 = vst [vmem:[#allocation223_spill] sm:$0xff] %v9590_v49 }
 0x60f   :  { %v9573_v25 = vpop.xlane.xlu2 %3024 }
 0x610   :  { %11970 = vst [vmem:[#allocation216_spill] sm:$0xff] %v9573_v25  ;;  %v9588_v24 = vpop.xlane.xlu0 %3170  ;;  %v12046_v25 = vld [vmem:[#allocation41_spill] sm:$0xff] }
 0x611   :  { %11976 = vst [vmem:[#allocation222_spill] sm:$0xff] %v9588_v24  ;;  %v2057_v16 = vcvt.f32.s32 %v12046_v25 }
 0x615   :  { %v9599_v51 = vpop.xlane.xlu1 %3014 }
 0x616   :  { %3910 = vperm.xlu1 %6131, %v11448_v53   ;;  %11981 = vst [vmem:[#allocation225_spill] sm:$0xff] %v9599_v51 }
 0x617   :  { %v9578_v13 = vpop.xlane.xlu2 %3038 }
 0x618   :  { %11972 = vst [vmem:[#allocation218_spill] sm:$0xff] %v9578_v13  ;;  %v9596_v13 = vpop.xlane.xlu0 %3192 }
 0x619   :  { %11980 = vst [vmem:[#allocation224_spill] sm:$0xff] %v9596_v13 }
 0x61c   :  { %3916 = vperm.xlu2 %6132, %v11448_v53  }
 0x61d   :  { %v9610_v57 = vpop.xlane.xlu1 %3036 }
 0x61e   :  { %6133 = vset.pattern.permute.xlu1 %v6860_v8  ;;  %11985 = vst [vmem:[#allocation229_spill] sm:$0xff] %v9610_v57 }
 0x61f   :  { %v9586_v7 = vpop.xlane.xlu2 %3060 }
 0x620   :  { %11975 = vst [vmem:[#allocation221_spill] sm:$0xff] %v9586_v7  ;;  %v9605_v62 = vpop.xlane.xlu0 %3206 }
 0x621   :  { %11983 = vst [vmem:[#allocation227_spill] sm:$0xff] %v9605_v62 }
 0x624   :  { %6134 = vset.pattern.permute.xlu2 %v11978_v28 }
 0x625   :  { %v9618_v51 = vpop.xlane.xlu1 %3050 }
 0x626   :  { %3922 = vperm.xlu1 %6133, %v11448_v53   ;;  %11988 = vst [vmem:[#allocation232_spill] sm:$0xff] %v9618_v51 }
 0x627   :  { %v9594_v20 = vpop.xlane.xlu2 %3074 }
 0x628   :  { %11979 = vst [vmem:[#allocation9_spill] sm:$0xff] %v9594_v20  ;;  %v9616_v20 = vpop.xlane.xlu0 %3228 }
 0x629   :  { %11987 = vst [vmem:[#allocation231_spill] sm:$0xff] %v9616_v20 }
 0x62c   :  { %3928 = vperm.xlu2 %6134, %v11448_v53  }
 0x62e   :  { %6135 = vset.pattern.permute.xlu1 %v11860_v18 }
 0x62f   :  { %v9602_v6 = vpop.xlane.xlu2 %3096 }
 0x630   :  { %11982 = vst [vmem:[#allocation226_spill] sm:$0xff] %v9602_v6  ;;  %v9624_v61 = vpop.xlane.xlu0 %3242 }
 0x631   :  { %11990 = vst [vmem:[#allocation234_spill] sm:$0xff] %v9624_v61 }
 0x634   :  { %6136 = vset.pattern.permute.xlu2 %v11811_v4 }
 0x636   :  { %3934 = vperm.xlu1 %6135, %v11448_v53  }
 0x637   :  { %v9608_v49 = vpop.xlane.xlu2 %3110 }
 0x638   :  { %11984 = vst [vmem:[#allocation228_spill] sm:$0xff] %v9608_v49  ;;  %v9626_v49 = vpop.xlane.xlu1 %3072  ;;  %v9632_v52 = vpop.permute.xlu0 %4219 }
 0x639   :  { %11991 = vst [vmem:[#allocation235_spill] sm:$0xff] %v9626_v49 }
 0x63a   :  { %11993 = vst [vmem:[#allocation237_spill] sm:$0xff] %v9632_v52 }
 0x63c   :  { %3940 = vperm.xlu2 %6136, %v11448_v53  }
 0x63e   :  { %6137 = vset.pattern.permute.xlu1 %v6938_v21 }
 0x63f   :  { %v9614_v13 = vpop.xlane.xlu2 %3132 }
 0x640   :  { %11986 = vst [vmem:[#allocation230_spill] sm:$0xff] %v9614_v13  ;;  %v9635_v20 = vpop.xlane.xlu1 %3086 }
 0x641   :  { %11994 = vst [vmem:[#allocation238_spill] sm:$0xff] %v9635_v20  ;;  %v1781_v20 = vcvt.f32.s32 %v12000_v39 }
 0x644   :  { %6138 = vset.pattern.permute.xlu2 %v6884_v12 }
 0x646   :  { %3952 = vperm.xlu1 %6137, %v11448_v53  }
 0x647   :  { %v9622_v58 = vpop.xlane.xlu2 %3146 }
 0x648   :  { %11989 = vst [vmem:[#allocation233_spill] sm:$0xff] %v9622_v58  ;;  %v9640_v58 = vpop.permute.xlu0 %4249  ;;  %v9646_v56 = vpop.xlane.xlu1 %3108 }
 0x649   :  { %11997 = vst [vmem:[#allocation241_spill] sm:$0xff] %v9646_v56 }
 0x64c   :  { %3958 = vperm.xlu2 %6138, %v11448_v53  }
 0x64e   :  { %6139 = vset.pattern.permute.xlu1 %v11874_v36 }
 0x64f   :  { %v9630_v57 = vpop.xlane.xlu2 %3168 }
 0x650   :  { %11992 = vst [vmem:[#allocation236_spill] sm:$0xff] %v9630_v57  ;;  %v9648_v26 = vpop.permute.xlu0 %4279  ;;  %v9655_v5 = vpop.xlane.xlu1 %3122  ;;  %v12015_v57 = vld [vmem:[#allocation127_spill] sm:$0xff] }
 0x651   :  { %11998 = vst [vmem:[#allocation242_spill] sm:$0xff] %v9648_v26  ;;  %v1877_v24 = vcvt.f32.s32 %v12015_v57 }
 0x652   :  { %12002 = vst [vmem:[#allocation70_spill] sm:$0xff] %v9655_v5 }
 0x654   :  { %6140 = vset.pattern.permute.xlu2 %v11829_v1 }
 0x656   :  { %3964 = vperm.xlu1 %6139, %v11448_v53  }
 0x657   :  { %v9638_v51 = vpop.xlane.xlu2 %3182 }
 0x658   :  { %11995 = vst [vmem:[#allocation239_spill] sm:$0xff] %v9638_v51  ;;  %v1782_v51 = vshll.u32 %v1781_v20, 16  ;;  %v9659_v61 = vpop.permute.xlu0 %4310  ;;  %v9664_v39 = vpop.xlane.xlu1 %3144 }
 0x659   :  { %12004 = vst [vmem:[#allocation157_spill] sm:$0xff] %v9659_v61 }
 0x65a   :  { %v1783_v52 = vadd.s32 %v1782_v51, %v1780_v9  ;;  %12006 = vst [vmem:[#allocation244_spill] sm:$0xff] %v9664_v39  ;;  %v12009_v51 = vld [vmem:[#allocation10_spill] sm:$0xff] }
 0x65c   :  { %3970 = vperm.xlu2 %6140, %v11448_v53   ;;  %v3264_v26 = vcvt.s32.f32 %v1783_v52 }
 0x65e   :  { %6141 = vset.pattern.permute.xlu1 %v11381_v27 }
 0x65f   :  { %v9644_v49 = vpop.xlane.xlu2 %3204 }
 0x660   :  { %11996 = vst [vmem:[#allocation240_spill] sm:$0xff] %v9644_v49  ;;  %v9670_v54 = vpop.permute.xlu0 %4340  ;;  %v9673_v9 = vpop.xlane.xlu1 %3158 }
 0x661   :  { %12008 = vst [vmem:[#allocation246_spill] sm:$0xff] %v9673_v9 }
 0x664   :  { %6142 = vset.pattern.permute.xlu2 %v11999_v32 }
 0x666   :  { %3982 = vperm.xlu1 %6141, %v11448_v53  }
 0x667   :  { %v9653_v50 = vpop.xlane.xlu2 %3218 }
 0x668   :  { %12001 = vst [vmem:[#allocation21_spill] sm:$0xff] %v9653_v50  ;;  %v3392_v50 = vmul.f32 -0.5, %v3264_v26  ;;  %v9678_v39 = vpop.permute.xlu0 %4370 }
 0x669   :  { %12011 = vst [vmem:[#allocation247_spill] sm:$0xff] %v9678_v39  ;;  %v12016_v39 = vld [vmem:[#allocation167_spill] sm:$0xff] }
 0x66a   :  { %v3524_v5 = vmul.f32 1.442695, %v3392_v50  ;;  %v1876_v13 = vcvt.f32.s32 %v12016_v39 }
 0x66c   :  { %3988 = vperm.xlu2 %6142, %v11448_v53   ;;  %6251 = vpow2.f32 %v3524_v5  ;;  %v9684_v5 = vpop.xlane.xlu1 %3180 }
 0x66e   :  { %6143 = vset.pattern.permute.xlu1 %v11887_v23 }
 0x66f   :  { %v9662_v56 = vpop.xlane.xlu2 %3240 }
 0x670   :  { %12005 = vst [vmem:[#allocation243_spill] sm:$0xff] %v9662_v56  ;;  %v12013_v56 = vld [vmem:[#allocation75_spill] sm:$0xff]  ;;  %v9688_v37 = vpop.permute.xlu0 %4401 }
 0x671   :  { %v1840_v49 = vcvt.f32.s32 %v12013_v56  ;;  %12017 = vst [vmem:[#allocation75_spill] sm:$0xff] %v9688_v37  ;;  %v12032_v37 = vld [vmem:[#allocation137_spill] sm:$0xff] }
 0x672   :  { %v6252_v61 = vpop.eup %6251 }
 0x674   :  { %6144 = vset.pattern.permute.xlu2 %v11842_v31 }
 0x676   :  { %3994 = vperm.xlu1 %6143, %v11448_v53   ;;  %v12012_v53 = vld [vmem:[#allocation120_spill] sm:$0xff] }
 0x677   :  { %v9668_v20 = vpop.xlane.xlu2 %3254  ;;  %v1841_v26 = vcvt.f32.s32 %v12012_v53  ;;  %12014 = vst [vmem:[#allocation120_spill] sm:$0xff] %v9684_v5  ;;  %v1878_v53 = vshll.u32 %v1877_v24, 16  ;;  %v9692_v5 = vpop.xlane.xlu1 %3194 }
 0x678   :  { %12007 = vst [vmem:[#allocation245_spill] sm:$0xff] %v9668_v20  ;;  %v3776_v20 = vsub.f32 0.0, %v6252_v61 }
 0x679   :  { %v1842_v62 = vshll.u32 %v1841_v26, 16  ;;  %v1879_v56 = vadd.s32 %v1878_v53, %v1876_v13  ;;  %12018 = vst [vmem:[#allocation127_spill] sm:$0xff] %v9692_v5 }
 0x67b   :  { %v3272_v57 = vcvt.s32.f32 %v1879_v56 }
 0x67c   :  { %4001 = vperm.xlu2 %6144, %v11799_v14  }
 0x67e   :  { %6145 = vset.pattern.permute.xlu1 %v12009_v51 }
 0x67f   :  { %v9676_v52 = vpop.permute.xlu2 %3916  ;;  %v9698_v24 = vpop.xlane.xlu1 %3216 }
 0x680   :  { %12010 = vst [vmem:[#allocation10_spill] sm:$0xff] %v9676_v52  ;;  %v1843_v52 = vadd.s32 %v1842_v62, %v1840_v49  ;;  %v9695_v62 = vpop.permute.xlu0 %3946  ;;  %v3400_v49 = vmul.f32 -0.5, %v3272_v57 }
 0x681   :  { %12019 = vst [vmem:[#allocation167_spill] sm:$0xff] %v9695_v62 }
 0x682   :  { %v3269_v61 = vcvt.s32.f32 %v1843_v52  ;;  %v3540_v39 = vmul.f32 1.442695, %v3400_v49  ;;  %12020 = vst [vmem:[#allocation248_spill] sm:$0xff] %v9698_v24 }
 0x684   :  { %6146 = vset.pattern.permute.xlu2 %v6860_v8 }
 0x686   :  { %4013 = vperm.xlu1 %6145, %v11799_v14  }
 0x687   :  { %v3929_v50 = vpop.permute.xlu2 %3928  ;;  %v9707_v53 = vpop.xlane.xlu1 %3230 }
 0x688   :  { %v4807_v9 = vmul.f32 %v3929_v50, %v3776_v20  ;;  %v3397_v20 = vmul.f32 -0.5, %v3269_v61  ;;  %v9701_v13 = vpop.permute.xlu0 %4431 }
 0x68a   :  { %v4939_v63 = vmul.f32 1.442695, %v4807_v9 }
 0x68c   :  { %6253 = vpow2.f32 %v4939_v63  ;;  %4019 = vperm.xlu2 %6146, %v11799_v14   ;;  %v3534_v63 = vmul.f32 1.442695, %v3397_v20 }
 0x68e   :  { %6147 = vset.pattern.permute.xlu1 %v11978_v28  ;;  %6255 = vpow2.f32 %v3534_v63 }
 0x68f   :  { %6257 = vpow2.f32 %v3540_v39  ;;  %v9712_v24 = vpop.xlane.xlu1 %3252 }
 0x690   :  { %v3977_v20 = vpop.permute.xlu0 %3976  ;;  %12024 = vst [vmem:[#allocation250_spill] sm:$0xff] %v9712_v24 }
 0x692   :  { %v6254_v6 = vpop.eup %6253 }
 0x693   :  { %5328 = vperm.xlu0 %6250, %v6254_v6   ;;  %v12022_v6 = vld [vmem:[#allocation14_spill] sm:$0xff] }
 0x694   :  { %6148 = vset.pattern.permute.xlu2 %v11860_v18  ;;  %v6256_v52 = vpop.eup %6255  ;;  %12023 = vst [vmem:[#allocation14_spill] sm:$0xff] %v9707_v53 }
 0x695   :  { %v3781_v26 = vsub.f32 0.0, %v6256_v52  ;;  %v6258_v50 = vpop.eup %6257 }
 0x696   :  { %4025 = vperm.xlu1 %6147, %v11799_v14   ;;  %v9703_v9 = vpop.permute.xlu2 %3940  ;;  %v3784_v57 = vsub.f32 0.0, %v6258_v50 }
 0x697   :  { %12021 = vst [vmem:[#allocation249_spill] sm:$0xff] %v9703_v9 }
 0x698   :  { %v4815_v49 = vmul.f32 %v3977_v20, %v3784_v57  ;;  %v12028_v20 = vld [vmem:[#allocation39_spill] sm:$0xff] }
 0x699   :  { %v1913_v57 = vcvt.f32.s32 %v12028_v20  ;;  %v1949_v20 = vcvt.f32.s32 %v12032_v37 }
 0x69a   :  { %v4955_v39 = vmul.f32 1.442695, %v4815_v49  ;;  %v12030_v49 = vld [vmem:[#allocation81_spill] sm:$0xff] }
 0x69c   :  { %4031 = vperm.xlu2 %6148, %v11799_v14  }
 0x69e   :  { %6149 = vset.pattern.permute.xlu1 %v12022_v6 }
 0x6a4   :  { %6150 = vset.pattern.permute.xlu2 %v6938_v21 }
 0x6a6   :  { %v3959_v61 = vpop.permute.xlu2 %3958  ;;  %4043 = vperm.xlu1 %6149, %v11799_v14  }
 0x6a7   :  { %v4812_v56 = vmul.f32 %v3959_v61, %v3781_v26  ;;  %v9716_v26 = vpop.permute.xlu1 %3910  ;;  %v12026_v61 = vld [vmem:[#allocation18_spill] sm:$0xff] }
 0x6a8   :  { %12025 = vst [vmem:[#allocation251_spill] sm:$0xff] %v9716_v26  ;;  %v9741_v26 = vpop.permute.xlu0 %4461 }
 0x6a9   :  { %v4949_v63 = vmul.f32 1.442695, %v4812_v56 }
 0x6ab   :  { %6259 = vpow2.f32 %v4949_v63 }
 0x6ac   :  { %4049 = vperm.xlu2 %6150, %v11799_v14   ;;  %6261 = vpow2.f32 %v4955_v39  ;;  %v1912_v39 = vcvt.f32.s32 %v12030_v49  ;;  %v12034_v49 = vld [vmem:[#allocation171_spill] sm:$0xff] }
 0x6ae   :  { %6151 = vset.pattern.permute.xlu1 %v6884_v12 }
 0x6af   :  { %v9720_v56 = vpop.permute.xlu1 %3922 }
 0x6b0   :  { %12027 = vst [vmem:[#allocation18_spill] sm:$0xff] %v9720_v56 }
 0x6b1   :  { %v6260_v52 = vpop.eup %6259 }
 0x6b2   :  { %5343 = vperm.xlu0 %6250, %v6260_v52   ;;  %v6262_v50 = vpop.eup %6261  ;;  %v1914_v52 = vshll.u32 %v1913_v57, 16  ;;  %v1948_v57 = vcvt.f32.s32 %v12034_v49 }
 0x6b4   :  { %6152 = vset.pattern.permute.xlu2 %v11874_v36 }
 0x6b6   :  { %4055 = vperm.xlu1 %6151, %v11799_v14  }
 0x6b7   :  { %v9725_v63 = vpop.permute.xlu1 %3934 }
 0x6b8   :  { %12029 = vst [vmem:[#allocation39_spill] sm:$0xff] %v9725_v63  ;;  %v9738_v63 = vpop.permute.xlu2 %3970 }
 0x6b9   :  { %12035 = vst [vmem:[#allocation171_spill] sm:$0xff] %v9738_v63 }
 0x6ba   :  { %5352 = vperm.xlu0 %6250, %v6262_v50   ;;  %v1915_v50 = vadd.s32 %v1914_v52, %v1912_v39  ;;  %v1950_v39 = vshll.u32 %v1949_v20, 16  ;;  %v12036_v52 = vld [vmem:[#allocation11_spill] sm:$0xff] }
 0x6bb   :  { %v1985_v56 = vcvt.f32.s32 %v12036_v52  ;;  %12037 = vst [vmem:[#allocation11_spill] sm:$0xff] %v9741_v26  ;;  %v12042_v52 = vld [vmem:[#allocation34_spill] sm:$0xff] }
 0x6bc   :  { %4061 = vperm.xlu2 %6152, %v11799_v14   ;;  %v3275_v53 = vcvt.s32.f32 %v1915_v50  ;;  %v1951_v50 = vadd.s32 %v1950_v39, %v1948_v57  ;;  %v2021_v26 = vcvt.f32.s32 %v12042_v52  ;;  %v9752_v57 = vpop.permute.xlu0 %4007 }
 0x6bd   :  { %v1986_v37 = vshll.u32 %v1985_v56, 16  ;;  %12043 = vst [vmem:[#allocation34_spill] sm:$0xff] %v9752_v57 }
 0x6be   :  { %6153 = vset.pattern.permute.xlu1 %v12026_v61  ;;  %v3403_v5 = vmul.f32 -0.5, %v3275_v53  ;;  %v12038_v53 = vld [vmem:[#allocation173_spill] sm:$0xff] }
 0x6bf   :  { %v9730_v24 = vpop.permute.xlu1 %3952 }
 0x6c0   :  { %12031 = vst [vmem:[#allocation81_spill] sm:$0xff] %v9730_v24  ;;  %v3546_v9 = vmul.f32 1.442695, %v3403_v5  ;;  %v1984_v24 = vcvt.f32.s32 %v12038_v53  ;;  %v3278_v5 = vcvt.s32.f32 %v1951_v50  ;;  %v2022_v50 = vshll.u32 %v2021_v26, 16 }
 0x6c1   :  { %v2058_v26 = vshll.u32 %v2057_v16, 16 }
 0x6c2   :  { %6263 = vpow2.f32 %v3546_v9  ;;  %v1987_v49 = vadd.s32 %v1986_v37, %v1984_v24  ;;  %v3406_v63 = vmul.f32 -0.5, %v3278_v5  ;;  %v12044_v9 = vld [vmem:[#allocation175_spill] sm:$0xff] }
 0x6c3   :  { %v2020_v56 = vcvt.f32.s32 %v12044_v9 }
 0x6c4   :  { %6154 = vset.pattern.permute.xlu2 %v11381_v27  ;;  %v3552_v24 = vmul.f32 1.442695, %v3406_v63 }
 0x6c5   :  { %v2023_v52 = vadd.s32 %v2022_v50, %v2020_v56 }
 0x6c6   :  { %4073 = vperm.xlu1 %6153, %v11799_v14   ;;  %v9748_v7 = vpop.permute.xlu2 %3988 }
 0x6c7   :  { %12041 = vst [vmem:[#allocation22_spill] sm:$0xff] %v9748_v7  ;;  %v3284_v63 = vcvt.s32.f32 %v2023_v52 }
 0x6c8   :  { %v9735_v62 = vpop.permute.xlu1 %3964  ;;  %v6264_v20 = vpop.eup %6263 }
 0x6c9   :  { %12033 = vst [vmem:[#allocation137_spill] sm:$0xff] %v9735_v62  ;;  %v3787_v39 = vsub.f32 0.0, %v6264_v20  ;;  %v9761_v20 = vpop.permute.xlu0 %4492  ;;  %v3412_v9 = vmul.f32 -0.5, %v3284_v63 }
 0x6ca   :  { %12048 = vst [vmem:[#allocation41_spill] sm:$0xff] %v9761_v20 }
 0x6cb   :  { %v3564_v50 = vmul.f32 1.442695, %v3412_v9 }
 0x6cc   :  { %4079 = vperm.xlu2 %6154, %v11799_v14  }
 0x6ce   :  { %6155 = vset.pattern.permute.xlu1 %v11999_v32 }
 0x6d4   :  { %6156 = vset.pattern.permute.xlu2 %v11887_v23 }
 0x6d6   :  { %4085 = vperm.xlu1 %6155, %v11799_v14   ;;  %v9756_v7 = vpop.permute.xlu2 %4001 }
 0x6d7   :  { %12045 = vst [vmem:[#allocation175_spill] sm:$0xff] %v9756_v7 }
 0x6d8   :  { %v9746_v62 = vpop.permute.xlu1 %3982 }
 0x6d9   :  { %12040 = vst [vmem:[#allocation173_spill] sm:$0xff] %v9746_v62 }
 0x6dc   :  { %4091 = vperm.xlu2 %6156, %v11799_v14   ;;  %v3281_v14 = vcvt.s32.f32 %v1987_v49  ;;  %v12047_v49 = vld [vmem:[#allocation177_spill] sm:$0xff] }
 0x6dd   :  { %v2056_v57 = vcvt.f32.s32 %v12047_v49 }
 0x6de   :  { %6157 = vset.pattern.permute.xlu1 %v12039_v30  ;;  %v3409_v37 = vmul.f32 -0.5, %v3281_v14 }
 0x6df   :  { %v2059_v14 = vadd.s32 %v2058_v26, %v2056_v57 }
 0x6e0   :  { %v3558_v5 = vmul.f32 1.442695, %v3409_v37  ;;  %v9768_v37 = vpop.permute.xlu0 %4037 }
 0x6e1   :  { %12050 = vst [vmem:[#allocation252_spill] sm:$0xff] %v9768_v37 }
 0x6e4   :  { %6158 = vset.pattern.permute.xlu2 %v12009_v51 }
 0x6e6   :  { %4104 = vperm.xlu1 %6157, %v11851_v33  }
 0x6e8   :  { %v3995_v53 = vpop.permute.xlu1 %3994 }
 0x6e9   :  { %v4818_v62 = vmul.f32 %v3995_v53, %v3787_v39  ;;  %v9764_v39 = vpop.permute.xlu2 %4019 }
 0x6ea   :  { %12049 = vst [vmem:[#allocation177_spill] sm:$0xff] %v9764_v39 }
 0x6eb   :  { %v4961_v47 = vmul.f32 1.442695, %v4818_v62 }
 0x6ec   :  { %4110 = vperm.xlu2 %6158, %v11851_v33  }
 0x6ed   :  { %6265 = vpow2.f32 %v4961_v47  ;;  %v3287_v47 = vcvt.s32.f32 %v2059_v14  ;;  %v9772_v14 = vpop.permute.xlu0 %4522 }
 0x6ee   :  { %6159 = vset.pattern.permute.xlu1 %v6860_v8  ;;  %6267 = vpow2.f32 %v3552_v24 }
 0x6ef   :  { %6269 = vpow2.f32 %v3558_v5  ;;  %v3415_v57 = vmul.f32 -0.5, %v3287_v47 }
 0x6f0   :  { %6271 = vpow2.f32 %v3564_v50 }
 0x6f1   :  { %v3570_v63 = vmul.f32 1.442695, %v3415_v57 }
 0x6f3   :  { %v6266_v62 = vpop.eup %6265 }
 0x6f4   :  { %v6268_v25 = vpop.eup %6267  ;;  %6160 = vset.pattern.permute.xlu2 %v11978_v28  ;;  %5361 = vperm.xlu0 %6250, %v6266_v62  }
 0x6f5   :  { %v3790_v56 = vsub.f32 0.0, %v6268_v25  ;;  %v6270_v53 = vpop.eup %6269 }
 0x6f6   :  { %4116 = vperm.xlu1 %6159, %v11851_v33   ;;  %v4032_v52 = vpop.permute.xlu2 %4031  ;;  %v3793_v49 = vsub.f32 0.0, %v6270_v53  ;;  %v6272_v25 = vpop.eup %6271 }
 0x6f7   :  { %v3796_v47 = vsub.f32 0.0, %v6272_v25 }
 0x6f8   :  { %v4014_v16 = vpop.permute.xlu1 %4013  ;;  %v4824_v26 = vmul.f32 %v4032_v52, %v3793_v49 }
 0x6f9   :  { %v4821_v24 = vmul.f32 %v4014_v16, %v3790_v56 }
 0x6fa   :  { %v4973_v62 = vmul.f32 1.442695, %v4824_v26 }
 0x6fb   :  { %v4967_v5 = vmul.f32 1.442695, %v4821_v24  ;;  %v4068_v24 = vpop.permute.xlu0 %4067 }
 0x6fc   :  { %4122 = vperm.xlu2 %6160, %v11851_v33  }
 0x6fd   :  { %6273 = vpow2.f32 %v4967_v5 }
 0x6fe   :  { %6161 = vset.pattern.permute.xlu1 %v11811_v4  ;;  %6275 = vpow2.f32 %v3570_v63 }
 0x6ff   :  { %6277 = vpow2.f32 %v4973_v62  ;;  %v12051_v62 = vld [vmem:[#allocation47_spill] sm:$0xff] }
 0x700   :  { %v2093_v25 = vcvt.f32.s32 %v12051_v62  ;;  %v12058_v62 = vld [vmem:[#allocation181_spill] sm:$0xff] }
 0x703   :  { %v6274_v9 = vpop.eup %6273 }
 0x704   :  { %6162 = vset.pattern.permute.xlu2 %v12022_v6  ;;  %5370 = vperm.xlu0 %6250, %v6274_v9   ;;  %v6276_v50 = vpop.eup %6275 }
 0x705   :  { %v6278_v57 = vpop.eup %6277  ;;  %v3799_v52 = vsub.f32 0.0, %v6276_v50 }
 0x706   :  { %v4050_v56 = vpop.permute.xlu2 %4049  ;;  %4134 = vperm.xlu1 %6161, %v11851_v33  }
 0x707   :  { %v4827_v53 = vmul.f32 %v4050_v56, %v3796_v47  ;;  %v4830_v49 = vmul.f32 %v4068_v24, %v3799_v52  ;;  %v12053_v47 = vld [vmem:[#allocation179_spill] sm:$0xff] }
 0x708   :  { %v9785_v9 = vpop.permute.xlu1 %4025  ;;  %v2092_v56 = vcvt.f32.s32 %v12053_v47 }
 0x709   :  { %v4979_v16 = vmul.f32 1.442695, %v4827_v53  ;;  %v4985_v5 = vmul.f32 1.442695, %v4830_v49  ;;  %12052 = vst [vmem:[#allocation47_spill] sm:$0xff] %v9785_v9  ;;  %v2094_v53 = vshll.u32 %v2093_v25, 16  ;;  %v2128_v25 = vcvt.f32.s32 %v12058_v62 }
 0x70a   :  { %v12056_v49 = vld [vmem:[#allocation54_spill] sm:$0xff] }
 0x70b   :  { %6279 = vpow2.f32 %v4979_v16  ;;  %v2095_v50 = vadd.s32 %v2094_v53, %v2092_v56  ;;  %v12060_v53 = vld [vmem:[#allocation69_spill] sm:$0xff] }
 0x70c   :  { %4140 = vperm.xlu2 %6162, %v11851_v33   ;;  %5379 = vperm.xlu0 %6250, %v6278_v57   ;;  %6281 = vpow2.f32 %v4985_v5  ;;  %v9792_v57 = vpop.permute.xlu0 %4552  ;;  %v2129_v5 = vcvt.f32.s32 %v12056_v49  ;;  %v2165_v20 = vcvt.f32.s32 %v12060_v53  ;;  %v12065_v53 = vld [vmem:[#allocation60_spill] sm:$0xff] }
 0x70d   :  { %v3290_v24 = vcvt.s32.f32 %v2095_v50  ;;  %12055 = vst [vmem:[#allocation253_spill] sm:$0xff] %v9792_v57 }
 0x70e   :  { %6163 = vset.pattern.permute.xlu1 %v6938_v21  ;;  %v2130_v56 = vshll.u32 %v2129_v5, 16  ;;  %v2166_v49 = vshll.u32 %v2165_v20, 16 }
 0x70f   :  { %v3418_v52 = vmul.f32 -0.5, %v3290_v24  ;;  %v12062_v24 = vld [vmem:[#allocation183_spill] sm:$0xff] }
 0x710   :  { %v2131_v57 = vadd.s32 %v2130_v56, %v2128_v25  ;;  %v12067_v56 = vld [vmem:[#allocation12_spill] sm:$0xff] }
 0x711   :  { %v6280_v26 = vpop.eup %6279 }
 0x712   :  { %v6282_v63 = vpop.eup %6281 }
 0x714   :  { %6164 = vset.pattern.permute.xlu2 %v6884_v12  ;;  %5388 = vperm.xlu0 %6250, %v6280_v26   ;;  %v9803_v50 = vpop.permute.xlu0 %3904 }
 0x715   :  { %12061 = vst [vmem:[#allocation69_spill] sm:$0xff] %v9803_v50  ;;  %v12070_v50 = vld [vmem:[#allocation66_spill] sm:$0xff] }
 0x716   :  { %4146 = vperm.xlu1 %6163, %v11851_v33   ;;  %v9800_v47 = vpop.permute.xlu2 %4061  ;;  %v2237_v2 = vcvt.f32.s32 %v12070_v50 }
 0x717   :  { %12059 = vst [vmem:[#allocation181_spill] sm:$0xff] %v9800_v47  ;;  %v2201_v47 = vcvt.f32.s32 %v12065_v53 }
 0x718   :  { %v9790_v16 = vpop.permute.xlu1 %4043 }
 0x719   :  { %12054 = vst [vmem:[#allocation179_spill] sm:$0xff] %v9790_v16  ;;  %v2164_v16 = vcvt.f32.s32 %v12062_v24 }
 0x71b   :  { %v2167_v62 = vadd.s32 %v2166_v49, %v2164_v16 }
 0x71c   :  { %4152 = vperm.xlu2 %6164, %v11851_v33   ;;  %5397 = vperm.xlu0 %6250, %v6282_v63   ;;  %v3576_v63 = vmul.f32 1.442695, %v3418_v52  ;;  %v3293_v52 = vcvt.s32.f32 %v2131_v57  ;;  %v9814_v25 = vpop.permute.xlu0 %4098  ;;  %v2202_v57 = vshll.u32 %v2201_v47, 16 }
 0x71d   :  { %12066 = vst [vmem:[#allocation60_spill] sm:$0xff] %v9814_v25 }
 0x71e   :  { %6165 = vset.pattern.permute.xlu1 %v11829_v1  ;;  %6283 = vpow2.f32 %v3576_v63  ;;  %v3421_v9 = vmul.f32 -0.5, %v3293_v52  ;;  %v12068_v63 = vld [vmem:[#allocation187_spill] sm:$0xff] }
 0x71f   :  { %v2200_v20 = vcvt.f32.s32 %v12068_v63 }
 0x720   :  { %v3582_v16 = vmul.f32 1.442695, %v3421_v9 }
 0x721   :  { %v2203_v53 = vadd.s32 %v2202_v57, %v2200_v20 }
 0x723   :  { %v3299_v9 = vcvt.s32.f32 %v2203_v53 }
 0x724   :  { %6166 = vset.pattern.permute.xlu2 %v12026_v61  ;;  %v6284_v5 = vpop.eup %6283 }
 0x725   :  { %v3802_v24 = vsub.f32 0.0, %v6284_v5  ;;  %v9823_v5 = vpop.permute.xlu0 %4583 }
 0x726   :  { %4164 = vperm.xlu1 %6165, %v11851_v33   ;;  %v9810_v37 = vpop.permute.xlu2 %4079  ;;  %12072 = vst [vmem:[#allocation187_spill] sm:$0xff] %v9823_v5  ;;  %v12085_v5 = vld [vmem:[#allocation191_spill] sm:$0xff] }
 0x727   :  { %12064 = vst [vmem:[#allocation254_spill] sm:$0xff] %v9810_v37 }
 0x728   :  { %v9797_v26 = vpop.permute.xlu1 %4055 }
 0x729   :  { %12057 = vst [vmem:[#allocation54_spill] sm:$0xff] %v9797_v26 }
 0x72c   :  { %4170 = vperm.xlu2 %6166, %v11851_v33  }
 0x72e   :  { %6167 = vset.pattern.permute.xlu1 %v11381_v27 }
 0x734   :  { %6168 = vset.pattern.permute.xlu2 %v11999_v32 }
 0x736   :  { %4176 = vperm.xlu1 %6167, %v11851_v33   ;;  %v9818_v37 = vpop.permute.xlu2 %4091 }
 0x737   :  { %12069 = vst [vmem:[#allocation12_spill] sm:$0xff] %v9818_v37 }
 0x738   :  { %v9808_v26 = vpop.permute.xlu1 %4073 }
 0x739   :  { %12063 = vst [vmem:[#allocation183_spill] sm:$0xff] %v9808_v26 }
 0x73c   :  { %4182 = vperm.xlu2 %6168, %v11851_v33   ;;  %v3296_v33 = vcvt.s32.f32 %v2167_v62  ;;  %v12071_v62 = vld [vmem:[#allocation35_spill] sm:$0xff] }
 0x73d   :  { %v2236_v25 = vcvt.f32.s32 %v12071_v62 }
 0x73e   :  { %6169 = vset.pattern.permute.xlu1 %v11842_v31  ;;  %v3424_v49 = vmul.f32 -0.5, %v3296_v33 }
 0x740   :  { %v3588_v52 = vmul.f32 1.442695, %v3424_v49  ;;  %v9830_v49 = vpop.permute.xlu0 %4128 }
 0x741   :  { %12074 = vst [vmem:[#allocation35_spill] sm:$0xff] %v9830_v49 }
 0x744   :  { %6170 = vset.pattern.permute.xlu2 %v12039_v30 }
 0x746   :  { %4195 = vperm.xlu1 %6169, %v12067_v56   ;;  %v9826_v33 = vpop.permute.xlu2 %4110 }
 0x747   :  { %12073 = vst [vmem:[#allocation66_spill] sm:$0xff] %v9826_v33 }
 0x748   :  { %v4086_v39 = vpop.permute.xlu1 %4085 }
 0x749   :  { %v4833_v26 = vmul.f32 %v4086_v39, %v3802_v24  ;;  %v2238_v39 = vshll.u32 %v2237_v2, 16  ;;  %v3427_v24 = vmul.f32 -0.5, %v3299_v9 }
 0x74b   :  { %v4991_v7 = vmul.f32 1.442695, %v4833_v26  ;;  %v2239_v47 = vadd.s32 %v2238_v39, %v2236_v25  ;;  %v3594_v57 = vmul.f32 1.442695, %v3427_v24 }
 0x74c   :  { %4201 = vperm.xlu2 %6170, %v12067_v56  }
 0x74d   :  { %6285 = vpow2.f32 %v4991_v7  ;;  %v3302_v7 = vcvt.s32.f32 %v2239_v47  ;;  %v9834_v47 = vpop.permute.xlu0 %4613 }
 0x74e   :  { %6171 = vset.pattern.permute.xlu1 %v12009_v51  ;;  %6287 = vpow2.f32 %v3582_v16  ;;  %12075 = vst [vmem:[#allocation255_spill] sm:$0xff] %v9834_v47 }
 0x74f   :  { %6289 = vpow2.f32 %v3588_v52  ;;  %v3430_v25 = vmul.f32 -0.5, %v3302_v7 }
 0x750   :  { %6291 = vpow2.f32 %v3594_v57 }
 0x751   :  { %v3600_v9 = vmul.f32 1.442695, %v3430_v25 }
 0x753   :  { %v6286_v26 = vpop.eup %6285 }
 0x754   :  { %v6288_v50 = vpop.eup %6287  ;;  %6172 = vset.pattern.permute.xlu2 %v6860_v8  ;;  %5406 = vperm.xlu0 %6250, %v6286_v26  }
 0x755   :  { %v3805_v63 = vsub.f32 0.0, %v6288_v50  ;;  %v6290_v20 = vpop.eup %6289 }
 0x756   :  { %4207 = vperm.xlu1 %6171, %v12067_v56   ;;  %v4123_v53 = vpop.permute.xlu2 %4122  ;;  %v3808_v62 = vsub.f32 0.0, %v6290_v20  ;;  %v6292_v50 = vpop.eup %6291 }
 0x757   :  { %v3811_v7 = vsub.f32 0.0, %v6292_v50 }
 0x758   :  { %v4105_v2 = vpop.permute.xlu1 %4104  ;;  %v4839_v39 = vmul.f32 %v4123_v53, %v3808_v62 }
 0x759   :  { %v4836_v16 = vmul.f32 %v4105_v2, %v3805_v63 }
 0x75a   :  { %v5003_v26 = vmul.f32 1.442695, %v4839_v39 }
 0x75b   :  { %v4997_v52 = vmul.f32 1.442695, %v4836_v16  ;;  %v4159_v16 = vpop.permute.xlu0 %4158 }
 0x75c   :  { %4213 = vperm.xlu2 %6172, %v12067_v56  }
 0x75d   :  { %6293 = vpow2.f32 %v4997_v52 }
 0x75e   :  { %6173 = vset.pattern.permute.xlu1 %v11860_v18  ;;  %6295 = vpow2.f32 %v3600_v9 }
 0x75f   :  { %6297 = vpow2.f32 %v5003_v26  ;;  %v12076_v26 = vld [vmem:[#allocation158_spill] sm:$0xff] }
 0x760   :  { %v2273_v50 = vcvt.f32.s32 %v12076_v26 }
 0x763   :  { %v6294_v24 = vpop.eup %6293 }
 0x764   :  { %6174 = vset.pattern.permute.xlu2 %v11811_v4  ;;  %5415 = vperm.xlu0 %6250, %v6294_v24   ;;  %v6296_v57 = vpop.eup %6295 }
 0x765   :  { %v6298_v25 = vpop.eup %6297  ;;  %v3814_v53 = vsub.f32 0.0, %v6296_v57 }
 0x766   :  { %v4141_v63 = vpop.permute.xlu2 %4140  ;;  %4225 = vperm.xlu1 %6173, %v12067_v56  }
 0x767   :  { %v4842_v20 = vmul.f32 %v4141_v63, %v3811_v7  ;;  %v4845_v62 = vmul.f32 %v4159_v16, %v3814_v53  ;;  %v12078_v7 = vld [vmem:[#allocation112_spill] sm:$0xff]  ;;  %v12080_v53 = vld [vmem:[#allocation162_spill] sm:$0xff] }
 0x768   :  { %v9847_v24 = vpop.permute.xlu1 %4116  ;;  %v2272_v63 = vcvt.f32.s32 %v12078_v7 }
 0x769   :  { %v5009_v2 = vmul.f32 1.442695, %v4842_v20  ;;  %v5015_v52 = vmul.f32 1.442695, %v4845_v62  ;;  %12077 = vst [vmem:[#allocation158_spill] sm:$0xff] %v9847_v24  ;;  %v2274_v20 = vshll.u32 %v2273_v50, 16  ;;  %v2309_v62 = vcvt.f32.s32 %v12080_v53 }
 0x76b   :  { %6299 = vpow2.f32 %v5009_v2  ;;  %v2275_v57 = vadd.s32 %v2274_v20, %v2272_v63  ;;  %v2310_v7 = vshll.u32 %v2309_v62, 16  ;;  %v12084_v63 = vld [vmem:[#allocation168_spill] sm:$0xff] }
 0x76c   :  { %4231 = vperm.xlu2 %6174, %v12067_v56   ;;  %5424 = vperm.xlu0 %6250, %v6298_v25   ;;  %6301 = vpow2.f32 %v5015_v52  ;;  %v2345_v20 = vcvt.f32.s32 %v12084_v63  ;;  %v12088_v62 = vld [vmem:[#allocation84_spill] sm:$0xff] }
 0x76d   :  { %v3305_v16 = vcvt.s32.f32 %v2275_v57  ;;  %v2381_v63 = vcvt.f32.s32 %v12088_v62  ;;  %v2416_v62 = vcvt.f32.s32 %v9205_v34 }
 0x76e   :  { %6175 = vset.pattern.permute.xlu1 %v12022_v6 }
 0x76f   :  { %v3433_v25 = vmul.f32 -0.5, %v3305_v16  ;;  %v2346_v16 = vshll.u32 %v2345_v20, 16  ;;  %v2382_v33 = vshll.u32 %v2381_v63, 16 }
 0x771   :  { %v6300_v39 = vpop.eup %6299 }
 0x772   :  { %v6302_v9 = vpop.eup %6301 }
 0x774   :  { %6176 = vset.pattern.permute.xlu2 %v6938_v21  ;;  %5433 = vperm.xlu0 %6250, %v6300_v39   ;;  %v3606_v39 = vmul.f32 1.442695, %v3433_v25 }
 0x776   :  { %4237 = vperm.xlu1 %6175, %v12067_v56   ;;  %v9860_v50 = vpop.permute.xlu2 %4152  ;;  %6303 = vpow2.f32 %v3606_v39 }
 0x778   :  { %v9852_v2 = vpop.permute.xlu1 %4134 }
 0x779   :  { %12079 = vst [vmem:[#allocation112_spill] sm:$0xff] %v9852_v2  ;;  %v2344_v2 = vcvt.f32.s32 %v12085_v5 }
 0x77b   :  { %v2347_v25 = vadd.s32 %v2346_v16, %v2344_v2 }
 0x77c   :  { %4243 = vperm.xlu2 %6176, %v12067_v56   ;;  %5442 = vperm.xlu0 %6250, %v6302_v9   ;;  %v12082_v9 = vld [vmem:[#allocation190_spill] sm:$0xff] }
 0x77d   :  { %v2308_v26 = vcvt.f32.s32 %v12082_v9  ;;  %12083 = vst [vmem:[#allocation190_spill] sm:$0xff] %v9860_v50  ;;  %v6304_v9 = vpop.eup %6303  ;;  %v3311_v24 = vcvt.s32.f32 %v2347_v25 }
 0x77e   :  { %6178 = vset.pattern.permute.xlu1 %v11874_v36  ;;  %v3817_v5 = vsub.f32 0.0, %v6304_v9 }
 0x77f   :  { %v2311_v57 = vadd.s32 %v2310_v7, %v2308_v26  ;;  %v12089_v26 = vld [vmem:[#allocation192_spill] sm:$0xff]  ;;  %v3439_v16 = vmul.f32 -0.5, %v3311_v24 }
 0x780   :  { %v2380_v7 = vcvt.f32.s32 %v12089_v26 }
 0x781   :  { %v3618_v25 = vmul.f32 1.442695, %v3439_v16 }
 0x782   :  { %v2383_v47 = vadd.s32 %v2382_v33, %v2380_v7 }
 0x784   :  { %6179 = vset.pattern.permute.xlu2 %v11829_v1  ;;  %v3314_v9 = vcvt.s32.f32 %v2383_v47 }
 0x786   :  { %4255 = vperm.xlu1 %6178, %v12067_v56   ;;  %v9868_v49 = vpop.permute.xlu2 %4170 }
 0x787   :  { %12087 = vst [vmem:[#allocation191_spill] sm:$0xff] %v9868_v49 }
 0x788   :  { %v9857_v52 = vpop.permute.xlu1 %4146 }
 0x789   :  { %12081 = vst [vmem:[#allocation162_spill] sm:$0xff] %v9857_v52  ;;  %v3308_v52 = vcvt.s32.f32 %v2311_v57 }
 0x78b   :  { %v3436_v50 = vmul.f32 -0.5, %v3308_v52  ;;  %v12091_v52 = vld [vmem:[#allocation20_spill] sm:$0xff] }
 0x78c   :  { %4261 = vperm.xlu2 %6179, %v12067_v56  }
 0x78d   :  { %v3612_v2 = vmul.f32 1.442695, %v3436_v50 }
 0x78e   :  { %6180 = vset.pattern.permute.xlu1 %v12026_v61 }
 0x794   :  { %6181 = vset.pattern.permute.xlu2 %v11381_v27 }
 0x796   :  { %4267 = vperm.xlu1 %6180, %v12067_v56   ;;  %v9875_v49 = vpop.permute.xlu2 %4182 }
 0x798   :  { %v9866_v53 = vpop.permute.xlu1 %4164 }
 0x799   :  { %12086 = vst [vmem:[#allocation168_spill] sm:$0xff] %v9866_v53  ;;  %v12090_v53 = vld [vmem:[#allocation89_spill] sm:$0xff] }
 0x79a   :  { %v2417_v57 = vcvt.f32.s32 %v12090_v53  ;;  %v3442_v53 = vmul.f32 -0.5, %v3314_v9 }
 0x79c   :  { %4273 = vperm.xlu2 %6181, %v12067_v56   ;;  %v3624_v33 = vmul.f32 1.442695, %v3442_v53 }
 0x79e   :  { %6183 = vset.pattern.permute.xlu1 %v11887_v23 }
 0x7a4   :  { %6184 = vset.pattern.permute.xlu2 %v11842_v31 }
 0x7a6   :  { %4285 = vperm.xlu1 %6183, %v12067_v56   ;;  %v2418_v56 = vshll.u32 %v2417_v57, 16 }
 0x7a8   :  { %v4177_v39 = vpop.permute.xlu1 %4176  ;;  %v2419_v63 = vadd.s32 %v2418_v56, %v2416_v62 }
 0x7a9   :  { %v4848_v20 = vmul.f32 %v4177_v39, %v3817_v5  ;;  %v9880_v5 = vpop.permute.xlu2 %4201 }
 0x7aa   :  { %v3317_v26 = vcvt.s32.f32 %v2419_v63 }
 0x7ab   :  { %v5021_v37 = vmul.f32 1.442695, %v4848_v20 }
 0x7ac   :  { %4292 = vperm.xlu2 %6184, %v12091_v52   ;;  %v3445_v7 = vmul.f32 -0.5, %v3317_v26 }
 0x7ad   :  { %6305 = vpow2.f32 %v5021_v37 }
 0x7ae   :  { %6185 = vset.pattern.permute.xlu1 %v12039_v30  ;;  %6307 = vpow2.f32 %v3612_v2  ;;  %v3630_v16 = vmul.f32 1.442695, %v3445_v7 }
 0x7af   :  { %6309 = vpow2.f32 %v3618_v25 }
 0x7b0   :  { %6311 = vpow2.f32 %v3624_v33 }
 0x7b3   :  { %v6306_v24 = vpop.eup %6305 }
 0x7b4   :  { %v6308_v50 = vpop.eup %6307  ;;  %6186 = vset.pattern.permute.xlu2 %v12009_v51  ;;  %5451 = vperm.xlu0 %6250, %v6306_v24  }
 0x7b5   :  { %v3820_v34 = vsub.f32 0.0, %v6308_v50  ;;  %v6310_v37 = vpop.eup %6309 }
 0x7b6   :  { %4298 = vperm.xlu1 %6185, %v12091_v52   ;;  %v4214_v47 = vpop.permute.xlu2 %4213  ;;  %v3823_v57 = vsub.f32 0.0, %v6310_v37  ;;  %v6312_v25 = vpop.eup %6311 }
 0x7b7   :  { %v3826_v63 = vsub.f32 0.0, %v6312_v25 }
 0x7b8   :  { %v4196_v39 = vpop.permute.xlu1 %4195  ;;  %v4854_v62 = vmul.f32 %v4214_v47, %v3823_v57 }
 0x7b9   :  { %v4851_v20 = vmul.f32 %v4196_v39, %v3820_v34 }
 0x7ba   :  { %v5033_v56 = vmul.f32 1.442695, %v4854_v62 }
 0x7bb   :  { %v5027_v2 = vmul.f32 1.442695, %v4851_v20 }
 0x7bc   :  { %4304 = vperm.xlu2 %6186, %v12091_v52  }
 0x7bd   :  { %6313 = vpow2.f32 %v5027_v2  ;;  %v2452_v2 = vcvt.f32.s32 %v9228_v38  ;;  %v2488_v38 = vcvt.f32.s32 %v9253_v17 }
 0x7be   :  { %6188 = vset.pattern.permute.xlu1 %v11978_v28  ;;  %6315 = vpow2.f32 %v3630_v16 }
 0x7bf   :  { %6317 = vpow2.f32 %v5033_v56 }
 0x7c3   :  { %v6314_v9 = vpop.eup %6313 }
 0x7c4   :  { %6189 = vset.pattern.permute.xlu2 %v11860_v18  ;;  %5460 = vperm.xlu0 %6250, %v6314_v9   ;;  %v6316_v24 = vpop.eup %6315 }
 0x7c5   :  { %v3829_v26 = vsub.f32 0.0, %v6316_v24  ;;  %v6318_v37 = vpop.eup %6317 }
 0x7c6   :  { %v4232_v50 = vpop.permute.xlu2 %4231  ;;  %4316 = vperm.xlu1 %6188, %v12091_v52  }
 0x7c7   :  { %v4857_v53 = vmul.f32 %v4232_v50, %v3826_v63  ;;  %v4860_v33 = vmul.f32 %v9640_v58, %v3829_v26  ;;  %v12092_v58 = vld [vmem:[#allocation95_spill] sm:$0xff]  ;;  %v12093_v63 = vld [vmem:[#allocation102_spill] sm:$0xff] }
 0x7c8   :  { %v2453_v47 = vcvt.f32.s32 %v12092_v58  ;;  %v9898_v57 = vpop.permute.xlu1 %4207  ;;  %v2489_v24 = vcvt.f32.s32 %v12093_v63 }
 0x7c9   :  { %v5039_v34 = vmul.f32 1.442695, %v4857_v53  ;;  %v5045_v7 = vmul.f32 1.442695, %v4860_v33 }
 0x7ca   :  { %v2454_v16 = vshll.u32 %v2453_v47, 16 }
 0x7cb   :  { %6319 = vpow2.f32 %v5039_v34  ;;  %v2490_v34 = vshll.u32 %v2489_v24, 16  ;;  %v2560_v24 = vcvt.f32.s32 %v9301_v10 }
 0x7cc   :  { %4322 = vperm.xlu2 %6189, %v12091_v52   ;;  %5469 = vperm.xlu0 %6250, %v6318_v37   ;;  %6321 = vpow2.f32 %v5045_v7  ;;  %v2455_v62 = vadd.s32 %v2454_v16, %v2452_v2  ;;  %v12094_v37 = vld [vmem:[#allocation106_spill] sm:$0xff] }
 0x7cd   :  { %v2525_v33 = vcvt.f32.s32 %v12094_v37  ;;  %v2491_v7 = vadd.s32 %v2490_v34, %v2488_v38  ;;  %v12098_v37 = vld [vmem:[#allocation119_spill] sm:$0xff] }
 0x7ce   :  { %6190 = vset.pattern.permute.xlu1 %v11811_v4  ;;  %v3320_v25 = vcvt.s32.f32 %v2455_v62  ;;  %v12097_v62 = vld [vmem:[#allocation188_spill] sm:$0xff] }
 0x7cf   :  { %v3323_v47 = vcvt.s32.f32 %v2491_v7 }
 0x7d0   :  { %v3448_v9 = vmul.f32 -0.5, %v3320_v25  ;;  %v2561_v25 = vcvt.f32.s32 %v12097_v62  ;;  %v2596_v62 = vcvt.f32.s32 %v9324_v43  ;;  %v12099_v43 = vld [vmem:[#allocation24_spill] sm:$0xff] }
 0x7d1   :  { %v6320_v39 = vpop.eup %6319 }
 0x7d2   :  { %v6322_v20 = vpop.eup %6321  ;;  %v3636_v53 = vmul.f32 1.442695, %v3448_v9  ;;  %v3451_v9 = vmul.f32 -0.5, %v3323_v47  ;;  %v2562_v34 = vshll.u32 %v2561_v25, 16 }
 0x7d4   :  { %6191 = vset.pattern.permute.xlu2 %v12022_v6  ;;  %5478 = vperm.xlu0 %6250, %v6320_v39   ;;  %v2524_v39 = vcvt.f32.s32 %v9276_v45  ;;  %6323 = vpow2.f32 %v3636_v53  ;;  %v3642_v7 = vmul.f32 1.442695, %v3451_v9 }
 0x7d6   :  { %4328 = vperm.xlu1 %6190, %v12091_v52   ;;  %v9911_v26 = vpop.permute.xlu2 %4243 }
 0x7d8   :  { %v9903_v56 = vpop.permute.xlu1 %4225 }
 0x7da   :  { %v6324_v17 = vpop.eup %6323 }
 0x7db   :  { %v3832_v45 = vsub.f32 0.0, %v6324_v17 }
 0x7dc   :  { %4334 = vperm.xlu2 %6191, %v12091_v52   ;;  %5487 = vperm.xlu0 %6250, %v6322_v20   ;;  %v2526_v20 = vshll.u32 %v2525_v33, 16  ;;  %v2597_v33 = vcvt.f32.s32 %v12098_v37 }
 0x7de   :  { %6193 = vset.pattern.permute.xlu1 %v6884_v12  ;;  %v2527_v2 = vadd.s32 %v2526_v20, %v2524_v39  ;;  %v2598_v47 = vshll.u32 %v2597_v33, 16 }
 0x7e0   :  { %v3326_v63 = vcvt.s32.f32 %v2527_v2  ;;  %v2599_v17 = vadd.s32 %v2598_v47, %v2596_v62 }
 0x7e2   :  { %v3454_v39 = vmul.f32 -0.5, %v3326_v63 }
 0x7e4   :  { %6194 = vset.pattern.permute.xlu2 %v11874_v36  ;;  %v3648_v2 = vmul.f32 1.442695, %v3454_v39 }
 0x7e6   :  { %4346 = vperm.xlu1 %6193, %v12091_v52   ;;  %v9919_v16 = vpop.permute.xlu2 %4261 }
 0x7e7   :  { %12096 = vst [vmem:[#allocation192_spill] sm:$0xff] %v9919_v16 }
 0x7e8   :  { %v9908_v50 = vpop.permute.xlu1 %4237 }
 0x7ec   :  { %4352 = vperm.xlu2 %6194, %v12091_v52  }
 0x7ee   :  { %6195 = vset.pattern.permute.xlu1 %v11829_v1 }
 0x7f4   :  { %6196 = vset.pattern.permute.xlu2 %v12026_v61 }
 0x7f6   :  { %4358 = vperm.xlu1 %6195, %v12091_v52   ;;  %v9926_v20 = vpop.permute.xlu2 %4273 }
 0x7f8   :  { %v9917_v58 = vpop.permute.xlu1 %4255 }
 0x7f9   :  { %12095 = vst [vmem:[#allocation84_spill] sm:$0xff] %v9917_v58  ;;  %v2563_v58 = vadd.s32 %v2562_v34, %v2560_v24 }
 0x7fb   :  { %v3329_v10 = vcvt.s32.f32 %v2563_v58 }
 0x7fc   :  { %4364 = vperm.xlu2 %6196, %v12091_v52  }
 0x7fe   :  { %6198 = vset.pattern.permute.xlu1 %v11999_v32 }
 0x804   :  { %6199 = vset.pattern.permute.xlu2 %v11887_v23 }
 0x806   :  { %4376 = vperm.xlu1 %6198, %v12091_v52   ;;  %v9931_v25 = vpop.permute.xlu2 %4292 }
 0x808   :  { %v4268_v53 = vpop.permute.xlu1 %4267 }
 0x809   :  { %v4863_v38 = vmul.f32 %v4268_v53, %v3832_v45  ;;  %v3457_v45 = vmul.f32 -0.5, %v3329_v10  ;;  %v3332_v53 = vcvt.s32.f32 %v2599_v17 }
 0x80b   :  { %v5051_v16 = vmul.f32 1.442695, %v4863_v38  ;;  %v3654_v24 = vmul.f32 1.442695, %v3457_v45  ;;  %v3460_v38 = vmul.f32 -0.5, %v3332_v53 }
 0x80c   :  { %4382 = vperm.xlu2 %6199, %v12091_v52  }
 0x80d   :  { %6325 = vpow2.f32 %v5051_v16  ;;  %v3660_v39 = vmul.f32 1.442695, %v3460_v38 }
 0x80e   :  { %6200 = vset.pattern.permute.xlu1 %v11842_v31  ;;  %6327 = vpow2.f32 %v3642_v7 }
 0x80f   :  { %6329 = vpow2.f32 %v3648_v2 }
 0x810   :  { %6331 = vpow2.f32 %v3654_v24 }
 0x813   :  { %v6326_v9 = vpop.eup %6325 }
 0x814   :  { %v6328_v63 = vpop.eup %6327  ;;  %6201 = vset.pattern.permute.xlu2 %v12039_v30  ;;  %5496 = vperm.xlu0 %6250, %v6326_v9  }
 0x815   :  { %v3835_v52 = vsub.f32 0.0, %v6328_v63  ;;  %v6330_v16 = vpop.eup %6329 }
 0x816   :  { %4389 = vperm.xlu1 %6200, %v12099_v43   ;;  %v4305_v58 = vpop.permute.xlu2 %4304  ;;  %v3838_v33 = vsub.f32 0.0, %v6330_v16  ;;  %v6332_v2 = vpop.eup %6331 }
 0x817   :  { %v3841_v17 = vsub.f32 0.0, %v6332_v2 }
 0x818   :  { %v4286_v34 = vpop.permute.xlu1 %4285  ;;  %v4869_v62 = vmul.f32 %v4305_v58, %v3838_v33 }
 0x819   :  { %v4866_v37 = vmul.f32 %v4286_v34, %v3835_v52 }
 0x81a   :  { %v5063_v47 = vmul.f32 1.442695, %v4869_v62 }
 0x81b   :  { %v5057_v7 = vmul.f32 1.442695, %v4866_v37 }
 0x81c   :  { %4395 = vperm.xlu2 %6201, %v12099_v43  }
 0x81d   :  { %6333 = vpow2.f32 %v5057_v7  ;;  %v2632_v7 = vcvt.f32.s32 %v9349_v44  ;;  %v2668_v44 = vcvt.f32.s32 %v9374_v35 }
 0x81e   :  { %6204 = vset.pattern.permute.xlu1 %v6860_v8  ;;  %6335 = vpow2.f32 %v3660_v39 }
 0x81f   :  { %6337 = vpow2.f32 %v5063_v47 }
 0x823   :  { %v6334_v10 = vpop.eup %6333 }
 0x824   :  { %6205 = vset.pattern.permute.xlu2 %v11978_v28  ;;  %5505 = vperm.xlu0 %6250, %v6334_v10   ;;  %v6336_v9 = vpop.eup %6335 }
 0x825   :  { %v3844_v53 = vsub.f32 0.0, %v6336_v9  ;;  %v6338_v16 = vpop.eup %6337 }
 0x826   :  { %v4323_v63 = vpop.permute.xlu2 %4322  ;;  %4407 = vperm.xlu1 %6204, %v12099_v43  }
 0x827   :  { %v4872_v45 = vmul.f32 %v4323_v63, %v3841_v17  ;;  %v4875_v24 = vmul.f32 %v9670_v54, %v3844_v53  ;;  %v12100_v54 = vld [vmem:[#allocation125_spill] sm:$0xff]  ;;  %v12101_v17 = vld [vmem:[#allocation131_spill] sm:$0xff] }
 0x828   :  { %v2633_v58 = vcvt.f32.s32 %v12100_v54  ;;  %v9949_v33 = vpop.permute.xlu1 %4298  ;;  %v2669_v9 = vcvt.f32.s32 %v12101_v17  ;;  %v2740_v17 = vcvt.f32.s32 %v9420_v19 }
 0x829   :  { %v5069_v52 = vmul.f32 1.442695, %v4872_v45  ;;  %v5075_v38 = vmul.f32 1.442695, %v4875_v24 }
 0x82a   :  { %v2634_v39 = vshll.u32 %v2633_v58, 16 }
 0x82b   :  { %6339 = vpow2.f32 %v5069_v52  ;;  %v2670_v52 = vshll.u32 %v2669_v9, 16 }
 0x82c   :  { %4413 = vperm.xlu2 %6205, %v12099_v43   ;;  %5514 = vperm.xlu0 %6250, %v6338_v16   ;;  %6341 = vpow2.f32 %v5075_v38  ;;  %v2635_v62 = vadd.s32 %v2634_v39, %v2632_v7  ;;  %v12102_v16 = vld [vmem:[#allocation194_spill] sm:$0xff] }
 0x82d   :  { %v2705_v24 = vcvt.f32.s32 %v12102_v16  ;;  %v2671_v38 = vadd.s32 %v2670_v52, %v2668_v44  ;;  %v12104_v52 = vld [vmem:[#allocation52_spill] sm:$0xff] }
 0x82e   :  { %6206 = vset.pattern.permute.xlu1 %v11860_v18  ;;  %v3335_v2 = vcvt.s32.f32 %v2635_v62  ;;  %v2741_v62 = vcvt.f32.s32 %v9284_v11  ;;  %v2777_v16 = vcvt.f32.s32 %v12104_v52  ;;  %v2776_v11 = vcvt.f32.s32 %v9439_v48 }
 0x82f   :  { %v3338_v58 = vcvt.s32.f32 %v2671_v38 }
 0x830   :  { %v3463_v10 = vmul.f32 -0.5, %v3335_v2  ;;  %v2742_v44 = vshll.u32 %v2741_v62, 16 }
 0x831   :  { %v6340_v34 = vpop.eup %6339  ;;  %v3466_v2 = vmul.f32 -0.5, %v3338_v58  ;;  %v2778_v58 = vshll.u32 %v2777_v16, 16 }
 0x832   :  { %v6342_v37 = vpop.eup %6341  ;;  %v3666_v45 = vmul.f32 1.442695, %v3463_v10 }
 0x834   :  { %6207 = vset.pattern.permute.xlu2 %v11811_v4  ;;  %5523 = vperm.xlu0 %6250, %v6340_v34   ;;  %v2704_v34 = vcvt.f32.s32 %v9397_v42  ;;  %6343 = vpow2.f32 %v3666_v45 }
 0x836   :  { %4419 = vperm.xlu1 %6206, %v12099_v43   ;;  %v9962_v53 = vpop.permute.xlu2 %4334 }
 0x838   :  { %v9954_v47 = vpop.permute.xlu1 %4316 }
 0x83a   :  { %v6344_v35 = vpop.eup %6343 }
 0x83b   :  { %v3847_v42 = vsub.f32 0.0, %v6344_v35  ;;  %v2779_v35 = vadd.s32 %v2778_v58, %v2776_v11  ;;  %v12105_v11 = vld [vmem:[#allocation26_spill] sm:$0xff] }
 0x83c   :  { %4425 = vperm.xlu2 %6207, %v12099_v43   ;;  %5532 = vperm.xlu0 %6250, %v6342_v37   ;;  %v2706_v37 = vshll.u32 %v2705_v24, 16  ;;  %v3672_v24 = vmul.f32 1.442695, %v3466_v2 }
 0x83e   :  { %6209 = vset.pattern.permute.xlu1 %v6938_v21  ;;  %v2707_v7 = vadd.s32 %v2706_v37, %v2704_v34 }
 0x840   :  { %v3341_v10 = vcvt.s32.f32 %v2707_v7 }
 0x842   :  { %v3469_v38 = vmul.f32 -0.5, %v3341_v10 }
 0x844   :  { %6210 = vset.pattern.permute.xlu2 %v6884_v12  ;;  %v3678_v7 = vmul.f32 1.442695, %v3469_v38 }
 0x846   :  { %4437 = vperm.xlu1 %6209, %v12099_v43   ;;  %v9970_v39 = vpop.permute.xlu2 %4352 }
 0x847   :  { %12103 = vst [vmem:[#allocation89_spill] sm:$0xff] %v9970_v39  ;;  %v2743_v39 = vadd.s32 %v2742_v44, %v2740_v17 }
 0x848   :  { %v9959_v63 = vpop.permute.xlu1 %4328 }
 0x849   :  { %v3344_v19 = vcvt.s32.f32 %v2743_v39 }
 0x84c   :  { %4443 = vperm.xlu2 %6210, %v12099_v43  }
 0x84e   :  { %6211 = vset.pattern.permute.xlu1 %v11874_v36 }
 0x854   :  { %6212 = vset.pattern.permute.xlu2 %v11829_v1 }
 0x856   :  { %4449 = vperm.xlu1 %6211, %v12099_v43   ;;  %v9977_v34 = vpop.permute.xlu2 %4364 }
 0x858   :  { %v9968_v54 = vpop.permute.xlu1 %4346 }
 0x85c   :  { %4455 = vperm.xlu2 %6212, %v12099_v43  }
 0x85e   :  { %6214 = vset.pattern.permute.xlu1 %v11381_v27 }
 0x864   :  { %6215 = vset.pattern.permute.xlu2 %v11999_v32 }
 0x866   :  { %4467 = vperm.xlu1 %6214, %v12099_v43   ;;  %v9982_v62 = vpop.permute.xlu2 %4382 }
 0x868   :  { %v4359_v9 = vpop.permute.xlu1 %4358 }
 0x869   :  { %v4878_v45 = vmul.f32 %v4359_v9, %v3847_v42  ;;  %v3472_v42 = vmul.f32 -0.5, %v3344_v19  ;;  %v3347_v9 = vcvt.s32.f32 %v2779_v35 }
 0x86b   :  { %v5081_v37 = vmul.f32 1.442695, %v4878_v45  ;;  %v3684_v45 = vmul.f32 1.442695, %v3472_v42  ;;  %v3475_v44 = vmul.f32 -0.5, %v3347_v9 }
 0x86c   :  { %4473 = vperm.xlu2 %6215, %v12099_v43  }
 0x86d   :  { %6345 = vpow2.f32 %v5081_v37  ;;  %v3690_v37 = vmul.f32 1.442695, %v3475_v44 }
 0x86e   :  { %6216 = vset.pattern.permute.xlu1 %v11887_v23  ;;  %6347 = vpow2.f32 %v3672_v24 }
 0x86f   :  { %6349 = vpow2.f32 %v3678_v7 }
 0x870   :  { %6351 = vpow2.f32 %v3684_v45 }
 0x873   :  { %v6346_v2 = vpop.eup %6345 }
 0x874   :  { %v6348_v10 = vpop.eup %6347  ;;  %6217 = vset.pattern.permute.xlu2 %v11842_v31  ;;  %5541 = vperm.xlu0 %6250, %v6346_v2  }
 0x875   :  { %v3850_v48 = vsub.f32 0.0, %v6348_v10  ;;  %v6350_v17 = vpop.eup %6349 }
 0x876   :  { %4479 = vperm.xlu1 %6216, %v12099_v43   ;;  %v4396_v39 = vpop.permute.xlu2 %4395  ;;  %v3853_v24 = vsub.f32 0.0, %v6350_v17  ;;  %v6352_v43 = vpop.eup %6351 }
 0x877   :  { %v3856_v19 = vsub.f32 0.0, %v6352_v43  ;;  %v2849_v43 = vcvt.f32.s32 %v9372_v29 }
 0x878   :  { %v4377_v52 = vpop.permute.xlu1 %4376  ;;  %v4884_v58 = vmul.f32 %v4396_v39, %v3853_v24 }
 0x879   :  { %v4881_v16 = vmul.f32 %v4377_v52, %v3850_v48 }
 0x87a   :  { %v5093_v31 = vmul.f32 1.442695, %v4884_v58 }
 0x87b   :  { %v5087_v38 = vmul.f32 1.442695, %v4881_v16 }
 0x87c   :  { %4486 = vperm.xlu2 %6217, %v12105_v11  }
 0x87d   :  { %6353 = vpow2.f32 %v5087_v38 }
 0x87e   :  { %6219 = vset.pattern.permute.xlu1 %v12009_v51  ;;  %6355 = vpow2.f32 %v3690_v37 }
 0x87f   :  { %6357 = vpow2.f32 %v5093_v31 }
 0x883   :  { %v6354_v7 = vpop.eup %6353 }
 0x884   :  { %6220 = vset.pattern.permute.xlu2 %v6860_v8  ;;  %5550 = vperm.xlu0 %6250, %v6354_v7   ;;  %v6356_v35 = vpop.eup %6355 }
 0x885   :  { %v3859_v42 = vsub.f32 0.0, %v6356_v35  ;;  %v6358_v48 = vpop.eup %6357 }
 0x886   :  { %v4414_v2 = vpop.permute.xlu2 %4413  ;;  %4498 = vperm.xlu1 %6219, %v12105_v11  }
 0x887   :  { %v4887_v10 = vmul.f32 %v4414_v2, %v3856_v19  ;;  %v4890_v17 = vmul.f32 %v9701_v13, %v3859_v42  ;;  %v12106_v13 = vld [vmem:[#allocation59_spill] sm:$0xff]  ;;  %v2850_v2 = vshll.u32 %v2849_v43, 16 }
 0x888   :  { %v2813_v16 = vcvt.f32.s32 %v12106_v13  ;;  %v10000_v39 = vpop.permute.xlu1 %4389  ;;  %v2920_v13 = vcvt.f32.s32 %v9527_v22 }
 0x889   :  { %v5099_v9 = vmul.f32 1.442695, %v4887_v10  ;;  %v5105_v45 = vmul.f32 1.442695, %v4890_v17  ;;  %v2885_v10 = vcvt.f32.s32 %v9402_v0  ;;  %v2921_v0 = vcvt.f32.s32 %v9426_v55 }
 0x88a   :  { %v2814_v24 = vshll.u32 %v2813_v16, 16  ;;  %v2956_v55 = vcvt.f32.s32 %v9546_v46 }
 0x88b   :  { %6359 = vpow2.f32 %v5099_v9  ;;  %v2886_v9 = vshll.u32 %v2885_v10, 16 }
 0x88c   :  { %4504 = vperm.xlu2 %6220, %v12105_v11   ;;  %5559 = vperm.xlu0 %6250, %v6358_v48   ;;  %6361 = vpow2.f32 %v5105_v45 }
 0x88e   :  { %6221 = vset.pattern.permute.xlu1 %v11978_v28 }
 0x891   :  { %v6360_v44 = vpop.eup %6359 }
 0x892   :  { %v6362_v52 = vpop.eup %6361 }
 0x894   :  { %6222 = vset.pattern.permute.xlu2 %v11860_v18  ;;  %5568 = vperm.xlu0 %6250, %v6360_v44   ;;  %v2812_v18 = vcvt.f32.s32 %v9462_v3  ;;  %v2848_v3 = vcvt.f32.s32 %v9483_v41 }
 0x896   :  { %4510 = vperm.xlu1 %6221, %v12105_v11   ;;  %v2815_v38 = vadd.s32 %v2814_v24, %v2812_v18  ;;  %v10013_v35 = vpop.permute.xlu2 %4425  ;;  %v2851_v42 = vadd.s32 %v2850_v2, %v2848_v3  ;;  %v2922_v24 = vshll.u32 %v2921_v0, 16 }
 0x897   :  { %12109 = vst [vmem:[#allocation102_spill] sm:$0xff] %v10013_v35 }
 0x898   :  { %v10005_v37 = vpop.permute.xlu1 %4407  ;;  %v3350_v58 = vcvt.s32.f32 %v2815_v38  ;;  %v3353_v48 = vcvt.s32.f32 %v2851_v42  ;;  %v2957_v38 = vcvt.f32.s32 %v9454_v60  ;;  %v2923_v3 = vadd.s32 %v2922_v24, %v2920_v13 }
 0x899   :  { %12107 = vst [vmem:[#allocation20_spill] sm:$0xff] %v10005_v37 }
 0x89a   :  { %v3478_v31 = vmul.f32 -0.5, %v3350_v58  ;;  %v3481_v44 = vmul.f32 -0.5, %v3353_v48  ;;  %v2958_v2 = vshll.u32 %v2957_v38, 16  ;;  %v3359_v22 = vcvt.s32.f32 %v2923_v3 }
 0x89c   :  { %4516 = vperm.xlu2 %6222, %v12105_v11   ;;  %5577 = vperm.xlu0 %6250, %v6362_v52   ;;  %v3696_v19 = vmul.f32 1.442695, %v3478_v31  ;;  %v3702_v58 = vmul.f32 1.442695, %v3481_v44  ;;  %v2959_v42 = vadd.s32 %v2958_v2, %v2956_v55  ;;  %v3487_v48 = vmul.f32 -0.5, %v3359_v22 }
 0x89e   :  { %6224 = vset.pattern.permute.xlu1 %v12022_v6  ;;  %6363 = vpow2.f32 %v3696_v19  ;;  %v3714_v0 = vmul.f32 1.442695, %v3487_v48 }
 0x8a4   :  { %6225 = vset.pattern.permute.xlu2 %v6938_v21  ;;  %v6364_v41 = vpop.eup %6363 }
 0x8a6   :  { %4528 = vperm.xlu1 %6224, %v12105_v11   ;;  %v10021_v45 = vpop.permute.xlu2 %4443 }
 0x8a7   :  { %12111 = vst [vmem:[#allocation188_spill] sm:$0xff] %v10021_v45 }
 0x8a8   :  { %v10010_v7 = vpop.permute.xlu1 %4419 }
 0x8a9   :  { %12108 = vst [vmem:[#allocation95_spill] sm:$0xff] %v10010_v7 }
 0x8ac   :  { %4534 = vperm.xlu2 %6225, %v12105_v11  }
 0x8ae   :  { %6226 = vset.pattern.permute.xlu1 %v6884_v12 }
 0x8b4   :  { %6227 = vset.pattern.permute.xlu2 %v11874_v36  ;;  %v2884_v36 = vcvt.f32.s32 %v9504_v59  ;;  %v3862_v59 = vsub.f32 0.0, %v6364_v41 }
 0x8b6   :  { %4540 = vperm.xlu1 %6226, %v12105_v11   ;;  %v2887_v17 = vadd.s32 %v2886_v9, %v2884_v36  ;;  %v10028_v43 = vpop.permute.xlu2 %4455 }
 0x8b7   :  { %12112 = vst [vmem:[#allocation119_spill] sm:$0xff] %v10028_v43 }
 0x8b8   :  { %v10019_v29 = vpop.permute.xlu1 %4437  ;;  %v3356_v52 = vcvt.s32.f32 %v2887_v17  ;;  %v3362_v17 = vcvt.s32.f32 %v2959_v42 }
 0x8b9   :  { %12110 = vst [vmem:[#allocation106_spill] sm:$0xff] %v10019_v29 }
 0x8ba   :  { %v3484_v31 = vmul.f32 -0.5, %v3356_v52  ;;  %v3490_v44 = vmul.f32 -0.5, %v3362_v17  ;;  %v12116_v17 = vld [vmem:[#allocation154_spill] sm:$0xff] }
 0x8bc   :  { %4546 = vperm.xlu2 %6227, %v12105_v11   ;;  %v3708_v10 = vmul.f32 1.442695, %v3484_v31  ;;  %v3720_v24 = vmul.f32 1.442695, %v3490_v44 }
 0x8be   :  { %6229 = vset.pattern.permute.xlu1 %v12026_v61 }
 0x8c4   :  { %6230 = vset.pattern.permute.xlu2 %v11381_v27 }
 0x8c6   :  { %4558 = vperm.xlu1 %6229, %v12105_v11   ;;  %v10033_v36 = vpop.permute.xlu2 %4473 }
 0x8c7   :  { %12113 = vst [vmem:[#allocation24_spill] sm:$0xff] %v10033_v36 }
 0x8c8   :  { %v4450_v16 = vpop.permute.xlu1 %4449 }
 0x8c9   :  { %v4893_v18 = vmul.f32 %v4450_v16, %v3862_v59 }
 0x8cb   :  { %v5111_v19 = vmul.f32 1.442695, %v4893_v18 }
 0x8cc   :  { %4564 = vperm.xlu2 %6230, %v12105_v11  }
 0x8cd   :  { %6365 = vpow2.f32 %v5111_v19 }
 0x8ce   :  { %6231 = vset.pattern.permute.xlu1 %v11999_v32  ;;  %6367 = vpow2.f32 %v3702_v58 }
 0x8cf   :  { %6369 = vpow2.f32 %v3708_v10 }
 0x8d0   :  { %6371 = vpow2.f32 %v3714_v0  ;;  %v12117_v0 = vld [vmem:[#allocation155_spill] sm:$0xff] }
 0x8d3   :  { %v6366_v60 = vpop.eup %6365 }
 0x8d4   :  { %v6368_v9 = vpop.eup %6367  ;;  %6232 = vset.pattern.permute.xlu2 %v11887_v23  ;;  %5586 = vperm.xlu0 %6250, %v6366_v60  }
 0x8d5   :  { %v3865_v46 = vsub.f32 0.0, %v6368_v9  ;;  %v6370_v41 = vpop.eup %6369  ;;  %v12115_v9 = vld [vmem:[#allocation211_spill] sm:$0xff] }
 0x8d6   :  { %4570 = vperm.xlu1 %6231, %v12105_v11   ;;  %v4487_v13 = vpop.permute.xlu2 %4486  ;;  %v3868_v16 = vsub.f32 0.0, %v6370_v41  ;;  %v6372_v58 = vpop.eup %6371 }
 0x8d7   :  { %v3871_v19 = vsub.f32 0.0, %v6372_v58  ;;  %v12122_v58 = vld [vmem:[#allocation109_spill] sm:$0xff] }
 0x8d8   :  { %v4468_v52 = vpop.permute.xlu1 %4467  ;;  %v4899_v38 = vmul.f32 %v4487_v13, %v3868_v16  ;;  %v12120_v13 = vld [vmem:[#allocation63_spill] sm:$0xff] }
 0x8d9   :  { %v4896_v59 = vmul.f32 %v4468_v52, %v3865_v46  ;;  %v1733_v46 = vcvt.f32.s32 %v12116_v17  ;;  %v1744_v16 = vcvt.f32.s32 %v12120_v13  ;;  %v12131_v13 = vld [vmem:[#allocation221_spill] sm:$0xff] }
 0x8da   :  { %v5123_v23 = vmul.f32 1.442695, %v4899_v38 }
 0x8db   :  { %v5117_v18 = vmul.f32 1.442695, %v4896_v59  ;;  %v12119_v59 = vld [vmem:[#allocation105_spill] sm:$0xff] }
 0x8dc   :  { %4576 = vperm.xlu2 %6232, %v12105_v11  }
 0x8dd   :  { %6373 = vpow2.f32 %v5117_v18 }
 0x8de   :  { %6234 = vset.pattern.permute.xlu1 %v12039_v30  ;;  %6375 = vpow2.f32 %v3720_v24  ;;  %v12121_v24 = vld [vmem:[#allocation67_spill] sm:$0xff] }
 0x8df   :  { %6377 = vpow2.f32 %v5123_v23  ;;  %v1757_v38 = vcvt.f32.s32 %v12121_v24 }
 0x8e3   :  { %v6374_v31 = vpop.eup %6373 }
 0x8e4   :  { %6235 = vset.pattern.permute.xlu2 %v12009_v51  ;;  %5595 = vperm.xlu0 %6250, %v6374_v31   ;;  %v6376_v3 = vpop.eup %6375  ;;  %v1769_v31 = vcvt.f32.s32 %v12122_v58 }
 0x8e5   :  { %v3874_v11 = vsub.f32 0.0, %v6376_v3  ;;  %v6378_v22 = vpop.eup %6377  ;;  %v1758_v3 = vshll.u32 %v1757_v38, 16 }
 0x8e6   :  { %v4505_v55 = vpop.permute.xlu2 %4504  ;;  %4589 = vperm.xlu1 %6234, %v11857_v15  }
 0x8e7   :  { %v4902_v2 = vmul.f32 %v4505_v55, %v3871_v19  ;;  %v4905_v30 = vmul.f32 %v9772_v14, %v3874_v11  ;;  %v12123_v55 = vld [vmem:[#allocation68_spill] sm:$0xff]  ;;  %v12124_v11 = vld [vmem:[#allocation203_spill] sm:$0xff] }
 0x8e8   :  { %v10051_v14 = vpop.permute.xlu1 %4479 }
 0x8e9   :  { %v5129_v10 = vmul.f32 1.442695, %v4902_v2  ;;  %v5135_v51 = vmul.f32 1.442695, %v4905_v30  ;;  %12114 = vst [vmem:[#allocation125_spill] sm:$0xff] %v10051_v14  ;;  %v1768_v2 = vcvt.f32.s32 %v12123_v55  ;;  %v12126_v30 = vld [vmem:[#allocation107_spill] sm:$0xff] }
 0x8ea   :  { %v12134_v55 = vld [vmem:[#allocation73_spill] sm:$0xff]  ;;  %v12274_v14 = vld [vmem:[#allocation134_spill] sm:$0xff] }
 0x8eb   :  { %6379 = vpow2.f32 %v5129_v10  ;;  %v3029_v10 = vcvt.f32.s32 %v12124_v11 }
 0x8ec   :  { %4595 = vperm.xlu2 %6235, %v11857_v15   ;;  %5604 = vperm.xlu0 %6250, %v6378_v22   ;;  %6381 = vpow2.f32 %v5135_v51  ;;  %v1756_v51 = vcvt.f32.s32 %v12126_v30 }
 0x8ee   :  { %6236 = vset.pattern.permute.xlu1 %v6860_v8  ;;  %v2993_v8 = vcvt.f32.s32 %v9481_v40  ;;  %v1732_v40 = vcvt.f32.s32 %v12119_v59  ;;  %v1759_v17 = vadd.s32 %v1758_v3, %v1756_v51  ;;  %v12136_v51 = vld [vmem:[#allocation116_spill] sm:$0xff] }
 0x8f0   :  { %v2994_v48 = vshll.u32 %v2993_v8, 16  ;;  %v3262_v24 = vcvt.s32.f32 %v1759_v17 }
 0x8f1   :  { %v6380_v42 = vpop.eup %6379 }
 0x8f2   :  { %v6382_v60 = vpop.eup %6381 }
 0x8f4   :  { %6237 = vset.pattern.permute.xlu2 %v11978_v28  ;;  %5613 = vperm.xlu0 %6250, %v6380_v42   ;;  %v2992_v28 = vcvt.f32.s32 %v12115_v9 }
 0x8f6   :  { %4601 = vperm.xlu1 %6236, %v11857_v15   ;;  %v2995_v41 = vadd.s32 %v2994_v48, %v2992_v28  ;;  %v10072_v28 = vpop.permute.xlu2 %4516 }
 0x8f7   :  { %12128 = vst [vmem:[#allocation52_spill] sm:$0xff] %v10072_v28 }
 0x8f8   :  { %v10058_v44 = vpop.permute.xlu1 %4498  ;;  %v3365_v52 = vcvt.s32.f32 %v2995_v41  ;;  %v12129_v41 = vld [vmem:[#allocation72_spill] sm:$0xff] }
 0x8f9   :  { %12118 = vst [vmem:[#allocation131_spill] sm:$0xff] %v10058_v44  ;;  %v12253_v44 = vld [vmem:[#allocation132_spill] sm:$0xff] }
 0x8fa   :  { %v3493_v19 = vmul.f32 -0.5, %v3365_v52 }
 0x8fc   :  { %4607 = vperm.xlu2 %6237, %v11857_v15   ;;  %5622 = vperm.xlu0 %6250, %v6382_v60   ;;  %v1770_v60 = vshll.u32 %v1769_v31, 16  ;;  %v3726_v8 = vmul.f32 1.442695, %v3493_v19 }
 0x8fe   :  { %6239 = vset.pattern.permute.xlu1 %v11811_v4  ;;  %v1745_v4 = vcvt.f32.s32 %v12117_v0  ;;  %v1793_v0 = vcvt.f32.s32 %v12129_v41  ;;  %6383 = vpow2.f32 %v3726_v8  ;;  %v12138_v41 = vld [vmem:[#allocation209_spill] sm:$0xff] }
 0x900   :  { %v1746_v18 = vshll.u32 %v1745_v4, 16  ;;  %v3030_v4 = vshll.u32 %v3029_v10, 16 }
 0x904   :  { %6240 = vset.pattern.permute.xlu2 %v12022_v6  ;;  %v1734_v6 = vshll.u32 %v1733_v46, 16  ;;  %v1771_v46 = vadd.s32 %v1770_v60, %v1768_v2  ;;  %v1817_v2 = vcvt.f32.s32 %v12134_v55  ;;  %v3390_v60 = vmul.f32 -0.5, %v3262_v24  ;;  %v6384_v8 = vpop.eup %6383 }
 0x906   :  { %4619 = vperm.xlu1 %6239, %v11857_v15   ;;  %v1735_v23 = vadd.s32 %v1734_v6, %v1732_v40  ;;  %v12130_v6 = vld [vmem:[#allocation161_spill] sm:$0xff]  ;;  %v3263_v38 = vcvt.s32.f32 %v1771_v46  ;;  %v10083_v30 = vpop.permute.xlu2 %4534  ;;  %v1818_v46 = vshll.u32 %v1817_v2, 16 }
 0x907   :  { %v3065_v52 = vcvt.f32.s32 %v12130_v6  ;;  %12135 = vst [vmem:[#allocation59_spill] sm:$0xff] %v10083_v30 }
 0x908   :  { %v10068_v22 = vpop.permute.xlu1 %4510  ;;  %v3260_v42 = vcvt.s32.f32 %v1735_v23  ;;  %v1794_v23 = vshll.u32 %v1793_v0, 16  ;;  %v3101_v0 = vcvt.f32.s32 %v12138_v41  ;;  %v12145_v41 = vld [vmem:[#allocation76_spill] sm:$0xff] }
 0x909   :  { %12125 = vst [vmem:[#allocation194_spill] sm:$0xff] %v10068_v22  ;;  %v3066_v58 = vshll.u32 %v3065_v52, 16 }
 0x90a   :  { %v3388_v59 = vmul.f32 -0.5, %v3260_v42  ;;  %v1805_v42 = vcvt.f32.s32 %v12136_v51 }
 0x90c   :  { %4625 = vperm.xlu2 %6240, %v11857_v15   ;;  %v3516_v19 = vmul.f32 1.442695, %v3388_v59  ;;  %v1806_v52 = vshll.u32 %v1805_v42, 16  ;;  %v3520_v59 = vmul.f32 1.442695, %v3390_v60 }
 0x90e   :  { %6241 = vset.pattern.permute.xlu1 %v6938_v21  ;;  %v1747_v21 = vadd.s32 %v1746_v18, %v1744_v16  ;;  %v3064_v16 = vcvt.f32.s32 %v12131_v13  ;;  %6385 = vpow2.f32 %v3516_v19  ;;  %v12141_v19 = vld [vmem:[#allocation74_spill] sm:$0xff] }
 0x910   :  { %v3261_v48 = vcvt.s32.f32 %v1747_v21  ;;  %v12133_v21 = vld [vmem:[#allocation113_spill] sm:$0xff]  ;;  %v3067_v10 = vadd.s32 %v3066_v58, %v3064_v16 }
 0x911   :  { %v1792_v3 = vcvt.f32.s32 %v12133_v21  ;;  %v1829_v21 = vcvt.f32.s32 %v12141_v19 }
 0x912   :  { %v3389_v18 = vmul.f32 -0.5, %v3261_v48  ;;  %v12137_v48 = vld [vmem:[#allocation71_spill] sm:$0xff]  ;;  %v3371_v6 = vcvt.s32.f32 %v3067_v10  ;;  %v3102_v10 = vshll.u32 %v3101_v0, 16 }
 0x913   :  { %v1804_v17 = vcvt.f32.s32 %v12137_v48 }
 0x914   :  { %6242 = vset.pattern.permute.xlu2 %v6884_v12  ;;  %v12127_v12 = vld [vmem:[#allocation216_spill] sm:$0xff]  ;;  %v3499_v42 = vmul.f32 -0.5, %v3371_v6 }
 0x915   :  { %v3028_v9 = vcvt.f32.s32 %v12127_v12  ;;  %v3391_v12 = vmul.f32 -0.5, %v3263_v38  ;;  %v12140_v38 = vld [vmem:[#allocation226_spill] sm:$0xff]  ;;  %v1807_v58 = vadd.s32 %v1806_v52, %v1804_v17 }
 0x916   :  { %4631 = vperm.xlu1 %6241, %v11857_v15   ;;  %v10094_v60 = vpop.permute.xlu2 %4546 }
 0x917   :  { %v3031_v40 = vadd.s32 %v3030_v4, %v3028_v9  ;;  %v1795_v9 = vadd.s32 %v1794_v23, %v1792_v3  ;;  %v3522_v13 = vmul.f32 1.442695, %v3391_v12  ;;  %v12142_v3 = vld [vmem:[#allocation215_spill] sm:$0xff]  ;;  %12143 = vst [vmem:[#allocation211_spill] sm:$0xff] %v10094_v60 }
 0x918   :  { %v10079_v31 = vpop.permute.xlu1 %4528  ;;  %v3137_v55 = vcvt.f32.s32 %v12142_v3 }
 0x919   :  { %12132 = vst [vmem:[#allocation26_spill] sm:$0xff] %v10079_v31  ;;  %v3368_v11 = vcvt.s32.f32 %v3031_v40  ;;  %v3877_v40 = vsub.f32 0.0, %v6384_v8  ;;  %v3265_v16 = vcvt.s32.f32 %v1795_v9  ;;  %v12144_v8 = vld [vmem:[#allocation230_spill] sm:$0xff] }
 0x91a   :  { %v3136_v12 = vcvt.f32.s32 %v12144_v8  ;;  %v3138_v0 = vshll.u32 %v3137_v55, 16  ;;  %v12148_v8 = vld [vmem:[#allocation163_spill] sm:$0xff]  ;;  %v12251_v31 = vld [vmem:[#allocation126_spill] sm:$0xff] }
 0x91b   :  { %v3496_v4 = vmul.f32 -0.5, %v3368_v11  ;;  %v3393_v48 = vmul.f32 -0.5, %v3265_v16 }
 0x91c   :  { %4637 = vperm.xlu2 %6242, %v11857_v15   ;;  %v3139_v16 = vadd.s32 %v3138_v0, %v3136_v12 }
 0x91d   :  { %v3732_v51 = vmul.f32 1.442695, %v3496_v4 }
 0x91e   :  { %6244 = vset.pattern.permute.xlu1 %v11829_v1  ;;  %v3518_v1 = vmul.f32 1.442695, %v3389_v18  ;;  %v12139_v18 = vld [vmem:[#allocation159_spill] sm:$0xff] }
 0x91f   :  { %v1816_v24 = vcvt.f32.s32 %v12139_v18  ;;  %v1853_v18 = vcvt.f32.s32 %v12145_v41 }
 0x920   :  { %6387 = vpow2.f32 %v3518_v1  ;;  %v6386_v1 = vpop.eup %6385 }
 0x921   :  { %v1819_v11 = vadd.s32 %v1818_v46, %v1816_v24  ;;  %6389 = vpow2.f32 %v3520_v59  ;;  %v1830_v46 = vshll.u32 %v1829_v21, 16  ;;  %v3772_v6 = vsub.f32 0.0, %v6386_v1  ;;  %v12146_v59 = vld [vmem:[#allocation118_spill] sm:$0xff]  ;;  %v12149_v1 = vld [vmem:[#allocation165_spill] sm:$0xff] }
 0x922   :  { %6391 = vpow2.f32 %v3522_v13  ;;  %v3738_v24 = vmul.f32 1.442695, %v3499_v42  ;;  %v1854_v19 = vshll.u32 %v1853_v18, 16  ;;  %v1865_v42 = vcvt.f32.s32 %v12149_v1 }
 0x923   :  { %v3267_v4 = vcvt.s32.f32 %v1819_v11  ;;  %v1852_v11 = vcvt.f32.s32 %v12148_v8  ;;  %v12153_v8 = vld [vmem:[#allocation251_spill] sm:$0xff] }
 0x924   :  { %6245 = vset.pattern.permute.xlu2 %v12026_v61  ;;  %v3100_v61 = vcvt.f32.s32 %v12140_v38  ;;  %v1828_v38 = vcvt.f32.s32 %v12146_v59 }
 0x925   :  { %v3395_v55 = vmul.f32 -0.5, %v3267_v4  ;;  %v1855_v0 = vadd.s32 %v1854_v19, %v1852_v11 }
 0x926   :  { %4649 = vperm.xlu1 %6244, %v11857_v15   ;;  %v3103_v17 = vadd.s32 %v3102_v10, %v3100_v61  ;;  %v6388_v52 = vpop.eup %6387  ;;  %v12147_v61 = vld [vmem:[#allocation69_spill] sm:$0xff] }
 0x927   :  { %v4803_v13 = vmul.f32 %v12147_v61, %v3772_v6  ;;  %v3773_v41 = vsub.f32 0.0, %v6388_v52  ;;  %v1866_v61 = vshll.u32 %v1865_v42, 16 }
 0x928   :  { %v4541_v23 = vpop.permute.xlu1 %4540  ;;  %v3374_v3 = vcvt.s32.f32 %v3103_v17 }
 0x929   :  { %v4908_v2 = vmul.f32 %v4541_v23, %v3877_v40  ;;  %v3266_v40 = vcvt.s32.f32 %v1807_v58  ;;  %v3526_v23 = vmul.f32 1.442695, %v3393_v48  ;;  %v1831_v58 = vadd.s32 %v1830_v46, %v1828_v38 }
 0x92a   :  { %v3377_v48 = vcvt.s32.f32 %v3139_v16  ;;  %v4931_v17 = vmul.f32 1.442695, %v4803_v13  ;;  %v3502_v6 = vmul.f32 -0.5, %v3374_v3  ;;  %v3530_v38 = vmul.f32 1.442695, %v3395_v55 }
 0x92b   :  { %v5141_v9 = vmul.f32 1.442695, %v4908_v2  ;;  %v6390_v2 = vpop.eup %6389  ;;  %v3394_v10 = vmul.f32 -0.5, %v3266_v40  ;;  %v12152_v40 = vld [vmem:[#allocation122_spill] sm:$0xff]  ;;  %v3268_v59 = vcvt.s32.f32 %v1831_v58  ;;  %v4804_v1 = vmul.f32 %v12153_v8, %v3773_v41 }
 0x92c   :  { %4655 = vperm.xlu2 %6245, %v11857_v15   ;;  %v6392_v21 = vpop.eup %6391  ;;  %v1864_v46 = vcvt.f32.s32 %v12152_v40  ;;  %v3505_v16 = vmul.f32 -0.5, %v3377_v48  ;;  %v12155_v58 = vld [vmem:[#allocation78_spill] sm:$0xff] }
 0x92d   :  { %6393 = vpow2.f32 %v5141_v9  ;;  %v10104_v9 = vpop.permute.xlu2 %4564  ;;  %v3528_v4 = vmul.f32 1.442695, %v3394_v10  ;;  %v3775_v19 = vsub.f32 0.0, %v6392_v21  ;;  %v3396_v10 = vmul.f32 -0.5, %v3268_v59  ;;  %v12156_v40 = vld [vmem:[#allocation82_spill] sm:$0xff] }
 0x92e   :  { %6246 = vset.pattern.permute.xlu1 %v11381_v27  ;;  %6395 = vpow2.f32 %v3732_v51  ;;  %12150 = vst [vmem:[#allocation154_spill] sm:$0xff] %v10104_v9  ;;  %v12151_v51 = vld [vmem:[#allocation79_spill] sm:$0xff]  ;;  %v1888_v55 = vcvt.f32.s32 %v12155_v58  ;;  %v1867_v41 = vadd.s32 %v1866_v61, %v1864_v46  ;;  %v1901_v8 = vcvt.f32.s32 %v12156_v40 }
 0x92f   :  { %6397 = vpow2.f32 %v3738_v24  ;;  %v1889_v12 = vcvt.f32.s32 %v12151_v51  ;;  %v3774_v24 = vsub.f32 0.0, %v6390_v2  ;;  %v3744_v51 = vmul.f32 1.442695, %v3502_v6 }
 0x930   :  { %6399 = vpow2.f32 %v3526_v23  ;;  %v3270_v23 = vcvt.s32.f32 %v1855_v0  ;;  %v3532_v61 = vmul.f32 1.442695, %v3396_v10 }
 0x931   :  { %v1890_v52 = vshll.u32 %v1889_v12, 16  ;;  %6401 = vpow2.f32 %v4931_v17  ;;  %v4933_v12 = vmul.f32 1.442695, %v4804_v1 }
 0x932   :  { %6403 = vpow2.f32 %v3528_v4  ;;  %v3398_v9 = vmul.f32 -0.5, %v3270_v23 }
 0x933   :  { %v6394_v27 = vpop.eup %6393  ;;  %6405 = vpow2.f32 %v3530_v38  ;;  %v1891_v48 = vadd.s32 %v1890_v52, %v1888_v55  ;;  %v12158_v38 = vld [vmem:[#allocation18_spill] sm:$0xff]  ;;  %v12159_v52 = vmov 0   ;;  %v12161_v55 = vld [vmem:[#allocation39_spill] sm:$0xff] }
 0x934   :  { %v6396_v18 = vpop.eup %6395  ;;  %6247 = vset.pattern.permute.xlu2 %v11999_v32  ;;  %5631 = vperm.xlu0 %6250, %v6394_v27   ;;  %v12154_v32 = vld [vmem:[#allocation10_spill] sm:$0xff]  ;;  %6407 = vpow2.f32 %v3744_v51  ;;  %v4806_v1 = vmul.f32 %v12158_v38, %v3775_v19 }
 0x935   :  { %v3880_v13 = vsub.f32 0.0, %v6396_v18  ;;  %v6398_v3 = vpop.eup %6397  ;;  %v4805_v11 = vmul.f32 %v12154_v32, %v3774_v24  ;;  %v3750_v18 = vmul.f32 1.442695, %v3505_v16  ;;  %v12157_v24 = vld [vmem:[#allocation100_spill] sm:$0xff]  ;;  %v3273_v58 = vcvt.s32.f32 %v1891_v48 }
 0x936   :  { %4661 = vperm.xlu1 %6246, %v11857_v15   ;;  %v6400_v42 = vpop.eup %6399  ;;  %v4577_v21 = vpop.permute.xlu2 %4576  ;;  %v3883_v0 = vsub.f32 0.0, %v6398_v3  ;;  %v1925_v32 = vcvt.f32.s32 %v12157_v24  ;;  %v12160_v3 = vld [vmem:[#allocation129_spill] sm:$0xff] }
 0x937   :  { %v4935_v6 = vmul.f32 1.442695, %v4805_v11  ;;  %v3777_v4 = vsub.f32 0.0, %v6400_v42  ;;  %v6402_v46 = vpop.eup %6401  ;;  %v1900_v23 = vcvt.f32.s32 %v12160_v3  ;;  %v3536_v11 = vmul.f32 1.442695, %v3398_v9 }
 0x938   :  { %v4559_v27 = vpop.permute.xlu1 %4558  ;;  %v4914_v59 = vmul.f32 %v4577_v21, %v3883_v0  ;;  %v6404_v16 = vpop.eup %6403  ;;  %v1926_v51 = vshll.u32 %v1925_v32, 16 }
 0x939   :  { %v4911_v2 = vmul.f32 %v4559_v27, %v3880_v13  ;;  %v1902_v13 = vshll.u32 %v1901_v8, 16  ;;  %v3271_v27 = vcvt.s32.f32 %v1867_v41  ;;  %v12162_v8 = vld [vmem:[#allocation170_spill] sm:$0xff]  ;;  %v12163_v41 = vld [vmem:[#allocation83_spill] sm:$0xff] }
 0x93a   :  { %v5153_v10 = vmul.f32 1.442695, %v4914_v59  ;;  %v1924_v19 = vcvt.f32.s32 %v12162_v8  ;;  %v1937_v48 = vcvt.f32.s32 %v12163_v41  ;;  %v12167_v8 = vld [vmem:[#allocation167_spill] sm:$0xff] }
 0x93b   :  { %v5147_v17 = vmul.f32 1.442695, %v4911_v2  ;;  %v4808_v2 = vmul.f32 %v12161_v55, %v3777_v4  ;;  %v1903_v40 = vadd.s32 %v1902_v13, %v1900_v23  ;;  %v3399_v0 = vmul.f32 -0.5, %v3271_v27  ;;  %v12166_v55 = vld [vmem:[#allocation88_spill] sm:$0xff] }
 0x93c   :  { %4667 = vperm.xlu2 %6247, %v11857_v15   ;;  %v6406_v15 = vpop.eup %6405  ;;  %v1927_v24 = vadd.s32 %v1926_v51, %v1924_v19 }
 0x93d   :  { %6409 = vpow2.f32 %v5147_v17  ;;  %v6408_v42 = vpop.eup %6407  ;;  %v3401_v17 = vmul.f32 -0.5, %v3273_v58  ;;  %v4941_v9 = vmul.f32 1.442695, %v4808_v2  ;;  %v3274_v13 = vcvt.s32.f32 %v1903_v40 }
 0x93e   :  { %6411 = vpow2.f32 %v4933_v12  ;;  %6248 = vset.pattern.permute.xlu1 %v12159_v52  ;;  %v4937_v12 = vmul.f32 1.442695, %v4806_v1  ;;  %v3886_v59 = vsub.f32 0.0, %v6408_v42  ;;  %v3779_v38 = vsub.f32 0.0, %v6406_v15  ;;  %v12165_v1 = vld [vmem:[#allocation249_spill] sm:$0xff] }
 0x93f   :  { %6413 = vpow2.f32 %v3750_v18  ;;  %5316 = vperm.xlu1 %6248, %v6402_v46   ;;  %v3778_v46 = vsub.f32 0.0, %v6404_v16  ;;  %v3538_v27 = vmul.f32 1.442695, %v3399_v0  ;;  %v3542_v16 = vmul.f32 1.442695, %v3401_v17  ;;  %v12168_v42 = vld [vmem:[#allocation133_spill] sm:$0xff] }
 0x940   :  { %6415 = vpow2.f32 %v4935_v6  ;;  %v12164_v6 = vld [vmem:[#allocation85_spill] sm:$0xff]  ;;  %v1938_v58 = vshll.u32 %v1937_v48, 16  ;;  %v3276_v51 = vcvt.s32.f32 %v1927_v24  ;;  %v1973_v2 = vcvt.f32.s32 %v12166_v55  ;;  %v12169_v48 = vld [vmem:[#allocation172_spill] sm:$0xff] }
 0x941   :  { %6417 = vpow2.f32 %v3532_v61  ;;  %v1961_v4 = vcvt.f32.s32 %v12164_v6  ;;  %v4809_v3 = vmul.f32 %v12165_v1, %v3778_v46  ;;  %v1936_v19 = vcvt.f32.s32 %v12168_v42 }
 0x942   :  { %6419 = vpow2.f32 %v3536_v11  ;;  %v1960_v46 = vcvt.f32.s32 %v12169_v48  ;;  %v12175_v48 = vld [vmem:[#allocation174_spill] sm:$0xff] }
 0x943   :  { %v6410_v21 = vpop.eup %6409  ;;  %6421 = vpow2.f32 %v5153_v10  ;;  %v4810_v10 = vmul.f32 %v12167_v8, %v3779_v38  ;;  %v1962_v40 = vshll.u32 %v1961_v4, 16  ;;  %v1939_v17 = vadd.s32 %v1938_v58, %v1936_v19  ;;  %v12170_v38 = vld [vmem:[#allocation87_spill] sm:$0xff]  ;;  %v12172_v58 = vld [vmem:[#allocation81_spill] sm:$0xff] }
 0x944   :  { %v6412_v18 = vpop.eup %6411  ;;  %6249 = vset.pattern.permute.xlu2 %v12159_v52  ;;  %5640 = vperm.xlu0 %6250, %v6410_v21   ;;  %6423 = vpow2.f32 %v4937_v12  ;;  %v3402_v12 = vmul.f32 -0.5, %v3274_v13  ;;  %v1997_v4 = vcvt.f32.s32 %v12170_v38 }
 0x945   :  { %v6414_v32 = vpop.eup %6413  ;;  %5319 = vperm.xlu2 %6249, %v6412_v18   ;;  %6425 = vpow2.f32 %v4941_v9  ;;  %v4943_v18 = vmul.f32 1.442695, %v4809_v3  ;;  %v4945_v1 = vmul.f32 1.442695, %v4810_v10  ;;  %v1963_v9 = vadd.s32 %v1962_v40, %v1960_v46  ;;  %v12176_v46 = vld [vmem:[#allocation90_spill] sm:$0xff] }
 0x946   :  { %v6416_v61 = vpop.eup %6415  ;;  %v4596_v23 = vpop.permute.xlu2 %4595  ;;  %v3889_v15 = vsub.f32 0.0, %v6414_v32  ;;  %6427 = vpow2.f32 %v3538_v27  ;;  %v12171_v32 = vld [vmem:[#allocation255_spill] sm:$0xff]  ;;  %v3544_v3 = vmul.f32 1.442695, %v3402_v12  ;;  %v1998_v40 = vshll.u32 %v1997_v4, 16 }
 0x947   :  { %v4917_v11 = vmul.f32 %v4596_v23, %v3886_v59  ;;  %5322 = vperm.xlu1 %6248, %v6416_v61   ;;  %v6418_v52 = vpop.eup %6417  ;;  %v3404_v59 = vmul.f32 -0.5, %v3276_v51  ;;  %v1974_v61 = vshll.u32 %v1973_v2, 16  ;;  %6429 = vpow2.f32 %v3542_v16  ;;  %v12174_v16 = vld [vmem:[#allocation137_spill] sm:$0xff] }
 0x948   :  { %v6420_v41 = vpop.eup %6419  ;;  %v3780_v6 = vsub.f32 0.0, %v6418_v52  ;;  %v4920_v23 = vmul.f32 %v12171_v32, %v3889_v15  ;;  %v12173_v52 = vld [vmem:[#allocation139_spill] sm:$0xff]  ;;  %v3277_v51 = vcvt.s32.f32 %v1939_v17  ;;  %v3279_v42 = vcvt.s32.f32 %v1963_v9 }
 0x949   :  { %v5159_v21 = vmul.f32 1.442695, %v4917_v11  ;;  %v6422_v0 = vpop.eup %6421  ;;  %v3782_v27 = vsub.f32 0.0, %v6420_v41  ;;  %v1972_v55 = vcvt.f32.s32 %v12173_v52  ;;  %v3548_v2 = vmul.f32 1.442695, %v3404_v59  ;;  %v12177_v17 = vld [vmem:[#allocation91_spill] sm:$0xff] }
 0x94a   :  { %v6424_v24 = vpop.eup %6423  ;;  %v4811_v11 = vmul.f32 %v12172_v58, %v3780_v6  ;;  %v5165_v15 = vmul.f32 1.442695, %v4920_v23  ;;  %v1996_v41 = vcvt.f32.s32 %v12175_v48  ;;  %v2009_v6 = vcvt.f32.s32 %v12176_v46  ;;  %v12178_v23 = vld [vmem:[#allocation171_spill] sm:$0xff] }
 0x94b   :  { %6431 = vpow2.f32 %v5159_v21  ;;  %v6426_v13 = vpop.eup %6425  ;;  %v4813_v8 = vmul.f32 %v12174_v16, %v3782_v27  ;;  %v1975_v19 = vadd.s32 %v1974_v61, %v1972_v55  ;;  %v3407_v9 = vmul.f32 -0.5, %v3279_v42  ;;  %v12179_v55 = vld [vmem:[#allocation143_spill] sm:$0xff] }
 0x94c   :  { %5649 = vperm.xlu0 %6250, %v6422_v0   ;;  %6433 = vpow2.f32 %v4943_v18  ;;  %v6428_v10 = vpop.eup %6427  ;;  %v4947_v0 = vmul.f32 1.442695, %v4811_v11  ;;  %v3405_v18 = vmul.f32 -0.5, %v3277_v51  ;;  %v1999_v4 = vadd.s32 %v1998_v40, %v1996_v41 }
 0x94d   :  { %5325 = vperm.xlu2 %6249, %v6424_v24   ;;  %6435 = vpow2.f32 %v4945_v1  ;;  %v6430_v21 = vpop.eup %6429  ;;  %v2033_v24 = vcvt.f32.s32 %v12177_v17  ;;  %v3783_v1 = vsub.f32 0.0, %v6428_v10  ;;  %v4951_v38 = vmul.f32 1.442695, %v4813_v8 }
 0x94e   :  { %6437 = vpow2.f32 %v3544_v3  ;;  %v3280_v61 = vcvt.s32.f32 %v1975_v19  ;;  %v3785_v3 = vsub.f32 0.0, %v6430_v21  ;;  %v3550_v58 = vmul.f32 1.442695, %v3405_v18  ;;  %v12181_v19 = vld [vmem:[#allocation176_spill] sm:$0xff] }
 0x94f   :  { %5331 = vperm.xlu1 %6248, %v6426_v13   ;;  %6439 = vpow2.f32 %v3548_v2  ;;  %v4814_v13 = vmul.f32 %v12178_v23, %v3783_v1  ;;  %v2010_v11 = vshll.u32 %v2009_v6, 16  ;;  %v2034_v27 = vshll.u32 %v2033_v24, 16  ;;  %v12180_v2 = vld [vmem:[#allocation173_spill] sm:$0xff] }
 0x950   :  { %6441 = vpow2.f32 %v5165_v15  ;;  %v2008_v51 = vcvt.f32.s32 %v12179_v55  ;;  %v4816_v16 = vmul.f32 %v12180_v2, %v3785_v3  ;;  %v3554_v8 = vmul.f32 1.442695, %v3407_v9  ;;  %v12183_v6 = vld [vmem:[#allocation93_spill] sm:$0xff] }
 0x951   :  { %v6432_v12 = vpop.eup %6431  ;;  %6443 = vpow2.f32 %v4947_v0  ;;  %v3408_v10 = vmul.f32 -0.5, %v3280_v61  ;;  %v3282_v42 = vcvt.s32.f32 %v1999_v4  ;;  %v2032_v40 = vcvt.f32.s32 %v12181_v19  ;;  %v12184_v4 = vld [vmem:[#allocation22_spill] sm:$0xff] }
 0x952   :  { %v6434_v59 = vpop.eup %6433  ;;  %6445 = vpow2.f32 %v4951_v38  ;;  %v4953_v0 = vmul.f32 1.442695, %v4814_v13  ;;  %v2011_v18 = vadd.s32 %v2010_v11, %v2008_v51  ;;  %v2069_v17 = vcvt.f32.s32 %v12183_v6  ;;  %v12185_v11 = vld [vmem:[#allocation96_spill] sm:$0xff]  ;;  %v12187_v51 = vld [vmem:[#allocation175_spill] sm:$0xff] }
 0x953   :  { %v6436_v32 = vpop.eup %6435  ;;  %v2035_v41 = vadd.s32 %v2034_v27, %v2032_v40  ;;  %6447 = vpow2.f32 %v3550_v58  ;;  %v3556_v1 = vmul.f32 1.442695, %v3408_v10  ;;  %v3410_v38 = vmul.f32 -0.5, %v3282_v42  ;;  %v12186_v27 = vld [vmem:[#allocation44_spill] sm:$0xff]  ;;  %v12188_v42 = vld [vmem:[#allocation178_spill] sm:$0xff] }
 0x954   :  { %5658 = vperm.xlu0 %6250, %v6432_v12   ;;  %v6438_v52 = vpop.eup %6437  ;;  %v12182_v12 = vld [vmem:[#allocation94_spill] sm:$0xff]  ;;  %6449 = vpow2.f32 %v3554_v8  ;;  %v3283_v13 = vcvt.s32.f32 %v2011_v18  ;;  %v2081_v58 = vcvt.f32.s32 %v12185_v11  ;;  %v2044_v55 = vcvt.f32.s32 %v12186_v27 }
 0x955   :  { %5334 = vperm.xlu2 %6249, %v6434_v59   ;;  %v6440_v15 = vpop.eup %6439  ;;  %v2045_v48 = vcvt.f32.s32 %v12182_v12  ;;  %v3786_v24 = vsub.f32 0.0, %v6438_v52  ;;  %v4957_v59 = vmul.f32 1.442695, %v4816_v16  ;;  %6451 = vpow2.f32 %v4953_v0  ;;  %v12192_v11 = vld [vmem:[#allocation222_spill] sm:$0xff] }
 0x956   :  { %v6442_v21 = vpop.eup %6441  ;;  %v3788_v23 = vsub.f32 0.0, %v6440_v15  ;;  %v3285_v3 = vcvt.s32.f32 %v2035_v41  ;;  %v2070_v52 = vshll.u32 %v2069_v17, 16  ;;  %v3560_v8 = vmul.f32 1.442695, %v3410_v38  ;;  %v12189_v41 = vld [vmem:[#allocation97_spill] sm:$0xff]  ;;  %v12191_v38 = vld [vmem:[#allocation34_spill] sm:$0xff] }
 0x957   :  { %5337 = vperm.xlu1 %6248, %v6436_v32   ;;  %v6444_v46 = vpop.eup %6443  ;;  %v2046_v61 = vshll.u32 %v2045_v48, 16  ;;  %v4817_v32 = vmul.f32 %v12184_v4, %v3786_v24  ;;  %6453 = vpow2.f32 %v4957_v59  ;;  %v2068_v19 = vcvt.f32.s32 %v12188_v42  ;;  %v12190_v24 = vld [vmem:[#allocation46_spill] sm:$0xff] }
 0x958   :  { %v6446_v9 = vpop.eup %6445  ;;  %v4819_v2 = vmul.f32 %v12187_v51, %v3788_v23  ;;  %6455 = vpow2.f32 %v3556_v1  ;;  %v3411_v15 = vmul.f32 -0.5, %v3283_v13  ;;  %v3413_v48 = vmul.f32 -0.5, %v3285_v3 }
 0x959   :  { %v6448_v16 = vpop.eup %6447  ;;  %v2047_v10 = vadd.s32 %v2046_v61, %v2044_v55  ;;  %v4959_v40 = vmul.f32 1.442695, %v4817_v32  ;;  %v2082_v0 = vshll.u32 %v2081_v58, 16  ;;  %v2071_v18 = vadd.s32 %v2070_v52, %v2068_v19  ;;  %v12193_v52 = vld [vmem:[#allocation177_spill] sm:$0xff] }
 0x95a   :  { %v6450_v12 = vpop.eup %6449  ;;  %v3789_v6 = vsub.f32 0.0, %v6448_v16  ;;  %v4963_v17 = vmul.f32 1.442695, %v4819_v2  ;;  %6457 = vpow2.f32 %v3560_v8  ;;  %v3562_v23 = vmul.f32 1.442695, %v3411_v15  ;;  %v10153_v2 = vpop.permute.xlu1 %4570  ;;  %v12195_v16 = vld [vmem:[#allocation29_spill] sm:$0xff] }
 0x95b   :  { %v3286_v1 = vcvt.s32.f32 %v2047_v10  ;;  %6459 = vpow2.f32 %v4959_v40  ;;  %v3791_v4 = vsub.f32 0.0, %v6450_v12  ;;  %v3566_v13 = vmul.f32 1.442695, %v3413_v48  ;;  %12194 = vst [vmem:[#allocation155_spill] sm:$0xff] %v10153_v2  ;;  %v12196_v10 = vld [vmem:[#allocation236_spill] sm:$0xff] }
 0x95c   :  { %5667 = vperm.xlu0 %6250, %v6442_v21   ;;  %v6452_v21 = vpop.eup %6451  ;;  %v4820_v61 = vmul.f32 %v12191_v38, %v3789_v6  ;;  %v3173_v58 = vcvt.f32.s32 %v12192_v11  ;;  %v3288_v27 = vcvt.s32.f32 %v2071_v18  ;;  %6461 = vpow2.f32 %v4963_v17  ;;  %v12197_v40 = vld [vmem:[#allocation180_spill] sm:$0xff]  ;;  %v12198_v6 = vld [vmem:[#allocation101_spill] sm:$0xff] }
 0x95d   :  { %5340 = vperm.xlu2 %6249, %v6444_v46   ;;  %v2105_v46 = vcvt.f32.s32 %v12189_v41  ;;  %v6454_v59 = vpop.eup %6453  ;;  %v4822_v51 = vmul.f32 %v12193_v52, %v3791_v4  ;;  %v2117_v8 = vcvt.f32.s32 %v12195_v16  ;;  %v3172_v42 = vcvt.f32.s32 %v12196_v10  ;;  %v12200_v52 = vld [vmem:[#allocation49_spill] sm:$0xff] }
 0x95e   :  { %v6456_v32 = vpop.eup %6455  ;;  %v3414_v19 = vmul.f32 -0.5, %v3286_v1  ;;  %v2104_v12 = vcvt.f32.s32 %v12197_v40  ;;  %v4965_v15 = vmul.f32 1.442695, %v4820_v61  ;;  %v3174_v41 = vshll.u32 %v3173_v58, 16  ;;  %v12199_v61 = vld [vmem:[#allocation47_spill] sm:$0xff]  ;;  %v12204_v40 = vld [vmem:[#allocation104_spill] sm:$0xff] }
 0x95f   :  { %5346 = vperm.xlu1 %6248, %v6446_v9   ;;  %v2080_v9 = vcvt.f32.s32 %v12190_v24  ;;  %v2106_v55 = vshll.u32 %v2105_v46, 16  ;;  %v3792_v48 = vsub.f32 0.0, %v6456_v32  ;;  %v2141_v18 = vcvt.f32.s32 %v12198_v6  ;;  %v12205_v6 = vld [vmem:[#allocation103_spill] sm:$0xff] }
 0x960   :  { %6463 = vpow2.f32 %v3562_v23  ;;  %v3416_v17 = vmul.f32 -0.5, %v3288_v27  ;;  %v3175_v38 = vadd.s32 %v3174_v41, %v3172_v42  ;;  %v3568_v1 = vmul.f32 1.442695, %v3414_v19  ;;  %v12201_v27 = vld [vmem:[#allocation252_spill] sm:$0xff]  ;;  %v12203_v42 = vld [vmem:[#allocation182_spill] sm:$0xff] }
 0x961   :  { %v2083_v3 = vadd.s32 %v2082_v0, %v2080_v9  ;;  %v6458_v0 = vpop.eup %6457  ;;  %v2107_v24 = vadd.s32 %v2106_v55, %v2104_v12  ;;  %v4969_v9 = vmul.f32 1.442695, %v4822_v51  ;;  %6465 = vpow2.f32 %v3566_v13 }
 0x962   :  { %v6460_v46 = vpop.eup %6459  ;;  %6467 = vpow2.f32 %v4965_v15  ;;  %v3794_v11 = vsub.f32 0.0, %v6458_v0  ;;  %v4823_v32 = vmul.f32 %v12199_v61, %v3792_v48  ;;  %v2142_v16 = vshll.u32 %v2141_v18, 16  ;;  %v10162_v13 = vpop.permute.xlu1 %4589 }
 0x963   :  { %v6462_v4 = vpop.eup %6461  ;;  %v3572_v23 = vmul.f32 1.442695, %v3416_v17  ;;  %v3291_v10 = vcvt.s32.f32 %v2107_v24  ;;  %6469 = vpow2.f32 %v4969_v9  ;;  %12202 = vst [vmem:[#allocation105_spill] sm:$0xff] %v10162_v13  ;;  %v2140_v19 = vcvt.f32.s32 %v12203_v42  ;;  %v12210_v42 = vld [vmem:[#allocation153_spill] sm:$0xff] }
 0x964   :  { %v4825_v55 = vmul.f32 %v12201_v27, %v3794_v11  ;;  %v2153_v12 = vcvt.f32.s32 %v12204_v40  ;;  %v3380_v15 = vcvt.s32.f32 %v3175_v38  ;;  %v4971_v0 = vmul.f32 1.442695, %v4823_v32  ;;  %v12207_v27 = vld [vmem:[#allocation185_spill] sm:$0xff]  ;;  %v12212_v40 = vld [vmem:[#allocation240_spill] sm:$0xff] }
 0x965   :  { %5349 = vperm.xlu2 %6249, %v6452_v21   ;;  %v3289_v21 = vcvt.s32.f32 %v2083_v3  ;;  %v2116_v3 = vcvt.f32.s32 %v12200_v52  ;;  %6471 = vpow2.f32 %v3568_v1  ;;  %v2143_v41 = vadd.s32 %v2142_v16, %v2140_v19  ;;  %v12208_v1 = vld [vmem:[#allocation179_spill] sm:$0xff]  ;;  %v10170_v16 = vpop.permute.xlu2 %4607 }
 0x966   :  { %v6464_v51 = vpop.eup %6463  ;;  %v2177_v18 = vcvt.f32.s32 %v12205_v6  ;;  %v3419_v17 = vmul.f32 -0.5, %v3291_v10  ;;  %v4975_v24 = vmul.f32 1.442695, %v4825_v55  ;;  %6473 = vpow2.f32 %v3572_v23  ;;  %12209 = vst [vmem:[#allocation63_spill] sm:$0xff] %v10170_v16  ;;  %v10173_v23 = vpop.permute.xlu0 %4643 }
 0x967   :  { %5355 = vperm.xlu1 %6248, %v6454_v59   ;;  %v2118_v59 = vshll.u32 %v2117_v8, 16  ;;  %v3417_v58 = vmul.f32 -0.5, %v3289_v21  ;;  %v6466_v48 = vpop.eup %6465  ;;  %v3795_v9 = vsub.f32 0.0, %v6464_v51  ;;  %v2154_v11 = vshll.u32 %v2153_v12, 16  ;;  %12211 = vst [vmem:[#allocation67_spill] sm:$0xff] %v10173_v23 }
 0x968   :  { %v3797_v61 = vsub.f32 0.0, %v6466_v48  ;;  %v2189_v32 = vcvt.f32.s32 %v12207_v27  ;;  %6475 = vpow2.f32 %v4971_v0  ;;  %v2152_v10 = vcvt.f32.s32 %v12210_v42 }
 0x969   :  { %v2119_v8 = vadd.s32 %v2118_v59, %v2116_v3  ;;  %v3574_v21 = vmul.f32 1.442695, %v3417_v58  ;;  %v3508_v59 = vmul.f32 -0.5, %v3380_v15  ;;  %v12206_v3 = vld [vmem:[#allocation227_spill] sm:$0xff]  ;;  %v4826_v58 = vmul.f32 %v12208_v1, %v3795_v9  ;;  %v12213_v15 = vld [vmem:[#allocation54_spill] sm:$0xff] }
 0x96a   :  { %v3209_v38 = vcvt.f32.s32 %v12206_v3  ;;  %v3294_v55 = vcvt.s32.f32 %v2143_v41  ;;  %v2178_v51 = vshll.u32 %v2177_v18, 16  ;;  %v3578_v19 = vmul.f32 1.442695, %v3419_v17  ;;  %v10177_v0 = vpop.permute.xlu1 %4601  ;;  %v12216_v18 = vld [vmem:[#allocation57_spill] sm:$0xff]  ;;  %v12217_v17 = vld [vmem:[#allocation234_spill] sm:$0xff] }
 0x96b   :  { %6477 = vpow2.f32 %v3574_v21  ;;  %v3208_v12 = vcvt.f32.s32 %v12212_v40  ;;  %v4828_v48 = vmul.f32 %v12213_v15, %v3797_v61  ;;  %12214 = vst [vmem:[#allocation109_spill] sm:$0xff] %v10177_v0  ;;  %v2155_v6 = vadd.s32 %v2154_v11, %v2152_v10  ;;  %v12218_v61 = vld [vmem:[#allocation31_spill] sm:$0xff] }
 0x96c   :  { %6479 = vpow2.f32 %v4975_v24  ;;  %v3756_v27 = vmul.f32 1.442695, %v3508_v59  ;;  %v2188_v1 = vcvt.f32.s32 %v12216_v18  ;;  %v3210_v42 = vshll.u32 %v3209_v38, 16  ;;  %v12220_v18 = vld [vmem:[#allocation181_spill] sm:$0xff] }
 0x96d   :  { %5358 = vperm.xlu2 %6249, %v6460_v46   ;;  %v6468_v46 = vpop.eup %6467  ;;  %v2190_v21 = vshll.u32 %v2189_v32, 16  ;;  %v3422_v23 = vmul.f32 -0.5, %v3294_v55  ;;  %v3245_v24 = vcvt.f32.s32 %v12217_v17  ;;  %v2213_v15 = vcvt.f32.s32 %v12218_v61  ;;  %v12225_v61 = vld [vmem:[#allocation25_spill] sm:$0xff] }
 0x96e   :  { %v6470_v52 = vpop.eup %6469  ;;  %v3211_v0 = vadd.s32 %v3210_v42, %v3208_v12  ;;  %v4981_v11 = vmul.f32 1.442695, %v4828_v48  ;;  %6481 = vpow2.f32 %v3578_v19  ;;  %v12222_v48 = vld [vmem:[#allocation111_spill] sm:$0xff]  ;;  %v10191_v42 = vpop.permute.xlu0 %4188 }
 0x96f   :  { %5364 = vperm.xlu1 %6248, %v6462_v4   ;;  %v3292_v4 = vcvt.s32.f32 %v2119_v8  ;;  %v6472_v8 = vpop.eup %6471  ;;  %6483 = vpow2.f32 %v3756_v27  ;;  %v2191_v32 = vadd.s32 %v2190_v21, %v2188_v1  ;;  %v2225_v19 = vcvt.f32.s32 %v12222_v48 }
 0x970   :  { %v6474_v41 = vpop.eup %6473  ;;  %v3798_v40 = vsub.f32 0.0, %v6472_v8  ;;  %v3584_v8 = vmul.f32 1.442695, %v3422_v23  ;;  %v2212_v23 = vcvt.f32.s32 %v12225_v61 }
 0x971   :  { %v3420_v3 = vmul.f32 -0.5, %v3292_v4  ;;  %v6476_v13 = vpop.eup %6475  ;;  %v3295_v4 = vcvt.s32.f32 %v2155_v6  ;;  %v2214_v6 = vshll.u32 %v2213_v15, 16 }
 0x972   :  { %v6478_v10 = vpop.eup %6477  ;;  %v4829_v17 = vmul.f32 %v12220_v18, %v3798_v40  ;;  %v3298_v40 = vcvt.s32.f32 %v2191_v32  ;;  %v2226_v18 = vshll.u32 %v2225_v19, 16 }
 0x973   :  { %v3580_v59 = vmul.f32 1.442695, %v3420_v3  ;;  %v6480_v38 = vpop.eup %6479  ;;  %v3383_v3 = vcvt.s32.f32 %v3211_v0  ;;  %v3423_v1 = vmul.f32 -0.5, %v3295_v4  ;;  %v3801_v21 = vsub.f32 0.0, %v6478_v10  ;;  %v12227_v4 = vld [vmem:[#allocation64_spill] sm:$0xff] }
 0x974   :  { %v3426_v61 = vmul.f32 -0.5, %v3298_v40 }
 0x975   :  { %5367 = vperm.xlu2 %6249, %v6468_v46   ;;  %v12215_v46 = vld [vmem:[#allocation184_spill] sm:$0xff]  ;;  %v3511_v48 = vmul.f32 -0.5, %v3383_v3  ;;  %v3586_v10 = vmul.f32 1.442695, %v3423_v1 }
 0x976   :  { %v2176_v9 = vcvt.f32.s32 %v12215_v46  ;;  %v3800_v46 = vsub.f32 0.0, %v6474_v41 }
 0x977   :  { %5373 = vperm.xlu1 %6248, %v6470_v52   ;;  %v4977_v52 = vmul.f32 1.442695, %v4826_v58  ;;  %v12219_v58 = vld [vmem:[#allocation243_spill] sm:$0xff] }
 0x978   :  { %v2179_v16 = vadd.s32 %v2178_v51, %v2176_v9  ;;  %v3244_v55 = vcvt.f32.s32 %v12219_v58  ;;  %v10185_v51 = vpop.permute.xlu2 %4625  ;;  %v3246_v9 = vshll.u32 %v3245_v24, 16  ;;  %v10189_v41 = vpop.permute.xlu1 %4619 }
 0x979   :  { %6485 = vpow2.f32 %v4977_v52  ;;  %12221 = vst [vmem:[#allocation68_spill] sm:$0xff] %v10185_v51  ;;  %v6482_v52 = vpop.eup %6481  ;;  %v2224_v51 = vcvt.f32.s32 %v12227_v4  ;;  %v10202_v4 = vpop.permute.xlu0 %4673 }
 0x97a   :  { %v3297_v12 = vcvt.s32.f32 %v2179_v16  ;;  %6487 = vpow2.f32 %v4981_v11  ;;  %12224 = vst [vmem:[#allocation203_spill] sm:$0xff] %v10189_v41  ;;  %v3247_v24 = vadd.s32 %v3246_v9, %v3244_v55  ;;  %v4983_v16 = vmul.f32 1.442695, %v4829_v17  ;;  %v6484_v58 = vpop.eup %6483  ;;  %v12228_v17 = vld [vmem:[#allocation254_spill] sm:$0xff] }
 0x97b   :  { %6489 = vpow2.f32 %v3580_v59  ;;  %v3803_v41 = vsub.f32 0.0, %v6482_v52  ;;  %v4832_v9 = vmul.f32 %v12228_v17, %v3801_v21  ;;  %v2227_v59 = vadd.s32 %v2226_v18, %v2224_v51  ;;  %12233 = vst [vmem:[#allocation216_spill] sm:$0xff] %v10202_v4 }
 0x97c   :  { %v3425_v0 = vmul.f32 -0.5, %v3297_v12  ;;  %6491 = vpow2.f32 %v3584_v8  ;;  %v3386_v55 = vcvt.s32.f32 %v3247_v24  ;;  %v12230_v8 = vld [vmem:[#allocation12_spill] sm:$0xff]  ;;  %v3762_v52 = vmul.f32 1.442695, %v3511_v48  ;;  %v12232_v24 = vld [vmem:[#allocation114_spill] sm:$0xff] }
 0x97d   :  { %5376 = vperm.xlu2 %6249, %v6476_v13   ;;  %v12223_v13 = vld [vmem:[#allocation183_spill] sm:$0xff]  ;;  %6493 = vpow2.f32 %v4983_v16  ;;  %v2261_v16 = vcvt.f32.s32 %v12232_v24  ;;  %v3592_v18 = vmul.f32 1.442695, %v3426_v61  ;;  %v12235_v24 = vld [vmem:[#allocation156_spill] sm:$0xff] }
 0x97e   :  { %v4831_v27 = vmul.f32 %v12223_v13, %v3800_v46  ;;  %v2215_v46 = vadd.s32 %v2214_v6, %v2212_v23  ;;  %v3892_v6 = vsub.f32 0.0, %v6484_v58  ;;  %v3514_v58 = vmul.f32 -0.5, %v3386_v55 }
 0x97f   :  { %5382 = vperm.xlu1 %6248, %v6480_v38   ;;  %v12226_v38 = vld [vmem:[#allocation110_spill] sm:$0xff]  ;;  %v6486_v11 = vpop.eup %6485  ;;  %v2262_v4 = vshll.u32 %v2261_v16, 16 }
 0x980   :  { %v2249_v15 = vcvt.f32.s32 %v12226_v38  ;;  %v4987_v13 = vmul.f32 1.442695, %v4831_v27  ;;  %v6488_v32 = vpop.eup %6487  ;;  %v10197_v19 = vpop.permute.xlu2 %4637  ;;  %v3590_v38 = vmul.f32 1.442695, %v3425_v0  ;;  %v3300_v3 = vcvt.s32.f32 %v2215_v46 }
 0x981   :  { %12229 = vst [vmem:[#allocation107_spill] sm:$0xff] %v10197_v19  ;;  %v4834_v27 = vmul.f32 %v12230_v8, %v3803_v41  ;;  %v6490_v23 = vpop.eup %6489  ;;  %v4989_v46 = vmul.f32 1.442695, %v4832_v9  ;;  %v2260_v19 = vcvt.f32.s32 %v12235_v24  ;;  %v12243_v24 = vld [vmem:[#allocation23_spill] sm:$0xff] }
 0x982   :  { %v2250_v12 = vshll.u32 %v2249_v15, 16  ;;  %6495 = vpow2.f32 %v4987_v13  ;;  %v6492_v51 = vpop.eup %6491  ;;  %v12234_v15 = vld [vmem:[#allocation42_spill] sm:$0xff]  ;;  %v3428_v17 = vmul.f32 -0.5, %v3300_v3  ;;  %v3804_v8 = vsub.f32 0.0, %v6490_v23  ;;  %v12238_v23 = vld [vmem:[#allocation123_spill] sm:$0xff] }
 0x983   :  { %6497 = vpow2.f32 %v3586_v10  ;;  %v2285_v0 = vcvt.f32.s32 %v12234_v15  ;;  %v6494_v48 = vpop.eup %6493  ;;  %v3806_v10 = vsub.f32 0.0, %v6492_v51 }
 0x984   :  { %6499 = vpow2.f32 %v3590_v38 }
 0x985   :  { %5385 = vperm.xlu2 %6249, %v6486_v11   ;;  %v12231_v11 = vld [vmem:[#allocation108_spill] sm:$0xff]  ;;  %6501 = vpow2.f32 %v3762_v52  ;;  %v3596_v52 = vmul.f32 1.442695, %v3428_v17 }
 0x986   :  { %v2248_v40 = vcvt.f32.s32 %v12231_v11  ;;  %v4993_v11 = vmul.f32 1.442695, %v4834_v27  ;;  %v2357_v27 = vcvt.f32.s32 %v12238_v23 }
 0x987   :  { %5391 = vperm.xlu1 %6248, %v6488_v32   ;;  %v3301_v32 = vcvt.s32.f32 %v2227_v59  ;;  %v3768_v59 = vmul.f32 1.442695, %v3514_v58  ;;  %v10214_v58 = vpop.permute.xlu0 %5328 }
 0x988   :  { %v4632_v1 = vpop.permute.xlu1 %4631  ;;  %v2251_v41 = vadd.s32 %v2250_v12, %v2248_v40  ;;  %v6496_v61 = vpop.eup %6495  ;;  %v12239_v40 = vld [vmem:[#allocation189_spill] sm:$0xff] }
 0x989   :  { %v4923_v21 = vmul.f32 %v4632_v1, %v3892_v6  ;;  %v2286_v6 = vshll.u32 %v2285_v0, 16  ;;  %v12236_v1 = vld [vmem:[#allocation60_spill] sm:$0xff]  ;;  %v10207_v9 = vpop.permute.xlu2 %4655  ;;  %v6498_v12 = vpop.eup %6497  ;;  %v3429_v38 = vmul.f32 -0.5, %v3301_v32  ;;  %v2284_v16 = vcvt.f32.s32 %v12239_v40 }
 0x98a   :  { %v4835_v55 = vmul.f32 %v12236_v1, %v3804_v8  ;;  %12237 = vst [vmem:[#allocation72_spill] sm:$0xff] %v10207_v9  ;;  %v3303_v3 = vcvt.s32.f32 %v2251_v41  ;;  %v6500_v15 = vpop.eup %6499  ;;  %v12241_v0 = vld [vmem:[#allocation160_spill] sm:$0xff]  ;;  %v2321_v1 = vcvt.f32.s32 %v12243_v24 }
 0x98b   :  { %v5171_v13 = vmul.f32 1.442695, %v4923_v21  ;;  %v12240_v21 = vld [vmem:[#allocation66_spill] sm:$0xff]  ;;  %v6502_v32 = vpop.eup %6501  ;;  %v2287_v41 = vadd.s32 %v2286_v6, %v2284_v16  ;;  %v12245_v9 = vld [vmem:[#allocation124_spill] sm:$0xff]  ;;  %v12246_v16 = vld [vmem:[#allocation121_spill] sm:$0xff] }
 0x98c   :  { %v4837_v51 = vmul.f32 %v12240_v21, %v3806_v10  ;;  %v3431_v40 = vmul.f32 -0.5, %v3303_v3  ;;  %v2358_v10 = vshll.u32 %v2357_v27, 16  ;;  %v2356_v24 = vcvt.f32.s32 %v12246_v16 }
 0x98d   :  { %6503 = vpow2.f32 %v5171_v13  ;;  %5394 = vperm.xlu2 %6249, %v6494_v48   ;;  %v2296_v13 = vcvt.f32.s32 %v12241_v0  ;;  %v12242_v48 = vld [vmem:[#allocation115_spill] sm:$0xff]  ;;  %v2333_v0 = vcvt.f32.s32 %v12245_v9  ;;  %v3306_v60 = vcvt.s32.f32 %v2287_v41 }
 0x98e   :  { %6505 = vpow2.f32 %v4989_v46  ;;  %v2263_v46 = vadd.s32 %v2262_v4, %v2260_v19  ;;  %v2297_v8 = vcvt.f32.s32 %v12242_v48  ;;  %v4999_v19 = vmul.f32 1.442695, %v4837_v51  ;;  %v12248_v51 = vld [vmem:[#allocation117_spill] sm:$0xff] }
 0x98f   :  { %6507 = vpow2.f32 %v3592_v18  ;;  %5400 = vperm.xlu1 %6248, %v6496_v61   ;;  %v4995_v18 = vmul.f32 1.442695, %v4835_v55  ;;  %v12244_v61 = vld [vmem:[#allocation80_spill] sm:$0xff]  ;;  %v3807_v4 = vsub.f32 0.0, %v6498_v12  ;;  %v3809_v55 = vsub.f32 0.0, %v6500_v15 }
 0x990   :  { %6509 = vpow2.f32 %v4993_v11  ;;  %v2332_v23 = vcvt.f32.s32 %v12244_v61  ;;  %v3598_v11 = vmul.f32 1.442695, %v3429_v38  ;;  %v3304_v2 = vcvt.s32.f32 %v2263_v46  ;;  %v12247_v38 = vld [vmem:[#allocation158_spill] sm:$0xff] }
 0x991   :  { %6511 = vpow2.f32 %v3768_v59  ;;  %v2298_v6 = vshll.u32 %v2297_v8, 16  ;;  %v2322_v61 = vshll.u32 %v2321_v1, 16  ;;  %v4838_v3 = vmul.f32 %v12247_v38, %v3807_v4 }
 0x992   :  { %6513 = vpow2.f32 %v3596_v52  ;;  %v3602_v30 = vmul.f32 1.442695, %v3431_v40  ;;  %v2359_v9 = vadd.s32 %v2358_v10, %v2356_v24  ;;  %v3895_v12 = vsub.f32 0.0, %v6502_v32 }
 0x993   :  { %v6504_v17 = vpop.eup %6503  ;;  %6515 = vpow2.f32 %v4995_v18  ;;  %v2320_v46 = vcvt.f32.s32 %v12248_v51  ;;  %v2334_v8 = vshll.u32 %v2333_v0, 16  ;;  %v3432_v1 = vmul.f32 -0.5, %v3304_v2  ;;  %v10224_v18 = vpop.permute.xlu0 %5343 }
 0x994   :  { %v6506_v21 = vpop.eup %6505  ;;  %5676 = vperm.xlu0 %6250, %v6504_v17   ;;  %6517 = vpow2.f32 %v3598_v11  ;;  %v12249_v17 = vld [vmem:[#allocation35_spill] sm:$0xff]  ;;  %v3434_v10 = vmul.f32 -0.5, %v3306_v60  ;;  %v2299_v11 = vadd.s32 %v2298_v6, %v2296_v13  ;;  %v5001_v32 = vmul.f32 1.442695, %v4838_v3 }
 0x995   :  { %v6508_v48 = vpop.eup %6507  ;;  %5403 = vperm.xlu2 %6249, %v6506_v21   ;;  %v4840_v16 = vmul.f32 %v12249_v17, %v3809_v55  ;;  %6519 = vpow2.f32 %v4999_v19  ;;  %v12250_v21 = vld [vmem:[#allocation169_spill] sm:$0xff]  ;;  %v2323_v24 = vadd.s32 %v2322_v61, %v2320_v46  ;;  %v2369_v51 = vcvt.f32.s32 %v12251_v31  ;;  %v12252_v17 = vld [vmem:[#allocation128_spill] sm:$0xff] }
 0x996   :  { %v6510_v59 = vpop.eup %6509  ;;  %v4668_v27 = vpop.permute.xlu2 %4667  ;;  %v2368_v41 = vcvt.f32.s32 %v12250_v21  ;;  %v3810_v4 = vsub.f32 0.0, %v6508_v48  ;;  %v2335_v19 = vadd.s32 %v2334_v8, %v2332_v23  ;;  %v2393_v22 = vcvt.f32.s32 %v12252_v17  ;;  %v12254_v31 = vld [vmem:[#allocation112_spill] sm:$0xff] }
 0x997   :  { %5409 = vperm.xlu1 %6248, %v6510_v59   ;;  %v6512_v52 = vpop.eup %6511  ;;  %v3312_v59 = vcvt.s32.f32 %v2359_v9  ;;  %v5005_v21 = vmul.f32 1.442695, %v4840_v16  ;;  %6521 = vpow2.f32 %v3602_v30  ;;  %v2405_v48 = vcvt.f32.s32 %v12253_v44  ;;  %v12255_v44 = vld [vmem:[#allocation162_spill] sm:$0xff] }
 0x998   :  { %v4650_v15 = vpop.permute.xlu1 %4649  ;;  %v6514_v40 = vpop.eup %6513  ;;  %v3898_v0 = vsub.f32 0.0, %v6512_v52  ;;  %v3604_v13 = vmul.f32 1.442695, %v3432_v1  ;;  %v3307_v6 = vcvt.s32.f32 %v2299_v11  ;;  %v4841_v61 = vmul.f32 %v12254_v31, %v3810_v4 }
 0x999   :  { %v4926_v38 = vmul.f32 %v4650_v15, %v3895_v12  ;;  %v6516_v55 = vpop.eup %6515  ;;  %v3812_v12 = vsub.f32 0.0, %v6514_v40  ;;  %v3608_v3 = vmul.f32 1.442695, %v3434_v10  ;;  %v3309_v9 = vcvt.s32.f32 %v2323_v24 }
 0x99a   :  { %v6518_v2 = vpop.eup %6517  ;;  %v4929_v15 = vmul.f32 %v4668_v27, %v3898_v0  ;;  %v3440_v23 = vmul.f32 -0.5, %v3312_v59  ;;  %v2370_v52 = vshll.u32 %v2369_v51, 16  ;;  %v3310_v30 = vcvt.s32.f32 %v2335_v19  ;;  %v12258_v19 = vld [vmem:[#allocation130_spill] sm:$0xff] }
 0x99b   :  { %v5177_v28 = vmul.f32 1.442695, %v4926_v38  ;;  %v6520_v60 = vpop.eup %6519  ;;  %v2394_v8 = vshll.u32 %v2393_v22, 16  ;;  %v4843_v27 = vmul.f32 %v12255_v44, %v3812_v12  ;;  %v2406_v38 = vshll.u32 %v2405_v48, 16  ;;  %v10236_v17 = vpop.permute.xlu0 %5352  ;;  %v12260_v44 = vld [vmem:[#allocation168_spill] sm:$0xff] }
 0x99c   :  { %v3813_v1 = vsub.f32 0.0, %v6518_v2  ;;  %v5183_v40 = vmul.f32 1.442695, %v4929_v15  ;;  %v3435_v10 = vmul.f32 -0.5, %v3307_v6  ;;  %v5007_v24 = vmul.f32 1.442695, %v4841_v61 }
 0x99d   :  { %6523 = vpow2.f32 %v5177_v28  ;;  %5412 = vperm.xlu2 %6249, %v6516_v55   ;;  %v12256_v28 = vld [vmem:[#allocation86_spill] sm:$0xff]  ;;  %v6522_v11 = vpop.eup %6521  ;;  %v3437_v51 = vmul.f32 -0.5, %v3309_v9  ;;  %v3620_v0 = vmul.f32 1.442695, %v3440_v23  ;;  %v2371_v55 = vadd.s32 %v2370_v52, %v2368_v41 }
 0x99e   :  { %6525 = vpow2.f32 %v5001_v32  ;;  %v2404_v16 = vcvt.f32.s32 %v12256_v28  ;;  %v12257_v32 = vld [vmem:[#allocation193_spill] sm:$0xff]  ;;  %v2429_v22 = vcvt.f32.s32 %v12258_v19  ;;  %v3438_v12 = vmul.f32 -0.5, %v3310_v30 }
 0x99f   :  { %v10230_v46 = vpop.permute.xlu2 %5319  ;;  %5418 = vperm.xlu1 %6248, %v6520_v60   ;;  %6527 = vpow2.f32 %v5005_v21  ;;  %v2392_v4 = vcvt.f32.s32 %v12257_v32  ;;  %v5011_v48 = vmul.f32 1.442695, %v4843_v27  ;;  %v3610_v6 = vmul.f32 1.442695, %v3435_v10 }
 0x9a0   :  { %6529 = vpow2.f32 %v3604_v13  ;;  %v2407_v2 = vadd.s32 %v2406_v38, %v2404_v16  ;;  %v12259_v13 = vld [vmem:[#allocation190_spill] sm:$0xff]  ;;  %v3815_v61 = vsub.f32 0.0, %v6522_v11  ;;  %v3614_v41 = vmul.f32 1.442695, %v3437_v51  ;;  %v12262_v38 = vld [vmem:[#allocation19_spill] sm:$0xff] }
 0x9a1   :  { %v2395_v60 = vadd.s32 %v2394_v8, %v2392_v4  ;;  %6531 = vpow2.f32 %v3608_v3  ;;  %v4844_v31 = vmul.f32 %v12259_v13, %v3813_v1  ;;  %v3313_v9 = vcvt.s32.f32 %v2371_v55 }
 0x9a2   :  { %6533 = vpow2.f32 %v5183_v40  ;;  %v2430_v23 = vshll.u32 %v2429_v22, 16  ;;  %v3616_v8 = vmul.f32 1.442695, %v3438_v12  ;;  %v4846_v27 = vmul.f32 %v12260_v44, %v3815_v61  ;;  %v12263_v40 = vld [vmem:[#allocation135_spill] sm:$0xff]  ;;  %v12264_v12 = vld [vmem:[#allocation92_spill] sm:$0xff] }
 0x9a3   :  { %v6524_v59 = vpop.eup %6523  ;;  %6535 = vpow2.f32 %v5007_v24  ;;  %v3315_v3 = vcvt.s32.f32 %v2395_v60  ;;  %v3316_v16 = vcvt.s32.f32 %v2407_v2  ;;  %v2428_v1 = vcvt.f32.s32 %v12262_v38  ;;  %v10246_v51 = vpop.permute.xlu0 %5361 }
 0x9a4   :  { %v6526_v21 = vpop.eup %6525  ;;  %5685 = vperm.xlu0 %6250, %v6524_v59   ;;  %6537 = vpow2.f32 %v3620_v0  ;;  %v2441_v11 = vcvt.f32.s32 %v12263_v40  ;;  %v5013_v4 = vmul.f32 1.442695, %v4844_v31  ;;  %v3441_v24 = vmul.f32 -0.5, %v3313_v9  ;;  %v12266_v31 = vld [vmem:[#allocation191_spill] sm:$0xff]  ;;  %v12269_v40 = vld [vmem:[#allocation30_spill] sm:$0xff] }
 0x9a5   :  { %5421 = vperm.xlu2 %6249, %v6526_v21   ;;  %v6528_v15 = vpop.eup %6527  ;;  %6539 = vpow2.f32 %v5011_v48  ;;  %v2431_v59 = vadd.s32 %v2430_v23, %v2428_v1  ;;  %v3443_v55 = vmul.f32 -0.5, %v3315_v3  ;;  %v5017_v22 = vmul.f32 1.442695, %v4846_v27  ;;  %v12268_v3 = vld [vmem:[#allocation38_spill] sm:$0xff] }
 0x9a6   :  { %v6530_v30 = vpop.eup %6529  ;;  %6541 = vpow2.f32 %v3610_v6  ;;  %v2440_v60 = vcvt.f32.s32 %v12264_v12  ;;  %v3444_v48 = vmul.f32 -0.5, %v3316_v16  ;;  %v2442_v2 = vshll.u32 %v2441_v11, 16  ;;  %v12265_v6 = vld [vmem:[#allocation99_spill] sm:$0xff] }
 0x9a7   :  { %v10239_v52 = vpop.permute.xlu2 %5325  ;;  %5427 = vperm.xlu1 %6248, %v6528_v15   ;;  %v6532_v32 = vpop.eup %6531  ;;  %6543 = vpow2.f32 %v3614_v41  ;;  %v3816_v19 = vsub.f32 0.0, %v6530_v30  ;;  %v12267_v41 = vld [vmem:[#allocation186_spill] sm:$0xff]  ;;  %v3622_v44 = vmul.f32 1.442695, %v3441_v24  ;;  %v3626_v16 = vmul.f32 1.442695, %v3443_v55 }
 0x9a8   :  { %v10242_v28 = vpop.permute.xlu1 %4661  ;;  %v6534_v10 = vpop.eup %6533  ;;  %6545 = vpow2.f32 %v3616_v8  ;;  %v3818_v9 = vsub.f32 0.0, %v6532_v32  ;;  %v3318_v8 = vcvt.s32.f32 %v2431_v59  ;;  %v10257_v11 = vadd.s32 4294967288, %v12269_v40  ;;  %v12270_v24 = vld [vmem:[#allocation136_spill] sm:$0xff] }
 0x9a9   :  { %12261 = vst [vmem:[#allocation161_spill] sm:$0xff] %v10242_v28  ;;  %v6536_v0 = vpop.eup %6535  ;;  %6547 = vpow2.f32 %v5013_v4  ;;  %v4847_v61 = vmul.f32 %v12266_v31, %v3816_v19  ;;  %v3628_v32 = vmul.f32 1.442695, %v3444_v48  ;;  %v2465_v59 = vcvt.f32.s32 %v12270_v24  ;;  %v12272_v30 = vld [vmem:[#allocation48_spill] sm:$0xff] }
 0x9aa   :  { %v6538_v21 = vpop.eup %6537  ;;  %v4849_v1 = vmul.f32 %v9875_v49, %v3818_v9  ;;  %6549 = vpow2.f32 %v5017_v22  ;;  %v5701_v55 = vperm.slane %v10230_v46, %v10257_v11  ;;  %v12271_v22 = vld [vmem:[#allocation32_spill] sm:$0xff]  ;;  %v3446_v9 = vmul.f32 -0.5, %v3318_v8 }
 0x9ab   :  { %v6540_v15 = vpop.eup %6539  ;;  %v5019_v31 = vmul.f32 1.442695, %v4847_v61  ;;  %v2477_v23 = vcvt.f32.s32 %v12272_v30  ;;  %6551 = vpow2.f32 %v3622_v44  ;;  %v2466_v28 = vshll.u32 %v2465_v59, 16 }
 0x9ac   :  { %5694 = vperm.xlu0 %6250, %v6534_v10   ;;  %v6542_v38 = vpop.eup %6541  ;;  %v3824_v10 = vsub.f32 0.0, %v6538_v21  ;;  %v10267_v21 = vpop.permute.xlu0 %5370  ;;  %6553 = vpow2.f32 %v3626_v16  ;;  %v3632_v44 = vmul.f32 1.442695, %v3446_v9  ;;  %v12275_v16 = vld [vmem:[#allocation27_spill] sm:$0xff] }
 0x9ad   :  { %5430 = vperm.xlu2 %6249, %v6536_v0   ;;  %v6544_v4 = vpop.eup %6543  ;;  %v2443_v0 = vadd.s32 %v2442_v2, %v2440_v60  ;;  %v3819_v48 = vsub.f32 0.0, %v6542_v38  ;;  %v5023_v2 = vmul.f32 1.442695, %v4849_v1  ;;  %6555 = vpow2.f32 %v3628_v32 }
 0x9ae   :  { %v10259_v12 = vpop.eup %6545  ;;  %v3821_v13 = vsub.f32 0.0, %v6544_v4  ;;  %6557 = vpow2.f32 %v5019_v31  ;;  %v2464_v38 = vcvt.f32.s32 %v12274_v14  ;;  %v2478_v1 = vshll.u32 %v2477_v23, 16 }
 0x9af   :  { %v10253_v27 = vpop.permute.xlu2 %5334  ;;  %5436 = vperm.xlu1 %6248, %v6540_v15   ;;  %v6548_v60 = vpop.eup %6547  ;;  %v3319_v61 = vcvt.s32.f32 %v2443_v0  ;;  %v3822_v46 = vsub.f32 0.0, %v10259_v12  ;;  %v12273_v15 = vld [vmem:[#allocation237_spill] sm:$0xff]  ;;  %v4850_v30 = vmul.f32 %v10191_v42, %v3819_v48  ;;  %v2501_v36 = vcvt.f32.s32 %v12275_v16  ;;  %v12276_v12 = vld [vmem:[#allocation144_spill] sm:$0xff] }
 0x9b0   :  { %v4855_v8 = vmul.f32 %v12273_v15, %v3824_v10  ;;  %v10278_v4 = vadd.s32 4294967264, %v12269_v40  ;;  %v10281_v32 = vadd.s32 4294967280, %v12269_v40  ;;  %6559 = vpow2.f32 %v5023_v2 }
 0x9b1   :  { %v5317_v19 = vpop.permute.xlu1 %5316  ;;  %v4852_v10 = vmul.f32 %v9880_v5, %v3821_v13  ;;  %v3447_v0 = vmul.f32 -0.5, %v3319_v61  ;;  %v2513_v14 = vcvt.f32.s32 %v12276_v12  ;;  %v10288_v23 = vadd.s32 4294967272, %v12269_v40 }
 0x9b2   :  { %v5699_v49 = vperm.slane %v5317_v19, %v12269_v40  ;;  %v6550_v19 = vpop.eup %6549  ;;  %v5025_v15 = vmul.f32 1.442695, %v4850_v30  ;;  %v2502_v5 = vshll.u32 %v2501_v36, 16  ;;  %6561 = vpow2.f32 %v3632_v44 }
 0x9b3   :  { %v10284_v42 = vpop.eup %6551  ;;  %v5709_v13 = vperm.slane %v10239_v52, %v10288_v23  ;;  %v12277_v2 = vcvt.f32.s32 %v12265_v6  ;;  %v2514_v12 = vshll.u32 %v2513_v14, 16  ;;  %v4853_v6 = vmul.f32 %v9898_v57, %v3822_v46 }
 0x9b4   :  { %v5703_v24 = vsel %vm5702_vm8, %v5701_v55, %v5699_v49  ;;  %v10290_v31 = vpop.eup %6553  ;;  %v2467_v49 = vadd.s32 %v2466_v28, %v2464_v38  ;;  %v5029_v28 = vmul.f32 1.442695, %v4852_v10  ;;  %v12278_v38 = vld [vmem:[#allocation138_spill] sm:$0xff]  ;;  %v10304_v44 = vpop.permute.xlu0 %5379  ;;  %6563 = vpow2.f32 %v5025_v15 }
 0x9b5   :  { %5439 = vperm.xlu2 %6249, %v6548_v60   ;;  %v10293_v60 = vpop.eup %6555  ;;  %v2479_v61 = vadd.s32 %v2478_v1, %v12277_v2  ;;  %v2500_v16 = vcvt.f32.s32 %v12278_v38  ;;  %v12280_v1 = vld [vmem:[#allocation15_spill] sm:$0xff]  ;;  %v12281_v2 = vld [vmem:[#allocation13_spill] sm:$0xff]  ;;  %v12282_v57 = vcvt.f32.s32 %v12267_v41 }
 0x9b6   :  { %v6558_v48 = vpop.eup %6557  ;;  %v3321_v45 = vcvt.s32.f32 %v2467_v49  ;;  %v2549_v14 = vcvt.f32.s32 %v12281_v2  ;;  %6565 = vpow2.f32 %v5029_v28 }
 0x9b7   :  { %v10275_v55 = vpop.permute.xlu2 %5340  ;;  %5445 = vperm.xlu1 %6248, %v6550_v19   ;;  %v5713_v19 = vperm.slane %v10214_v58, %v10278_v4  ;;  %v6560_v43 = vpop.eup %6559  ;;  %v3322_v29 = vcvt.s32.f32 %v2479_v61  ;;  %v2515_v46 = vadd.s32 %v2514_v12, %v12282_v57  ;;  %v12283_v61 = vld [vmem:[#allocation28_spill] sm:$0xff] }
 0x9b8   :  { %v10316_v49 = vpop.eup %6561  ;;  %v2550_v28 = vshll.u32 %v2549_v14, 16  ;;  %v3828_v14 = vsub.f32 0.0, %v10293_v60 }
 0x9b9   :  { %v5323_v59 = vpop.permute.xlu1 %5322  ;;  %v3450_v12 = vmul.f32 -0.5, %v3322_v29 }
 0x9ba   :  { %v5705_v9 = vperm.slane %v5323_v59, %v10281_v32  ;;  %v12279_v59 = vld [vmem:[#allocation141_spill] sm:$0xff]  ;;  %v6564_v41 = vpop.eup %6563 }
 0x9bb   :  { %v2537_v36 = vcvt.f32.s32 %v12279_v59  ;;  %v3634_v59 = vmul.f32 1.442695, %v3447_v0 }
 0x9bc   :  { %v5707_v30 = vsel %vm5706_vm13, %v5705_v9, %v5703_v24  ;;  %v5035_v24 = vmul.f32 1.442695, %v4855_v8  ;;  %v2503_v9 = vadd.s32 %v2502_v5, %v2500_v16  ;;  %v10321_v8 = vadd.s32 4294967248, %v12269_v40 }
 0x9bd   :  { %v5711_v52 = vsel %vm5710_vm0, %v5709_v13, %v5707_v30  ;;  %5448 = vperm.xlu2 %6249, %v6558_v48   ;;  %v10314_v13 = vadd.s32 4294967256, %v12269_v40  ;;  %v2538_v15 = vshll.u32 %v2537_v36, 16  ;;  %v3449_v48 = vmul.f32 -0.5, %v3321_v45 }
 0x9be   :  { %v5715_v58 = vsel %vm5714_vm6, %v5713_v19, %v5711_v52  ;;  %v5031_v19 = vmul.f32 1.442695, %v4853_v6  ;;  %v3324_v0 = vcvt.s32.f32 %v2503_v9  ;;  %v2536_v30 = vcvt.f32.s32 %v12283_v61  ;;  %v6566_v9 = vpop.eup %6565 }
 0x9bf   :  { %v10311_v38 = vpop.permute.xlu2 %5349  ;;  %5454 = vperm.xlu1 %6248, %v6560_v43   ;;  %v5721_v16 = vperm.slane %v10253_v27, %v10321_v8  ;;  %v3825_v36 = vsub.f32 0.0, %v10284_v42  ;;  %6567 = vpow2.f32 %v3634_v59  ;;  %v3325_v45 = vcvt.s32.f32 %v2515_v46 }
 0x9c0   :  { %6569 = vpow2.f32 %v5035_v24  ;;  %v2539_v6 = vadd.s32 %v2538_v15, %v2536_v30  ;;  %v3827_v27 = vsub.f32 0.0, %v10290_v31  ;;  %v3638_v29 = vmul.f32 1.442695, %v3449_v48 }
 0x9c1   :  { %v5332_v5 = vpop.permute.xlu1 %5331  ;;  %6571 = vpow2.f32 %v5031_v19  ;;  %v4856_v57 = vmul.f32 %v9903_v56, %v3825_v36  ;;  %v12284_v42 = vcvt.f32.s32 %v12268_v3  ;;  %v3830_v24 = vsub.f32 0.0, %v10316_v49 }
 0x9c2   :  { %v5717_v43 = vperm.slane %v5332_v5, %v10314_v13  ;;  %v3452_v5 = vmul.f32 -0.5, %v3324_v0  ;;  %v3640_v15 = vmul.f32 1.442695, %v3450_v12  ;;  %v10341_v19 = vadd.s32 4294967224, %v12269_v40  ;;  %v12285_v0 = vld [vmem:[#allocation145_spill] sm:$0xff] }
 0x9c3   :  { %v2551_v59 = vadd.s32 %v2550_v28, %v12284_v42  ;;  %v10344_v56 = vadd.s32 4294967240, %v12269_v40  ;;  %v4858_v31 = vmul.f32 %v9908_v50, %v3827_v27  ;;  %v3453_v60 = vmul.f32 -0.5, %v3325_v45 }
 0x9c4   :  { %v5719_v52 = vsel %vm5718_vm15, %v5717_v43, %v5715_v58  ;;  %v10335_v58 = vpop.permute.xlu0 %5388  ;;  %v3327_v48 = vcvt.s32.f32 %v2539_v6  ;;  %v10348_v3 = vadd.s32 4294967232, %v12269_v40  ;;  %v2573_v61 = vcvt.f32.s32 %v12285_v0 }
 0x9c5   :  { %5457 = vperm.xlu2 %6249, %v6564_v41   ;;  %v5723_v2 = vsel %vm5722_vm14, %v5721_v16, %v5719_v52  ;;  %v10350_v49 = vpop.eup %6567  ;;  %v5037_v30 = vmul.f32 1.442695, %v4856_v57  ;;  %v3644_v41 = vmul.f32 1.442695, %v3452_v5  ;;  %v3328_v12 = vcvt.s32.f32 %v2551_v59 }
 0x9c6   :  { %v6570_v16 = vpop.eup %6569  ;;  %v5729_v50 = vperm.slane %v10275_v55, %v10348_v3  ;;  %v5733_v52 = vperm.slane %v10224_v18, %v10341_v19  ;;  %v5041_v45 = vmul.f32 1.442695, %v4858_v31  ;;  %6573 = vpow2.f32 %v3638_v29  ;;  %v12286_v18 = vld [vmem:[#allocation33_spill] sm:$0xff] }
 0x9c7   :  { %v10338_v46 = vpop.permute.xlu2 %5358  ;;  %5463 = vperm.xlu1 %6248, %v6566_v9   ;;  %v6572_v36 = vpop.eup %6571  ;;  %6575 = vpow2.f32 %v3640_v15  ;;  %v3455_v9 = vmul.f32 -0.5, %v3327_v48  ;;  %v3831_v57 = vsub.f32 0.0, %v10350_v49  ;;  %v2574_v5 = vshll.u32 %v2573_v61, 16  ;;  %v12287_v48 = vld [vmem:[#allocation84_spill] sm:$0xff] }
 0x9c8   :  { %v4859_v42 = vmul.f32 %v9911_v26, %v3828_v14  ;;  %6577 = vpow2.f32 %v5037_v30  ;;  %v3646_v59 = vmul.f32 1.442695, %v3453_v60  ;;  %v2572_v31 = vcvt.f32.s32 %v12286_v18  ;;  %v12288_v49 = vld [vmem:[#allocation40_spill] sm:$0xff] }
 0x9c9   :  { %v5338_v43 = vpop.permute.xlu1 %5337  ;;  %6579 = vpow2.f32 %v3644_v41  ;;  %v10370_v15 = vadd.s32 4294967216, %v12269_v40  ;;  %v4861_v26 = vmul.f32 %v12287_v48, %v3830_v24  ;;  %v3650_v14 = vmul.f32 1.442695, %v3455_v9  ;;  %v12290_v24 = vld [vmem:[#allocation147_spill] sm:$0xff] }
 0x9ca   :  { %v5725_v28 = vperm.slane %v5338_v43, %v10344_v56  ;;  %v3456_v43 = vmul.f32 -0.5, %v3328_v12  ;;  %6581 = vpow2.f32 %v5041_v45  ;;  %v2585_v0 = vcvt.f32.s32 %v12288_v49 }
 0x9cb   :  { %v10375_v60 = vadd.s32 4294967208, %v12269_v40  ;;  %v5043_v41 = vmul.f32 1.442695, %v4859_v42  ;;  %v2621_v45 = vcvt.f32.s32 %v12290_v24  ;;  %v5047_v18 = vmul.f32 1.442695, %v4861_v26 }
 0x9cc   :  { %v5727_v6 = vsel %vm5726_vm9, %v5725_v28, %v5723_v2  ;;  %v10367_v2 = vadd.s32 4294967200, %v12269_v40  ;;  %v10377_v61 = vpop.permute.xlu0 %5397  ;;  %v6574_v28 = vpop.eup %6573  ;;  %6583 = vpow2.f32 %v3646_v59  ;;  %v3652_v35 = vmul.f32 1.442695, %v3456_v43 }
 0x9cd   :  { %v5731_v27 = vsel %vm5730_vm2, %v5729_v50, %v5727_v6  ;;  %5466 = vperm.xlu2 %6249, %v6572_v36   ;;  %v6576_v50 = vpop.eup %6575  ;;  %v12289_v36 = vld [vmem:[#allocation146_spill] sm:$0xff]  ;;  %v5741_v6 = vperm.slane %v10311_v38, %v10375_v60  ;;  %6585 = vpow2.f32 %v3650_v14  ;;  %v3833_v48 = vsub.f32 0.0, %v6574_v28  ;;  %v12291_v38 = vld [vmem:[#allocation192_spill] sm:$0xff] }
 0x9ce   :  { %v5735_v55 = vsel %vm5734_vm10, %v5733_v52, %v5731_v27  ;;  %v2609_v52 = vcvt.f32.s32 %v12289_v36  ;;  %v6578_v9 = vpop.eup %6577  ;;  %v5745_v27 = vperm.slane %v10236_v17, %v10367_v2  ;;  %v3834_v36 = vsub.f32 0.0, %v6576_v50 }
 0x9cf   :  { %v10364_v29 = vpop.permute.xlu2 %5367  ;;  %5472 = vperm.xlu1 %6248, %v6570_v16   ;;  %v2575_v16 = vadd.s32 %v2574_v5, %v2572_v31  ;;  %v6580_v42 = vpop.eup %6579  ;;  %v2586_v31 = vshll.u32 %v2585_v0, 16  ;;  %6587 = vpow2.f32 %v5043_v41  ;;  %v4862_v24 = vmul.f32 %v12291_v38, %v3831_v57  ;;  %v12293_v41 = vld [vmem:[#allocation16_spill] sm:$0xff] }
 0x9d0   :  { %v2610_v26 = vshll.u32 %v2609_v52, 16  ;;  %v2622_v59 = vshll.u32 %v2621_v45, 16  ;;  %v4864_v14 = vmul.f32 %v9926_v20, %v3833_v48  ;;  %6589 = vpow2.f32 %v5047_v18  ;;  %v12294_v45 = vld [vmem:[#allocation45_spill] sm:$0xff] }
 0x9d1   :  { %v5347_v30 = vpop.permute.xlu1 %5346  ;;  %v3330_v17 = vcvt.s32.f32 %v2575_v16  ;;  %v10397_v0 = vadd.s32 4294967192, %v12269_v40  ;;  %v12292_v57 = vcvt.f32.s32 %v12271_v22  ;;  %v2608_v43 = vcvt.f32.s32 %v12293_v41 }
 0x9d2   :  { %v5737_v12 = vperm.slane %v5347_v30, %v10370_v15  ;;  %v6582_v30 = vpop.eup %6581  ;;  %v10403_v16 = vadd.s32 4294967184, %v12269_v40  ;;  %v2645_v20 = vcvt.f32.s32 %v12294_v45  ;;  %v12295_v48 = vcvt.f32.s32 %v12280_v1 }
 0x9d3   :  { %v2587_v28 = vadd.s32 %v2586_v31, %v12292_v57  ;;  %v10407_v52 = vpop.eup %6583  ;;  %v3458_v22 = vmul.f32 -0.5, %v3330_v17  ;;  %v2611_v18 = vadd.s32 %v2610_v26, %v2608_v43  ;;  %v5053_v38 = vmul.f32 1.442695, %v4864_v14  ;;  %v12296_v57 = vld [vmem:[#allocation242_spill] sm:$0xff] }
 0x9d4   :  { %v5739_v5 = vsel %vm5738_vm12, %v5737_v12, %v5735_v55  ;;  %v10393_v55 = vadd.s32 4294967176, %v12269_v40  ;;  %v10405_v12 = vpop.permute.xlu0 %5406  ;;  %v4865_v41 = vmul.f32 %v12296_v57, %v3834_v36  ;;  %v3836_v17 = vsub.f32 0.0, %v6580_v42 }
 0x9d5   :  { %v5743_v49 = vsel %vm5742_vm3, %v5741_v6, %v5739_v5  ;;  %5475 = vperm.xlu2 %6249, %v6578_v9   ;;  %v5049_v6 = vmul.f32 1.442695, %v4862_v24  ;;  %v5753_v5 = vperm.slane %v10338_v46, %v10403_v16  ;;  %v3331_v43 = vcvt.s32.f32 %v2587_v28 }
 0x9d6   :  { %v5747_v10 = vsel %vm5746_vm1, %v5745_v27, %v5743_v49  ;;  %v6586_v27 = vpop.eup %6585  ;;  %v2623_v49 = vadd.s32 %v2622_v59, %v12295_v48  ;;  %v2646_v37 = vshll.u32 %v2645_v20, 16  ;;  %v3333_v14 = vcvt.s32.f32 %v2611_v18 }
 0x9d7   :  { %v10390_v7 = vpop.permute.xlu2 %5376  ;;  %5481 = vperm.xlu1 %6248, %v6582_v30   ;;  %v6588_v31 = vpop.eup %6587  ;;  %v5757_v30 = vperm.slane %v10246_v51, %v10393_v55  ;;  %6591 = vpow2.f32 %v5049_v6  ;;  %v3839_v59 = vsub.f32 0.0, %v6586_v27  ;;  %v3656_v51 = vmul.f32 1.442695, %v3458_v22 }
 0x9d8   :  { %v6590_v46 = vpop.eup %6589  ;;  %6593 = vpow2.f32 %v3652_v35  ;;  %v3334_v36 = vcvt.s32.f32 %v2623_v49  ;;  %v5055_v20 = vmul.f32 1.442695, %v4865_v41  ;;  %v3837_v27 = vsub.f32 0.0, %v10407_v52 }
 0x9d9   :  { %v5356_v50 = vpop.permute.xlu1 %5355  ;;  %6595 = vpow2.f32 %v5053_v38  ;;  %v3459_v18 = vmul.f32 -0.5, %v3331_v43  ;;  %v12300_v38 = vld [vmem:[#allocation150_spill] sm:$0xff]  ;;  %v12302_v43 = vld [vmem:[#allocation152_spill] sm:$0xff] }
 0x9da   :  { %v5749_v9 = vperm.slane %v5356_v50, %v10397_v0  ;;  %v12297_v50 = vld [vmem:[#allocation65_spill] sm:$0xff]  ;;  %v2681_v57 = vcvt.f32.s32 %v12300_v38  ;;  %6597 = vpow2.f32 %v3656_v51 }
 0x9db   :  { %v2657_v45 = vcvt.f32.s32 %v12297_v50  ;;  %v12301_v50 = vld [vmem:[#allocation157_spill] sm:$0xff]  ;;  %6599 = vpow2.f32 %v5055_v20 }
 0x9dc   :  { %v5751_v24 = vsel %vm5750_vm5, %v5749_v9, %v5747_v10  ;;  %v12298_v9 = vld [vmem:[#allocation43_spill] sm:$0xff]  ;;  %v10429_v48 = vpop.permute.xlu0 %5415 }
 0x9dd   :  { %v5755_v26 = vsel %vm5754_vm11, %v5753_v5, %v5751_v24  ;;  %5484 = vperm.xlu2 %6249, %v6588_v31   ;;  %v2644_v42 = vcvt.f32.s32 %v12298_v9  ;;  %v4867_v5 = vmul.f32 %v9931_v25, %v3836_v17  ;;  %v12299_v31 = vld [vmem:[#allocation36_spill] sm:$0xff]  ;;  %v2658_v6 = vshll.u32 %v2657_v45, 16  ;;  %v6592_v41 = vpop.eup %6591 }
 0x9de   :  { %v10422_v1 = vsel %vm5758_vm4, %v5757_v30, %v5755_v26  ;;  %v2656_v28 = vcvt.f32.s32 %v12299_v31  ;;  %v5761_v30 = vperm.slane %v10364_v29, %v10257_v11  ;;  %v3461_v24 = vmul.f32 -0.5, %v3333_v14 }
 0x9df   :  { %v10424_v10 = vpop.permute.xlu2 %5385  ;;  %5490 = vperm.xlu1 %6248, %v6590_v46   ;;  %v2647_v35 = vadd.s32 %v2646_v37, %v2644_v42  ;;  %v5763_v25 = vperm.slane %v10267_v21, %v10281_v32  ;;  %v4870_v45 = vmul.f32 %v12301_v50, %v3839_v59  ;;  %v3462_v17 = vmul.f32 -0.5, %v3334_v36  ;;  %v6594_v37 = vpop.eup %6593 }
 0x9e0   :  { %v5059_v52 = vmul.f32 1.442695, %v4867_v5  ;;  %v2659_v46 = vadd.s32 %v2658_v6, %v2656_v28  ;;  %v2717_v29 = vcvt.f32.s32 %v12302_v43  ;;  %v6596_v9 = vpop.eup %6595  ;;  %v3658_v42 = vmul.f32 1.442695, %v3459_v18 }
 0x9e1   :  { %v5365_v22 = vpop.permute.xlu1 %5364  ;;  %v3336_v31 = vcvt.s32.f32 %v2647_v35  ;;  %v4868_v21 = vmul.f32 %v9949_v33, %v3837_v27  ;;  %v3662_v51 = vmul.f32 1.442695, %v3461_v24  ;;  %v5065_v36 = vmul.f32 1.442695, %v4870_v45  ;;  %v6598_v6 = vpop.eup %6597  ;;  %v12305_v24 = vld [vmem:[#allocation151_spill] sm:$0xff] }
 0x9e2   :  { %v5760_v49 = vperm.slane %v5365_v22, %v12269_v40  ;;  %v2682_v22 = vshll.u32 %v2681_v57, 16  ;;  %v3664_v5 = vmul.f32 1.442695, %v3462_v17  ;;  %6601 = vpow2.f32 %v5059_v52  ;;  %v6600_v52 = vpop.eup %6599 }
 0x9e3   :  { %v3840_v28 = vsub.f32 0.0, %v6594_v37  ;;  %v2718_v20 = vshll.u32 %v2717_v29, 16  ;;  %v3464_v35 = vmul.f32 -0.5, %v3336_v31  ;;  %v5061_v50 = vmul.f32 1.442695, %v4868_v21 }
 0x9e4   :  { %v5762_v26 = vsel %vm5702_vm8, %v5761_v30, %v5760_v49  ;;  %v3337_v30 = vcvt.s32.f32 %v2659_v46  ;;  %v12303_v49 = vld [vmem:[#allocation148_spill] sm:$0xff]  ;;  %6603 = vpow2.f32 %v3658_v42  ;;  %v2716_v57 = vcvt.f32.s32 %v12305_v24  ;;  %v10449_v45 = vpop.permute.xlu0 %5424 }
 0x9e5   :  { %5493 = vperm.xlu2 %6249, %v6592_v41   ;;  %v5764_v14 = vsel %vm5706_vm13, %v5763_v25, %v5762_v26  ;;  %v2680_v38 = vcvt.f32.s32 %v12303_v49  ;;  %v12304_v25 = vld [vmem:[#allocation195_spill] sm:$0xff]  ;;  %6605 = vpow2.f32 %v3662_v51  ;;  %v5767_v17 = vperm.slane %v10390_v7, %v10278_v4 }
 0x9e6   :  { %v2693_v41 = vcvt.f32.s32 %v12304_v25  ;;  %v5769_v26 = vperm.slane %v10304_v44, %v10314_v13  ;;  %6607 = vpow2.f32 %v3664_v5  ;;  %v3842_v37 = vsub.f32 0.0, %v6598_v6 }
 0x9e7   :  { %v10443_v59 = vpop.permute.xlu2 %5394  ;;  %5499 = vperm.xlu1 %6248, %v6596_v9   ;;  %v2683_v27 = vadd.s32 %v2682_v22, %v2680_v38  ;;  %v3465_v43 = vmul.f32 -0.5, %v3337_v30  ;;  %v2719_v9 = vadd.s32 %v2718_v20, %v2716_v57  ;;  %v3668_v21 = vmul.f32 1.442695, %v3464_v35  ;;  %v12306_v22 = vld [vmem:[#allocation8_spill] sm:$0xff]  ;;  %v12309_v57 = vld [vmem:[#allocation55_spill] sm:$0xff] }
 0x9e8   :  { %v2694_v29 = vshll.u32 %v2693_v41, 16  ;;  %v6602_v31 = vpop.eup %6601  ;;  %6609 = vpow2.f32 %v5061_v50  ;;  %v4871_v51 = vmul.f32 %v9954_v47, %v3840_v28  ;;  %v2692_v49 = vcvt.f32.s32 %v12306_v22  ;;  %v12307_v38 = vld [vmem:[#allocation140_spill] sm:$0xff] }
 0x9e9   :  { %v5374_v18 = vpop.permute.xlu1 %5373  ;;  %v3339_v44 = vcvt.s32.f32 %v2683_v27  ;;  %6611 = vpow2.f32 %v5065_v36  ;;  %v4873_v6 = vmul.f32 %v9959_v63, %v3842_v37  ;;  %v2728_v25 = vcvt.f32.s32 %v12307_v38  ;;  %v12308_v27 = vld [vmem:[#allocation196_spill] sm:$0xff] }
 0x9ea   :  { %v5765_v33 = vperm.slane %v5374_v18, %v10288_v23  ;;  %v2695_v41 = vadd.s32 %v2694_v29, %v2692_v49  ;;  %v3342_v20 = vcvt.s32.f32 %v2719_v9  ;;  %v3670_v47 = vmul.f32 1.442695, %v3465_v43 }
 0x9eb   :  { %v5067_v28 = vmul.f32 1.442695, %v4871_v51  ;;  %6613 = vpow2.f32 %v3668_v21  ;;  %v2729_v24 = vcvt.f32.s32 %v12308_v27  ;;  %v2753_v36 = vcvt.f32.s32 %v12309_v57 }
 0x9ec   :  { %v5766_v46 = vsel %vm5710_vm0, %v5765_v33, %v5764_v14  ;;  %v6604_v14 = vpop.eup %6603  ;;  %v3467_v33 = vmul.f32 -0.5, %v3339_v44  ;;  %v5773_v63 = vperm.slane %v10424_v10, %v10344_v56  ;;  %v5071_v37 = vmul.f32 1.442695, %v4873_v6  ;;  %v10474_v9 = vpop.permute.xlu0 %5433 }
 0x9ed   :  { %v5768_v42 = vsel %vm5714_vm6, %v5767_v17, %v5766_v46  ;;  %5502 = vperm.xlu2 %6249, %v6600_v52   ;;  %v6606_v30 = vpop.eup %6605  ;;  %v5775_v52 = vperm.slane %v10335_v58, %v10348_v3  ;;  %v3340_v43 = vcvt.s32.f32 %v2695_v41  ;;  %v3470_v29 = vmul.f32 -0.5, %v3342_v20  ;;  %v12310_v20 = vld [vmem:[#allocation56_spill] sm:$0xff] }
 0x9ee   :  { %v5770_v7 = vsel %vm5718_vm15, %v5769_v26, %v5768_v42  ;;  %v10464_v35 = vpop.eup %6607  ;;  %v3843_v26 = vsub.f32 0.0, %v6604_v14  ;;  %v3845_v42 = vsub.f32 0.0, %v6606_v30  ;;  %6615 = vpow2.f32 %v5067_v28 }
 0x9ef   :  { %v10460_v5 = vpop.permute.xlu2 %5403  ;;  %5508 = vperm.xlu1 %6248, %v6602_v31   ;;  %v6610_v17 = vpop.eup %6609  ;;  %v3846_v10 = vsub.f32 0.0, %v10464_v35  ;;  %6617 = vpow2.f32 %v3670_v47  ;;  %v3674_v22 = vmul.f32 1.442695, %v3467_v33  ;;  %v2730_v49 = vshll.u32 %v2729_v24, 16  ;;  %v12311_v35 = vld [vmem:[#allocation61_spill] sm:$0xff] }
 0x9f0   :  { %v6612_v21 = vpop.eup %6611  ;;  %v4874_v51 = vmul.f32 %v9962_v53, %v3843_v26  ;;  %v5792_v6 = vperm.slane %v10429_v48, %v10257_v11  ;;  %6619 = vpow2.f32 %v5071_v37  ;;  %v4876_v30 = vmul.f32 %v9968_v54, %v3845_v42 }
 0x9f1   :  { %v5383_v18 = vpop.permute.xlu1 %5382  ;;  %v6614_v14 = vpop.eup %6613  ;;  %v3468_v38 = vmul.f32 -0.5, %v3340_v43  ;;  %v3680_v41 = vmul.f32 1.442695, %v3470_v29  ;;  %v2765_v47 = vcvt.f32.s32 %v12311_v35  ;;  %v2731_v57 = vadd.s32 %v2730_v49, %v2728_v25  ;;  %v12314_v49 = vld [vmem:[#allocation142_spill] sm:$0xff] }
 0x9f2   :  { %v5771_v50 = vperm.slane %v5383_v18, %v10321_v8  ;;  %v2752_v18 = vcvt.f32.s32 %v12310_v20  ;;  %v5073_v27 = vmul.f32 1.442695, %v4874_v51  ;;  %v3848_v54 = vsub.f32 0.0, %v6614_v14  ;;  %v12315_v14 = vld [vmem:[#allocation53_spill] sm:$0xff] }
 0x9f3   :  { %v5077_v26 = vmul.f32 1.442695, %v4876_v30  ;;  %6621 = vpow2.f32 %v3674_v22  ;;  %v3676_v43 = vmul.f32 1.442695, %v3468_v38  ;;  %v2766_v29 = vshll.u32 %v2765_v47, 16  ;;  %v12316_v30 = vld [vmem:[#allocation199_spill] sm:$0xff] }
 0x9f4   :  { %v5772_v46 = vsel %vm5722_vm14, %v5771_v50, %v5770_v7  ;;  %v2754_v7 = vshll.u32 %v2753_v36, 16  ;;  %v12312_v50 = vld [vmem:[#allocation197_spill] sm:$0xff]  ;;  %6623 = vpow2.f32 %v3680_v41  ;;  %v4879_v38 = vmul.f32 %v9977_v34, %v3848_v54 }
 0x9f5   :  { %v5774_v31 = vsel %vm5726_vm9, %v5773_v63, %v5772_v46  ;;  %5511 = vperm.xlu2 %6249, %v6610_v17   ;;  %v2789_v33 = vcvt.f32.s32 %v12312_v50  ;;  %v5779_v63 = vperm.slane %v10443_v59, %v10370_v15  ;;  %v6616_v17 = vpop.eup %6615  ;;  %6625 = vpow2.f32 %v5073_v27  ;;  %v12317_v41 = vld [vmem:[#allocation37_spill] sm:$0xff]  ;;  %v12318_v50 = vld [vmem:[#allocation200_spill] sm:$0xff] }
 0x9f6   :  { %v5776_v58 = vsel %vm5730_vm2, %v5775_v52, %v5774_v31  ;;  %v2755_v36 = vadd.s32 %v2754_v7, %v2752_v18  ;;  %v5781_v52 = vperm.slane %v10377_v61, %v10375_v60  ;;  %v6618_v46 = vpop.eup %6617  ;;  %v2764_v61 = vcvt.f32.s32 %v12314_v49 }
 0x9f7   :  { %v5413_v44 = vpop.permute.xlu2 %5412  ;;  %5517 = vperm.xlu1 %6248, %v6612_v21   ;;  %v6620_v25 = vpop.eup %6619  ;;  %v2790_v31 = vshll.u32 %v2789_v33, 16  ;;  %v12313_v21 = vld [vmem:[#allocation89_spill] sm:$0xff]  ;;  %v3343_v7 = vcvt.s32.f32 %v2731_v57  ;;  %6627 = vpow2.f32 %v5077_v26  ;;  %v3849_v20 = vsub.f32 0.0, %v6618_v46 }
 0x9f8   :  { %v5791_v53 = vperm.slane %v5413_v44, %v12269_v40  ;;  %v4877_v59 = vmul.f32 %v12313_v21, %v3846_v10  ;;  %v3345_v22 = vcvt.s32.f32 %v2755_v36  ;;  %v10500_v44 = vpop.permute.xlu0 %5442  ;;  %v2800_v10 = vcvt.f32.s32 %v12317_v41 }
 0x9f9   :  { %v5392_v28 = vpop.permute.xlu1 %5391  ;;  %v2767_v18 = vadd.s32 %v2766_v29, %v2764_v61  ;;  %6629 = vpow2.f32 %v3676_v43  ;;  %v6622_v47 = vpop.eup %6621  ;;  %v2825_v33 = vcvt.f32.s32 %v12318_v50  ;;  %v3471_v36 = vmul.f32 -0.5, %v3343_v7  ;;  %v12320_v29 = vld [vmem:[#allocation247_spill] sm:$0xff]  ;;  %v12323_v50 = vld [vmem:[#allocation201_spill] sm:$0xff] }
 0x9fa   :  { %v10488_v24 = vsel %vm5702_vm8, %v5792_v6, %v5791_v53  ;;  %v5777_v48 = vperm.slane %v5392_v28, %v10341_v19  ;;  %v2788_v6 = vcvt.f32.s32 %v12315_v14  ;;  %v2801_v53 = vcvt.f32.s32 %v12316_v30  ;;  %v6624_v57 = vpop.eup %6623 }
 0x9fb   :  { %v5079_v27 = vmul.f32 1.442695, %v4877_v59  ;;  %v5785_v34 = vperm.slane %v10460_v5, %v10397_v0  ;;  %v6626_v54 = vpop.eup %6625  ;;  %v5083_v46 = vmul.f32 1.442695, %v4879_v38  ;;  %v2826_v61 = vshll.u32 %v2825_v33, 16  ;;  %v12321_v38 = vld [vmem:[#allocation98_spill] sm:$0xff] }
 0x9fc   :  { %v5778_v37 = vsel %vm5734_vm10, %v5777_v48, %v5776_v58  ;;  %v2791_v28 = vadd.s32 %v2790_v31, %v2788_v6  ;;  %v2802_v26 = vshll.u32 %v2801_v53, 16  ;;  %v3851_v31 = vsub.f32 0.0, %v6622_v47 }
 0x9fd   :  { %v5780_v42 = vsel %vm5738_vm12, %v5779_v63, %v5778_v37  ;;  %5520 = vperm.xlu2 %6249, %v6616_v17   ;;  %v3473_v63 = vmul.f32 -0.5, %v3345_v22  ;;  %v12319_v17 = vld [vmem:[#allocation202_spill] sm:$0xff]  ;;  %v5787_v37 = vperm.slane %v10405_v12, %v10403_v16  ;;  %v6628_v59 = vpop.eup %6627  ;;  %6631 = vpow2.f32 %v5079_v27 }
 0x9fe   :  { %v5782_v51 = vsel %vm5742_vm3, %v5781_v52, %v5780_v42  ;;  %v2837_v52 = vcvt.f32.s32 %v12319_v17  ;;  %v4880_v42 = vmul.f32 %v12320_v29, %v3849_v20  ;;  %v3348_v49 = vcvt.s32.f32 %v2791_v28 }
 0x9ff   :  { %v10502_v58 = vpop.permute.xlu2 %5421  ;;  %5526 = vperm.xlu1 %6248, %v6620_v25   ;;  %v3346_v25 = vcvt.s32.f32 %v2767_v18  ;;  %v6630_v7 = vpop.eup %6629  ;;  %v3854_v22 = vsub.f32 0.0, %v6624_v57  ;;  %v3682_v14 = vmul.f32 1.442695, %v3471_v36  ;;  %v3686_v12 = vmul.f32 1.442695, %v3473_v63  ;;  %v12322_v18 = vld [vmem:[#allocation17_spill] sm:$0xff] }
 0xa00   :  { %v2838_v6 = vshll.u32 %v2837_v52, 16  ;;  %v10519_v30 = vpop.permute.xlu0 %5451  ;;  %v2803_v53 = vadd.s32 %v2802_v26, %v2800_v10  ;;  %v2824_v41 = vcvt.f32.s32 %v12321_v38  ;;  %6633 = vpow2.f32 %v5083_v46  ;;  %v12324_v63 = vld [vmem:[#allocation75_spill] sm:$0xff] }
 0xa01   :  { %v5401_v35 = vpop.permute.xlu1 %5400  ;;  %v4882_v20 = vmul.f32 %v9982_v62, %v3851_v31  ;;  %v5085_v47 = vmul.f32 1.442695, %v4880_v42  ;;  %v3474_v28 = vmul.f32 -0.5, %v3346_v25  ;;  %v2861_v33 = vcvt.f32.s32 %v12323_v50 }
 0xa02   :  { %v5783_v48 = vperm.slane %v5401_v35, %v10367_v2  ;;  %v2836_v35 = vcvt.f32.s32 %v12322_v18  ;;  %v2827_v57 = vadd.s32 %v2826_v61, %v2824_v41  ;;  %v4885_v17 = vmul.f32 %v12324_v63, %v3854_v22  ;;  %v12326_v61 = vld [vmem:[#allocation204_spill] sm:$0xff]  ;;  %v12327_v22 = vld [vmem:[#allocation206_spill] sm:$0xff] }
 0xa03   :  { %v3852_v52 = vsub.f32 0.0, %v6630_v7  ;;  %6635 = vpow2.f32 %v3682_v14  ;;  %v5089_v62 = vmul.f32 1.442695, %v4882_v20  ;;  %v2862_v46 = vshll.u32 %v2861_v33, 16 }
 0xa04   :  { %v5784_v43 = vsel %vm5746_vm1, %v5783_v48, %v5782_v51  ;;  %v3476_v48 = vmul.f32 -0.5, %v3348_v49  ;;  %v2839_v10 = vadd.s32 %v2838_v6, %v2836_v35  ;;  %6637 = vpow2.f32 %v3686_v12  ;;  %v12328_v6 = vld [vmem:[#allocation50_spill] sm:$0xff] }
 0xa05   :  { %v5786_v21 = vsel %vm5750_vm5, %v5785_v34, %v5784_v43  ;;  %5529 = vperm.xlu2 %6249, %v6626_v54   ;;  %v6632_v34 = vpop.eup %6631  ;;  %v3349_v54 = vcvt.s32.f32 %v2803_v53  ;;  %v12325_v43 = vld [vmem:[#allocation205_spill] sm:$0xff]  ;;  %6639 = vpow2.f32 %v5085_v47  ;;  %v2860_v7 = vcvt.f32.s32 %v12326_v61 }
 0xa06   :  { %v5788_v5 = vsel %vm5754_vm11, %v5787_v37, %v5786_v21  ;;  %v3688_v37 = vmul.f32 1.442695, %v3474_v28  ;;  %v2897_v29 = vcvt.f32.s32 %v12325_v43  ;;  %v6634_v25 = vpop.eup %6633  ;;  %v3692_v31 = vmul.f32 1.442695, %v3476_v48  ;;  %v12329_v48 = vld [vmem:[#allocation62_spill] sm:$0xff] }
 0xa07   :  { %v10521_v51 = vpop.permute.xlu2 %5430  ;;  %5535 = vperm.xlu1 %6248, %v6628_v59   ;;  %v3351_v21 = vcvt.s32.f32 %v2827_v57  ;;  %v4883_v59 = vmul.f32 %v10000_v39, %v3852_v52  ;;  %v3352_v49 = vcvt.s32.f32 %v2839_v10  ;;  %v2873_v14 = vcvt.f32.s32 %v12327_v22 }
 0xa08   :  { %v3477_v53 = vmul.f32 -0.5, %v3349_v54  ;;  %6641 = vpow2.f32 %v5089_v62  ;;  %v5095_v41 = vmul.f32 1.442695, %v4885_v17  ;;  %v2863_v20 = vadd.s32 %v2862_v46, %v2860_v7  ;;  %v12332_v7 = vld [vmem:[#allocation95_spill] sm:$0xff] }
 0xa09   :  { %v5410_v27 = vpop.permute.xlu1 %5409  ;;  %v6636_v38 = vpop.eup %6635  ;;  %v2898_v18 = vshll.u32 %v2897_v29, 16  ;;  %6643 = vpow2.f32 %v3688_v37  ;;  %v3479_v47 = vmul.f32 -0.5, %v3351_v21  ;;  %v5091_v28 = vmul.f32 1.442695, %v4883_v59  ;;  %v12330_v29 = vld [vmem:[#allocation20_spill] sm:$0xff] }
 0xa0a   :  { %v5789_v36 = vperm.slane %v5410_v27, %v10393_v55  ;;  %v6638_v35 = vpop.eup %6637  ;;  %6645 = vpow2.f32 %v3692_v31  ;;  %v3480_v33 = vmul.f32 -0.5, %v3352_v49  ;;  %v2874_v27 = vshll.u32 %v2873_v14, 16  ;;  %v12331_v49 = vld [vmem:[#allocation207_spill] sm:$0xff]  ;;  %v12333_v14 = vld [vmem:[#allocation149_spill] sm:$0xff] }
 0xa0b   :  { %v2896_v57 = vcvt.f32.s32 %v12329_v48  ;;  %v6640_v63 = vpop.eup %6639  ;;  %v3694_v10 = vmul.f32 1.442695, %v3477_v53  ;;  %v5798_v17 = vperm.slane %v10449_v45, %v10278_v4  ;;  %v3855_v52 = vsub.f32 0.0, %v6636_v38 }
 0xa0c   :  { %v5790_v26 = vsel %vm5758_vm4, %v5789_v36, %v5788_v5  ;;  %v10537_v5 = vpop.permute.xlu0 %5460  ;;  %v5796_v36 = vperm.slane %v10502_v58, %v10288_v23  ;;  %v3354_v54 = vcvt.s32.f32 %v2863_v20  ;;  %v3698_v43 = vmul.f32 1.442695, %v3479_v47 }
 0xa0d   :  { %v10532_v42 = vsel %vm5977_vm7, %v5790_v26, %v10422_v1  ;;  %5538 = vperm.xlu2 %6249, %v6632_v34   ;;  %v2872_v1 = vcvt.f32.s32 %v12328_v6  ;;  %v2899_v62 = vadd.s32 %v2898_v18, %v2896_v57  ;;  %v3857_v26 = vsub.f32 0.0, %v6638_v35 }
 0xa0e   :  { %v6642_v46 = vpop.eup %6641  ;;  %6647 = vpow2.f32 %v5091_v28  ;;  %v4886_v58 = vmul.f32 %v12330_v29, %v3855_v52  ;;  %v3700_v45 = vmul.f32 1.442695, %v3480_v33  ;;  %v2909_v61 = vcvt.f32.s32 %v12331_v49 }
 0xa0f   :  { %v10539_v12 = vpop.permute.xlu2 %5439  ;;  %5544 = vperm.xlu1 %6248, %v6634_v25   ;;  %v6644_v31 = vpop.eup %6643  ;;  %6649 = vpow2.f32 %v5095_v41  ;;  %v2875_v21 = vadd.s32 %v2874_v27, %v2872_v1  ;;  %v4888_v22 = vmul.f32 %v12332_v7, %v3857_v26  ;;  %v2908_v6 = vcvt.f32.s32 %v12333_v14  ;;  %v12339_v7 = vld [vmem:[#allocation208_spill] sm:$0xff] }
 0xa10   :  { %6651 = vpow2.f32 %v3694_v10  ;;  %v3482_v53 = vmul.f32 -0.5, %v3354_v54  ;;  %v3357_v38 = vcvt.s32.f32 %v2899_v62  ;;  %v5097_v41 = vmul.f32 1.442695, %v4886_v58  ;;  %v12335_v62 = vld [vmem:[#allocation213_spill] sm:$0xff]  ;;  %v12337_v58 = vld [vmem:[#allocation51_spill] sm:$0xff] }
 0xa11   :  { %v5419_v39 = vpop.permute.xlu1 %5418  ;;  %6653 = vpow2.f32 %v3698_v43  ;;  %v3355_v35 = vcvt.s32.f32 %v2875_v21  ;;  %v5802_v28 = vperm.slane %v10521_v51, %v10321_v8  ;;  %v2910_v33 = vshll.u32 %v2909_v61, 16  ;;  %v12336_v51 = vld [vmem:[#allocation102_spill] sm:$0xff] }
 0xa12   :  { %v5794_v50 = vperm.slane %v5419_v39, %v10281_v32  ;;  %v3858_v39 = vsub.f32 0.0, %v6644_v31  ;;  %6655 = vpow2.f32 %v3700_v45  ;;  %v5804_v27 = vperm.slane %v10474_v9, %v10344_v56  ;;  %v12338_v45 = vld [vmem:[#allocation106_spill] sm:$0xff] }
 0xa13   :  { %v5101_v48 = vmul.f32 1.442695, %v4888_v22  ;;  %v3485_v10 = vmul.f32 -0.5, %v3357_v38  ;;  %v2945_v26 = vcvt.f32.s32 %v12335_v62  ;;  %6657 = vpow2.f32 %v5097_v41 }
 0xa14   :  { %v5795_v34 = vsel %vm5706_vm13, %v5794_v50, %v10488_v24  ;;  %v6646_v24 = vpop.eup %6645  ;;  %v10558_v20 = vpop.permute.xlu0 %5469  ;;  %v3483_v9 = vmul.f32 -0.5, %v3355_v35  ;;  %v2911_v31 = vadd.s32 %v2910_v33, %v2908_v6  ;;  %v2969_v22 = vcvt.f32.s32 %v12339_v7 }
 0xa15   :  { %v5797_v37 = vsel %vm5710_vm0, %v5796_v36, %v5795_v34  ;;  %5547 = vperm.xlu2 %6249, %v6640_v63   ;;  %v3860_v47 = vsub.f32 0.0, %v6646_v24  ;;  %v6648_v50 = vpop.eup %6647  ;;  %v3704_v63 = vmul.f32 1.442695, %v3482_v53  ;;  %6659 = vpow2.f32 %v5101_v48 }
 0xa16   :  { %v5799_v25 = vsel %vm5714_vm6, %v5798_v17, %v5797_v37  ;;  %v6650_v36 = vpop.eup %6649  ;;  %v12334_v17 = vld [vmem:[#allocation164_spill] sm:$0xff]  ;;  %v4889_v37 = vmul.f32 %v12336_v51, %v3858_v39  ;;  %v3710_v49 = vmul.f32 1.442695, %v3485_v10  ;;  %v2946_v38 = vshll.u32 %v2945_v26, 16  ;;  %v12342_v26 = vld [vmem:[#allocation217_spill] sm:$0xff] }
 0xa17   :  { %v10553_v59 = vpop.permute.xlu2 %5448  ;;  %5553 = vperm.xlu1 %6248, %v6642_v46   ;;  %v2933_v52 = vcvt.f32.s32 %v12334_v17  ;;  %v6652_v54 = vpop.eup %6651  ;;  %v4891_v21 = vmul.f32 %v12338_v45, %v3860_v47  ;;  %6661 = vpow2.f32 %v3704_v63  ;;  %v3706_v41 = vmul.f32 1.442695, %v3483_v9 }
 0xa18   :  { %v6654_v29 = vpop.eup %6653  ;;  %v3861_v14 = vsub.f32 0.0, %v6652_v54  ;;  %v5808_v47 = vperm.slane %v10539_v12, %v10341_v19  ;;  %v3358_v33 = vcvt.s32.f32 %v2911_v31  ;;  %6663 = vpow2.f32 %v3710_v49  ;;  %v12345_v49 = vld [vmem:[#allocation198_spill] sm:$0xff] }
 0xa19   :  { %v5428_v18 = vpop.permute.xlu1 %5427  ;;  %v6656_v24 = vpop.eup %6655  ;;  %v2934_v61 = vshll.u32 %v2933_v52, 16  ;;  %v3863_v6 = vsub.f32 0.0, %v6654_v29  ;;  %v5107_v48 = vmul.f32 1.442695, %v4891_v21  ;;  %v2970_v63 = vshll.u32 %v2969_v22, 16  ;;  %v12344_v29 = vld [vmem:[#allocation119_spill] sm:$0xff] }
 0xa1a   :  { %v5800_v1 = vperm.slane %v5428_v18, %v10314_v13  ;;  %v5103_v18 = vmul.f32 1.442695, %v4889_v37  ;;  %v3864_v62 = vsub.f32 0.0, %v6656_v24  ;;  %v2968_v51 = vcvt.f32.s32 %v12342_v26  ;;  %v12349_v26 = vld [vmem:[#allocation225_spill] sm:$0xff] }
 0xa1b   :  { %v3486_v31 = vmul.f32 -0.5, %v3358_v33  ;;  %vm5979_vm7 = vcmask 1042434  }
 0xa1c   :  { %v5801_v57 = vsel %vm5718_vm15, %v5800_v1, %v5799_v25  ;;  %v2944_v25 = vcvt.f32.s32 %v12337_v58  ;;  %v12340_v1 = vld [vmem:[#allocation210_spill] sm:$0xff]  ;;  %6665 = vpow2.f32 %v5103_v18  ;;  %v4894_v58 = vmul.f32 %v12344_v29, %v3863_v6 }
 0xa1d   :  { %v5803_v34 = vsel %vm5722_vm14, %v5802_v28, %v5801_v57  ;;  %5556 = vperm.xlu2 %6249, %v6648_v50   ;;  %v2932_v35 = vcvt.f32.s32 %v12340_v1  ;;  %v10578_v28 = vpop.permute.xlu0 %5478  ;;  %v6658_v50 = vpop.eup %6657  ;;  %6667 = vpow2.f32 %v3706_v41  ;;  %v2971_v45 = vadd.s32 %v2970_v63, %v2968_v51  ;;  %v12347_v18 = vld [vmem:[#allocation214_spill] sm:$0xff] }
 0xa1e   :  { %v5805_v46 = vsel %vm5726_vm9, %v5804_v27, %v5803_v34  ;;  %v5810_v27 = vperm.slane %v10500_v44, %v10370_v15  ;;  %v6660_v17 = vpop.eup %6659  ;;  %v2947_v52 = vadd.s32 %v2946_v38, %v2944_v25  ;;  %v12341_v34 = vld [vmem:[#allocation188_spill] sm:$0xff]  ;;  %6669 = vpow2.f32 %v5107_v48 }
 0xa1f   :  { %5562 = vperm.xlu1 %6248, %v6650_v36   ;;  %v10571_v43 = vpop.permute.xlu2 %5457  ;;  %v2935_v36 = vadd.s32 %v2934_v61, %v2932_v35  ;;  %v4892_v54 = vmul.f32 %v12341_v34, %v3861_v14  ;;  %v6662_v37 = vpop.eup %6661  ;;  %v2980_v61 = vcvt.f32.s32 %v12345_v49  ;;  %v5814_v1 = vperm.slane %v10553_v59, %v10367_v2 }
 0xa20   :  { %v3361_v7 = vcvt.s32.f32 %v2947_v52  ;;  %v6664_v14 = vpop.eup %6663  ;;  %v3866_v41 = vsub.f32 0.0, %v6662_v37  ;;  %v3712_v48 = vmul.f32 1.442695, %v3486_v31 }
 0xa21   :  { %v5437_v53 = vpop.permute.xlu1 %5436  ;;  %v3360_v25 = vcvt.s32.f32 %v2935_v36  ;;  %v5109_v24 = vmul.f32 1.442695, %v4892_v54  ;;  %v3363_v36 = vcvt.s32.f32 %v2971_v45  ;;  %v3869_v52 = vsub.f32 0.0, %v6664_v14  ;;  %v12348_v54 = vld [vmem:[#allocation58_spill] sm:$0xff] }
 0xa22   :  { %v5806_v39 = vperm.slane %v5437_v53, %v10348_v3  ;;  %v12346_v53 = vld [vmem:[#allocation11_spill] sm:$0xff]  ;;  %v6666_v35 = vpop.eup %6665  ;;  %v3489_v59 = vmul.f32 -0.5, %v3361_v7  ;;  %v12352_v7 = vld [vmem:[#allocation41_spill] sm:$0xff] }
 0xa23   :  { %v4895_v38 = vmul.f32 %v12346_v53, %v3864_v62  ;;  %6671 = vpow2.f32 %v5109_v24  ;;  %v3491_v31 = vmul.f32 -0.5, %v3363_v36  ;;  %v4900_v24 = vmul.f32 %v12352_v7, %v3869_v52 }
 0xa24   :  { %v5807_v57 = vsel %vm5730_vm2, %v5806_v39, %v5805_v46  ;;  %v12343_v46 = vld [vmem:[#allocation220_spill] sm:$0xff]  ;;  %v3005_v39 = vcvt.f32.s32 %v12347_v18 }
 0xa25   :  { %v5809_v10 = vsel %vm5734_vm10, %v5808_v47, %v5807_v57  ;;  %5565 = vperm.xlu2 %6249, %v6658_v50   ;;  %v2981_v9 = vcvt.f32.s32 %v12343_v46  ;;  %v5816_v47 = vperm.slane %v10519_v30, %v10397_v0  ;;  %v5113_v50 = vmul.f32 1.442695, %v4894_v58  ;;  %v10602_v63 = vpop.permute.xlu0 %5487 }
 0xa26   :  { %v5811_v12 = vsel %vm5738_vm12, %v5810_v27, %v5809_v10  ;;  %v6668_v27 = vpop.eup %6667  ;;  %v3488_v57 = vmul.f32 -0.5, %v3360_v25  ;;  %v3016_v30 = vcvt.f32.s32 %v12348_v54  ;;  %v3006_v62 = vshll.u32 %v3005_v39, 16  ;;  %v12351_v25 = vld [vmem:[#allocation223_spill] sm:$0xff]  ;;  %v12356_v54 = vld [vmem:[#allocation77_spill] sm:$0xff] }
 0xa27   :  { %5571 = vperm.xlu1 %6248, %v6660_v17   ;;  %v10589_v44 = vpop.permute.xlu2 %5466  ;;  %v2982_v6 = vshll.u32 %v2981_v9, 16  ;;  %v6670_v17 = vpop.eup %6669  ;;  %v5115_v37 = vmul.f32 1.442695, %v4895_v38  ;;  %6673 = vpow2.f32 %v5113_v50  ;;  %v12350_v9 = vld [vmem:[#allocation24_spill] sm:$0xff]  ;;  %v3004_v45 = vcvt.f32.s32 %v12351_v25 }
 0xa28   :  { %v4897_v29 = vmul.f32 %v12350_v9, %v3866_v41  ;;  %v3716_v58 = vmul.f32 1.442695, %v3488_v57  ;;  %6675 = vpow2.f32 %v3712_v48  ;;  %v12353_v41 = vld [vmem:[#allocation218_spill] sm:$0xff]  ;;  %v12354_v50 = vld [vmem:[#allocation232_spill] sm:$0xff] }
 0xa29   :  { %v5446_v21 = vpop.permute.xlu1 %5445  ;;  %v2983_v46 = vadd.s32 %v2982_v6, %v2980_v61  ;;  %v3007_v53 = vadd.s32 %v3006_v62, %v3004_v45  ;;  %v5820_v61 = vperm.slane %v10571_v43, %v10393_v55  ;;  %v6672_v38 = vpop.eup %6671  ;;  %v12355_v43 = vld [vmem:[#allocation125_spill] sm:$0xff]  ;;  %v3052_v62 = vcvt.f32.s32 %v12356_v54 }
 0xa2a   :  { %v5812_v22 = vperm.slane %v5446_v21, %v10375_v60  ;;  %v3867_v21 = vsub.f32 0.0, %v6668_v27  ;;  %6677 = vpow2.f32 %v3716_v58 }
 0xa2b   :  { %v3364_v39 = vcvt.s32.f32 %v2983_v46  ;;  %6679 = vpow2.f32 %v5115_v37  ;;  %v5125_v46 = vmul.f32 1.442695, %v4900_v24  ;;  %v12357_v37 = vld [vmem:[#allocation9_spill] sm:$0xff]  ;;  %v5825_v24 = vperm.slane %v10589_v44, %v10281_v32  ;;  %v12359_v44 = vld [vmem:[#allocation131_spill] sm:$0xff] }
 0xa2c   :  { %v5813_v33 = vsel %vm5742_vm3, %v5812_v22, %v5811_v12  ;;  %v3017_v12 = vcvt.f32.s32 %v12349_v26  ;;  %v3718_v22 = vmul.f32 1.442695, %v3489_v59  ;;  %v4898_v36 = vmul.f32 %v12355_v43, %v3867_v21  ;;  %v12360_v43 = vld [vmem:[#allocation235_spill] sm:$0xff] }
 0xa2d   :  { %v5815_v10 = vsel %vm5746_vm1, %v5814_v1, %v5813_v33  ;;  %5574 = vperm.xlu2 %6249, %v6666_v35   ;;  %v3041_v1 = vcvt.f32.s32 %v12353_v41  ;;  %v5119_v35 = vmul.f32 1.442695, %v4897_v29  ;;  %v3053_v33 = vcvt.f32.s32 %v12354_v50  ;;  %v10619_v27 = vpop.permute.xlu0 %5496  ;;  %v6674_v57 = vpop.eup %6673 }
 0xa2e   :  { %v5817_v34 = vsel %vm5750_vm5, %v5816_v47, %v5815_v10  ;;  %v3018_v18 = vshll.u32 %v3017_v12, 16  ;;  %v3722_v47 = vmul.f32 1.442695, %v3491_v31  ;;  %6681 = vpow2.f32 %v3718_v22 }
 0xa2f   :  { %5580 = vperm.xlu1 %6248, %v6670_v17   ;;  %v10608_v51 = vpop.permute.xlu2 %5475  ;;  %v3366_v17 = vcvt.s32.f32 %v3007_v53  ;;  %v3492_v26 = vmul.f32 -0.5, %v3364_v39  ;;  %v3042_v12 = vshll.u32 %v3041_v1, 16  ;;  %6683 = vpow2.f32 %v5119_v35 }
 0xa30   :  { %v3019_v52 = vadd.s32 %v3018_v18, %v3016_v30  ;;  %v3054_v9 = vshll.u32 %v3053_v33, 16  ;;  %v3077_v29 = vcvt.f32.s32 %v12357_v37  ;;  %6685 = vpow2.f32 %v3722_v47 }
 0xa31   :  { %v5455_v49 = vpop.permute.xlu1 %5454  ;;  %v5822_v30 = vperm.slane %v10537_v5, %v12269_v40  ;;  %v5121_v25 = vmul.f32 1.442695, %v4898_v36  ;;  %v3724_v53 = vmul.f32 1.442695, %v3492_v26  ;;  %6687 = vpow2.f32 %v5125_v46 }
 0xa32   :  { %v5818_v14 = vperm.slane %v5455_v49, %v10403_v16  ;;  %v3494_v49 = vmul.f32 -0.5, %v3366_v17  ;;  %v3367_v7 = vcvt.s32.f32 %v3019_v52  ;;  %v3055_v5 = vadd.s32 %v3054_v9, %v3052_v62  ;;  %v12361_v17 = vld [vmem:[#allocation238_spill] sm:$0xff] }
 0xa33   :  { %v3078_v41 = vshll.u32 %v3077_v29, 16  ;;  %6689 = vpow2.f32 %v5121_v25  ;;  %v3076_v36 = vcvt.f32.s32 %v12360_v43  ;;  %v3089_v52 = vcvt.f32.s32 %v12361_v17  ;;  %v12362_v62 = vld [vmem:[#allocation194_spill] sm:$0xff] }
 0xa34   :  { %v5819_v6 = vsel %vm5754_vm11, %v5818_v14, %v5817_v34  ;;  %v6676_v34 = vpop.eup %6675  ;;  %6691 = vpow2.f32 %v3724_v53  ;;  %v3370_v9 = vcvt.s32.f32 %v3055_v5 }
 0xa35   :  { %v5821_v48 = vsel %vm5758_vm4, %v5820_v61, %v5819_v6  ;;  %5583 = vperm.xlu2 %6249, %v6672_v38   ;;  %v6678_v21 = vpop.eup %6677  ;;  %v3870_v22 = vsub.f32 0.0, %v6676_v34  ;;  %v5827_v61 = vperm.slane %v10558_v20, %v10288_v23  ;;  %v10639_v1 = vpop.permute.xlu0 %5505  ;;  %v3728_v20 = vmul.f32 1.442695, %v3494_v49 }
 0xa36   :  { %v10624_v10 = vsel %vm5979_vm7, %v5821_v48, %v10532_v42  ;;  %v12358_v42 = vld [vmem:[#allocation229_spill] sm:$0xff]  ;;  %v6680_v14 = vpop.eup %6679  ;;  %v3872_v50 = vsub.f32 0.0, %v6678_v21  ;;  %v3079_v37 = vadd.s32 %v3078_v41, %v3076_v36  ;;  %v3090_v21 = vshll.u32 %v3089_v52, 16 }
 0xa37   :  { %5589 = vperm.xlu1 %6248, %v6674_v57   ;;  %v10626_v59 = vpop.permute.xlu2 %5484  ;;  %v3040_v31 = vcvt.f32.s32 %v12358_v42  ;;  %v6682_v39 = vpop.eup %6681  ;;  %v4901_v47 = vmul.f32 %v12359_v44, %v3870_v22  ;;  %v3495_v57 = vmul.f32 -0.5, %v3367_v7  ;;  %6693 = vpow2.f32 %v3728_v20  ;;  %v12366_v44 = vld [vmem:[#allocation52_spill] sm:$0xff] }
 0xa38   :  { %v6684_v6 = vpop.eup %6683  ;;  %v4903_v26 = vmul.f32 %v12362_v62, %v3872_v50  ;;  %v5831_v49 = vperm.slane %v10608_v51, %v10314_v13  ;;  %vm5981_vm7 = vcmask 1043459  }
 0xa39   :  { %v5464_v58 = vpop.permute.xlu1 %5463  ;;  %v3043_v18 = vadd.s32 %v3042_v12, %v3040_v31  ;;  %v6686_v48 = vpop.eup %6685  ;;  %v12363_v12 = vld [vmem:[#allocation166_spill] sm:$0xff]  ;;  %v5127_v42 = vmul.f32 1.442695, %v4901_v47 }
 0xa3a   :  { %v5823_v45 = vperm.slane %v5464_v58, %v10257_v11  ;;  %v3088_v46 = vcvt.f32.s32 %v12363_v12  ;;  %v3873_v58 = vsub.f32 0.0, %v6682_v39  ;;  %v3875_v31 = vsub.f32 0.0, %v6686_v48  ;;  %v6688_v25 = vpop.eup %6687  ;;  %v12367_v48 = vld [vmem:[#allocation212_spill] sm:$0xff] }
 0xa3b   :  { %v3369_v54 = vcvt.s32.f32 %v3043_v18  ;;  %v6690_v7 = vpop.eup %6689  ;;  %v3498_v18 = vmul.f32 -0.5, %v3370_v9  ;;  %6695 = vpow2.f32 %v5127_v42  ;;  %v3124_v20 = vcvt.f32.s32 %v12367_v48 }
 0xa3c   :  { %v5824_v38 = vsel %vm5702_vm8, %v5823_v45, %v5822_v30  ;;  %v3730_v45 = vmul.f32 1.442695, %v3495_v57  ;;  %v6692_v41 = vpop.eup %6691  ;;  %v4904_v51 = vmul.f32 %v12366_v44, %v3873_v58  ;;  %v12368_v57 = vld [vmem:[#allocation26_spill] sm:$0xff]  ;;  %v12369_v58 = vld [vmem:[#allocation241_spill] sm:$0xff]  ;;  %v12372_v44 = vld [vmem:[#allocation211_spill] sm:$0xff] }
 0xa3d   :  { %v5826_v35 = vsel %vm5706_vm13, %v5825_v24, %v5824_v38  ;;  %5592 = vperm.xlu2 %6249, %v6680_v14   ;;  %v3497_v22 = vmul.f32 -0.5, %v3369_v54  ;;  %v5833_v24 = vperm.slane %v10578_v28, %v10321_v8  ;;  %v5131_v14 = vmul.f32 1.442695, %v4903_v26  ;;  %v12364_v38 = vld [vmem:[#allocation228_spill] sm:$0xff]  ;;  %v10661_v50 = vpop.permute.xlu0 %5514  ;;  %v6694_v36 = vpop.eup %6693 }
 0xa3e   :  { %v5828_v33 = vsel %vm5710_vm0, %v5827_v61, %v5826_v35  ;;  %v3372_v61 = vcvt.s32.f32 %v3079_v37  ;;  %v3113_v39 = vcvt.f32.s32 %v12364_v38  ;;  %v12365_v35 = vld [vmem:[#allocation70_spill] sm:$0xff]  ;;  %6697 = vpow2.f32 %v3730_v45 }
 0xa3f   :  { %5598 = vperm.xlu1 %6248, %v6684_v6   ;;  %v10646_v34 = vpop.permute.xlu2 %5493  ;;  %v3125_v6 = vcvt.f32.s32 %v12365_v35  ;;  %v3091_v28 = vadd.s32 %v3090_v21, %v3088_v46  ;;  %6699 = vpow2.f32 %v5131_v14  ;;  %v4906_v43 = vmul.f32 %v12368_v57, %v3875_v31 }
 0xa40   :  { %v3734_v17 = vmul.f32 1.442695, %v3497_v22  ;;  %v3500_v52 = vmul.f32 -0.5, %v3372_v61  ;;  %v3114_v54 = vshll.u32 %v3113_v39, 16  ;;  %v3876_v62 = vsub.f32 0.0, %v6692_v41  ;;  %v12371_v39 = vld [vmem:[#allocation59_spill] sm:$0xff] }
 0xa41   :  { %v5473_v29 = vpop.permute.xlu1 %5472  ;;  %v3736_v12 = vmul.f32 1.442695, %v3498_v18  ;;  %v3126_v9 = vshll.u32 %v3125_v6, 16  ;;  %v5133_v37 = vmul.f32 1.442695, %v4904_v51  ;;  %v3112_v42 = vcvt.f32.s32 %v12369_v58  ;;  %v6696_v31 = vpop.eup %6695  ;;  %v12376_v58 = vld [vmem:[#allocation219_spill] sm:$0xff] }
 0xa42   :  { %v5829_v30 = vperm.slane %v5473_v29, %v10278_v4  ;;  %v3373_v29 = vcvt.s32.f32 %v3091_v28  ;;  %v5837_v45 = vperm.slane %v10626_v59, %v10348_v3  ;;  %v5839_v21 = vperm.slane %v10602_v63, %v10341_v19  ;;  %v12373_v28 = vld [vmem:[#allocation244_spill] sm:$0xff] }
 0xa43   :  { %v3740_v14 = vmul.f32 1.442695, %v3500_v52  ;;  %6701 = vpow2.f32 %v3734_v17  ;;  %v3127_v38 = vadd.s32 %v3126_v9, %v3124_v20  ;;  %v4907_v59 = vmul.f32 %v12371_v39, %v3876_v62  ;;  %v12374_v20 = vld [vmem:[#allocation246_spill] sm:$0xff]  ;;  %v12375_v9 = vld [vmem:[#allocation239_spill] sm:$0xff] }
 0xa44   :  { %v5830_v53 = vsel %vm5714_vm6, %v5829_v30, %v5828_v33  ;;  %v12370_v30 = vld [vmem:[#allocation233_spill] sm:$0xff]  ;;  %6703 = vpow2.f32 %v5133_v37  ;;  %v3501_v41 = vmul.f32 -0.5, %v3373_v29  ;;  %v3148_v48 = vcvt.f32.s32 %v12373_v28  ;;  %v12378_v39 = vld [vmem:[#allocation127_spill] sm:$0xff]  ;;  %v12381_v28 = vld [vmem:[#allocation120_spill] sm:$0xff] }
 0xa45   :  { %v5832_v5 = vsel %vm5718_vm15, %v5831_v49, %v5830_v53  ;;  %5601 = vperm.xlu2 %6249, %v6690_v7   ;;  %v3878_v49 = vsub.f32 0.0, %v6694_v36  ;;  %v5137_v7 = vmul.f32 1.442695, %v4906_v43  ;;  %v3115_v53 = vadd.s32 %v3114_v54, %v3112_v42  ;;  %v10683_v43 = vpop.permute.xlu0 %5523 }
 0xa46   :  { %v5834_v47 = vsel %vm5722_vm14, %v5833_v24, %v5832_v5  ;;  %v6698_v24 = vpop.eup %6697  ;;  %6705 = vpow2.f32 %v3736_v12  ;;  %v3161_v57 = vcvt.f32.s32 %v12374_v20  ;;  %v3376_v17 = vcvt.s32.f32 %v3127_v38 }
 0xa47   :  { %5607 = vperm.xlu1 %6248, %v6688_v25   ;;  %v10663_v33 = vpop.permute.xlu2 %5502  ;;  %v3149_v25 = vcvt.f32.s32 %v12370_v30  ;;  %v6700_v61 = vpop.eup %6699  ;;  %v3879_v6 = vsub.f32 0.0, %v6698_v24  ;;  %v4909_v51 = vmul.f32 %v12372_v44, %v3878_v49  ;;  %6707 = vpow2.f32 %v5137_v7 }
 0xa48   :  { %6709 = vpow2.f32 %v3740_v14  ;;  %v5139_v52 = vmul.f32 1.442695, %v4907_v59  ;;  %v3185_v37 = vcvt.f32.s32 %v12375_v9  ;;  %v3160_v42 = vcvt.f32.s32 %v12376_v58 }
 0xa49   :  { %v5482_v26 = vpop.permute.xlu1 %5481  ;;  %v3150_v63 = vshll.u32 %v3149_v25, 16  ;;  %v6702_v62 = vpop.eup %6701  ;;  %v5845_v30 = vperm.slane %v10619_v27, %v10367_v2  ;;  %v5143_v25 = vmul.f32 1.442695, %v4909_v51  ;;  %v3162_v7 = vshll.u32 %v3161_v57, 16 }
 0xa4a   :  { %v5835_v46 = vperm.slane %v5482_v26, %v10344_v56  ;;  %v3742_v26 = vmul.f32 1.442695, %v3501_v41  ;;  %v6704_v29 = vpop.eup %6703  ;;  %6711 = vpow2.f32 %v5139_v52  ;;  %v3186_v27 = vshll.u32 %v3185_v37, 16  ;;  %v12379_v41 = vld [vmem:[#allocation224_spill] sm:$0xff] }
 0xa4b   :  { %v3151_v12 = vadd.s32 %v3150_v63, %v3148_v48  ;;  %v3197_v59 = vcvt.f32.s32 %v12378_v39  ;;  %v3196_v63 = vcvt.f32.s32 %v12379_v41  ;;  %v3184_v48 = vcvt.f32.s32 %v12381_v28  ;;  %v12385_v41 = vld [vmem:[#allocation14_spill] sm:$0xff]  ;;  %v12386_v28 = vld [vmem:[#allocation248_spill] sm:$0xff] }
 0xa4c   :  { %v5836_v22 = vsel %vm5726_vm9, %v5835_v46, %v5834_v47  ;;  %v3375_v47 = vcvt.s32.f32 %v3115_v53  ;;  %v5843_v46 = vperm.slane %v10646_v34, %v10375_v60  ;;  %v3881_v34 = vsub.f32 0.0, %v6702_v62 }
 0xa4d   :  { %v5838_v18 = vsel %vm5730_vm2, %v5837_v45, %v5836_v22  ;;  %5610 = vperm.xlu2 %6249, %v6696_v31   ;;  %v6706_v31 = vpop.eup %6705  ;;  %v3504_v53 = vmul.f32 -0.5, %v3376_v17  ;;  %v3378_v38 = vcvt.s32.f32 %v3151_v12  ;;  %6713 = vpow2.f32 %v3742_v26  ;;  %v10703_v12 = vpop.permute.xlu0 %5532 }
 0xa4e   :  { %v5840_v5 = vsel %vm5734_vm10, %v5839_v21, %v5838_v18  ;;  %v12377_v21 = vld [vmem:[#allocation253_spill] sm:$0xff]  ;;  %v3503_v22 = vmul.f32 -0.5, %v3375_v47  ;;  %v6708_v14 = vpop.eup %6707  ;;  %6715 = vpow2.f32 %v5143_v25  ;;  %v3163_v47 = vadd.s32 %v3162_v7, %v3160_v42  ;;  %v12383_v7 = vld [vmem:[#allocation155_spill] sm:$0xff] }
 0xa4f   :  { %5616 = vperm.xlu1 %6248, %v6700_v61   ;;  %v10678_v35 = vpop.permute.xlu2 %5511  ;;  %v4910_v49 = vmul.f32 %v12377_v21, %v3879_v6  ;;  %v6710_v61 = vpop.eup %6709  ;;  %v12380_v6 = vld [vmem:[#allocation154_spill] sm:$0xff]  ;;  %v3882_v17 = vsub.f32 0.0, %v6706_v31  ;;  %v3748_v52 = vmul.f32 1.442695, %v3504_v53  ;;  %v3187_v62 = vadd.s32 %v3186_v27, %v3184_v48 }
 0xa50   :  { %v4912_v44 = vmul.f32 %v12380_v6, %v3881_v34  ;;  %v3746_v20 = vmul.f32 1.442695, %v3503_v22  ;;  %v3198_v26 = vshll.u32 %v3197_v59, 16  ;;  %v3506_v9 = vmul.f32 -0.5, %v3378_v38  ;;  %v12384_v34 = vld [vmem:[#allocation187_spill] sm:$0xff] }
 0xa51   :  { %v5491_v36 = vpop.permute.xlu1 %5490  ;;  %v5145_v51 = vmul.f32 1.442695, %v4910_v49  ;;  %v5849_v37 = vperm.slane %v10663_v33, %v10403_v16  ;;  %v3379_v25 = vcvt.s32.f32 %v3163_v47  ;;  %v4913_v33 = vmul.f32 %v12383_v7, %v3882_v17  ;;  %v12390_v7 = vld [vmem:[#allocation109_spill] sm:$0xff] }
 0xa52   :  { %v5841_v54 = vperm.slane %v5491_v36, %v10370_v15  ;;  %v3884_v36 = vsub.f32 0.0, %v6710_v61  ;;  %v5149_v58 = vmul.f32 1.442695, %v4912_v44  ;;  %6717 = vpow2.f32 %v3746_v20  ;;  %v12387_v20 = vld [vmem:[#allocation245_spill] sm:$0xff] }
 0xa53   :  { %6719 = vpow2.f32 %v5145_v51  ;;  %v3752_v61 = vmul.f32 1.442695, %v3506_v9  ;;  %v3507_v39 = vmul.f32 -0.5, %v3379_v25  ;;  %v3233_v6 = vcvt.f32.s32 %v12385_v41 }
 0xa54   :  { %v5842_v45 = vsel %vm5738_vm12, %v5841_v54, %v5840_v5  ;;  %v4915_v53 = vmul.f32 %v12384_v34, %v3884_v36  ;;  %6721 = vpow2.f32 %v5149_v58  ;;  %v5151_v44 = vmul.f32 1.442695, %v4913_v33  ;;  %v12391_v34 = vld [vmem:[#allocation250_spill] sm:$0xff] }
 0xa55   :  { %v5844_v24 = vsel %vm5742_vm3, %v5843_v46, %v5842_v45  ;;  %5619 = vperm.xlu2 %6249, %v6704_v29   ;;  %v6712_v46 = vpop.eup %6711  ;;  %v5851_v29 = vperm.slane %v10639_v1, %v10393_v55  ;;  %v12382_v45 = vld [vmem:[#allocation21_spill] sm:$0xff]  ;;  %6723 = vpow2.f32 %v3748_v52  ;;  %v3220_v48 = vcvt.f32.s32 %v12386_v28  ;;  %v10728_v17 = vpop.permute.xlu0 %5541 }
 0xa56   :  { %v5846_v18 = vsel %vm5746_vm1, %v5845_v30, %v5844_v24  ;;  %v6714_v30 = vpop.eup %6713  ;;  %v3221_v31 = vcvt.f32.s32 %v12382_v45  ;;  %v3199_v24 = vadd.s32 %v3198_v26, %v3196_v63  ;;  %v5854_v63 = vperm.slane %v10678_v35, %v10257_v11 }
 0xa57   :  { %5625 = vperm.xlu1 %6248, %v6708_v14   ;;  %v10697_v5 = vpop.permute.xlu2 %5520  ;;  %v6716_v49 = vpop.eup %6715  ;;  %v3885_v27 = vsub.f32 0.0, %v6714_v30  ;;  %v5856_v36 = vperm.slane %v10661_v50, %v10281_v32  ;;  %6725 = vpow2.f32 %v3752_v61  ;;  %v3754_v45 = vmul.f32 1.442695, %v3507_v39 }
 0xa58   :  { %v3222_v38 = vshll.u32 %v3221_v31, 16  ;;  %v3382_v47 = vcvt.s32.f32 %v3199_v24  ;;  %6727 = vpow2.f32 %v5151_v44 }
 0xa59   :  { %v5500_v57 = vpop.permute.xlu1 %5499 }
 0xa5a   :  { %v5847_v54 = vperm.slane %v5500_v57, %v10397_v0  ;;  %v3257_v57 = vcvt.f32.s32 %v12387_v20  ;;  %v3223_v35 = vadd.s32 %v3222_v38, %v3220_v48  ;;  %v3510_v50 = vmul.f32 -0.5, %v3382_v47 }
 0xa5c   :  { %v5848_v42 = vsel %vm5750_vm5, %v5847_v54, %v5846_v18  ;;  %v3381_v18 = vcvt.s32.f32 %v3187_v62  ;;  %v5155_v54 = vmul.f32 1.442695, %v4915_v53  ;;  %v3258_v25 = vshll.u32 %v3257_v57, 16 }
 0xa5d   :  { %v5850_v21 = vsel %vm5754_vm11, %v5849_v37, %v5848_v42  ;;  %5628 = vperm.xlu2 %6249, %v6712_v46   ;;  %v3234_v46 = vshll.u32 %v3233_v6, 16  ;;  %v3384_v24 = vcvt.s32.f32 %v3223_v35  ;;  %v3256_v53 = vcvt.f32.s32 %v12391_v34  ;;  %v10739_v44 = vpop.permute.xlu0 %5550  ;;  %v12393_v35 = vld [vmem:[#allocation203_spill] sm:$0xff] }
 0xa5e   :  { %v5852_v22 = vsel %vm5758_vm4, %v5851_v29, %v5850_v21  ;;  %v3509_v62 = vmul.f32 -0.5, %v3381_v18  ;;  %v12388_v29 = vld [vmem:[#allocation105_spill] sm:$0xff]  ;;  %v12389_v21 = vld [vmem:[#allocation231_spill] sm:$0xff]  ;;  %6729 = vpow2.f32 %v5155_v54  ;;  %v3760_v39 = vmul.f32 1.442695, %v3510_v50 }
 0xa5f   :  { %5634 = vperm.xlu1 %6248, %v6716_v49   ;;  %v10714_v1 = vpop.permute.xlu2 %5529  ;;  %v10717_v14 = vsel %vm5981_vm7, %v5852_v22, %v10624_v10  ;;  %v6718_v10 = vpop.eup %6717  ;;  %v4916_v58 = vmul.f32 %v12388_v29, %v3885_v27  ;;  %v3232_v49 = vcvt.f32.s32 %v12389_v21  ;;  %v3259_v6 = vadd.s32 %v3258_v25, %v3256_v53  ;;  %v12392_v54 = vld [vmem:[#allocation63_spill] sm:$0xff] }
 0xa60   :  { %v6720_v52 = vpop.eup %6719  ;;  %v3887_v42 = vsub.f32 0.0, %v6718_v10  ;;  %v3758_v22 = vmul.f32 1.442695, %v3509_v62  ;;  %6731 = vpow2.f32 %v3754_v45  ;;  %v5862_v10 = vperm.slane %v10683_v43, %v10314_v13 }
 0xa61   :  { %v5509_v59 = vpop.permute.xlu1 %5508  ;;  %v6722_v37 = vpop.eup %6721  ;;  %v3235_v38 = vadd.s32 %v3234_v46, %v3232_v49  ;;  %v3512_v20 = vmul.f32 -0.5, %v3384_v24  ;;  %v5866_v45 = vperm.slane %v10714_v1, %v10344_v56  ;;  %v5868_v49 = vperm.slane %v10703_v12, %v10348_v3 }
 0xa62   :  { %v5853_v51 = vperm.slane %v5509_v59, %v12269_v40  ;;  %v6724_v30 = vpop.eup %6723  ;;  %v4918_v33 = vmul.f32 %v12390_v7, %v3887_v42  ;;  %v5157_v59 = vmul.f32 1.442695, %v4916_v58  ;;  %6733 = vpow2.f32 %v3758_v22 }
 0xa63   :  { %v6726_v61 = vpop.eup %6725  ;;  %v3888_v27 = vsub.f32 0.0, %v6724_v30  ;;  %v3764_v46 = vmul.f32 1.442695, %v3512_v20  ;;  %vm5983_vm7 = vcmask 1044484  }
 0xa64   :  { %v5855_v26 = vsel %vm5702_vm8, %v5854_v63, %v5853_v51  ;;  %v5860_v63 = vperm.slane %v10697_v5, %v10278_v4  ;;  %v6728_v51 = vpop.eup %6727  ;;  %v5161_v47 = vmul.f32 1.442695, %v4918_v33  ;;  %v3890_v48 = vsub.f32 0.0, %v6726_v61 }
 0xa65   :  { %5637 = vperm.xlu2 %6249, %v6720_v52   ;;  %v5857_v9 = vsel %vm5706_vm13, %v5856_v36, %v5855_v26  ;;  %v6730_v36 = vpop.eup %6729  ;;  %v3385_v52 = vcvt.s32.f32 %v3235_v38  ;;  %v4919_v62 = vmul.f32 %v12392_v54, %v3888_v27  ;;  %6735 = vpow2.f32 %v5157_v59  ;;  %v5560_v34 = vpop.permute.xlu0 %5559  ;;  %v12394_v38 = vld [vmem:[#allocation68_spill] sm:$0xff] }
 0xa66   :  { %6737 = vpow2.f32 %v3760_v39  ;;  %v3387_v26 = vcvt.s32.f32 %v3259_v6  ;;  %v5885_v39 = vperm.slane %v5560_v34, %v10257_v11  ;;  %v12395_v6 = vld [vmem:[#allocation107_spill] sm:$0xff]  ;;  %v5874_v54 = vperm.slane %v10728_v17, %v10375_v60 }
 0xa67   :  { %5643 = vperm.xlu1 %6248, %v6722_v37   ;;  %v10733_v31 = vpop.permute.xlu2 %5538  ;;  %6739 = vpow2.f32 %v5161_v47  ;;  %v6732_v37 = vpop.eup %6731  ;;  %v5163_v42 = vmul.f32 1.442695, %v4919_v62  ;;  %v3513_v30 = vmul.f32 -0.5, %v3385_v52 }
 0xa68   :  { %v6734_v58 = vpop.eup %6733  ;;  %v3515_v25 = vmul.f32 -0.5, %v3387_v26  ;;  %v3891_v7 = vsub.f32 0.0, %v6732_v37  ;;  %6741 = vpow2.f32 %v3764_v46 }
 0xa69   :  { %v5518_v18 = vpop.permute.xlu1 %5517  ;;  %v3893_v53 = vsub.f32 0.0, %v6734_v58  ;;  %6743 = vpow2.f32 %v5163_v42  ;;  %v3766_v1 = vmul.f32 1.442695, %v3513_v30  ;;  %v12397_v42 = vld [vmem:[#allocation72_spill] sm:$0xff] }
 0xa6a   :  { %v5858_v41 = vperm.slane %v5518_v18, %v10288_v23  ;;  %v4922_v27 = vmul.f32 %v12394_v38, %v3891_v7  ;;  %v12398_v38 = vld [vmem:[#allocation161_spill] sm:$0xff] }
 0xa6b   :  { %v6736_v21 = vpop.eup %6735 }
 0xa6c   :  { %v5859_v28 = vsel %vm5710_vm0, %v5858_v41, %v5857_v9  ;;  %v4921_v9 = vmul.f32 %v12393_v35, %v3890_v48  ;;  %v6738_v24 = vpop.eup %6737  ;;  %v3770_v41 = vmul.f32 1.442695, %v3515_v25 }
 0xa6d   :  { %v5861_v57 = vsel %vm5714_vm6, %v5860_v63, %v5859_v28  ;;  %5646 = vperm.xlu2 %6249, %v6728_v51   ;;  %v6740_v61 = vpop.eup %6739  ;;  %v4924_v63 = vmul.f32 %v12395_v6, %v3893_v53  ;;  %v5169_v28 = vmul.f32 1.442695, %v4922_v27 }
 0xa6e   :  { %v5863_v5 = vsel %vm5718_vm15, %v5862_v10, %v5861_v57  ;;  %v5167_v33 = vmul.f32 1.442695, %v4921_v9  ;;  %v3894_v10 = vsub.f32 0.0, %v6738_v24  ;;  %v6742_v57 = vpop.eup %6741  ;;  %v12396_v9 = vld [vmem:[#allocation67_spill] sm:$0xff] }
 0xa6f   :  { %5652 = vperm.xlu1 %6248, %v6730_v36   ;;  %v10749_v43 = vpop.permute.xlu2 %5547  ;;  %v5872_v36 = vperm.slane %v10733_v31, %v10370_v15  ;;  %v6744_v52 = vpop.eup %6743  ;;  %v5173_v62 = vmul.f32 1.442695, %v4924_v63  ;;  %v3896_v46 = vsub.f32 0.0, %v6742_v57 }
 0xa70   :  { %6745 = vpow2.f32 %v5167_v33  ;;  %v4925_v37 = vmul.f32 %v12396_v9, %v3894_v10 }
 0xa71   :  { %v5527_v29 = vpop.permute.xlu1 %5526  ;;  %6747 = vpow2.f32 %v3766_v1  ;;  %v4927_v30 = vmul.f32 %v12397_v42, %v3896_v46 }
 0xa72   :  { %v5864_v50 = vperm.slane %v5527_v29, %v10321_v8  ;;  %6749 = vpow2.f32 %v3770_v41  ;;  %v5175_v25 = vmul.f32 1.442695, %v4925_v37 }
 0xa73   :  { %6751 = vpow2.f32 %v5169_v28  ;;  %v5179_v24 = vmul.f32 1.442695, %v4927_v30 }
 0xa74   :  { %v5865_v22 = vsel %vm5722_vm14, %v5864_v50, %v5863_v5  ;;  %6753 = vpow2.f32 %v5173_v62 }
 0xa75   :  { %v5867_v18 = vsel %vm5726_vm9, %v5866_v45, %v5865_v22  ;;  %5655 = vperm.xlu2 %6249, %v6736_v21   ;;  %v5880_v22 = vperm.slane %v10739_v44, %v10403_v16  ;;  %6755 = vpow2.f32 %v5175_v25 }
 0xa76   :  { %v5869_v59 = vsel %vm5730_vm2, %v5868_v49, %v5867_v18  ;;  %v6746_v35 = vpop.eup %6745  ;;  %v5878_v49 = vperm.slane %v10749_v43, %v10397_v0  ;;  %6757 = vpow2.f32 %v5179_v24 }
 0xa77   :  { %5661 = vperm.xlu1 %6248, %v6740_v61   ;;  %v5557_v12 = vpop.permute.xlu2 %5556  ;;  %v6748_v31 = vpop.eup %6747 }
 0xa78   :  { %v5884_v51 = vperm.slane %v5557_v12, %v12269_v40  ;;  %v6750_v17 = vpop.eup %6749  ;;  %v3897_v21 = vsub.f32 0.0, %v6748_v31  ;;  %v5569_v61 = vpop.permute.xlu0 %5568 }
 0xa79   :  { %v5536_v47 = vpop.permute.xlu1 %5535  ;;  %v6752_v7 = vpop.eup %6751  ;;  %v3899_v33 = vsub.f32 0.0, %v6750_v17  ;;  %v5891_v62 = vperm.slane %v5569_v61, %v10278_v4 }
 0xa7a   :  { %v10765_v48 = vsel %vm5702_vm8, %v5885_v39, %v5884_v51  ;;  %v5870_v20 = vperm.slane %v5536_v47, %v10341_v19  ;;  %v6754_v18 = vpop.eup %6753  ;;  %v4928_v27 = vmul.f32 %v12398_v38, %v3897_v21 }
 0xa7b   :  { %v6756_v6 = vpop.eup %6755 }
 0xa7c   :  { %v5871_v5 = vsel %vm5734_vm10, %v5870_v20, %v5869_v59  ;;  %v12399_v59 = vld [vmem:[#allocation216_spill] sm:$0xff]  ;;  %v5181_v44 = vmul.f32 1.442695, %v4928_v27  ;;  %v6758_v47 = vpop.eup %6757 }
 0xa7d   :  { %v5873_v26 = vsel %vm5738_vm12, %v5872_v36, %v5871_v5  ;;  %5664 = vperm.xlu2 %6249, %v6744_v52   ;;  %v4930_v41 = vmul.f32 %v12399_v59, %v3899_v33 }
 0xa7e   :  { %v5875_v29 = vsel %vm5742_vm3, %v5874_v54, %v5873_v26  ;;  %6759 = vpow2.f32 %v5181_v44 }
 0xa7f   :  { %5670 = vperm.xlu1 %6248, %v6746_v35   ;;  %v5566_v58 = vpop.permute.xlu2 %5565  ;;  %v5185_v63 = vmul.f32 1.442695, %v4930_v41 }
 0xa80   :  { %v5578_v20 = vpop.permute.xlu0 %5577  ;;  %v5889_v52 = vperm.slane %v5566_v58, %v10288_v23 }
 0xa81   :  { %v5545_v50 = vpop.permute.xlu1 %5544  ;;  %6761 = vpow2.f32 %v5185_v63  ;;  %v5897_v31 = vperm.slane %v5578_v20, %v10344_v56 }
 0xa82   :  { %v5876_v45 = vperm.slane %v5545_v50, %v10367_v2 }
 0xa84   :  { %v5877_v34 = vsel %vm5746_vm1, %v5876_v45, %v5875_v29  ;;  %v6760_v54 = vpop.eup %6759 }
 0xa85   :  { %v5879_v53 = vsel %vm5750_vm5, %v5878_v49, %v5877_v34  ;;  %5673 = vperm.xlu2 %6249, %v6752_v7  }
 0xa86   :  { %v5881_v1 = vsel %vm5754_vm11, %v5880_v22, %v5879_v53 }
 0xa87   :  { %5679 = vperm.xlu1 %6248, %v6754_v18   ;;  %v5575_v43 = vpop.permute.xlu2 %5574  ;;  %v6762_v26 = vpop.eup %6761 }
 0xa88   :  { %v5587_v37 = vpop.permute.xlu0 %5586  ;;  %v5895_v58 = vperm.slane %v5575_v43, %v10321_v8 }
 0xa89   :  { %v5554_v12 = vpop.permute.xlu1 %5553  ;;  %v5903_v49 = vperm.slane %v5587_v37, %v10370_v15 }
 0xa8a   :  { %v5882_v39 = vperm.slane %v5554_v12, %v10393_v55 }
 0xa8c   :  { %v5883_v51 = vsel %vm5758_vm4, %v5882_v39, %v5881_v1 }
 0xa8d   :  { %v5984_v10 = vsel %vm5983_vm7, %v5883_v51, %v10717_v14  ;;  %5682 = vperm.xlu2 %6249, %v6756_v6   ;;  %vm5985_vm7 = vcmask 1045509  }
 0xa8f   :  { %5688 = vperm.xlu1 %6248, %v6758_v47   ;;  %v5584_v28 = vpop.permute.xlu2 %5583 }
 0xa90   :  { %v5596_v50 = vpop.permute.xlu0 %5595  ;;  %v5901_v21 = vperm.slane %v5584_v28, %v10341_v19 }
 0xa91   :  { %v5563_v57 = vpop.permute.xlu1 %5562  ;;  %v5909_v38 = vperm.slane %v5596_v50, %v10397_v0 }
 0xa92   :  { %v5887_v36 = vperm.slane %v5563_v57, %v10281_v32 }
 0xa94   :  { %v5888_v5 = vsel %vm5706_vm13, %v5887_v36, %v10765_v48 }
 0xa95   :  { %v5890_v14 = vsel %vm5710_vm0, %v5889_v52, %v5888_v5  ;;  %5691 = vperm.xlu2 %6249, %v6760_v54  }
 0xa96   :  { %v5892_v35 = vsel %vm5714_vm6, %v5891_v62, %v5890_v14 }
 0xa97   :  { %v5593_v9 = vpop.permute.xlu2 %5592  ;;  %5697 = vperm.xlu1 %6248, %v6762_v26  }
 0xa98   :  { %v5605_v53 = vpop.permute.xlu0 %5604  ;;  %v5907_v61 = vperm.slane %v5593_v9, %v10367_v2 }
 0xa99   :  { %v5572_v46 = vpop.permute.xlu1 %5571  ;;  %v5915_v28 = vperm.slane %v5605_v53, %v12269_v40 }
 0xa9a   :  { %v5893_v29 = vperm.slane %v5572_v46, %v10314_v13 }
 0xa9c   :  { %v5894_v42 = vsel %vm5718_vm15, %v5893_v29, %v5892_v35 }
 0xa9d   :  { %v5896_v48 = vsel %vm5722_vm14, %v5895_v58, %v5894_v42 }
 0xa9e   :  { %v5898_v30 = vsel %vm5726_vm9, %v5897_v31, %v5896_v48 }
 0xa9f   :  { %v5602_v17 = vpop.permute.xlu2 %5601 }
 0xaa0   :  { %v5913_v12 = vperm.slane %v5602_v17, %v10393_v55  ;;  %v5614_v39 = vpop.permute.xlu0 %5613 }
 0xaa1   :  { %v5581_v25 = vpop.permute.xlu1 %5580  ;;  %v5920_v26 = vperm.slane %v5614_v39, %v10288_v23 }
 0xaa2   :  { %v5899_v45 = vperm.slane %v5581_v25, %v10348_v3 }
 0xaa4   :  { %v5900_v7 = vsel %vm5730_vm2, %v5899_v45, %v5898_v30 }
 0xaa5   :  { %v5902_v33 = vsel %vm5734_vm10, %v5901_v21, %v5900_v7 }
 0xaa6   :  { %v5904_v22 = vsel %vm5738_vm12, %v5903_v49, %v5902_v33 }
 0xaa7   :  { %v5611_v24 = vpop.permute.xlu2 %5610 }
 0xaa8   :  { %v5623_v52 = vpop.permute.xlu0 %5622  ;;  %v5918_v54 = vperm.slane %v5611_v24, %v10281_v32 }
 0xaa9   :  { %v5590_v34 = vpop.permute.xlu1 %5589  ;;  %v5926_v42 = vperm.slane %v5623_v52, %v10321_v8 }
 0xaaa   :  { %v5905_v18 = vperm.slane %v5590_v34, %v10375_v60 }
 0xaac   :  { %v5906_v27 = vsel %vm5742_vm3, %v5905_v18, %v5904_v22 }
 0xaad   :  { %v5908_v1 = vsel %vm5746_vm1, %v5907_v61, %v5906_v27 }
 0xaae   :  { %v5910_v43 = vsel %vm5750_vm5, %v5909_v38, %v5908_v1 }
 0xaaf   :  { %v5620_v44 = vpop.permute.xlu2 %5619 }
 0xab0   :  { %v5632_v35 = vpop.permute.xlu0 %5631  ;;  %v5924_v46 = vperm.slane %v5620_v44, %v10314_v13 }
 0xab1   :  { %v5599_v59 = vpop.permute.xlu1 %5598  ;;  %v5932_v49 = vperm.slane %v5632_v35, %v10341_v19 }
 0xab2   :  { %v5911_v41 = vperm.slane %v5599_v59, %v10403_v16 }
 0xab4   :  { %v5912_v6 = vsel %vm5754_vm11, %v5911_v41, %v5910_v43 }
 0xab5   :  { %v5914_v63 = vsel %vm5758_vm4, %v5913_v12, %v5912_v6 }
 0xab6   :  { %v5986_v51 = vsel %vm5985_vm7, %v5914_v63, %v5984_v10  ;;  %vm5987_vm7 = vcmask 1046534  }
 0xab7   :  { %v5629_v36 = vpop.permute.xlu2 %5628 }
 0xab8   :  { %v5641_v30 = vpop.permute.xlu0 %5640  ;;  %v5930_v50 = vperm.slane %v5629_v36, %v10348_v3 }
 0xab9   :  { %v5608_v47 = vpop.permute.xlu1 %5607  ;;  %v5938_v18 = vperm.slane %v5641_v30, %v10367_v2 }
 0xaba   :  { %v5916_v20 = vperm.slane %v5608_v47, %v10257_v11 }
 0xabc   :  { %v5917_v57 = vsel %vm5702_vm8, %v5916_v20, %v5915_v28 }
 0xabd   :  { %v5919_v5 = vsel %vm5706_vm13, %v5918_v54, %v5917_v57 }
 0xabe   :  { %v5921_v10 = vsel %vm5710_vm0, %v5920_v26, %v5919_v5 }
 0xabf   :  { %v5638_v9 = vpop.permute.xlu2 %5637 }
 0xac0   :  { %v5936_v24 = vperm.slane %v5638_v9, %v10375_v60  ;;  %v5650_v34 = vpop.permute.xlu0 %5649 }
 0xac1   :  { %v5617_v62 = vpop.permute.xlu1 %5616  ;;  %v5944_v59 = vperm.slane %v5650_v34, %v10393_v55 }
 0xac2   :  { %v5922_v14 = vperm.slane %v5617_v62, %v10278_v4 }
 0xac4   :  { %v5923_v37 = vsel %vm5714_vm6, %v5922_v14, %v5921_v10 }
 0xac5   :  { %v5925_v58 = vsel %vm5718_vm15, %v5924_v46, %v5923_v37 }
 0xac6   :  { %v5927_v48 = vsel %vm5722_vm14, %v5926_v42, %v5925_v58 }
 0xac7   :  { %v5647_v25 = vpop.permute.xlu2 %5646 }
 0xac8   :  { %v5942_v27 = vperm.slane %v5647_v25, %v10403_v16  ;;  %v5659_v63 = vpop.permute.xlu0 %5658 }
 0xac9   :  { %v5626_v29 = vpop.permute.xlu1 %5625  ;;  %v5949_v62 = vperm.slane %v5659_v63, %v10281_v32 }
 0xaca   :  { %v5928_v31 = vperm.slane %v5626_v29, %v10344_v56 }
 0xacc   :  { %v5929_v17 = vsel %vm5726_vm9, %v5928_v31, %v5927_v48 }
 0xacd   :  { %v5931_v45 = vsel %vm5730_vm2, %v5930_v50, %v5929_v17 }
 0xace   :  { %v5933_v33 = vsel %vm5734_vm10, %v5932_v49, %v5931_v45 }
 0xacf   :  { %v5656_v1 = vpop.permute.xlu2 %5655 }
 0xad0   :  { %v5947_v57 = vperm.slane %v5656_v1, %v10257_v11  ;;  %v5668_v36 = vpop.permute.xlu0 %5667 }
 0xad1   :  { %v5635_v21 = vpop.permute.xlu1 %5634  ;;  %v5955_v11 = vperm.slane %v5668_v36, %v10314_v13 }
 0xad2   :  { %v5934_v7 = vperm.slane %v5635_v21, %v10370_v15 }
 0xad4   :  { %v5935_v22 = vsel %vm5738_vm12, %v5934_v7, %v5933_v33 }
 0xad5   :  { %v5937_v53 = vsel %vm5742_vm3, %v5936_v24, %v5935_v22 }
 0xad6   :  { %v5939_v43 = vsel %vm5746_vm1, %v5938_v18, %v5937_v53 }
 0xad7   :  { %v5665_v47 = vpop.permute.xlu2 %5664 }
 0xad8   :  { %v5953_v26 = vperm.slane %v5665_v47, %v10278_v4  ;;  %v5677_v9 = vpop.permute.xlu0 %5676 }
 0xad9   :  { %v5644_v61 = vpop.permute.xlu1 %5643  ;;  %v5961_v31 = vperm.slane %v5677_v9, %v10348_v3 }
 0xada   :  { %v5940_v38 = vperm.slane %v5644_v61, %v10397_v0 }
 0xadc   :  { %v5941_v41 = vsel %vm5750_vm5, %v5940_v38, %v5939_v43 }
 0xadd   :  { %v5943_v12 = vsel %vm5754_vm11, %v5942_v27, %v5941_v41 }
 0xade   :  { %v5945_v44 = vsel %vm5758_vm4, %v5944_v59, %v5943_v12 }
 0xadf   :  { %v5988_v39 = vsel %vm5987_vm7, %v5945_v44, %v5986_v51  ;;  %v5674_v5 = vpop.permute.xlu2 %5673 }
 0xae0   :  { %v5959_v32 = vperm.slane %v5674_v5, %v10344_v56  ;;  %v5686_v42 = vpop.permute.xlu0 %5685 }
 0xae1   :  { %v5653_v6 = vpop.permute.xlu1 %5652  ;;  %v5967_v56 = vperm.slane %v5686_v42, %v10375_v60 }
 0xae2   :  { %v5946_v28 = vperm.slane %v5653_v6, %v12269_v40 }
 0xae4   :  { %v5948_v52 = vsel %vm5702_vm8, %v5947_v57, %v5946_v28  ;;  %vm5989_vm8 = vcmask 1047559  }
 0xae5   :  { %v5950_v14 = vsel %vm5706_vm13, %v5949_v62, %v5948_v52 }
 0xae7   :  { %v5683_v46 = vpop.permute.xlu2 %5682 }
 0xae8   :  { %v5965_v48 = vperm.slane %v5683_v46, %v10370_v15  ;;  %v5695_v3 = vpop.permute.xlu0 %5694 }
 0xae9   :  { %v5662_v20 = vpop.permute.xlu1 %5661  ;;  %v5973_v7 = vperm.slane %v5695_v3, %v10403_v16 }
 0xaea   :  { %v5951_v54 = vperm.slane %v5662_v20, %v10288_v23 }
 0xaec   :  { %v5952_v51 = vsel %vm5710_vm0, %v5951_v54, %v5950_v14 }
 0xaed   :  { %v5954_v40 = vsel %vm5714_vm6, %v5953_v26, %v5952_v51 }
 0xaee   :  { %v5956_v37 = vsel %vm5718_vm15, %v5955_v11, %v5954_v40 }
 0xaef   :  { %v5692_v25 = vpop.permute.xlu2 %5691 }
 0xaf0   :  { %v5971_v21 = vperm.slane %v5692_v25, %v10397_v0 }
 0xaf1   :  { %v5671_v35 = vpop.permute.xlu1 %5670 }
 0xaf2   :  { %v5957_v10 = vperm.slane %v5671_v35, %v10321_v8 }
 0xaf4   :  { %v5958_v23 = vsel %vm5722_vm14, %v5957_v10, %v5956_v37 }
 0xaf5   :  { %v5960_v58 = vsel %vm5726_vm9, %v5959_v32, %v5958_v23 }
 0xaf6   :  { %v5962_v8 = vsel %vm5730_vm2, %v5961_v31, %v5960_v58 }
 0xaf9   :  { %v5680_v29 = vpop.permute.xlu1 %5679 }
 0xafa   :  { %v5963_v4 = vperm.slane %v5680_v29, %v10341_v19 }
 0xafc   :  { %v5964_v13 = vsel %vm5734_vm10, %v5963_v4, %v5962_v8 }
 0xafd   :  { %v5966_v30 = vsel %vm5738_vm12, %v5965_v48, %v5964_v13 }
 0xafe   :  { %v5968_v45 = vsel %vm5742_vm3, %v5967_v56, %v5966_v30 }
 0xb01   :  { %v5689_v17 = vpop.permute.xlu1 %5688 }
 0xb02   :  { %v5969_v50 = vperm.slane %v5689_v17, %v10367_v2 }
 0xb04   :  { %v5970_v19 = vsel %vm5746_vm1, %v5969_v50, %v5968_v45 }
 0xb05   :  { %v5972_v49 = vsel %vm5750_vm5, %v5971_v21, %v5970_v19 }
 0xb06   :  { %v5974_v60 = vsel %vm5754_vm11, %v5973_v7, %v5972_v49 }
 0xb09   :  { %v5698_v15 = vpop.permute.xlu1 %5697 }
 0xb0a   :  { %v5975_v2 = vperm.slane %v5698_v15, %v10393_v55 }
 0xb0c   :  { %v5976_v33 = vsel %vm5758_vm4, %v5975_v2, %v5974_v60 }
 0xb0d   :  { %v5990_v0 = vsel %vm5989_vm8, %v5976_v33, %v5988_v39 }
 0xb0e   :  { %5992 = vst [vmem:[#allocation5] sm:$0xff] %v5990_v0 }
 0xb0f   :  { %6003 = dma.vmem_to_hbm [thread:$0]  %s5999_s11, 128, %s6001_s14, [#allocation4]  }
 0xb10   :  { %6815 = dma.done.wait [#allocation4], 128  }
 0xb11   :  { %6816 = vsyncadd [#allocation4], 4294967168 }
 0xb12   :  { %6008 = vsyncpa [#allocation3], 1 }
 0xb13   :  { %6009 = vsyncpa [#allocation4], 1 }

</bundles_post_ra>
